<compile_context>
chip_gen: v7x
topology: tpu7x:2x2x1
jax: 0.10.0
libtpu: 0.0.40
codegen_flags: <defaults>
</compile_context>

<pallas_src>
import functools

import numpy as np
import jax
import jax.numpy as jnp
from jax import lax
from jax.experimental import pallas as pl
from jax.experimental.pallas import tpu as pltpu

SLOPE = 0.2               # LeakyReLU negative slope
KH = KW = 4               # conv kernel size (both stages)
NTAP = KH * KW            # 16 conv2 taps
C1 = 64                   # conv1 out channels
C2 = 128                  # conv2 out channels
PATCH = 10                # fused receptive field of the two stride-2 convs
NK = PATCH * PATCH        # 100 pixels per stride-4 patch
KPAD = 128                # patch pixels zero-padded to lane width
NPOS = 25                 # 5x5 conv2 output positions
HID = 1024                # Linear(3200 -> 1024)
FEAT = NPOS * C2          # 3200


def _lrelu(y):
    return jnp.where(y >= 0, y, SLOPE * y)


# =============================================================================
# Fused encoder kernel.
# =============================================================================
def _encoder_kernel(n, npad, z_dim, block_m,
                    p_ref, w1_ref, b1_ref, w2_ref, b2_ref,
                    w3_ref, b3_ref, w4_ref, b4_ref,
                    zn_ref, zcls_ref, zraw_ref,
                    feat_ref, h3_ref):
    i = pl.program_id(0)

    # ---- step 0: Conv1 + Conv2 (+ LeakyReLUs), entirely VMEM-resident -------
    @pl.when(i == 0)
    def _convs():
        # conv1: stride-4 10x10 patches (rows = pos*npad + sample) against
        # zero-scattered per-tap weights -> every conv1 activation that each
        # conv2 tap needs, as one lane-dense matmul (columns = (tap, c1)).
        h1 = _lrelu(jnp.dot(p_ref[...], w1_ref[...],
                            preferred_element_type=jnp.float32) + b1_ref[...])
        # conv2: contract the (tap, c1) axis in one matmul.
        feat = _lrelu(jnp.dot(h1, w2_ref[...],
                              preferred_element_type=jnp.float32) + b2_ref[...])
        # Re-tile (pos, sample, c2) rows into the lane-dense (sample, pos*128+c2)
        # feature matrix used by the Linear (vreg-aligned 8-row moves only).
        for pos in range(NPOS):
            feat_ref[:, pos * C2:(pos + 1) * C2] = (
                feat[pos * npad:(pos + 1) * npad, :].astype(jnp.bfloat16))

    # ---- every step: one block_m-wide chunk of Linear(3200->1024)+LeakyReLU -
    h3_ref[i] = _lrelu(
        jnp.dot(feat_ref[...], w3_ref[...], preferred_element_type=jnp.float32)
        + b3_ref[...])

    # ---- last step: head = single Linear(1024 -> z_dim+num_class), split,
    #      softmax over the class logits --------------------------------------
    @pl.when(i == pl.num_programs(0) - 1)
    def _head():
        z = b4_ref[...]
        for c in range(HID // block_m):
            z = z + jnp.dot(h3_ref[c], w4_ref[c],
                            preferred_element_type=jnp.float32)
        zn_ref[...] = z[:n, :z_dim]
        raw = z[:n, z_dim:]
        zraw_ref[...] = raw
        m = jnp.max(raw, axis=-1, keepdims=True)
        e = jnp.exp(raw - m)
        zcls_ref[...] = e / jnp.sum(e, axis=-1, keepdims=True)


def encoder_forward(x_nchw, params, *, z_dim, num_class, block_m=512):
    n = x_nchw.shape[0]
    npad = ((n + 7) // 8) * 8             # pad batch rows to a sublane multiple
    nsteps = HID // block_m
    num_out = z_dim + num_class
    rows = NPOS * npad

    # Wrapper-side layout plumbing: stride-4 10x10 patch extraction on the raw
    # 12 KB input (one small XLA fusion; nothing else precedes the kernel).
    x2 = x_nchw[:, 0]                                             # (N, 28, 28)
    rs = [lax.slice(x2, (0, py, 0), (n, py + 17, 28), (1, 4, 1))
          for py in range(PATCH)]
    xr = jnp.stack(rs, axis=2)                                    # (N,5,10,28)
    cs = [lax.slice(xr, (0, 0, 0, px), (n, 5, PATCH, px + 17), (1, 1, 1, 4))
          for px in range(PATCH)]
    p5 = jnp.stack(cs, axis=4)                                    # (N,5,10,5,10)
    p5 = p5.transpose(0, 1, 3, 2, 4).reshape(n, NPOS, NK)         # (N,25,100)
    pm = jnp.pad(p5.transpose(1, 0, 2),
                 ((0, 0), (0, npad - n), (0, KPAD - NK)))         # (25,npad,128)
    patches = pm.reshape(rows, KPAD)

    w4g = params["w4"].reshape(nsteps, block_m, num_out)

    kernel = functools.partial(_encoder_kernel, n, npad, z_dim, block_m)
    return pl.pallas_call(
        kernel,
        out_shape=(jax.ShapeDtypeStruct((n, z_dim), jnp.float32),
                   jax.ShapeDtypeStruct((n, num_class), jnp.float32),
                   jax.ShapeDtypeStruct((n, num_class), jnp.float32)),
        grid_spec=pltpu.PrefetchScalarGridSpec(
            num_scalar_prefetch=0,
            grid=(nsteps,),
            in_specs=[
                pl.BlockSpec((rows, KPAD), lambda i: (0, 0)),           # patches
                pl.BlockSpec((KPAD, NTAP * C1), lambda i: (0, 0)),      # w1 scattered
                pl.BlockSpec((1, NTAP * C1), lambda i: (0, 0)),         # b1 tiled
                pl.BlockSpec((NTAP * C1, C2), lambda i: (0, 0)),        # w2
                pl.BlockSpec((1, C2), lambda i: (0, 0)),                # b2
                pl.BlockSpec((FEAT, block_m), lambda i: (0, i)),        # w3 chunk
                pl.BlockSpec((1, block_m), lambda i: (0, i)),           # b3 chunk
                pl.BlockSpec((nsteps, block_m, num_out),
                             lambda i: (0, 0, 0)),                      # w4
                pl.BlockSpec((1, num_out), lambda i: (0, 0)),           # b4
            ],
            out_specs=[
                pl.BlockSpec((n, z_dim), lambda i: (0, 0)),
                pl.BlockSpec((n, num_class), lambda i: (0, 0)),
                pl.BlockSpec((n, num_class), lambda i: (0, 0)),
            ],
            scratch_shapes=[
                pltpu.VMEM((npad, FEAT), jnp.bfloat16),                 # feat
                pltpu.VMEM((nsteps, npad, block_m), jnp.float32),       # h3
            ],
        ),
        compiler_params=pltpu.CompilerParams(
            dimension_semantics=("arbitrary",)),
    )(patches, params["w1s"], params["b1t"], params["w2f"], params["b2"],
      params["w3p_bf16"], params["b3"], w4g, params["b4"])


# =============================================================================
# Parameters (deterministic, PyTorch-like fan-in uniform init) + kernel layouts.
# =============================================================================
def init_params(key, z_dim, num_class):
    ks = jax.random.split(key, 8)

    def u(kk, shape, fan_in):
        bound = 1.0 / np.sqrt(fan_in)
        return jax.random.uniform(kk, shape, jnp.float32, -bound, bound)

    w1c = u(ks[0], (C1, 1, KH, KW), 1 * KH * KW)          # Conv2d(1,64)  OIHW
    cb1 = u(ks[1], (C1,), 1 * KH * KW)
    w2c = u(ks[2], (C2, C1, KH, KW), C1 * KH * KW)        # Conv2d(64,128) OIHW
    cb2 = u(ks[3], (C2,), C1 * KH * KW)
    w3 = u(ks[4], (FEAT, HID), FEAT)                      # Linear(3200,1024), (in,out)
    b3 = u(ks[5], (HID,), FEAT)
    w4 = u(ks[6], (HID, z_dim + num_class), HID)
    b4 = u(ks[7], (z_dim + num_class,), HID)

    # Conv1 weight zero-scattered onto the 10x10 (stride-4) patch-pixel axis,
    # one 64-wide output group per conv2 tap: column t*64+c1 of w1s reads the
    # 4x4 conv1 window that conv2 tap t=(ky,kx) needs.
    kyg, kxg, iyg, ixg = np.meshgrid(np.arange(KH), np.arange(KW),
                                     np.arange(KH), np.arange(KW),
                                     indexing="ij")
    t_idx = (kyg * KW + kxg).reshape(-1)
    k_idx = ((2 * kyg + iyg) * PATCH + (2 * kxg + ixg)).reshape(-1)
    vals = w1c[:, 0][:, iyg.reshape(-1), ixg.reshape(-1)].T        # (256, 64)
    w1s3 = jnp.zeros((NTAP, KPAD, C1), jnp.float32).at[t_idx, k_idx].set(vals)
    w1s = w1s3.transpose(1, 0, 2).reshape(KPAD, NTAP * C1)         # (128, 1024)
    b1t = jnp.tile(cb1.reshape(1, C1), (1, NTAP))                  # (1, 1024)

    # Conv2 weight with contraction axis ordered (tap, c1), matching h1 columns.
    w2f = w2c.transpose(2, 3, 1, 0).reshape(NTAP * C1, C2)         # (1024, 128)

    # Fold the PyTorch NCHW flatten (idx = c2*25 + pos) into a row permutation
    # of w3; the kernel's feature layout is idx = pos*128 + c2.
    j = np.arange(FEAT)
    perm = (j % C2) * NPOS + (j // C2)
    w3_perm = w3[perm, :]

    return dict(
        # PyTorch-layout originals (used by the pure-JAX reference)
        w1c=w1c, cb1=cb1, w2c=w2c, cb2=cb2, w3=w3, b3_vec=b3, w4=w4, b4_vec=b4,
        # kernel-layout derived tensors
        w1s=w1s, b1t=b1t, w2f=w2f, b2=cb2.reshape(1, C2),
        w3p_bf16=w3_perm.astype(jnp.bfloat16), b3=b3.reshape(1, HID),
        b4=b4.reshape(1, z_dim + num_class),
    )


# =============================================================================
# Pure-JAX reference (independent lowering: lax.conv + HIGHEST-precision
# matmuls, PyTorch NCHW flatten order, unpermuted f32 weights).
# =============================================================================
def reference_forward(x_nchw, params, z_dim):
    hp = lax.Precision.HIGHEST
    dn = ("NCHW", "OIHW", "NCHW")
    y = lax.conv_general_dilated(x_nchw, params["w1c"], (2, 2), "VALID",
                                 dimension_numbers=dn, precision=hp)
    y = _lrelu(y + params["cb1"].reshape(1, -1, 1, 1))
    y = lax.conv_general_dilated(y, params["w2c"], (2, 2), "VALID",
                                 dimension_numbers=dn, precision=hp)
    y = _lrelu(y + params["cb2"].reshape(1, -1, 1, 1))            # (N,128,5,5)
    feat = y.reshape(y.shape[0], -1)                              # NCHW flatten
    h3 = _lrelu(jnp.dot(feat, params["w3"], precision=hp) + params["b3_vec"])
    z = jnp.dot(h3, params["w4"], precision=hp) + params["b4_vec"]
    z_n = z[:, :z_dim]
    raw = z[:, z_dim:]
    return z_n, jax.nn.softmax(raw, axis=1), raw


if __name__ == "__main__":
    z_dim, num_class, batch = 16, 10, 4
    key = jax.random.PRNGKey(0)
    kx, kp = jax.random.split(key)
    x = jax.random.normal(kx, (batch, 1, 28, 28), jnp.float32)
    params = init_params(kp, z_dim, num_class)

    fwd = jax.jit(functools.partial(encoder_forward, z_dim=z_dim,
                                    num_class=num_class, block_m=512))
    z_n, z_class, z_raw = jax.block_until_ready(fwd(x, params))

    assert z_n.shape == (batch, z_dim), z_n.shape
    assert z_class.shape == (batch, num_class), z_class.shape
    assert z_raw.shape == (batch, num_class), z_raw.shape
    assert bool(jnp.all(jnp.isfinite(z_n)))
    assert bool(jnp.all(jnp.isfinite(z_class)))
    assert bool(jnp.all(jnp.isfinite(z_raw)))
    # softmax rows sum to 1
    assert float(jnp.max(jnp.abs(jnp.sum(z_class, axis=1) - 1.0))) < 1e-4

    rn, rc, rr = reference_forward(x, params, z_dim)
    max_diff = max(float(jnp.max(jnp.abs(z_n - rn))),
                   float(jnp.max(jnp.abs(z_class - rc))),
                   float(jnp.max(jnp.abs(z_raw - rr))))
    assert max_diff < 2e-2, f"max diff vs reference: {max_diff}"

    print("KERNEL_OK")
</pallas_src>

<mosaic_0001>
module attributes {stable_mosaic.version = 11 : i64} {
  func.func @_encoder_kernel(%arg0: i32, %arg1: memref<200x128xf32, #tpu.memory_space<vmem>>, %arg2: memref<128x1024xf32, #tpu.memory_space<vmem>>, %arg3: memref<1x1024xf32, #tpu.memory_space<vmem>>, %arg4: memref<1024x128xf32, #tpu.memory_space<vmem>>, %arg5: memref<1x128xf32, #tpu.memory_space<vmem>>, %arg6: memref<3200x512xbf16, #tpu.memory_space<vmem>>, %arg7: memref<1x512xf32, #tpu.memory_space<vmem>>, %arg8: memref<2x512x26xf32, #tpu.memory_space<vmem>>, %arg9: memref<1x26xf32, #tpu.memory_space<vmem>>, %arg10: memref<4x16xf32, #tpu.memory_space<vmem>>, %arg11: memref<4x10xf32, #tpu.memory_space<vmem>>, %arg12: memref<4x10xf32, #tpu.memory_space<vmem>>, %arg13: memref<8x3200xbf16, #tpu.memory_space<vmem>>, %arg14: memref<2x8x512xf32, #tpu.memory_space<vmem>>) attributes {dimension_semantics = [#tpu.dimension_semantics<arbitrary>], iteration_bounds = array<i64: 2>, scalar_prefetch = 0 : i64, scratch_operands = 2 : i64, tpu.core_type = #tpu.core_type<tc>, window_params = [{pipeline_mode = #tpu.pipeline_mode<synchronous>, transform_indices = @transform_0, window_bounds = array<i64: 200, 128>}, {pipeline_mode = #tpu.pipeline_mode<synchronous>, transform_indices = @transform_1, window_bounds = array<i64: 128, 1024>}, {pipeline_mode = #tpu.pipeline_mode<synchronous>, transform_indices = @transform_2, window_bounds = array<i64: 1, 1024>}, {pipeline_mode = #tpu.pipeline_mode<synchronous>, transform_indices = @transform_3, window_bounds = array<i64: 1024, 128>}, {pipeline_mode = #tpu.pipeline_mode<synchronous>, transform_indices = @transform_4, window_bounds = array<i64: 1, 128>}, {transform_indices = @transform_5, window_bounds = array<i64: 3200, 512>}, {transform_indices = @transform_6, window_bounds = array<i64: 1, 512>}, {pipeline_mode = #tpu.pipeline_mode<synchronous>, transform_indices = @transform_7, window_bounds = array<i64: 2, 512, 26>}, {pipeline_mode = #tpu.pipeline_mode<synchronous>, transform_indices = @transform_8, window_bounds = array<i64: 1, 26>}, {pipeline_mode = #tpu.pipeline_mode<synchronous>, transform_indices = @transform_9, window_bounds = array<i64: 4, 16>}, {pipeline_mode = #tpu.pipeline_mode<synchronous>, transform_indices = @transform_10, window_bounds = array<i64: 4, 10>}, {pipeline_mode = #tpu.pipeline_mode<synchronous>, transform_indices = @transform_11, window_bounds = array<i64: 4, 10>}]} {
    %c0_i32 = arith.constant 0 : i32
    %0 = arith.cmpi eq, %arg0, %c0_i32 : i32
    %1 = arith.extui %0 : i1 to i32
    %c0_i32_0 = arith.constant 0 : i32
    %2 = arith.cmpi ne, %1, %c0_i32_0 : i32
    scf.if %2 {
      %c0_11 = arith.constant 0 : index
      %c0_12 = arith.constant 0 : index
      %21 = vector.load %arg1[%c0_11, %c0_12] : memref<200x128xf32, #tpu.memory_space<vmem>>, vector<200x128xf32>
      %c0_13 = arith.constant 0 : index
      %c0_14 = arith.constant 0 : index
      %22 = vector.load %arg2[%c0_13, %c0_14] : memref<128x1024xf32, #tpu.memory_space<vmem>>, vector<128x1024xf32>
      %cst_15 = arith.constant dense<0.000000e+00> : vector<200x1024xf32>
      %23 = tpu.matmul %21, %22, %cst_15 {dimension_numbers = #tpu.dot_dimension_numbers<[1], [0], [0], [1], [0, 0, 1, 1], [], []>} : vector<200x128xf32>, vector<128x1024xf32>, vector<200x1024xf32> -> vector<200x1024xf32>
      %c0_16 = arith.constant 0 : index
      %c0_17 = arith.constant 0 : index
      %24 = vector.load %arg3[%c0_16, %c0_17] : memref<1x1024xf32, #tpu.memory_space<vmem>>, vector<1x1024xf32>
      %25 = vector.broadcast %24 : vector<1x1024xf32> to vector<200x1024xf32>
      %26 = arith.addf %23, %25 : vector<200x1024xf32>
      %cst_18 = arith.constant 0.000000e+00 : f32
      %27 = vector.broadcast %cst_18 : f32 to vector<200x1024xf32>
      %28 = arith.cmpf oge, %26, %27 : vector<200x1024xf32>
      %cst_19 = arith.constant 2.000000e-01 : f32
      %29 = vector.broadcast %cst_19 : f32 to vector<200x1024xf32>
      %30 = arith.mulf %29, %26 : vector<200x1024xf32>
      %31 = arith.select %28, %26, %30 : vector<200x1024xi1>, vector<200x1024xf32>
      %c0_20 = arith.constant 0 : index
      %c0_21 = arith.constant 0 : index
      %32 = vector.load %arg4[%c0_20, %c0_21] : memref<1024x128xf32, #tpu.memory_space<vmem>>, vector<1024x128xf32>
      %cst_22 = arith.constant dense<0.000000e+00> : vector<200x128xf32>
      %33 = tpu.matmul %31, %32, %cst_22 {dimension_numbers = #tpu.dot_dimension_numbers<[1], [0], [0], [1], [0, 0, 1, 1], [], []>} : vector<200x1024xf32>, vector<1024x128xf32>, vector<200x128xf32> -> vector<200x128xf32>
      %c0_23 = arith.constant 0 : index
      %c0_24 = arith.constant 0 : index
      %34 = vector.load %arg5[%c0_23, %c0_24] : memref<1x128xf32, #tpu.memory_space<vmem>>, vector<1x128xf32>
      %35 = vector.broadcast %34 : vector<1x128xf32> to vector<200x128xf32>
      %36 = arith.addf %33, %35 : vector<200x128xf32>
      %cst_25 = arith.constant 0.000000e+00 : f32
      %37 = vector.broadcast %cst_25 : f32 to vector<200x128xf32>
      %38 = arith.cmpf oge, %36, %37 : vector<200x128xf32>
      %cst_26 = arith.constant 2.000000e-01 : f32
      %39 = vector.broadcast %cst_26 : f32 to vector<200x128xf32>
      %40 = arith.mulf %39, %36 : vector<200x128xf32>
      %41 = arith.select %38, %36, %40 : vector<200x128xi1>, vector<200x128xf32>
      %42 = vector.extract_strided_slice %41 {offsets = [0, 0], sizes = [8, 128], strides = [1, 1]} : vector<200x128xf32> to vector<8x128xf32>
      %43 = arith.truncf %42 : vector<8x128xf32> to vector<8x128xbf16>
      %c0_27 = arith.constant 0 : index
      %c0_28 = arith.constant 0 : index
      %44 = vector.load %arg13[%c0_27, %c0_28] : memref<8x3200xbf16, #tpu.memory_space<vmem>>, vector<8x128xbf16>
      tpu.vector_store %arg13[%c0_27, %c0_28], %43 {strides = array<i32>} : memref<8x3200xbf16, #tpu.memory_space<vmem>>, vector<8x128xbf16>,
      %45 = vector.extract_strided_slice %41 {offsets = [8, 0], sizes = [8, 128], strides = [1, 1]} : vector<200x128xf32> to vector<8x128xf32>
      %46 = arith.truncf %45 : vector<8x128xf32> to vector<8x128xbf16>
      %c0_29 = arith.constant 0 : index
      %c128 = arith.constant 128 : index
      %47 = vector.load %arg13[%c0_29, %c128] : memref<8x3200xbf16, #tpu.memory_space<vmem>>, vector<8x128xbf16>
      tpu.vector_store %arg13[%c0_29, %c128], %46 {strides = array<i32>} : memref<8x3200xbf16, #tpu.memory_space<vmem>>, vector<8x128xbf16>,
      %48 = vector.extract_strided_slice %41 {offsets = [16, 0], sizes = [8, 128], strides = [1, 1]} : vector<200x128xf32> to vector<8x128xf32>
      %49 = arith.truncf %48 : vector<8x128xf32> to vector<8x128xbf16>
      %c0_30 = arith.constant 0 : index
      %c256 = arith.constant 256 : index
      %50 = vector.load %arg13[%c0_30, %c256] : memref<8x3200xbf16, #tpu.memory_space<vmem>>, vector<8x128xbf16>
      tpu.vector_store %arg13[%c0_30, %c256], %49 {strides = array<i32>} : memref<8x3200xbf16, #tpu.memory_space<vmem>>, vector<8x128xbf16>,
      %51 = vector.extract_strided_slice %41 {offsets = [24, 0], sizes = [8, 128], strides = [1, 1]} : vector<200x128xf32> to vector<8x128xf32>
      %52 = arith.truncf %51 : vector<8x128xf32> to vector<8x128xbf16>
      %c0_31 = arith.constant 0 : index
      %c384 = arith.constant 384 : index
      %53 = vector.load %arg13[%c0_31, %c384] : memref<8x3200xbf16, #tpu.memory_space<vmem>>, vector<8x128xbf16>
      tpu.vector_store %arg13[%c0_31, %c384], %52 {strides = array<i32>} : memref<8x3200xbf16, #tpu.memory_space<vmem>>, vector<8x128xbf16>,
      %54 = vector.extract_strided_slice %41 {offsets = [32, 0], sizes = [8, 128], strides = [1, 1]} : vector<200x128xf32> to vector<8x128xf32>
      %55 = arith.truncf %54 : vector<8x128xf32> to vector<8x128xbf16>
      %c0_32 = arith.constant 0 : index
      %c512 = arith.constant 512 : index
      %56 = vector.load %arg13[%c0_32, %c512] : memref<8x3200xbf16, #tpu.memory_space<vmem>>, vector<8x128xbf16>
      tpu.vector_store %arg13[%c0_32, %c512], %55 {strides = array<i32>} : memref<8x3200xbf16, #tpu.memory_space<vmem>>, vector<8x128xbf16>,
      %57 = vector.extract_strided_slice %41 {offsets = [40, 0], sizes = [8, 128], strides = [1, 1]} : vector<200x128xf32> to vector<8x128xf32>
      %58 = arith.truncf %57 : vector<8x128xf32> to vector<8x128xbf16>
      %c0_33 = arith.constant 0 : index
      %c640 = arith.constant 640 : index
      %59 = vector.load %arg13[%c0_33, %c640] : memref<8x3200xbf16, #tpu.memory_space<vmem>>, vector<8x128xbf16>
      tpu.vector_store %arg13[%c0_33, %c640], %58 {strides = array<i32>} : memref<8x3200xbf16, #tpu.memory_space<vmem>>, vector<8x128xbf16>,
      %60 = vector.extract_strided_slice %41 {offsets = [48, 0], sizes = [8, 128], strides = [1, 1]} : vector<200x128xf32> to vector<8x128xf32>
      %61 = arith.truncf %60 : vector<8x128xf32> to vector<8x128xbf16>
      %c0_34 = arith.constant 0 : index
      %c768 = arith.constant 768 : index
      %62 = vector.load %arg13[%c0_34, %c768] : memref<8x3200xbf16, #tpu.memory_space<vmem>>, vector<8x128xbf16>
      tpu.vector_store %arg13[%c0_34, %c768], %61 {strides = array<i32>} : memref<8x3200xbf16, #tpu.memory_space<vmem>>, vector<8x128xbf16>,
      %63 = vector.extract_strided_slice %41 {offsets = [56, 0], sizes = [8, 128], strides = [1, 1]} : vector<200x128xf32> to vector<8x128xf32>
      %64 = arith.truncf %63 : vector<8x128xf32> to vector<8x128xbf16>
      %c0_35 = arith.constant 0 : index
      %c896 = arith.constant 896 : index
      %65 = vector.load %arg13[%c0_35, %c896] : memref<8x3200xbf16, #tpu.memory_space<vmem>>, vector<8x128xbf16>
      tpu.vector_store %arg13[%c0_35, %c896], %64 {strides = array<i32>} : memref<8x3200xbf16, #tpu.memory_space<vmem>>, vector<8x128xbf16>,
      %66 = vector.extract_strided_slice %41 {offsets = [64, 0], sizes = [8, 128], strides = [1, 1]} : vector<200x128xf32> to vector<8x128xf32>
      %67 = arith.truncf %66 : vector<8x128xf32> to vector<8x128xbf16>
      %c0_36 = arith.constant 0 : index
      %c1024 = arith.constant 1024 : index
      %68 = vector.load %arg13[%c0_36, %c1024] : memref<8x3200xbf16, #tpu.memory_space<vmem>>, vector<8x128xbf16>
      tpu.vector_store %arg13[%c0_36, %c1024], %67 {strides = array<i32>} : memref<8x3200xbf16, #tpu.memory_space<vmem>>, vector<8x128xbf16>,
      %69 = vector.extract_strided_slice %41 {offsets = [72, 0], sizes = [8, 128], strides = [1, 1]} : vector<200x128xf32> to vector<8x128xf32>
      %70 = arith.truncf %69 : vector<8x128xf32> to vector<8x128xbf16>
      %c0_37 = arith.constant 0 : index
      %c1152 = arith.constant 1152 : index
      %71 = vector.load %arg13[%c0_37, %c1152] : memref<8x3200xbf16, #tpu.memory_space<vmem>>, vector<8x128xbf16>
      tpu.vector_store %arg13[%c0_37, %c1152], %70 {strides = array<i32>} : memref<8x3200xbf16, #tpu.memory_space<vmem>>, vector<8x128xbf16>,
      %72 = vector.extract_strided_slice %41 {offsets = [80, 0], sizes = [8, 128], strides = [1, 1]} : vector<200x128xf32> to vector<8x128xf32>
      %73 = arith.truncf %72 : vector<8x128xf32> to vector<8x128xbf16>
      %c0_38 = arith.constant 0 : index
      %c1280 = arith.constant 1280 : index
      %74 = vector.load %arg13[%c0_38, %c1280] : memref<8x3200xbf16, #tpu.memory_space<vmem>>, vector<8x128xbf16>
      tpu.vector_store %arg13[%c0_38, %c1280], %73 {strides = array<i32>} : memref<8x3200xbf16, #tpu.memory_space<vmem>>, vector<8x128xbf16>,
      %75 = vector.extract_strided_slice %41 {offsets = [88, 0], sizes = [8, 128], strides = [1, 1]} : vector<200x128xf32> to vector<8x128xf32>
      %76 = arith.truncf %75 : vector<8x128xf32> to vector<8x128xbf16>
      %c0_39 = arith.constant 0 : index
      %c1408 = arith.constant 1408 : index
      %77 = vector.load %arg13[%c0_39, %c1408] : memref<8x3200xbf16, #tpu.memory_space<vmem>>, vector<8x128xbf16>
      tpu.vector_store %arg13[%c0_39, %c1408], %76 {strides = array<i32>} : memref<8x3200xbf16, #tpu.memory_space<vmem>>, vector<8x128xbf16>,
      %78 = vector.extract_strided_slice %41 {offsets = [96, 0], sizes = [8, 128], strides = [1, 1]} : vector<200x128xf32> to vector<8x128xf32>
      %79 = arith.truncf %78 : vector<8x128xf32> to vector<8x128xbf16>
      %c0_40 = arith.constant 0 : index
      %c1536 = arith.constant 1536 : index
      %80 = vector.load %arg13[%c0_40, %c1536] : memref<8x3200xbf16, #tpu.memory_space<vmem>>, vector<8x128xbf16>
      tpu.vector_store %arg13[%c0_40, %c1536], %79 {strides = array<i32>} : memref<8x3200xbf16, #tpu.memory_space<vmem>>, vector<8x128xbf16>,
      %81 = vector.extract_strided_slice %41 {offsets = [104, 0], sizes = [8, 128], strides = [1, 1]} : vector<200x128xf32> to vector<8x128xf32>
      %82 = arith.truncf %81 : vector<8x128xf32> to vector<8x128xbf16>
      %c0_41 = arith.constant 0 : index
      %c1664 = arith.constant 1664 : index
      %83 = vector.load %arg13[%c0_41, %c1664] : memref<8x3200xbf16, #tpu.memory_space<vmem>>, vector<8x128xbf16>
      tpu.vector_store %arg13[%c0_41, %c1664], %82 {strides = array<i32>} : memref<8x3200xbf16, #tpu.memory_space<vmem>>, vector<8x128xbf16>,
      %84 = vector.extract_strided_slice %41 {offsets = [112, 0], sizes = [8, 128], strides = [1, 1]} : vector<200x128xf32> to vector<8x128xf32>
      %85 = arith.truncf %84 : vector<8x128xf32> to vector<8x128xbf16>
      %c0_42 = arith.constant 0 : index
      %c1792 = arith.constant 1792 : index
      %86 = vector.load %arg13[%c0_42, %c1792] : memref<8x3200xbf16, #tpu.memory_space<vmem>>, vector<8x128xbf16>
      tpu.vector_store %arg13[%c0_42, %c1792], %85 {strides = array<i32>} : memref<8x3200xbf16, #tpu.memory_space<vmem>>, vector<8x128xbf16>,
      %87 = vector.extract_strided_slice %41 {offsets = [120, 0], sizes = [8, 128], strides = [1, 1]} : vector<200x128xf32> to vector<8x128xf32>
      %88 = arith.truncf %87 : vector<8x128xf32> to vector<8x128xbf16>
      %c0_43 = arith.constant 0 : index
      %c1920 = arith.constant 1920 : index
      %89 = vector.load %arg13[%c0_43, %c1920] : memref<8x3200xbf16, #tpu.memory_space<vmem>>, vector<8x128xbf16>
      tpu.vector_store %arg13[%c0_43, %c1920], %88 {strides = array<i32>} : memref<8x3200xbf16, #tpu.memory_space<vmem>>, vector<8x128xbf16>,
      %90 = vector.extract_strided_slice %41 {offsets = [128, 0], sizes = [8, 128], strides = [1, 1]} : vector<200x128xf32> to vector<8x128xf32>
      %91 = arith.truncf %90 : vector<8x128xf32> to vector<8x128xbf16>
      %c0_44 = arith.constant 0 : index
      %c2048 = arith.constant 2048 : index
      %92 = vector.load %arg13[%c0_44, %c2048] : memref<8x3200xbf16, #tpu.memory_space<vmem>>, vector<8x128xbf16>
      tpu.vector_store %arg13[%c0_44, %c2048], %91 {strides = array<i32>} : memref<8x3200xbf16, #tpu.memory_space<vmem>>, vector<8x128xbf16>,
      %93 = vector.extract_strided_slice %41 {offsets = [136, 0], sizes = [8, 128], strides = [1, 1]} : vector<200x128xf32> to vector<8x128xf32>
      %94 = arith.truncf %93 : vector<8x128xf32> to vector<8x128xbf16>
      %c0_45 = arith.constant 0 : index
      %c2176 = arith.constant 2176 : index
      %95 = vector.load %arg13[%c0_45, %c2176] : memref<8x3200xbf16, #tpu.memory_space<vmem>>, vector<8x128xbf16>
      tpu.vector_store %arg13[%c0_45, %c2176], %94 {strides = array<i32>} : memref<8x3200xbf16, #tpu.memory_space<vmem>>, vector<8x128xbf16>,
      %96 = vector.extract_strided_slice %41 {offsets = [144, 0], sizes = [8, 128], strides = [1, 1]} : vector<200x128xf32> to vector<8x128xf32>
      %97 = arith.truncf %96 : vector<8x128xf32> to vector<8x128xbf16>
      %c0_46 = arith.constant 0 : index
      %c2304 = arith.constant 2304 : index
      %98 = vector.load %arg13[%c0_46, %c2304] : memref<8x3200xbf16, #tpu.memory_space<vmem>>, vector<8x128xbf16>
      tpu.vector_store %arg13[%c0_46, %c2304], %97 {strides = array<i32>} : memref<8x3200xbf16, #tpu.memory_space<vmem>>, vector<8x128xbf16>,
      %99 = vector.extract_strided_slice %41 {offsets = [152, 0], sizes = [8, 128], strides = [1, 1]} : vector<200x128xf32> to vector<8x128xf32>
      %100 = arith.truncf %99 : vector<8x128xf32> to vector<8x128xbf16>
      %c0_47 = arith.constant 0 : index
      %c2432 = arith.constant 2432 : index
      %101 = vector.load %arg13[%c0_47, %c2432] : memref<8x3200xbf16, #tpu.memory_space<vmem>>, vector<8x128xbf16>
      tpu.vector_store %arg13[%c0_47, %c2432], %100 {strides = array<i32>} : memref<8x3200xbf16, #tpu.memory_space<vmem>>, vector<8x128xbf16>,
      %102 = vector.extract_strided_slice %41 {offsets = [160, 0], sizes = [8, 128], strides = [1, 1]} : vector<200x128xf32> to vector<8x128xf32>
      %103 = arith.truncf %102 : vector<8x128xf32> to vector<8x128xbf16>
      %c0_48 = arith.constant 0 : index
      %c2560 = arith.constant 2560 : index
      %104 = vector.load %arg13[%c0_48, %c2560] : memref<8x3200xbf16, #tpu.memory_space<vmem>>, vector<8x128xbf16>
      tpu.vector_store %arg13[%c0_48, %c2560], %103 {strides = array<i32>} : memref<8x3200xbf16, #tpu.memory_space<vmem>>, vector<8x128xbf16>,
      %105 = vector.extract_strided_slice %41 {offsets = [168, 0], sizes = [8, 128], strides = [1, 1]} : vector<200x128xf32> to vector<8x128xf32>
      %106 = arith.truncf %105 : vector<8x128xf32> to vector<8x128xbf16>
      %c0_49 = arith.constant 0 : index
      %c2688 = arith.constant 2688 : index
      %107 = vector.load %arg13[%c0_49, %c2688] : memref<8x3200xbf16, #tpu.memory_space<vmem>>, vector<8x128xbf16>
      tpu.vector_store %arg13[%c0_49, %c2688], %106 {strides = array<i32>} : memref<8x3200xbf16, #tpu.memory_space<vmem>>, vector<8x128xbf16>,
      %108 = vector.extract_strided_slice %41 {offsets = [176, 0], sizes = [8, 128], strides = [1, 1]} : vector<200x128xf32> to vector<8x128xf32>
      %109 = arith.truncf %108 : vector<8x128xf32> to vector<8x128xbf16>
      %c0_50 = arith.constant 0 : index
      %c2816 = arith.constant 2816 : index
      %110 = vector.load %arg13[%c0_50, %c2816] : memref<8x3200xbf16, #tpu.memory_space<vmem>>, vector<8x128xbf16>
      tpu.vector_store %arg13[%c0_50, %c2816], %109 {strides = array<i32>} : memref<8x3200xbf16, #tpu.memory_space<vmem>>, vector<8x128xbf16>,
      %111 = vector.extract_strided_slice %41 {offsets = [184, 0], sizes = [8, 128], strides = [1, 1]} : vector<200x128xf32> to vector<8x128xf32>
      %112 = arith.truncf %111 : vector<8x128xf32> to vector<8x128xbf16>
      %c0_51 = arith.constant 0 : index
      %c2944 = arith.constant 2944 : index
      %113 = vector.load %arg13[%c0_51, %c2944] : memref<8x3200xbf16, #tpu.memory_space<vmem>>, vector<8x128xbf16>
      tpu.vector_store %arg13[%c0_51, %c2944], %112 {strides = array<i32>} : memref<8x3200xbf16, #tpu.memory_space<vmem>>, vector<8x128xbf16>,
      %114 = vector.extract_strided_slice %41 {offsets = [192, 0], sizes = [8, 128], strides = [1, 1]} : vector<200x128xf32> to vector<8x128xf32>
      %115 = arith.truncf %114 : vector<8x128xf32> to vector<8x128xbf16>
      %c0_52 = arith.constant 0 : index
      %c3072 = arith.constant 3072 : index
      %116 = vector.load %arg13[%c0_52, %c3072] : memref<8x3200xbf16, #tpu.memory_space<vmem>>, vector<8x128xbf16>
      tpu.vector_store %arg13[%c0_52, %c3072], %115 {strides = array<i32>} : memref<8x3200xbf16, #tpu.memory_space<vmem>>, vector<8x128xbf16>,
    } else {
    }
    %c0 = arith.constant 0 : index
    %c0_1 = arith.constant 0 : index
    %3 = vector.load %arg13[%c0, %c0_1] : memref<8x3200xbf16, #tpu.memory_space<vmem>>, vector<8x3200xbf16>
    %c0_2 = arith.constant 0 : index
    %c0_3 = arith.constant 0 : index
    %4 = vector.load %arg6[%c0_2, %c0_3] : memref<3200x512xbf16, #tpu.memory_space<vmem>>, vector<3200x512xbf16>
    %cst = arith.constant dense<0.000000e+00> : vector<8x512xf32>
    %5 = tpu.matmul %3, %4, %cst {dimension_numbers = #tpu.dot_dimension_numbers<[1], [0], [0], [1], [0, 0, 1, 1], [], []>} : vector<8x3200xbf16>, vector<3200x512xbf16>, vector<8x512xf32> -> vector<8x512xf32>
    %c0_4 = arith.constant 0 : index
    %c0_5 = arith.constant 0 : index
    %6 = vector.load %arg7[%c0_4, %c0_5] : memref<1x512xf32, #tpu.memory_space<vmem>>, vector<1x512xf32>
    %7 = vector.broadcast %6 : vector<1x512xf32> to vector<8x512xf32>
    %8 = arith.addf %5, %7 : vector<8x512xf32>
    %cst_6 = arith.constant 0.000000e+00 : f32
    %9 = vector.broadcast %cst_6 : f32 to vector<8x512xf32>
    %10 = arith.cmpf oge, %8, %9 : vector<8x512xf32>
    %cst_7 = arith.constant 2.000000e-01 : f32
    %11 = vector.broadcast %cst_7 : f32 to vector<8x512xf32>
    %12 = arith.mulf %11, %8 : vector<8x512xf32>
    %13 = arith.select %10, %8, %12 : vector<8x512xi1>, vector<8x512xf32>
    %14 = arith.index_cast %arg0 : i32 to index
    %c0_8 = arith.constant 0 : index
    %c0_9 = arith.constant 0 : index
    %15 = vector.load %arg14[%14, %c0_8, %c0_9] : memref<2x8x512xf32, #tpu.memory_space<vmem>>, vector<1x8x512xf32>
    %16 = vector.shape_cast %15 : vector<1x8x512xf32> to vector<8x512xf32>
    %17 = vector.shape_cast %13 : vector<8x512xf32> to vector<1x8x512xf32>
    tpu.vector_store %arg14[%14, %c0_8, %c0_9], %17 {strides = array<i32>} : memref<2x8x512xf32, #tpu.memory_space<vmem>>, vector<1x8x512xf32>,
    %c1_i32 = arith.constant 1 : i32
    %18 = arith.cmpi eq, %arg0, %c1_i32 : i32
    %19 = arith.extui %18 : i1 to i32
    %c0_i32_10 = arith.constant 0 : i32
    %20 = arith.cmpi ne, %19, %c0_i32_10 : i32
    scf.if %20 {
      %c0_11 = arith.constant 0 : index
      %c0_12 = arith.constant 0 : index
      %21 = vector.load %arg9[%c0_11, %c0_12] : memref<1x26xf32, #tpu.memory_space<vmem>>, vector<1x26xf32>
      %c0_13 = arith.constant 0 : index
      %c0_14 = arith.constant 0 : index
      %c0_15 = arith.constant 0 : index
      %22 = vector.load %arg14[%c0_13, %c0_14, %c0_15] : memref<2x8x512xf32, #tpu.memory_space<vmem>>, vector<1x8x512xf32>
      %23 = vector.shape_cast %22 : vector<1x8x512xf32> to vector<8x512xf32>
      %c0_16 = arith.constant 0 : index
      %c0_17 = arith.constant 0 : index
      %c0_18 = arith.constant 0 : index
      %24 = vector.load %arg8[%c0_16, %c0_17, %c0_18] : memref<2x512x26xf32, #tpu.memory_space<vmem>>, vector<1x512x26xf32>
      %25 = vector.shape_cast %24 : vector<1x512x26xf32> to vector<512x26xf32>
      %cst_19 = arith.constant dense<0.000000e+00> : vector<8x26xf32>
      %26 = tpu.matmul %23, %25, %cst_19 {dimension_numbers = #tpu.dot_dimension_numbers<[1], [0], [0], [1], [0, 0, 1, 1], [], []>} : vector<8x512xf32>, vector<512x26xf32>, vector<8x26xf32> -> vector<8x26xf32>
      %27 = vector.broadcast %21 : vector<1x26xf32> to vector<8x26xf32>
      %28 = arith.addf %27, %26 : vector<8x26xf32>
      %c1 = arith.constant 1 : index
      %c0_20 = arith.constant 0 : index
      %c0_21 = arith.constant 0 : index
      %29 = vector.load %arg14[%c1, %c0_20, %c0_21] : memref<2x8x512xf32, #tpu.memory_space<vmem>>, vector<1x8x512xf32>
      %30 = vector.shape_cast %29 : vector<1x8x512xf32> to vector<8x512xf32>
      %c1_22 = arith.constant 1 : index
      %c0_23 = arith.constant 0 : index
      %c0_24 = arith.constant 0 : index
      %31 = vector.load %arg8[%c1_22, %c0_23, %c0_24] : memref<2x512x26xf32, #tpu.memory_space<vmem>>, vector<1x512x26xf32>
      %32 = vector.shape_cast %31 : vector<1x512x26xf32> to vector<512x26xf32>
      %cst_25 = arith.constant dense<0.000000e+00> : vector<8x26xf32>
      %33 = tpu.matmul %30, %32, %cst_25 {dimension_numbers = #tpu.dot_dimension_numbers<[1], [0], [0], [1], [0, 0, 1, 1], [], []>} : vector<8x512xf32>, vector<512x26xf32>, vector<8x26xf32> -> vector<8x26xf32>
      %34 = arith.addf %28, %33 : vector<8x26xf32>
      %35 = vector.extract_strided_slice %34 {offsets = [0, 0], sizes = [4, 16], strides = [1, 1]} : vector<8x26xf32> to vector<4x16xf32>
      %c0_26 = arith.constant 0 : index
      %c0_27 = arith.constant 0 : index
      %36 = vector.load %arg10[%c0_26, %c0_27] : memref<4x16xf32, #tpu.memory_space<vmem>>, vector<4x16xf32>
      tpu.vector_store %arg10[%c0_26, %c0_27], %35 {strides = array<i32>} : memref<4x16xf32, #tpu.memory_space<vmem>>, vector<4x16xf32>,
      %37 = vector.extract_strided_slice %34 {offsets = [0, 16], sizes = [4, 10], strides = [1, 1]} : vector<8x26xf32> to vector<4x10xf32>
      %c0_28 = arith.constant 0 : index
      %c0_29 = arith.constant 0 : index
      %38 = vector.load %arg12[%c0_28, %c0_29] : memref<4x10xf32, #tpu.memory_space<vmem>>, vector<4x10xf32>
      tpu.vector_store %arg12[%c0_28, %c0_29], %37 {strides = array<i32>} : memref<4x10xf32, #tpu.memory_space<vmem>>, vector<4x10xf32>,
      %cst_30 = arith.constant dense<0xFF800000> : vector<4xf32>
      %39 = vector.multi_reduction <maximumf>, %37, %cst_30 [1] : vector<4x10xf32> to vector<4xf32>
      %40 = vector.shape_cast %39 : vector<4xf32> to vector<4x1xf32>
      %41 = vector.broadcast %40 : vector<4x1xf32> to vector<4x10xf32>
      %42 = arith.subf %37, %41 : vector<4x10xf32>
      %43 = math.exp %42 : vector<4x10xf32>
      %cst_31 = arith.constant dense<0.000000e+00> : vector<4xf32>
      %44 = vector.multi_reduction <add>, %43, %cst_31 [1] : vector<4x10xf32> to vector<4xf32>
      %45 = vector.shape_cast %44 : vector<4xf32> to vector<4x1xf32>
      %46 = vector.broadcast %45 : vector<4x1xf32> to vector<4x10xf32>
      %47 = arith.divf %43, %46 : vector<4x10xf32>
      %c0_32 = arith.constant 0 : index
      %c0_33 = arith.constant 0 : index
      %48 = vector.load %arg11[%c0_32, %c0_33] : memref<4x10xf32, #tpu.memory_space<vmem>>, vector<4x10xf32>
      tpu.vector_store %arg11[%c0_32, %c0_33], %47 {strides = array<i32>} : memref<4x10xf32, #tpu.memory_space<vmem>>, vector<4x10xf32>,
    } else {
    }
    return
  }
  func.func @transform_0(%arg0: i32) -> (i32, i32) {
    %c0_i32 = arith.constant 0 : i32
    %c0_i32_0 = arith.constant 0 : i32
    %c0_i32_1 = arith.constant 0 : i32
    return %c0_i32, %c0_i32_0 : i32, i32
  }
  func.func @transform_1(%arg0: i32) -> (i32, i32) {
    %c0_i32 = arith.constant 0 : i32
    %c0_i32_0 = arith.constant 0 : i32
    %c0_i32_1 = arith.constant 0 : i32
    return %c0_i32, %c0_i32_0 : i32, i32
  }
  func.func @transform_2(%arg0: i32) -> (i32, i32) {
    %c0_i32 = arith.constant 0 : i32
    %c0_i32_0 = arith.constant 0 : i32
    %c0_i32_1 = arith.constant 0 : i32
    return %c0_i32, %c0_i32_0 : i32, i32
  }
  func.func @transform_3(%arg0: i32) -> (i32, i32) {
    %c0_i32 = arith.constant 0 : i32
    %c0_i32_0 = arith.constant 0 : i32
    %c0_i32_1 = arith.constant 0 : i32
    return %c0_i32, %c0_i32_0 : i32, i32
  }
  func.func @transform_4(%arg0: i32) -> (i32, i32) {
    %c0_i32 = arith.constant 0 : i32
    %c0_i32_0 = arith.constant 0 : i32
    %c0_i32_1 = arith.constant 0 : i32
    return %c0_i32, %c0_i32_0 : i32, i32
  }
  func.func @transform_5(%arg0: i32) -> (i32, i32) {
    %c0_i32 = arith.constant 0 : i32
    %c0_i32_0 = arith.constant 0 : i32
    return %c0_i32, %arg0 : i32, i32
  }
  func.func @transform_6(%arg0: i32) -> (i32, i32) {
    %c0_i32 = arith.constant 0 : i32
    %c0_i32_0 = arith.constant 0 : i32
    return %c0_i32, %arg0 : i32, i32
  }
  func.func @transform_7(%arg0: i32) -> (i32, i32, i32) {
    %c0_i32 = arith.constant 0 : i32
    %c0_i32_0 = arith.constant 0 : i32
    %c0_i32_1 = arith.constant 0 : i32
    %c0_i32_2 = arith.constant 0 : i32
    return %c0_i32, %c0_i32_0, %c0_i32_1 : i32, i32, i32
  }
  func.func @transform_8(%arg0: i32) -> (i32, i32) {
    %c0_i32 = arith.constant 0 : i32
    %c0_i32_0 = arith.constant 0 : i32
    %c0_i32_1 = arith.constant 0 : i32
    return %c0_i32, %c0_i32_0 : i32, i32
  }
  func.func @transform_9(%arg0: i32) -> (i32, i32) {
    %c0_i32 = arith.constant 0 : i32
    %c0_i32_0 = arith.constant 0 : i32
    %c0_i32_1 = arith.constant 0 : i32
    return %c0_i32, %c0_i32_0 : i32, i32
  }
  func.func @transform_10(%arg0: i32) -> (i32, i32) {
    %c0_i32 = arith.constant 0 : i32
    %c0_i32_0 = arith.constant 0 : i32
    %c0_i32_1 = arith.constant 0 : i32
    return %c0_i32, %c0_i32_0 : i32, i32
  }
  func.func @transform_11(%arg0: i32) -> (i32, i32) {
    %c0_i32 = arith.constant 0 : i32
    %c0_i32_0 = arith.constant 0 : i32
    %c0_i32_1 = arith.constant 0 : i32
    return %c0_i32, %c0_i32_0 : i32, i32
  }
}

</mosaic_0001>

<bundles_post_ra>
// kernel: encoder_forward.1
= control target key start
LH: loop header
LB: loop body
LE: loop exit
PB: predicated region body
PF: predicated region fallthrough
CT: control target
= control target key end

     0   :  { %17 = vsyncpa [#allocation6], 0  ;;  %s19761_s0 = inlined_call_operand.vmem [shape: f32[200,128], index: 0, kind: input, shape index: {}]   ;;  %s19762_s1 = inlined_call_operand.vmem [shape: f32[128,1024], index: 1, kind: input, shape index: {}]   ;;  %s19763_s2 = inlined_call_operand.vmem [shape: f32[1,1024], index: 2, kind: input, shape index: {}]   ;;  %s19764_s3 = inlined_call_operand.vmem [shape: f32[1024,128], index: 3, kind: input, shape index: {}]   ;;  %s19765_s4 = inlined_call_operand.vmem [shape: f32[1,128], index: 4, kind: input, shape index: {}]   ;;  %s19766_s5 = inlined_call_operand.vmem [shape: bf16[3200,1024], index: 5, kind: input, shape index: {}]   ;;  %s19767_s6 = inlined_call_operand.vmem [shape: f32[1,1024], index: 6, kind: input, shape index: {}]   ;;  %s19768_s7 = inlined_call_operand.vmem [shape: f32[2,512,26], index: 7, kind: input, shape index: {}]   ;;  %s19769_s8 = inlined_call_operand.vmem [shape: f32[1,26], index: 8, kind: input, shape index: {}]   ;;  %s19770_s9 = inlined_call_operand.hbm [shape: f32[4,16], index: 9, kind: output, shape index: {0}]   ;;  %s19771_s10 = inlined_call_operand.hbm [shape: f32[4,10], index: 10, kind: output, shape index: {1}]   ;;  %s19772_s11 = inlined_call_operand.hbm [shape: f32[4,10], index: 11, kind: output, shape index: {2}]  }
   0x1   :  { %18 = vsyncpa [#allocation8], 0  ;;  %s14540_s17 = smov 0   ;;  %s14542_s18 = smov 0  }
   0x2   :  { %s14544_s19 = smov 0  }
   0x3 LB: > { %s14556_s20 = sadd.s32 4294967295, %s14471_s19   ;;  %s14559_s21 = sadd.s32 1, %s14471_s19   ;;  %s14471_s19 = sphi %s14544_s19, %s19874_s19   ;;  %s14467_s18 = sphi %s14542_s18, %s19873_s18   ;;  %s14463_s17 = sphi %s14540_s17, %s19872_s17  }
   0x4   : > { %s133_s22 = ssub.s32 %s14471_s19, %s14559_s21  ;;  %s136_s23 = sadd.s32 1, %s14467_s18 }
   0x5   : > { %p134_p0 = scmp.eq.s32.totalorder %s133_s22, 0  ;;  %p143_p1 = scmp.ne.s32.totalorder %s14467_s18, %s14463_s17 }
   0x6   : > { %p144_p2 = scmp.eq.s32.totalorder %s14471_s19, 0  ;;  %p11263_p4 = scmp.ge.s32.totalorder %s14471_s19, 2 }
   0x7   : > { %s14568_s24 = scalar_select %p134_p0, %s14467_s18, %s136_s23  }
   0x8   : > { %p145_p3 = por %p144_p2, %p143_p1  ;;  %321 = sbr.rel (%p11263_p4) target bundleno = 419 (0x1a3), region = 44 }
   0xf   : > { %324 = sbr.rel (!%p145_p3) target bundleno = 419 (0x1a3), region = 48  ;;  %s326_s25 = sand.u32 (%p145_p3), 1, %s14467_s18  }
  0x10   : > { %s12171_s26 = sshll.u32 (%p145_p3), %s14471_s19, 4  ;;  %s13082_s27 = smul.u32 (%p145_p3), 6400, %s326_s25 }
  0x11   : > { %s14576_s30 = scalar_lea.vmem (%p145_p3), %s19766_s5, %s12171_s26 }
  0x12   : > { %v344_v0 = vld [vmem:[%s14576_s30] sm:$0xff] (%p145_p3)  ;;  %v346_v1 = vld [vmem:[%s14576_s30 + $0x8] sm:$0xff] (%p145_p3)  ;;  %s14584_s12 = scalar_lea.vmem (%p145_p3), [#allocation4], %s13082_s27 }
  0x13   : > { %v348_v2 = vld [vmem:[%s14576_s30 + $0x20] sm:$0xff] (%p145_p3)  ;;  %v350_v3 = vld [vmem:[%s14576_s30 + $0x28] sm:$0xff] (%p145_p3)  ;;  %345 = vst [vmem:[%s14584_s12] sm:$0xff] (%p145_p3), %v344_v0  ;;  %347 = vst [vmem:[%s14584_s12 + $0x8] sm:$0xff] (%p145_p3), %v346_v1 }
  0x14   : > { %v352_v4 = vld [vmem:[%s14576_s30 + $0x40] sm:$0xff] (%p145_p3)  ;;  %v354_v5 = vld [vmem:[%s14576_s30 + $0x48] sm:$0xff] (%p145_p3)  ;;  %349 = vst [vmem:[%s14584_s12 + $0x10] sm:$0xff] (%p145_p3), %v348_v2  ;;  %351 = vst [vmem:[%s14584_s12 + $0x18] sm:$0xff] (%p145_p3), %v350_v3 }
  0x15   : > { %353 = vst [vmem:[%s14584_s12 + $0x20] sm:$0xff] (%p145_p3), %v352_v4  ;;  %355 = vst [vmem:[%s14584_s12 + $0x28] sm:$0xff] (%p145_p3), %v354_v5  ;;  %v356_v6 = vld [vmem:[%s14576_s30 + $0x60] sm:$0xff] (%p145_p3)  ;;  %v358_v7 = vld [vmem:[%s14576_s30 + $0x68] sm:$0xff] (%p145_p3) }
  0x16   : > { %v360_v8 = vld [vmem:[%s14576_s30 + $0x80] sm:$0xff]  ;;  %357 = vst [vmem:[%s14584_s12 + $0x30] sm:$0xff] %v356_v6  ;;  %359 = vst [vmem:[%s14584_s12 + $0x38] sm:$0xff] %v358_v7  ;;  %v362_v9 = vld [vmem:[%s14576_s30 + $0x88] sm:$0xff] }
  0x17   : > { %361 = vst [vmem:[%s14584_s12 + $0x40] sm:$0xff] %v360_v8  ;;  %v364_v10 = vld [vmem:[%s14576_s30 + $0xa0] sm:$0xff]  ;;  %v366_v11 = vld [vmem:[%s14576_s30 + $0xa8] sm:$0xff]  ;;  %363 = vst [vmem:[%s14584_s12 + $0x48] sm:$0xff] %v362_v9 }
  0x18   : > { %365 = vst [vmem:[%s14584_s12 + $0x50] sm:$0xff] %v364_v10  ;;  %367 = vst [vmem:[%s14584_s12 + $0x58] sm:$0xff] %v366_v11  ;;  %v368_v12 = vld [vmem:[%s14576_s30 + $0xc0] sm:$0xff]  ;;  %v370_v13 = vld [vmem:[%s14576_s30 + $0xc8] sm:$0xff] }
  0x19   : > { %v372_v14 = vld [vmem:[%s14576_s30 + $0xe0] sm:$0xff]  ;;  %369 = vst [vmem:[%s14584_s12 + $0x60] sm:$0xff] %v368_v12  ;;  %371 = vst [vmem:[%s14584_s12 + $0x68] sm:$0xff] %v370_v13  ;;  %v374_v15 = vld [vmem:[%s14576_s30 + $0xe8] sm:$0xff] }
  0x1a   : > { %373 = vst [vmem:[%s14584_s12 + $0x70] sm:$0xff] %v372_v14  ;;  %v376_v16 = vld [vmem:[%s14576_s30 + $0x100] sm:$0xff]  ;;  %v378_v17 = vld [vmem:[%s14576_s30 + $0x108] sm:$0xff]  ;;  %375 = vst [vmem:[%s14584_s12 + $0x78] sm:$0xff] %v374_v15 }
  0x1b   : > { %377 = vst [vmem:[%s14584_s12 + $0x80] sm:$0xff] %v376_v16  ;;  %379 = vst [vmem:[%s14584_s12 + $0x88] sm:$0xff] %v378_v17  ;;  %v380_v18 = vld [vmem:[%s14576_s30 + $0x120] sm:$0xff]  ;;  %v382_v19 = vld [vmem:[%s14576_s30 + $0x128] sm:$0xff] }
  0x1c   : > { %v384_v20 = vld [vmem:[%s14576_s30 + $0x140] sm:$0xff]  ;;  %381 = vst [vmem:[%s14584_s12 + $0x90] sm:$0xff] %v380_v18  ;;  %383 = vst [vmem:[%s14584_s12 + $0x98] sm:$0xff] %v382_v19  ;;  %v386_v21 = vld [vmem:[%s14576_s30 + $0x148] sm:$0xff] }
  0x1d   : > { %385 = vst [vmem:[%s14584_s12 + $0xa0] sm:$0xff] %v384_v20  ;;  %v388_v22 = vld [vmem:[%s14576_s30 + $0x160] sm:$0xff]  ;;  %v390_v23 = vld [vmem:[%s14576_s30 + $0x168] sm:$0xff]  ;;  %387 = vst [vmem:[%s14584_s12 + $0xa8] sm:$0xff] %v386_v21 }
  0x1e   : > { %389 = vst [vmem:[%s14584_s12 + $0xb0] sm:$0xff] %v388_v22  ;;  %391 = vst [vmem:[%s14584_s12 + $0xb8] sm:$0xff] %v390_v23  ;;  %v392_v24 = vld [vmem:[%s14576_s30 + $0x180] sm:$0xff]  ;;  %v394_v25 = vld [vmem:[%s14576_s30 + $0x188] sm:$0xff] }
  0x1f   : > { %v396_v26 = vld [vmem:[%s14576_s30 + $0x1a0] sm:$0xff]  ;;  %393 = vst [vmem:[%s14584_s12 + $0xc0] sm:$0xff] %v392_v24  ;;  %395 = vst [vmem:[%s14584_s12 + $0xc8] sm:$0xff] %v394_v25  ;;  %v398_v27 = vld [vmem:[%s14576_s30 + $0x1a8] sm:$0xff] }
  0x20   : > { %397 = vst [vmem:[%s14584_s12 + $0xd0] sm:$0xff] %v396_v26  ;;  %v400_v28 = vld [vmem:[%s14576_s30 + $0x1c0] sm:$0xff]  ;;  %v402_v29 = vld [vmem:[%s14576_s30 + $0x1c8] sm:$0xff]  ;;  %399 = vst [vmem:[%s14584_s12 + $0xd8] sm:$0xff] %v398_v27 }
  0x21   : > { %401 = vst [vmem:[%s14584_s12 + $0xe0] sm:$0xff] %v400_v28  ;;  %403 = vst [vmem:[%s14584_s12 + $0xe8] sm:$0xff] %v402_v29  ;;  %v404_v30 = vld [vmem:[%s14576_s30 + $0x1e0] sm:$0xff]  ;;  %v406_v31 = vld [vmem:[%s14576_s30 + $0x1e8] sm:$0xff] }
  0x22   : > { %v408_v32 = vld [vmem:[%s14576_s30 + $0x200] sm:$0xff]  ;;  %405 = vst [vmem:[%s14584_s12 + $0xf0] sm:$0xff] %v404_v30  ;;  %407 = vst [vmem:[%s14584_s12 + $0xf8] sm:$0xff] %v406_v31  ;;  %v410_v33 = vld [vmem:[%s14576_s30 + $0x208] sm:$0xff] }
  0x23   : > { %409 = vst [vmem:[%s14584_s12 + $0x100] sm:$0xff] %v408_v32  ;;  %v412_v34 = vld [vmem:[%s14576_s30 + $0x220] sm:$0xff]  ;;  %v414_v35 = vld [vmem:[%s14576_s30 + $0x228] sm:$0xff]  ;;  %411 = vst [vmem:[%s14584_s12 + $0x108] sm:$0xff] %v410_v33 }
  0x24   : > { %413 = vst [vmem:[%s14584_s12 + $0x110] sm:$0xff] %v412_v34  ;;  %415 = vst [vmem:[%s14584_s12 + $0x118] sm:$0xff] %v414_v35  ;;  %v416_v36 = vld [vmem:[%s14576_s30 + $0x240] sm:$0xff]  ;;  %v418_v37 = vld [vmem:[%s14576_s30 + $0x248] sm:$0xff] }
  0x25   : > { %v420_v38 = vld [vmem:[%s14576_s30 + $0x260] sm:$0xff]  ;;  %417 = vst [vmem:[%s14584_s12 + $0x120] sm:$0xff] %v416_v36  ;;  %419 = vst [vmem:[%s14584_s12 + $0x128] sm:$0xff] %v418_v37  ;;  %v422_v39 = vld [vmem:[%s14576_s30 + $0x268] sm:$0xff] }
  0x26   : > { %421 = vst [vmem:[%s14584_s12 + $0x130] sm:$0xff] %v420_v38  ;;  %v424_v40 = vld [vmem:[%s14576_s30 + $0x280] sm:$0xff]  ;;  %v426_v41 = vld [vmem:[%s14576_s30 + $0x288] sm:$0xff]  ;;  %423 = vst [vmem:[%s14584_s12 + $0x138] sm:$0xff] %v422_v39 }
  0x27   : > { %425 = vst [vmem:[%s14584_s12 + $0x140] sm:$0xff] %v424_v40  ;;  %427 = vst [vmem:[%s14584_s12 + $0x148] sm:$0xff] %v426_v41  ;;  %v428_v42 = vld [vmem:[%s14576_s30 + $0x2a0] sm:$0xff]  ;;  %v430_v43 = vld [vmem:[%s14576_s30 + $0x2a8] sm:$0xff] }
  0x28   : > { %v432_v44 = vld [vmem:[%s14576_s30 + $0x2c0] sm:$0xff]  ;;  %429 = vst [vmem:[%s14584_s12 + $0x150] sm:$0xff] %v428_v42  ;;  %431 = vst [vmem:[%s14584_s12 + $0x158] sm:$0xff] %v430_v43  ;;  %v434_v45 = vld [vmem:[%s14576_s30 + $0x2c8] sm:$0xff] }
  0x29   : > { %433 = vst [vmem:[%s14584_s12 + $0x160] sm:$0xff] %v432_v44  ;;  %v436_v46 = vld [vmem:[%s14576_s30 + $0x2e0] sm:$0xff]  ;;  %v438_v47 = vld [vmem:[%s14576_s30 + $0x2e8] sm:$0xff]  ;;  %435 = vst [vmem:[%s14584_s12 + $0x168] sm:$0xff] %v434_v45 }
  0x2a   : > { %437 = vst [vmem:[%s14584_s12 + $0x170] sm:$0xff] %v436_v46  ;;  %439 = vst [vmem:[%s14584_s12 + $0x178] sm:$0xff] %v438_v47  ;;  %v440_v48 = vld [vmem:[%s14576_s30 + $0x300] sm:$0xff]  ;;  %v442_v49 = vld [vmem:[%s14576_s30 + $0x308] sm:$0xff] }
  0x2b   : > { %v444_v50 = vld [vmem:[%s14576_s30 + $0x320] sm:$0xff]  ;;  %441 = vst [vmem:[%s14584_s12 + $0x180] sm:$0xff] %v440_v48  ;;  %443 = vst [vmem:[%s14584_s12 + $0x188] sm:$0xff] %v442_v49  ;;  %v446_v51 = vld [vmem:[%s14576_s30 + $0x328] sm:$0xff] }
  0x2c   : > { %445 = vst [vmem:[%s14584_s12 + $0x190] sm:$0xff] %v444_v50  ;;  %v448_v52 = vld [vmem:[%s14576_s30 + $0x340] sm:$0xff]  ;;  %v450_v53 = vld [vmem:[%s14576_s30 + $0x348] sm:$0xff]  ;;  %447 = vst [vmem:[%s14584_s12 + $0x198] sm:$0xff] %v446_v51 }
  0x2d   : > { %449 = vst [vmem:[%s14584_s12 + $0x1a0] sm:$0xff] %v448_v52  ;;  %451 = vst [vmem:[%s14584_s12 + $0x1a8] sm:$0xff] %v450_v53  ;;  %v452_v54 = vld [vmem:[%s14576_s30 + $0x360] sm:$0xff]  ;;  %v454_v55 = vld [vmem:[%s14576_s30 + $0x368] sm:$0xff] }
  0x2e   : > { %v456_v56 = vld [vmem:[%s14576_s30 + $0x380] sm:$0xff]  ;;  %453 = vst [vmem:[%s14584_s12 + $0x1b0] sm:$0xff] %v452_v54  ;;  %455 = vst [vmem:[%s14584_s12 + $0x1b8] sm:$0xff] %v454_v55  ;;  %v458_v57 = vld [vmem:[%s14576_s30 + $0x388] sm:$0xff] }
  0x2f   : > { %457 = vst [vmem:[%s14584_s12 + $0x1c0] sm:$0xff] %v456_v56  ;;  %v460_v58 = vld [vmem:[%s14576_s30 + $0x3a0] sm:$0xff]  ;;  %v462_v59 = vld [vmem:[%s14576_s30 + $0x3a8] sm:$0xff]  ;;  %459 = vst [vmem:[%s14584_s12 + $0x1c8] sm:$0xff] %v458_v57 }
  0x30   : > { %461 = vst [vmem:[%s14584_s12 + $0x1d0] sm:$0xff] %v460_v58  ;;  %463 = vst [vmem:[%s14584_s12 + $0x1d8] sm:$0xff] %v462_v59  ;;  %v464_v60 = vld [vmem:[%s14576_s30 + $0x3c0] sm:$0xff]  ;;  %v466_v61 = vld [vmem:[%s14576_s30 + $0x3c8] sm:$0xff] }
  0x31   : > { %v468_v62 = vld [vmem:[%s14576_s30 + $0x3e0] sm:$0xff]  ;;  %465 = vst [vmem:[%s14584_s12 + $0x1e0] sm:$0xff] %v464_v60  ;;  %467 = vst [vmem:[%s14584_s12 + $0x1e8] sm:$0xff] %v466_v61  ;;  %v470_v63 = vld [vmem:[%s14576_s30 + $0x3e8] sm:$0xff] }
  0x32   : > { %469 = vst [vmem:[%s14584_s12 + $0x1f0] sm:$0xff] %v468_v62  ;;  %v472_v0 = vld [vmem:[%s14576_s30 + $0x400] sm:$0xff]  ;;  %v474_v1 = vld [vmem:[%s14576_s30 + $0x408] sm:$0xff]  ;;  %471 = vst [vmem:[%s14584_s12 + $0x1f8] sm:$0xff] %v470_v63 }
  0x33   : > { %473 = vst [vmem:[%s14584_s12 + $0x200] sm:$0xff] %v472_v0  ;;  %475 = vst [vmem:[%s14584_s12 + $0x208] sm:$0xff] %v474_v1  ;;  %v476_v2 = vld [vmem:[%s14576_s30 + $0x420] sm:$0xff]  ;;  %v478_v3 = vld [vmem:[%s14576_s30 + $0x428] sm:$0xff] }
  0x34   : > { %v480_v4 = vld [vmem:[%s14576_s30 + $0x440] sm:$0xff]  ;;  %477 = vst [vmem:[%s14584_s12 + $0x210] sm:$0xff] %v476_v2  ;;  %479 = vst [vmem:[%s14584_s12 + $0x218] sm:$0xff] %v478_v3  ;;  %v482_v5 = vld [vmem:[%s14576_s30 + $0x448] sm:$0xff] }
  0x35   : > { %481 = vst [vmem:[%s14584_s12 + $0x220] sm:$0xff] %v480_v4  ;;  %v484_v6 = vld [vmem:[%s14576_s30 + $0x460] sm:$0xff]  ;;  %v486_v7 = vld [vmem:[%s14576_s30 + $0x468] sm:$0xff]  ;;  %483 = vst [vmem:[%s14584_s12 + $0x228] sm:$0xff] %v482_v5 }
  0x36   : > { %485 = vst [vmem:[%s14584_s12 + $0x230] sm:$0xff] %v484_v6  ;;  %487 = vst [vmem:[%s14584_s12 + $0x238] sm:$0xff] %v486_v7  ;;  %v488_v8 = vld [vmem:[%s14576_s30 + $0x480] sm:$0xff]  ;;  %v490_v9 = vld [vmem:[%s14576_s30 + $0x488] sm:$0xff] }
  0x37   : > { %v492_v10 = vld [vmem:[%s14576_s30 + $0x4a0] sm:$0xff]  ;;  %489 = vst [vmem:[%s14584_s12 + $0x240] sm:$0xff] %v488_v8  ;;  %491 = vst [vmem:[%s14584_s12 + $0x248] sm:$0xff] %v490_v9  ;;  %v494_v11 = vld [vmem:[%s14576_s30 + $0x4a8] sm:$0xff] }
  0x38   : > { %493 = vst [vmem:[%s14584_s12 + $0x250] sm:$0xff] %v492_v10  ;;  %v496_v12 = vld [vmem:[%s14576_s30 + $0x4c0] sm:$0xff]  ;;  %v498_v13 = vld [vmem:[%s14576_s30 + $0x4c8] sm:$0xff]  ;;  %495 = vst [vmem:[%s14584_s12 + $0x258] sm:$0xff] %v494_v11 }
  0x39   : > { %497 = vst [vmem:[%s14584_s12 + $0x260] sm:$0xff] %v496_v12  ;;  %499 = vst [vmem:[%s14584_s12 + $0x268] sm:$0xff] %v498_v13  ;;  %v500_v14 = vld [vmem:[%s14576_s30 + $0x4e0] sm:$0xff]  ;;  %v502_v15 = vld [vmem:[%s14576_s30 + $0x4e8] sm:$0xff] }
  0x3a   : > { %v504_v16 = vld [vmem:[%s14576_s30 + $0x500] sm:$0xff]  ;;  %501 = vst [vmem:[%s14584_s12 + $0x270] sm:$0xff] %v500_v14  ;;  %503 = vst [vmem:[%s14584_s12 + $0x278] sm:$0xff] %v502_v15  ;;  %v506_v17 = vld [vmem:[%s14576_s30 + $0x508] sm:$0xff] }
  0x3b   : > { %505 = vst [vmem:[%s14584_s12 + $0x280] sm:$0xff] %v504_v16  ;;  %v508_v18 = vld [vmem:[%s14576_s30 + $0x520] sm:$0xff]  ;;  %v510_v19 = vld [vmem:[%s14576_s30 + $0x528] sm:$0xff]  ;;  %507 = vst [vmem:[%s14584_s12 + $0x288] sm:$0xff] %v506_v17 }
  0x3c   : > { %509 = vst [vmem:[%s14584_s12 + $0x290] sm:$0xff] %v508_v18  ;;  %511 = vst [vmem:[%s14584_s12 + $0x298] sm:$0xff] %v510_v19  ;;  %v512_v20 = vld [vmem:[%s14576_s30 + $0x540] sm:$0xff]  ;;  %v514_v21 = vld [vmem:[%s14576_s30 + $0x548] sm:$0xff] }
  0x3d   : > { %v516_v22 = vld [vmem:[%s14576_s30 + $0x560] sm:$0xff]  ;;  %513 = vst [vmem:[%s14584_s12 + $0x2a0] sm:$0xff] %v512_v20  ;;  %515 = vst [vmem:[%s14584_s12 + $0x2a8] sm:$0xff] %v514_v21  ;;  %v518_v23 = vld [vmem:[%s14576_s30 + $0x568] sm:$0xff] }
  0x3e   : > { %517 = vst [vmem:[%s14584_s12 + $0x2b0] sm:$0xff] %v516_v22  ;;  %v520_v24 = vld [vmem:[%s14576_s30 + $0x580] sm:$0xff]  ;;  %v522_v25 = vld [vmem:[%s14576_s30 + $0x588] sm:$0xff]  ;;  %519 = vst [vmem:[%s14584_s12 + $0x2b8] sm:$0xff] %v518_v23 }
  0x3f   : > { %521 = vst [vmem:[%s14584_s12 + $0x2c0] sm:$0xff] %v520_v24  ;;  %523 = vst [vmem:[%s14584_s12 + $0x2c8] sm:$0xff] %v522_v25  ;;  %v524_v26 = vld [vmem:[%s14576_s30 + $0x5a0] sm:$0xff]  ;;  %v526_v27 = vld [vmem:[%s14576_s30 + $0x5a8] sm:$0xff] }
  0x40   : > { %v528_v28 = vld [vmem:[%s14576_s30 + $0x5c0] sm:$0xff]  ;;  %525 = vst [vmem:[%s14584_s12 + $0x2d0] sm:$0xff] %v524_v26  ;;  %527 = vst [vmem:[%s14584_s12 + $0x2d8] sm:$0xff] %v526_v27  ;;  %v530_v29 = vld [vmem:[%s14576_s30 + $0x5c8] sm:$0xff] }
  0x41   : > { %529 = vst [vmem:[%s14584_s12 + $0x2e0] sm:$0xff] %v528_v28  ;;  %v532_v30 = vld [vmem:[%s14576_s30 + $0x5e0] sm:$0xff]  ;;  %v534_v31 = vld [vmem:[%s14576_s30 + $0x5e8] sm:$0xff]  ;;  %531 = vst [vmem:[%s14584_s12 + $0x2e8] sm:$0xff] %v530_v29 }
  0x42   : > { %533 = vst [vmem:[%s14584_s12 + $0x2f0] sm:$0xff] %v532_v30  ;;  %535 = vst [vmem:[%s14584_s12 + $0x2f8] sm:$0xff] %v534_v31  ;;  %v536_v32 = vld [vmem:[%s14576_s30 + $0x600] sm:$0xff]  ;;  %v538_v33 = vld [vmem:[%s14576_s30 + $0x608] sm:$0xff] }
  0x43   : > { %v540_v34 = vld [vmem:[%s14576_s30 + $0x620] sm:$0xff]  ;;  %537 = vst [vmem:[%s14584_s12 + $0x300] sm:$0xff] %v536_v32  ;;  %539 = vst [vmem:[%s14584_s12 + $0x308] sm:$0xff] %v538_v33  ;;  %v542_v35 = vld [vmem:[%s14576_s30 + $0x628] sm:$0xff] }
  0x44   : > { %541 = vst [vmem:[%s14584_s12 + $0x310] sm:$0xff] %v540_v34  ;;  %v544_v36 = vld [vmem:[%s14576_s30 + $0x640] sm:$0xff]  ;;  %v546_v37 = vld [vmem:[%s14576_s30 + $0x648] sm:$0xff]  ;;  %543 = vst [vmem:[%s14584_s12 + $0x318] sm:$0xff] %v542_v35 }
  0x45   : > { %545 = vst [vmem:[%s14584_s12 + $0x320] sm:$0xff] %v544_v36  ;;  %547 = vst [vmem:[%s14584_s12 + $0x328] sm:$0xff] %v546_v37  ;;  %v548_v38 = vld [vmem:[%s14576_s30 + $0x660] sm:$0xff]  ;;  %v550_v39 = vld [vmem:[%s14576_s30 + $0x668] sm:$0xff] }
  0x46   : > { %v552_v40 = vld [vmem:[%s14576_s30 + $0x680] sm:$0xff]  ;;  %549 = vst [vmem:[%s14584_s12 + $0x330] sm:$0xff] %v548_v38  ;;  %551 = vst [vmem:[%s14584_s12 + $0x338] sm:$0xff] %v550_v39  ;;  %v554_v41 = vld [vmem:[%s14576_s30 + $0x688] sm:$0xff] }
  0x47   : > { %553 = vst [vmem:[%s14584_s12 + $0x340] sm:$0xff] %v552_v40  ;;  %v556_v42 = vld [vmem:[%s14576_s30 + $0x6a0] sm:$0xff]  ;;  %v558_v43 = vld [vmem:[%s14576_s30 + $0x6a8] sm:$0xff]  ;;  %555 = vst [vmem:[%s14584_s12 + $0x348] sm:$0xff] %v554_v41 }
  0x48   : > { %557 = vst [vmem:[%s14584_s12 + $0x350] sm:$0xff] %v556_v42  ;;  %559 = vst [vmem:[%s14584_s12 + $0x358] sm:$0xff] %v558_v43  ;;  %v560_v44 = vld [vmem:[%s14576_s30 + $0x6c0] sm:$0xff]  ;;  %v562_v45 = vld [vmem:[%s14576_s30 + $0x6c8] sm:$0xff] }
  0x49   : > { %v564_v46 = vld [vmem:[%s14576_s30 + $0x6e0] sm:$0xff]  ;;  %561 = vst [vmem:[%s14584_s12 + $0x360] sm:$0xff] %v560_v44  ;;  %563 = vst [vmem:[%s14584_s12 + $0x368] sm:$0xff] %v562_v45  ;;  %v566_v47 = vld [vmem:[%s14576_s30 + $0x6e8] sm:$0xff] }
  0x4a   : > { %565 = vst [vmem:[%s14584_s12 + $0x370] sm:$0xff] %v564_v46  ;;  %v568_v48 = vld [vmem:[%s14576_s30 + $0x700] sm:$0xff]  ;;  %v570_v49 = vld [vmem:[%s14576_s30 + $0x708] sm:$0xff]  ;;  %567 = vst [vmem:[%s14584_s12 + $0x378] sm:$0xff] %v566_v47 }
  0x4b   : > { %569 = vst [vmem:[%s14584_s12 + $0x380] sm:$0xff] %v568_v48  ;;  %571 = vst [vmem:[%s14584_s12 + $0x388] sm:$0xff] %v570_v49  ;;  %v572_v50 = vld [vmem:[%s14576_s30 + $0x720] sm:$0xff]  ;;  %v574_v51 = vld [vmem:[%s14576_s30 + $0x728] sm:$0xff] }
  0x4c   : > { %v576_v52 = vld [vmem:[%s14576_s30 + $0x740] sm:$0xff]  ;;  %573 = vst [vmem:[%s14584_s12 + $0x390] sm:$0xff] %v572_v50  ;;  %575 = vst [vmem:[%s14584_s12 + $0x398] sm:$0xff] %v574_v51  ;;  %v578_v53 = vld [vmem:[%s14576_s30 + $0x748] sm:$0xff] }
  0x4d   : > { %577 = vst [vmem:[%s14584_s12 + $0x3a0] sm:$0xff] %v576_v52  ;;  %v580_v54 = vld [vmem:[%s14576_s30 + $0x760] sm:$0xff]  ;;  %v582_v55 = vld [vmem:[%s14576_s30 + $0x768] sm:$0xff]  ;;  %579 = vst [vmem:[%s14584_s12 + $0x3a8] sm:$0xff] %v578_v53 }
  0x4e   : > { %581 = vst [vmem:[%s14584_s12 + $0x3b0] sm:$0xff] %v580_v54  ;;  %583 = vst [vmem:[%s14584_s12 + $0x3b8] sm:$0xff] %v582_v55  ;;  %v584_v56 = vld [vmem:[%s14576_s30 + $0x780] sm:$0xff]  ;;  %v586_v57 = vld [vmem:[%s14576_s30 + $0x788] sm:$0xff] }
  0x4f   : > { %v588_v58 = vld [vmem:[%s14576_s30 + $0x7a0] sm:$0xff]  ;;  %585 = vst [vmem:[%s14584_s12 + $0x3c0] sm:$0xff] %v584_v56  ;;  %587 = vst [vmem:[%s14584_s12 + $0x3c8] sm:$0xff] %v586_v57  ;;  %v590_v59 = vld [vmem:[%s14576_s30 + $0x7a8] sm:$0xff] }
  0x50   : > { %589 = vst [vmem:[%s14584_s12 + $0x3d0] sm:$0xff] %v588_v58  ;;  %v592_v60 = vld [vmem:[%s14576_s30 + $0x7c0] sm:$0xff]  ;;  %v594_v61 = vld [vmem:[%s14576_s30 + $0x7c8] sm:$0xff]  ;;  %591 = vst [vmem:[%s14584_s12 + $0x3d8] sm:$0xff] %v590_v59 }
  0x51   : > { %593 = vst [vmem:[%s14584_s12 + $0x3e0] sm:$0xff] %v592_v60  ;;  %595 = vst [vmem:[%s14584_s12 + $0x3e8] sm:$0xff] %v594_v61  ;;  %v596_v62 = vld [vmem:[%s14576_s30 + $0x7e0] sm:$0xff]  ;;  %v598_v63 = vld [vmem:[%s14576_s30 + $0x7e8] sm:$0xff] }
  0x52   : > { %v600_v0 = vld [vmem:[%s14576_s30 + $0x800] sm:$0xff]  ;;  %597 = vst [vmem:[%s14584_s12 + $0x3f0] sm:$0xff] %v596_v62  ;;  %599 = vst [vmem:[%s14584_s12 + $0x3f8] sm:$0xff] %v598_v63  ;;  %v602_v1 = vld [vmem:[%s14576_s30 + $0x808] sm:$0xff] }
  0x53   : > { %601 = vst [vmem:[%s14584_s12 + $0x400] sm:$0xff] %v600_v0  ;;  %v604_v2 = vld [vmem:[%s14576_s30 + $0x820] sm:$0xff]  ;;  %v606_v3 = vld [vmem:[%s14576_s30 + $0x828] sm:$0xff]  ;;  %603 = vst [vmem:[%s14584_s12 + $0x408] sm:$0xff] %v602_v1 }
  0x54   : > { %605 = vst [vmem:[%s14584_s12 + $0x410] sm:$0xff] %v604_v2  ;;  %607 = vst [vmem:[%s14584_s12 + $0x418] sm:$0xff] %v606_v3  ;;  %v608_v4 = vld [vmem:[%s14576_s30 + $0x840] sm:$0xff]  ;;  %v610_v5 = vld [vmem:[%s14576_s30 + $0x848] sm:$0xff] }
  0x55   : > { %v612_v6 = vld [vmem:[%s14576_s30 + $0x860] sm:$0xff]  ;;  %609 = vst [vmem:[%s14584_s12 + $0x420] sm:$0xff] %v608_v4  ;;  %611 = vst [vmem:[%s14584_s12 + $0x428] sm:$0xff] %v610_v5  ;;  %v614_v7 = vld [vmem:[%s14576_s30 + $0x868] sm:$0xff] }
  0x56   : > { %613 = vst [vmem:[%s14584_s12 + $0x430] sm:$0xff] %v612_v6  ;;  %v616_v8 = vld [vmem:[%s14576_s30 + $0x880] sm:$0xff]  ;;  %v618_v9 = vld [vmem:[%s14576_s30 + $0x888] sm:$0xff]  ;;  %615 = vst [vmem:[%s14584_s12 + $0x438] sm:$0xff] %v614_v7 }
  0x57   : > { %617 = vst [vmem:[%s14584_s12 + $0x440] sm:$0xff] %v616_v8  ;;  %619 = vst [vmem:[%s14584_s12 + $0x448] sm:$0xff] %v618_v9  ;;  %v620_v10 = vld [vmem:[%s14576_s30 + $0x8a0] sm:$0xff]  ;;  %v622_v11 = vld [vmem:[%s14576_s30 + $0x8a8] sm:$0xff] }
  0x58   : > { %v624_v12 = vld [vmem:[%s14576_s30 + $0x8c0] sm:$0xff]  ;;  %621 = vst [vmem:[%s14584_s12 + $0x450] sm:$0xff] %v620_v10  ;;  %623 = vst [vmem:[%s14584_s12 + $0x458] sm:$0xff] %v622_v11  ;;  %v626_v13 = vld [vmem:[%s14576_s30 + $0x8c8] sm:$0xff] }
  0x59   : > { %625 = vst [vmem:[%s14584_s12 + $0x460] sm:$0xff] %v624_v12  ;;  %v628_v14 = vld [vmem:[%s14576_s30 + $0x8e0] sm:$0xff]  ;;  %v630_v15 = vld [vmem:[%s14576_s30 + $0x8e8] sm:$0xff]  ;;  %627 = vst [vmem:[%s14584_s12 + $0x468] sm:$0xff] %v626_v13 }
  0x5a   : > { %629 = vst [vmem:[%s14584_s12 + $0x470] sm:$0xff] %v628_v14  ;;  %631 = vst [vmem:[%s14584_s12 + $0x478] sm:$0xff] %v630_v15  ;;  %v632_v16 = vld [vmem:[%s14576_s30 + $0x900] sm:$0xff]  ;;  %v634_v17 = vld [vmem:[%s14576_s30 + $0x908] sm:$0xff] }
  0x5b   : > { %v636_v18 = vld [vmem:[%s14576_s30 + $0x920] sm:$0xff]  ;;  %633 = vst [vmem:[%s14584_s12 + $0x480] sm:$0xff] %v632_v16  ;;  %635 = vst [vmem:[%s14584_s12 + $0x488] sm:$0xff] %v634_v17  ;;  %v638_v19 = vld [vmem:[%s14576_s30 + $0x928] sm:$0xff] }
  0x5c   : > { %637 = vst [vmem:[%s14584_s12 + $0x490] sm:$0xff] %v636_v18  ;;  %v640_v20 = vld [vmem:[%s14576_s30 + $0x940] sm:$0xff]  ;;  %v642_v21 = vld [vmem:[%s14576_s30 + $0x948] sm:$0xff]  ;;  %639 = vst [vmem:[%s14584_s12 + $0x498] sm:$0xff] %v638_v19 }
  0x5d   : > { %641 = vst [vmem:[%s14584_s12 + $0x4a0] sm:$0xff] %v640_v20  ;;  %643 = vst [vmem:[%s14584_s12 + $0x4a8] sm:$0xff] %v642_v21  ;;  %v644_v22 = vld [vmem:[%s14576_s30 + $0x960] sm:$0xff]  ;;  %v646_v23 = vld [vmem:[%s14576_s30 + $0x968] sm:$0xff] }
  0x5e   : > { %v648_v24 = vld [vmem:[%s14576_s30 + $0x980] sm:$0xff]  ;;  %645 = vst [vmem:[%s14584_s12 + $0x4b0] sm:$0xff] %v644_v22  ;;  %647 = vst [vmem:[%s14584_s12 + $0x4b8] sm:$0xff] %v646_v23  ;;  %v650_v25 = vld [vmem:[%s14576_s30 + $0x988] sm:$0xff] }
  0x5f   : > { %649 = vst [vmem:[%s14584_s12 + $0x4c0] sm:$0xff] %v648_v24  ;;  %v652_v26 = vld [vmem:[%s14576_s30 + $0x9a0] sm:$0xff]  ;;  %v654_v27 = vld [vmem:[%s14576_s30 + $0x9a8] sm:$0xff]  ;;  %651 = vst [vmem:[%s14584_s12 + $0x4c8] sm:$0xff] %v650_v25 }
  0x60   : > { %653 = vst [vmem:[%s14584_s12 + $0x4d0] sm:$0xff] %v652_v26  ;;  %655 = vst [vmem:[%s14584_s12 + $0x4d8] sm:$0xff] %v654_v27  ;;  %v656_v28 = vld [vmem:[%s14576_s30 + $0x9c0] sm:$0xff]  ;;  %v658_v29 = vld [vmem:[%s14576_s30 + $0x9c8] sm:$0xff] }
  0x61   : > { %v660_v30 = vld [vmem:[%s14576_s30 + $0x9e0] sm:$0xff]  ;;  %657 = vst [vmem:[%s14584_s12 + $0x4e0] sm:$0xff] %v656_v28  ;;  %659 = vst [vmem:[%s14584_s12 + $0x4e8] sm:$0xff] %v658_v29  ;;  %v662_v31 = vld [vmem:[%s14576_s30 + $0x9e8] sm:$0xff] }
  0x62   : > { %661 = vst [vmem:[%s14584_s12 + $0x4f0] sm:$0xff] %v660_v30  ;;  %v664_v32 = vld [vmem:[%s14576_s30 + $0xa00] sm:$0xff]  ;;  %v666_v33 = vld [vmem:[%s14576_s30 + $0xa08] sm:$0xff]  ;;  %663 = vst [vmem:[%s14584_s12 + $0x4f8] sm:$0xff] %v662_v31 }
  0x63   : > { %665 = vst [vmem:[%s14584_s12 + $0x500] sm:$0xff] %v664_v32  ;;  %667 = vst [vmem:[%s14584_s12 + $0x508] sm:$0xff] %v666_v33  ;;  %v668_v34 = vld [vmem:[%s14576_s30 + $0xa20] sm:$0xff]  ;;  %v670_v35 = vld [vmem:[%s14576_s30 + $0xa28] sm:$0xff] }
  0x64   : > { %v672_v36 = vld [vmem:[%s14576_s30 + $0xa40] sm:$0xff]  ;;  %669 = vst [vmem:[%s14584_s12 + $0x510] sm:$0xff] %v668_v34  ;;  %671 = vst [vmem:[%s14584_s12 + $0x518] sm:$0xff] %v670_v35  ;;  %v674_v37 = vld [vmem:[%s14576_s30 + $0xa48] sm:$0xff] }
  0x65   : > { %673 = vst [vmem:[%s14584_s12 + $0x520] sm:$0xff] %v672_v36  ;;  %v676_v38 = vld [vmem:[%s14576_s30 + $0xa60] sm:$0xff]  ;;  %v678_v39 = vld [vmem:[%s14576_s30 + $0xa68] sm:$0xff]  ;;  %675 = vst [vmem:[%s14584_s12 + $0x528] sm:$0xff] %v674_v37 }
  0x66   : > { %677 = vst [vmem:[%s14584_s12 + $0x530] sm:$0xff] %v676_v38  ;;  %679 = vst [vmem:[%s14584_s12 + $0x538] sm:$0xff] %v678_v39  ;;  %v680_v40 = vld [vmem:[%s14576_s30 + $0xa80] sm:$0xff]  ;;  %v682_v41 = vld [vmem:[%s14576_s30 + $0xa88] sm:$0xff] }
  0x67   : > { %v684_v42 = vld [vmem:[%s14576_s30 + $0xaa0] sm:$0xff]  ;;  %681 = vst [vmem:[%s14584_s12 + $0x540] sm:$0xff] %v680_v40  ;;  %683 = vst [vmem:[%s14584_s12 + $0x548] sm:$0xff] %v682_v41  ;;  %v686_v43 = vld [vmem:[%s14576_s30 + $0xaa8] sm:$0xff] }
  0x68   : > { %685 = vst [vmem:[%s14584_s12 + $0x550] sm:$0xff] %v684_v42  ;;  %v688_v44 = vld [vmem:[%s14576_s30 + $0xac0] sm:$0xff]  ;;  %v690_v45 = vld [vmem:[%s14576_s30 + $0xac8] sm:$0xff]  ;;  %687 = vst [vmem:[%s14584_s12 + $0x558] sm:$0xff] %v686_v43 }
  0x69   : > { %689 = vst [vmem:[%s14584_s12 + $0x560] sm:$0xff] %v688_v44  ;;  %691 = vst [vmem:[%s14584_s12 + $0x568] sm:$0xff] %v690_v45  ;;  %v692_v46 = vld [vmem:[%s14576_s30 + $0xae0] sm:$0xff]  ;;  %v694_v47 = vld [vmem:[%s14576_s30 + $0xae8] sm:$0xff] }
  0x6a   : > { %v696_v48 = vld [vmem:[%s14576_s30 + $0xb00] sm:$0xff]  ;;  %693 = vst [vmem:[%s14584_s12 + $0x570] sm:$0xff] %v692_v46  ;;  %695 = vst [vmem:[%s14584_s12 + $0x578] sm:$0xff] %v694_v47  ;;  %v698_v49 = vld [vmem:[%s14576_s30 + $0xb08] sm:$0xff] }
  0x6b   : > { %697 = vst [vmem:[%s14584_s12 + $0x580] sm:$0xff] %v696_v48  ;;  %v700_v50 = vld [vmem:[%s14576_s30 + $0xb20] sm:$0xff]  ;;  %v702_v51 = vld [vmem:[%s14576_s30 + $0xb28] sm:$0xff]  ;;  %699 = vst [vmem:[%s14584_s12 + $0x588] sm:$0xff] %v698_v49 }
  0x6c   : > { %701 = vst [vmem:[%s14584_s12 + $0x590] sm:$0xff] %v700_v50  ;;  %703 = vst [vmem:[%s14584_s12 + $0x598] sm:$0xff] %v702_v51  ;;  %v704_v52 = vld [vmem:[%s14576_s30 + $0xb40] sm:$0xff]  ;;  %v706_v53 = vld [vmem:[%s14576_s30 + $0xb48] sm:$0xff] }
  0x6d   : > { %v708_v54 = vld [vmem:[%s14576_s30 + $0xb60] sm:$0xff]  ;;  %705 = vst [vmem:[%s14584_s12 + $0x5a0] sm:$0xff] %v704_v52  ;;  %707 = vst [vmem:[%s14584_s12 + $0x5a8] sm:$0xff] %v706_v53  ;;  %v710_v55 = vld [vmem:[%s14576_s30 + $0xb68] sm:$0xff] }
  0x6e   : > { %709 = vst [vmem:[%s14584_s12 + $0x5b0] sm:$0xff] %v708_v54  ;;  %v712_v56 = vld [vmem:[%s14576_s30 + $0xb80] sm:$0xff]  ;;  %v714_v57 = vld [vmem:[%s14576_s30 + $0xb88] sm:$0xff]  ;;  %711 = vst [vmem:[%s14584_s12 + $0x5b8] sm:$0xff] %v710_v55 }
  0x6f   : > { %713 = vst [vmem:[%s14584_s12 + $0x5c0] sm:$0xff] %v712_v56  ;;  %715 = vst [vmem:[%s14584_s12 + $0x5c8] sm:$0xff] %v714_v57  ;;  %v716_v58 = vld [vmem:[%s14576_s30 + $0xba0] sm:$0xff]  ;;  %v718_v59 = vld [vmem:[%s14576_s30 + $0xba8] sm:$0xff] }
  0x70   : > { %v720_v60 = vld [vmem:[%s14576_s30 + $0xbc0] sm:$0xff]  ;;  %717 = vst [vmem:[%s14584_s12 + $0x5d0] sm:$0xff] %v716_v58  ;;  %719 = vst [vmem:[%s14584_s12 + $0x5d8] sm:$0xff] %v718_v59  ;;  %v722_v61 = vld [vmem:[%s14576_s30 + $0xbc8] sm:$0xff] }
  0x71   : > { %721 = vst [vmem:[%s14584_s12 + $0x5e0] sm:$0xff] %v720_v60  ;;  %v724_v62 = vld [vmem:[%s14576_s30 + $0xbe0] sm:$0xff]  ;;  %v726_v63 = vld [vmem:[%s14576_s30 + $0xbe8] sm:$0xff]  ;;  %723 = vst [vmem:[%s14584_s12 + $0x5e8] sm:$0xff] %v722_v61 }
  0x72   : > { %725 = vst [vmem:[%s14584_s12 + $0x5f0] sm:$0xff] %v724_v62  ;;  %727 = vst [vmem:[%s14584_s12 + $0x5f8] sm:$0xff] %v726_v63  ;;  %v728_v0 = vld [vmem:[%s14576_s30 + $0xc00] sm:$0xff]  ;;  %v730_v1 = vld [vmem:[%s14576_s30 + $0xc08] sm:$0xff] }
  0x73   : > { %v732_v2 = vld [vmem:[%s14576_s30 + $0xc20] sm:$0xff]  ;;  %729 = vst [vmem:[%s14584_s12 + $0x600] sm:$0xff] %v728_v0  ;;  %731 = vst [vmem:[%s14584_s12 + $0x608] sm:$0xff] %v730_v1  ;;  %v734_v3 = vld [vmem:[%s14576_s30 + $0xc28] sm:$0xff] }
  0x74   : > { %733 = vst [vmem:[%s14584_s12 + $0x610] sm:$0xff] %v732_v2  ;;  %v736_v4 = vld [vmem:[%s14576_s30 + $0xc40] sm:$0xff]  ;;  %v738_v5 = vld [vmem:[%s14576_s30 + $0xc48] sm:$0xff]  ;;  %735 = vst [vmem:[%s14584_s12 + $0x618] sm:$0xff] %v734_v3 }
  0x75   : > { %737 = vst [vmem:[%s14584_s12 + $0x620] sm:$0xff] %v736_v4  ;;  %739 = vst [vmem:[%s14584_s12 + $0x628] sm:$0xff] %v738_v5  ;;  %v740_v6 = vld [vmem:[%s14576_s30 + $0xc60] sm:$0xff]  ;;  %v742_v7 = vld [vmem:[%s14576_s30 + $0xc68] sm:$0xff] }
  0x76   : > { %v744_v8 = vld [vmem:[%s14576_s30 + $0xc80] sm:$0xff]  ;;  %741 = vst [vmem:[%s14584_s12 + $0x630] sm:$0xff] %v740_v6  ;;  %743 = vst [vmem:[%s14584_s12 + $0x638] sm:$0xff] %v742_v7  ;;  %v746_v9 = vld [vmem:[%s14576_s30 + $0xc88] sm:$0xff] }
  0x77   : > { %745 = vst [vmem:[%s14584_s12 + $0x640] sm:$0xff] %v744_v8  ;;  %v748_v10 = vld [vmem:[%s14576_s30 + $0xca0] sm:$0xff]  ;;  %v750_v11 = vld [vmem:[%s14576_s30 + $0xca8] sm:$0xff]  ;;  %747 = vst [vmem:[%s14584_s12 + $0x648] sm:$0xff] %v746_v9 }
  0x78   : > { %749 = vst [vmem:[%s14584_s12 + $0x650] sm:$0xff] %v748_v10  ;;  %751 = vst [vmem:[%s14584_s12 + $0x658] sm:$0xff] %v750_v11  ;;  %v752_v12 = vld [vmem:[%s14576_s30 + $0xcc0] sm:$0xff]  ;;  %v754_v13 = vld [vmem:[%s14576_s30 + $0xcc8] sm:$0xff] }
  0x79   : > { %v756_v14 = vld [vmem:[%s14576_s30 + $0xce0] sm:$0xff]  ;;  %753 = vst [vmem:[%s14584_s12 + $0x660] sm:$0xff] %v752_v12  ;;  %755 = vst [vmem:[%s14584_s12 + $0x668] sm:$0xff] %v754_v13  ;;  %v758_v15 = vld [vmem:[%s14576_s30 + $0xce8] sm:$0xff] }
  0x7a   : > { %757 = vst [vmem:[%s14584_s12 + $0x670] sm:$0xff] %v756_v14  ;;  %v760_v16 = vld [vmem:[%s14576_s30 + $0xd00] sm:$0xff]  ;;  %v762_v17 = vld [vmem:[%s14576_s30 + $0xd08] sm:$0xff]  ;;  %759 = vst [vmem:[%s14584_s12 + $0x678] sm:$0xff] %v758_v15 }
  0x7b   : > { %761 = vst [vmem:[%s14584_s12 + $0x680] sm:$0xff] %v760_v16  ;;  %763 = vst [vmem:[%s14584_s12 + $0x688] sm:$0xff] %v762_v17  ;;  %v764_v18 = vld [vmem:[%s14576_s30 + $0xd20] sm:$0xff]  ;;  %v766_v19 = vld [vmem:[%s14576_s30 + $0xd28] sm:$0xff] }
  0x7c   : > { %v768_v20 = vld [vmem:[%s14576_s30 + $0xd40] sm:$0xff]  ;;  %765 = vst [vmem:[%s14584_s12 + $0x690] sm:$0xff] %v764_v18  ;;  %767 = vst [vmem:[%s14584_s12 + $0x698] sm:$0xff] %v766_v19  ;;  %v770_v21 = vld [vmem:[%s14576_s30 + $0xd48] sm:$0xff] }
  0x7d   : > { %769 = vst [vmem:[%s14584_s12 + $0x6a0] sm:$0xff] %v768_v20  ;;  %v772_v22 = vld [vmem:[%s14576_s30 + $0xd60] sm:$0xff]  ;;  %v774_v23 = vld [vmem:[%s14576_s30 + $0xd68] sm:$0xff]  ;;  %771 = vst [vmem:[%s14584_s12 + $0x6a8] sm:$0xff] %v770_v21 }
  0x7e   : > { %773 = vst [vmem:[%s14584_s12 + $0x6b0] sm:$0xff] %v772_v22  ;;  %775 = vst [vmem:[%s14584_s12 + $0x6b8] sm:$0xff] %v774_v23  ;;  %v776_v24 = vld [vmem:[%s14576_s30 + $0xd80] sm:$0xff]  ;;  %v778_v25 = vld [vmem:[%s14576_s30 + $0xd88] sm:$0xff] }
  0x7f   : > { %v780_v26 = vld [vmem:[%s14576_s30 + $0xda0] sm:$0xff]  ;;  %777 = vst [vmem:[%s14584_s12 + $0x6c0] sm:$0xff] %v776_v24  ;;  %779 = vst [vmem:[%s14584_s12 + $0x6c8] sm:$0xff] %v778_v25  ;;  %v782_v27 = vld [vmem:[%s14576_s30 + $0xda8] sm:$0xff] }
  0x80   : > { %781 = vst [vmem:[%s14584_s12 + $0x6d0] sm:$0xff] %v780_v26  ;;  %v784_v28 = vld [vmem:[%s14576_s30 + $0xdc0] sm:$0xff]  ;;  %v786_v29 = vld [vmem:[%s14576_s30 + $0xdc8] sm:$0xff]  ;;  %783 = vst [vmem:[%s14584_s12 + $0x6d8] sm:$0xff] %v782_v27 }
  0x81   : > { %785 = vst [vmem:[%s14584_s12 + $0x6e0] sm:$0xff] %v784_v28  ;;  %787 = vst [vmem:[%s14584_s12 + $0x6e8] sm:$0xff] %v786_v29  ;;  %v788_v30 = vld [vmem:[%s14576_s30 + $0xde0] sm:$0xff]  ;;  %v790_v31 = vld [vmem:[%s14576_s30 + $0xde8] sm:$0xff] }
  0x82   : > { %v792_v32 = vld [vmem:[%s14576_s30 + $0xe00] sm:$0xff]  ;;  %789 = vst [vmem:[%s14584_s12 + $0x6f0] sm:$0xff] %v788_v30  ;;  %791 = vst [vmem:[%s14584_s12 + $0x6f8] sm:$0xff] %v790_v31  ;;  %v794_v33 = vld [vmem:[%s14576_s30 + $0xe08] sm:$0xff] }
  0x83   : > { %793 = vst [vmem:[%s14584_s12 + $0x700] sm:$0xff] %v792_v32  ;;  %v796_v34 = vld [vmem:[%s14576_s30 + $0xe20] sm:$0xff]  ;;  %v798_v35 = vld [vmem:[%s14576_s30 + $0xe28] sm:$0xff]  ;;  %795 = vst [vmem:[%s14584_s12 + $0x708] sm:$0xff] %v794_v33 }
  0x84   : > { %797 = vst [vmem:[%s14584_s12 + $0x710] sm:$0xff] %v796_v34  ;;  %799 = vst [vmem:[%s14584_s12 + $0x718] sm:$0xff] %v798_v35  ;;  %v800_v36 = vld [vmem:[%s14576_s30 + $0xe40] sm:$0xff]  ;;  %v802_v37 = vld [vmem:[%s14576_s30 + $0xe48] sm:$0xff] }
  0x85   : > { %v804_v38 = vld [vmem:[%s14576_s30 + $0xe60] sm:$0xff]  ;;  %801 = vst [vmem:[%s14584_s12 + $0x720] sm:$0xff] %v800_v36  ;;  %803 = vst [vmem:[%s14584_s12 + $0x728] sm:$0xff] %v802_v37  ;;  %v806_v39 = vld [vmem:[%s14576_s30 + $0xe68] sm:$0xff] }
  0x86   : > { %805 = vst [vmem:[%s14584_s12 + $0x730] sm:$0xff] %v804_v38  ;;  %v808_v40 = vld [vmem:[%s14576_s30 + $0xe80] sm:$0xff]  ;;  %v810_v41 = vld [vmem:[%s14576_s30 + $0xe88] sm:$0xff]  ;;  %807 = vst [vmem:[%s14584_s12 + $0x738] sm:$0xff] %v806_v39 }
  0x87   : > { %809 = vst [vmem:[%s14584_s12 + $0x740] sm:$0xff] %v808_v40  ;;  %811 = vst [vmem:[%s14584_s12 + $0x748] sm:$0xff] %v810_v41  ;;  %v812_v42 = vld [vmem:[%s14576_s30 + $0xea0] sm:$0xff]  ;;  %v814_v43 = vld [vmem:[%s14576_s30 + $0xea8] sm:$0xff] }
  0x88   : > { %v816_v44 = vld [vmem:[%s14576_s30 + $0xec0] sm:$0xff]  ;;  %813 = vst [vmem:[%s14584_s12 + $0x750] sm:$0xff] %v812_v42  ;;  %815 = vst [vmem:[%s14584_s12 + $0x758] sm:$0xff] %v814_v43  ;;  %v818_v45 = vld [vmem:[%s14576_s30 + $0xec8] sm:$0xff] }
  0x89   : > { %817 = vst [vmem:[%s14584_s12 + $0x760] sm:$0xff] %v816_v44  ;;  %v820_v46 = vld [vmem:[%s14576_s30 + $0xee0] sm:$0xff]  ;;  %v822_v47 = vld [vmem:[%s14576_s30 + $0xee8] sm:$0xff]  ;;  %819 = vst [vmem:[%s14584_s12 + $0x768] sm:$0xff] %v818_v45 }
  0x8a   : > { %821 = vst [vmem:[%s14584_s12 + $0x770] sm:$0xff] %v820_v46  ;;  %823 = vst [vmem:[%s14584_s12 + $0x778] sm:$0xff] %v822_v47  ;;  %v824_v48 = vld [vmem:[%s14576_s30 + $0xf00] sm:$0xff]  ;;  %v826_v49 = vld [vmem:[%s14576_s30 + $0xf08] sm:$0xff] }
  0x8b   : > { %v828_v50 = vld [vmem:[%s14576_s30 + $0xf20] sm:$0xff]  ;;  %825 = vst [vmem:[%s14584_s12 + $0x780] sm:$0xff] %v824_v48  ;;  %827 = vst [vmem:[%s14584_s12 + $0x788] sm:$0xff] %v826_v49  ;;  %v830_v51 = vld [vmem:[%s14576_s30 + $0xf28] sm:$0xff] }
  0x8c   : > { %829 = vst [vmem:[%s14584_s12 + $0x790] sm:$0xff] %v828_v50  ;;  %v832_v52 = vld [vmem:[%s14576_s30 + $0xf40] sm:$0xff]  ;;  %v834_v53 = vld [vmem:[%s14576_s30 + $0xf48] sm:$0xff]  ;;  %831 = vst [vmem:[%s14584_s12 + $0x798] sm:$0xff] %v830_v51 }
  0x8d   : > { %833 = vst [vmem:[%s14584_s12 + $0x7a0] sm:$0xff] %v832_v52  ;;  %835 = vst [vmem:[%s14584_s12 + $0x7a8] sm:$0xff] %v834_v53  ;;  %v836_v54 = vld [vmem:[%s14576_s30 + $0xf60] sm:$0xff]  ;;  %v838_v55 = vld [vmem:[%s14576_s30 + $0xf68] sm:$0xff] }
  0x8e   : > { %v840_v56 = vld [vmem:[%s14576_s30 + $0xf80] sm:$0xff]  ;;  %837 = vst [vmem:[%s14584_s12 + $0x7b0] sm:$0xff] %v836_v54  ;;  %839 = vst [vmem:[%s14584_s12 + $0x7b8] sm:$0xff] %v838_v55  ;;  %v842_v57 = vld [vmem:[%s14576_s30 + $0xf88] sm:$0xff] }
  0x8f   : > { %841 = vst [vmem:[%s14584_s12 + $0x7c0] sm:$0xff] %v840_v56  ;;  %v844_v58 = vld [vmem:[%s14576_s30 + $0xfa0] sm:$0xff]  ;;  %v846_v59 = vld [vmem:[%s14576_s30 + $0xfa8] sm:$0xff]  ;;  %843 = vst [vmem:[%s14584_s12 + $0x7c8] sm:$0xff] %v842_v57 }
  0x90   : > { %845 = vst [vmem:[%s14584_s12 + $0x7d0] sm:$0xff] %v844_v58  ;;  %847 = vst [vmem:[%s14584_s12 + $0x7d8] sm:$0xff] %v846_v59  ;;  %v848_v60 = vld [vmem:[%s14576_s30 + $0xfc0] sm:$0xff]  ;;  %v850_v61 = vld [vmem:[%s14576_s30 + $0xfc8] sm:$0xff] }
  0x91   : > { %v852_v62 = vld [vmem:[%s14576_s30 + $0xfe0] sm:$0xff]  ;;  %849 = vst [vmem:[%s14584_s12 + $0x7e0] sm:$0xff] %v848_v60  ;;  %851 = vst [vmem:[%s14584_s12 + $0x7e8] sm:$0xff] %v850_v61  ;;  %v854_v63 = vld [vmem:[%s14576_s30 + $0xfe8] sm:$0xff] }
  0x92   : > { %853 = vst [vmem:[%s14584_s12 + $0x7f0] sm:$0xff] %v852_v62  ;;  %v856_v0 = vld [vmem:[%s14576_s30 + $0x1000] sm:$0xff]  ;;  %v858_v1 = vld [vmem:[%s14576_s30 + $0x1008] sm:$0xff]  ;;  %855 = vst [vmem:[%s14584_s12 + $0x7f8] sm:$0xff] %v854_v63 }
  0x93   : > { %857 = vst [vmem:[%s14584_s12 + $0x800] sm:$0xff] %v856_v0  ;;  %859 = vst [vmem:[%s14584_s12 + $0x808] sm:$0xff] %v858_v1  ;;  %v860_v2 = vld [vmem:[%s14576_s30 + $0x1020] sm:$0xff]  ;;  %v862_v3 = vld [vmem:[%s14576_s30 + $0x1028] sm:$0xff] }
  0x94   : > { %v864_v4 = vld [vmem:[%s14576_s30 + $0x1040] sm:$0xff]  ;;  %861 = vst [vmem:[%s14584_s12 + $0x810] sm:$0xff] %v860_v2  ;;  %863 = vst [vmem:[%s14584_s12 + $0x818] sm:$0xff] %v862_v3  ;;  %v866_v5 = vld [vmem:[%s14576_s30 + $0x1048] sm:$0xff] }
  0x95   : > { %865 = vst [vmem:[%s14584_s12 + $0x820] sm:$0xff] %v864_v4  ;;  %v868_v6 = vld [vmem:[%s14576_s30 + $0x1060] sm:$0xff]  ;;  %v870_v7 = vld [vmem:[%s14576_s30 + $0x1068] sm:$0xff]  ;;  %867 = vst [vmem:[%s14584_s12 + $0x828] sm:$0xff] %v866_v5 }
  0x96   : > { %869 = vst [vmem:[%s14584_s12 + $0x830] sm:$0xff] %v868_v6  ;;  %871 = vst [vmem:[%s14584_s12 + $0x838] sm:$0xff] %v870_v7  ;;  %v872_v8 = vld [vmem:[%s14576_s30 + $0x1080] sm:$0xff]  ;;  %v874_v9 = vld [vmem:[%s14576_s30 + $0x1088] sm:$0xff] }
  0x97   : > { %v876_v10 = vld [vmem:[%s14576_s30 + $0x10a0] sm:$0xff]  ;;  %873 = vst [vmem:[%s14584_s12 + $0x840] sm:$0xff] %v872_v8  ;;  %875 = vst [vmem:[%s14584_s12 + $0x848] sm:$0xff] %v874_v9  ;;  %v878_v11 = vld [vmem:[%s14576_s30 + $0x10a8] sm:$0xff] }
  0x98   : > { %877 = vst [vmem:[%s14584_s12 + $0x850] sm:$0xff] %v876_v10  ;;  %v880_v12 = vld [vmem:[%s14576_s30 + $0x10c0] sm:$0xff]  ;;  %v882_v13 = vld [vmem:[%s14576_s30 + $0x10c8] sm:$0xff]  ;;  %879 = vst [vmem:[%s14584_s12 + $0x858] sm:$0xff] %v878_v11 }
  0x99   : > { %881 = vst [vmem:[%s14584_s12 + $0x860] sm:$0xff] %v880_v12  ;;  %883 = vst [vmem:[%s14584_s12 + $0x868] sm:$0xff] %v882_v13  ;;  %v884_v14 = vld [vmem:[%s14576_s30 + $0x10e0] sm:$0xff]  ;;  %v886_v15 = vld [vmem:[%s14576_s30 + $0x10e8] sm:$0xff] }
  0x9a   : > { %v888_v16 = vld [vmem:[%s14576_s30 + $0x1100] sm:$0xff]  ;;  %885 = vst [vmem:[%s14584_s12 + $0x870] sm:$0xff] %v884_v14  ;;  %887 = vst [vmem:[%s14584_s12 + $0x878] sm:$0xff] %v886_v15  ;;  %v890_v17 = vld [vmem:[%s14576_s30 + $0x1108] sm:$0xff] }
  0x9b   : > { %889 = vst [vmem:[%s14584_s12 + $0x880] sm:$0xff] %v888_v16  ;;  %v892_v18 = vld [vmem:[%s14576_s30 + $0x1120] sm:$0xff]  ;;  %v894_v19 = vld [vmem:[%s14576_s30 + $0x1128] sm:$0xff]  ;;  %891 = vst [vmem:[%s14584_s12 + $0x888] sm:$0xff] %v890_v17 }
  0x9c   : > { %893 = vst [vmem:[%s14584_s12 + $0x890] sm:$0xff] %v892_v18  ;;  %895 = vst [vmem:[%s14584_s12 + $0x898] sm:$0xff] %v894_v19  ;;  %v896_v20 = vld [vmem:[%s14576_s30 + $0x1140] sm:$0xff]  ;;  %v898_v21 = vld [vmem:[%s14576_s30 + $0x1148] sm:$0xff] }
  0x9d   : > { %v900_v22 = vld [vmem:[%s14576_s30 + $0x1160] sm:$0xff]  ;;  %897 = vst [vmem:[%s14584_s12 + $0x8a0] sm:$0xff] %v896_v20  ;;  %899 = vst [vmem:[%s14584_s12 + $0x8a8] sm:$0xff] %v898_v21  ;;  %v902_v23 = vld [vmem:[%s14576_s30 + $0x1168] sm:$0xff] }
  0x9e   : > { %901 = vst [vmem:[%s14584_s12 + $0x8b0] sm:$0xff] %v900_v22  ;;  %v904_v24 = vld [vmem:[%s14576_s30 + $0x1180] sm:$0xff]  ;;  %v906_v25 = vld [vmem:[%s14576_s30 + $0x1188] sm:$0xff]  ;;  %903 = vst [vmem:[%s14584_s12 + $0x8b8] sm:$0xff] %v902_v23 }
  0x9f   : > { %905 = vst [vmem:[%s14584_s12 + $0x8c0] sm:$0xff] %v904_v24  ;;  %907 = vst [vmem:[%s14584_s12 + $0x8c8] sm:$0xff] %v906_v25  ;;  %v908_v26 = vld [vmem:[%s14576_s30 + $0x11a0] sm:$0xff]  ;;  %v910_v27 = vld [vmem:[%s14576_s30 + $0x11a8] sm:$0xff] }
  0xa0   : > { %v912_v28 = vld [vmem:[%s14576_s30 + $0x11c0] sm:$0xff]  ;;  %909 = vst [vmem:[%s14584_s12 + $0x8d0] sm:$0xff] %v908_v26  ;;  %911 = vst [vmem:[%s14584_s12 + $0x8d8] sm:$0xff] %v910_v27  ;;  %v914_v29 = vld [vmem:[%s14576_s30 + $0x11c8] sm:$0xff] }
  0xa1   : > { %913 = vst [vmem:[%s14584_s12 + $0x8e0] sm:$0xff] %v912_v28  ;;  %v916_v30 = vld [vmem:[%s14576_s30 + $0x11e0] sm:$0xff]  ;;  %v918_v31 = vld [vmem:[%s14576_s30 + $0x11e8] sm:$0xff]  ;;  %915 = vst [vmem:[%s14584_s12 + $0x8e8] sm:$0xff] %v914_v29 }
  0xa2   : > { %917 = vst [vmem:[%s14584_s12 + $0x8f0] sm:$0xff] %v916_v30  ;;  %919 = vst [vmem:[%s14584_s12 + $0x8f8] sm:$0xff] %v918_v31  ;;  %v920_v32 = vld [vmem:[%s14576_s30 + $0x1200] sm:$0xff]  ;;  %v922_v33 = vld [vmem:[%s14576_s30 + $0x1208] sm:$0xff] }
  0xa3   : > { %v924_v34 = vld [vmem:[%s14576_s30 + $0x1220] sm:$0xff]  ;;  %921 = vst [vmem:[%s14584_s12 + $0x900] sm:$0xff] %v920_v32  ;;  %923 = vst [vmem:[%s14584_s12 + $0x908] sm:$0xff] %v922_v33  ;;  %v926_v35 = vld [vmem:[%s14576_s30 + $0x1228] sm:$0xff] }
  0xa4   : > { %925 = vst [vmem:[%s14584_s12 + $0x910] sm:$0xff] %v924_v34  ;;  %v928_v36 = vld [vmem:[%s14576_s30 + $0x1240] sm:$0xff]  ;;  %v930_v37 = vld [vmem:[%s14576_s30 + $0x1248] sm:$0xff]  ;;  %927 = vst [vmem:[%s14584_s12 + $0x918] sm:$0xff] %v926_v35 }
  0xa5   : > { %929 = vst [vmem:[%s14584_s12 + $0x920] sm:$0xff] %v928_v36  ;;  %931 = vst [vmem:[%s14584_s12 + $0x928] sm:$0xff] %v930_v37  ;;  %v932_v38 = vld [vmem:[%s14576_s30 + $0x1260] sm:$0xff]  ;;  %v934_v39 = vld [vmem:[%s14576_s30 + $0x1268] sm:$0xff] }
  0xa6   : > { %v936_v40 = vld [vmem:[%s14576_s30 + $0x1280] sm:$0xff]  ;;  %933 = vst [vmem:[%s14584_s12 + $0x930] sm:$0xff] %v932_v38  ;;  %935 = vst [vmem:[%s14584_s12 + $0x938] sm:$0xff] %v934_v39  ;;  %v938_v41 = vld [vmem:[%s14576_s30 + $0x1288] sm:$0xff] }
  0xa7   : > { %937 = vst [vmem:[%s14584_s12 + $0x940] sm:$0xff] %v936_v40  ;;  %v940_v42 = vld [vmem:[%s14576_s30 + $0x12a0] sm:$0xff]  ;;  %v942_v43 = vld [vmem:[%s14576_s30 + $0x12a8] sm:$0xff]  ;;  %939 = vst [vmem:[%s14584_s12 + $0x948] sm:$0xff] %v938_v41 }
  0xa8   : > { %941 = vst [vmem:[%s14584_s12 + $0x950] sm:$0xff] %v940_v42  ;;  %943 = vst [vmem:[%s14584_s12 + $0x958] sm:$0xff] %v942_v43  ;;  %v944_v44 = vld [vmem:[%s14576_s30 + $0x12c0] sm:$0xff]  ;;  %v946_v45 = vld [vmem:[%s14576_s30 + $0x12c8] sm:$0xff] }
  0xa9   : > { %v948_v46 = vld [vmem:[%s14576_s30 + $0x12e0] sm:$0xff]  ;;  %945 = vst [vmem:[%s14584_s12 + $0x960] sm:$0xff] %v944_v44  ;;  %947 = vst [vmem:[%s14584_s12 + $0x968] sm:$0xff] %v946_v45  ;;  %v950_v47 = vld [vmem:[%s14576_s30 + $0x12e8] sm:$0xff] }
  0xaa   : > { %949 = vst [vmem:[%s14584_s12 + $0x970] sm:$0xff] %v948_v46  ;;  %v952_v48 = vld [vmem:[%s14576_s30 + $0x1300] sm:$0xff]  ;;  %v954_v49 = vld [vmem:[%s14576_s30 + $0x1308] sm:$0xff]  ;;  %951 = vst [vmem:[%s14584_s12 + $0x978] sm:$0xff] %v950_v47 }
  0xab   : > { %953 = vst [vmem:[%s14584_s12 + $0x980] sm:$0xff] %v952_v48  ;;  %955 = vst [vmem:[%s14584_s12 + $0x988] sm:$0xff] %v954_v49  ;;  %v956_v50 = vld [vmem:[%s14576_s30 + $0x1320] sm:$0xff]  ;;  %v958_v51 = vld [vmem:[%s14576_s30 + $0x1328] sm:$0xff] }
  0xac   : > { %v960_v52 = vld [vmem:[%s14576_s30 + $0x1340] sm:$0xff]  ;;  %957 = vst [vmem:[%s14584_s12 + $0x990] sm:$0xff] %v956_v50  ;;  %959 = vst [vmem:[%s14584_s12 + $0x998] sm:$0xff] %v958_v51  ;;  %v962_v53 = vld [vmem:[%s14576_s30 + $0x1348] sm:$0xff] }
  0xad   : > { %961 = vst [vmem:[%s14584_s12 + $0x9a0] sm:$0xff] %v960_v52  ;;  %v964_v54 = vld [vmem:[%s14576_s30 + $0x1360] sm:$0xff]  ;;  %v966_v55 = vld [vmem:[%s14576_s30 + $0x1368] sm:$0xff]  ;;  %963 = vst [vmem:[%s14584_s12 + $0x9a8] sm:$0xff] %v962_v53 }
  0xae   : > { %965 = vst [vmem:[%s14584_s12 + $0x9b0] sm:$0xff] %v964_v54  ;;  %967 = vst [vmem:[%s14584_s12 + $0x9b8] sm:$0xff] %v966_v55  ;;  %v968_v56 = vld [vmem:[%s14576_s30 + $0x1380] sm:$0xff]  ;;  %v970_v57 = vld [vmem:[%s14576_s30 + $0x1388] sm:$0xff] }
  0xaf   : > { %v972_v58 = vld [vmem:[%s14576_s30 + $0x13a0] sm:$0xff]  ;;  %969 = vst [vmem:[%s14584_s12 + $0x9c0] sm:$0xff] %v968_v56  ;;  %971 = vst [vmem:[%s14584_s12 + $0x9c8] sm:$0xff] %v970_v57  ;;  %v974_v59 = vld [vmem:[%s14576_s30 + $0x13a8] sm:$0xff] }
  0xb0   : > { %973 = vst [vmem:[%s14584_s12 + $0x9d0] sm:$0xff] %v972_v58  ;;  %v976_v60 = vld [vmem:[%s14576_s30 + $0x13c0] sm:$0xff]  ;;  %v978_v61 = vld [vmem:[%s14576_s30 + $0x13c8] sm:$0xff]  ;;  %975 = vst [vmem:[%s14584_s12 + $0x9d8] sm:$0xff] %v974_v59 }
  0xb1   : > { %977 = vst [vmem:[%s14584_s12 + $0x9e0] sm:$0xff] %v976_v60  ;;  %979 = vst [vmem:[%s14584_s12 + $0x9e8] sm:$0xff] %v978_v61  ;;  %v980_v62 = vld [vmem:[%s14576_s30 + $0x13e0] sm:$0xff]  ;;  %v982_v63 = vld [vmem:[%s14576_s30 + $0x13e8] sm:$0xff] }
  0xb2   : > { %v984_v0 = vld [vmem:[%s14576_s30 + $0x1400] sm:$0xff]  ;;  %981 = vst [vmem:[%s14584_s12 + $0x9f0] sm:$0xff] %v980_v62  ;;  %983 = vst [vmem:[%s14584_s12 + $0x9f8] sm:$0xff] %v982_v63  ;;  %v986_v1 = vld [vmem:[%s14576_s30 + $0x1408] sm:$0xff] }
  0xb3   : > { %985 = vst [vmem:[%s14584_s12 + $0xa00] sm:$0xff] %v984_v0  ;;  %v988_v2 = vld [vmem:[%s14576_s30 + $0x1420] sm:$0xff]  ;;  %v990_v3 = vld [vmem:[%s14576_s30 + $0x1428] sm:$0xff]  ;;  %987 = vst [vmem:[%s14584_s12 + $0xa08] sm:$0xff] %v986_v1 }
  0xb4   : > { %989 = vst [vmem:[%s14584_s12 + $0xa10] sm:$0xff] %v988_v2  ;;  %991 = vst [vmem:[%s14584_s12 + $0xa18] sm:$0xff] %v990_v3  ;;  %v992_v4 = vld [vmem:[%s14576_s30 + $0x1440] sm:$0xff]  ;;  %v994_v5 = vld [vmem:[%s14576_s30 + $0x1448] sm:$0xff] }
  0xb5   : > { %v996_v6 = vld [vmem:[%s14576_s30 + $0x1460] sm:$0xff]  ;;  %993 = vst [vmem:[%s14584_s12 + $0xa20] sm:$0xff] %v992_v4  ;;  %995 = vst [vmem:[%s14584_s12 + $0xa28] sm:$0xff] %v994_v5  ;;  %v998_v7 = vld [vmem:[%s14576_s30 + $0x1468] sm:$0xff] }
  0xb6   : > { %997 = vst [vmem:[%s14584_s12 + $0xa30] sm:$0xff] %v996_v6  ;;  %v1000_v8 = vld [vmem:[%s14576_s30 + $0x1480] sm:$0xff]  ;;  %v1002_v9 = vld [vmem:[%s14576_s30 + $0x1488] sm:$0xff]  ;;  %999 = vst [vmem:[%s14584_s12 + $0xa38] sm:$0xff] %v998_v7 }
  0xb7   : > { %1001 = vst [vmem:[%s14584_s12 + $0xa40] sm:$0xff] %v1000_v8  ;;  %1003 = vst [vmem:[%s14584_s12 + $0xa48] sm:$0xff] %v1002_v9  ;;  %v1004_v10 = vld [vmem:[%s14576_s30 + $0x14a0] sm:$0xff]  ;;  %v1006_v11 = vld [vmem:[%s14576_s30 + $0x14a8] sm:$0xff] }
  0xb8   : > { %v1008_v12 = vld [vmem:[%s14576_s30 + $0x14c0] sm:$0xff]  ;;  %1005 = vst [vmem:[%s14584_s12 + $0xa50] sm:$0xff] %v1004_v10  ;;  %1007 = vst [vmem:[%s14584_s12 + $0xa58] sm:$0xff] %v1006_v11  ;;  %v1010_v13 = vld [vmem:[%s14576_s30 + $0x14c8] sm:$0xff] }
  0xb9   : > { %1009 = vst [vmem:[%s14584_s12 + $0xa60] sm:$0xff] %v1008_v12  ;;  %v1012_v14 = vld [vmem:[%s14576_s30 + $0x14e0] sm:$0xff]  ;;  %v1014_v15 = vld [vmem:[%s14576_s30 + $0x14e8] sm:$0xff]  ;;  %1011 = vst [vmem:[%s14584_s12 + $0xa68] sm:$0xff] %v1010_v13 }
  0xba   : > { %1013 = vst [vmem:[%s14584_s12 + $0xa70] sm:$0xff] %v1012_v14  ;;  %1015 = vst [vmem:[%s14584_s12 + $0xa78] sm:$0xff] %v1014_v15  ;;  %v1016_v16 = vld [vmem:[%s14576_s30 + $0x1500] sm:$0xff]  ;;  %v1018_v17 = vld [vmem:[%s14576_s30 + $0x1508] sm:$0xff] }
  0xbb   : > { %v1020_v18 = vld [vmem:[%s14576_s30 + $0x1520] sm:$0xff]  ;;  %1017 = vst [vmem:[%s14584_s12 + $0xa80] sm:$0xff] %v1016_v16  ;;  %1019 = vst [vmem:[%s14584_s12 + $0xa88] sm:$0xff] %v1018_v17  ;;  %v1022_v19 = vld [vmem:[%s14576_s30 + $0x1528] sm:$0xff] }
  0xbc   : > { %1021 = vst [vmem:[%s14584_s12 + $0xa90] sm:$0xff] %v1020_v18  ;;  %v1024_v20 = vld [vmem:[%s14576_s30 + $0x1540] sm:$0xff]  ;;  %v1026_v21 = vld [vmem:[%s14576_s30 + $0x1548] sm:$0xff]  ;;  %1023 = vst [vmem:[%s14584_s12 + $0xa98] sm:$0xff] %v1022_v19 }
  0xbd   : > { %1025 = vst [vmem:[%s14584_s12 + $0xaa0] sm:$0xff] %v1024_v20  ;;  %1027 = vst [vmem:[%s14584_s12 + $0xaa8] sm:$0xff] %v1026_v21  ;;  %v1028_v22 = vld [vmem:[%s14576_s30 + $0x1560] sm:$0xff]  ;;  %v1030_v23 = vld [vmem:[%s14576_s30 + $0x1568] sm:$0xff] }
  0xbe   : > { %v1032_v24 = vld [vmem:[%s14576_s30 + $0x1580] sm:$0xff]  ;;  %1029 = vst [vmem:[%s14584_s12 + $0xab0] sm:$0xff] %v1028_v22  ;;  %1031 = vst [vmem:[%s14584_s12 + $0xab8] sm:$0xff] %v1030_v23  ;;  %v1034_v25 = vld [vmem:[%s14576_s30 + $0x1588] sm:$0xff] }
  0xbf   : > { %1033 = vst [vmem:[%s14584_s12 + $0xac0] sm:$0xff] %v1032_v24  ;;  %v1036_v26 = vld [vmem:[%s14576_s30 + $0x15a0] sm:$0xff]  ;;  %v1038_v27 = vld [vmem:[%s14576_s30 + $0x15a8] sm:$0xff]  ;;  %1035 = vst [vmem:[%s14584_s12 + $0xac8] sm:$0xff] %v1034_v25 }
  0xc0   : > { %1037 = vst [vmem:[%s14584_s12 + $0xad0] sm:$0xff] %v1036_v26  ;;  %1039 = vst [vmem:[%s14584_s12 + $0xad8] sm:$0xff] %v1038_v27  ;;  %v1040_v28 = vld [vmem:[%s14576_s30 + $0x15c0] sm:$0xff]  ;;  %v1042_v29 = vld [vmem:[%s14576_s30 + $0x15c8] sm:$0xff] }
  0xc1   : > { %v1044_v30 = vld [vmem:[%s14576_s30 + $0x15e0] sm:$0xff]  ;;  %1041 = vst [vmem:[%s14584_s12 + $0xae0] sm:$0xff] %v1040_v28  ;;  %1043 = vst [vmem:[%s14584_s12 + $0xae8] sm:$0xff] %v1042_v29  ;;  %v1046_v31 = vld [vmem:[%s14576_s30 + $0x15e8] sm:$0xff] }
  0xc2   : > { %1045 = vst [vmem:[%s14584_s12 + $0xaf0] sm:$0xff] %v1044_v30  ;;  %v1048_v32 = vld [vmem:[%s14576_s30 + $0x1600] sm:$0xff]  ;;  %v1050_v33 = vld [vmem:[%s14576_s30 + $0x1608] sm:$0xff]  ;;  %1047 = vst [vmem:[%s14584_s12 + $0xaf8] sm:$0xff] %v1046_v31 }
  0xc3   : > { %1049 = vst [vmem:[%s14584_s12 + $0xb00] sm:$0xff] %v1048_v32  ;;  %1051 = vst [vmem:[%s14584_s12 + $0xb08] sm:$0xff] %v1050_v33  ;;  %v1052_v34 = vld [vmem:[%s14576_s30 + $0x1620] sm:$0xff]  ;;  %v1054_v35 = vld [vmem:[%s14576_s30 + $0x1628] sm:$0xff] }
  0xc4   : > { %v1056_v36 = vld [vmem:[%s14576_s30 + $0x1640] sm:$0xff]  ;;  %1053 = vst [vmem:[%s14584_s12 + $0xb10] sm:$0xff] %v1052_v34  ;;  %1055 = vst [vmem:[%s14584_s12 + $0xb18] sm:$0xff] %v1054_v35  ;;  %v1058_v37 = vld [vmem:[%s14576_s30 + $0x1648] sm:$0xff] }
  0xc5   : > { %1057 = vst [vmem:[%s14584_s12 + $0xb20] sm:$0xff] %v1056_v36  ;;  %v1060_v38 = vld [vmem:[%s14576_s30 + $0x1660] sm:$0xff]  ;;  %v1062_v39 = vld [vmem:[%s14576_s30 + $0x1668] sm:$0xff]  ;;  %1059 = vst [vmem:[%s14584_s12 + $0xb28] sm:$0xff] %v1058_v37 }
  0xc6   : > { %1061 = vst [vmem:[%s14584_s12 + $0xb30] sm:$0xff] %v1060_v38  ;;  %1063 = vst [vmem:[%s14584_s12 + $0xb38] sm:$0xff] %v1062_v39  ;;  %v1064_v40 = vld [vmem:[%s14576_s30 + $0x1680] sm:$0xff]  ;;  %v1066_v41 = vld [vmem:[%s14576_s30 + $0x1688] sm:$0xff] }
  0xc7   : > { %v1068_v42 = vld [vmem:[%s14576_s30 + $0x16a0] sm:$0xff]  ;;  %1065 = vst [vmem:[%s14584_s12 + $0xb40] sm:$0xff] %v1064_v40  ;;  %1067 = vst [vmem:[%s14584_s12 + $0xb48] sm:$0xff] %v1066_v41  ;;  %v1070_v43 = vld [vmem:[%s14576_s30 + $0x16a8] sm:$0xff] }
  0xc8   : > { %1069 = vst [vmem:[%s14584_s12 + $0xb50] sm:$0xff] %v1068_v42  ;;  %v1072_v44 = vld [vmem:[%s14576_s30 + $0x16c0] sm:$0xff]  ;;  %v1074_v45 = vld [vmem:[%s14576_s30 + $0x16c8] sm:$0xff]  ;;  %1071 = vst [vmem:[%s14584_s12 + $0xb58] sm:$0xff] %v1070_v43 }
  0xc9   : > { %1073 = vst [vmem:[%s14584_s12 + $0xb60] sm:$0xff] %v1072_v44  ;;  %1075 = vst [vmem:[%s14584_s12 + $0xb68] sm:$0xff] %v1074_v45  ;;  %v1076_v46 = vld [vmem:[%s14576_s30 + $0x16e0] sm:$0xff]  ;;  %v1078_v47 = vld [vmem:[%s14576_s30 + $0x16e8] sm:$0xff] }
  0xca   : > { %v1080_v48 = vld [vmem:[%s14576_s30 + $0x1700] sm:$0xff]  ;;  %1077 = vst [vmem:[%s14584_s12 + $0xb70] sm:$0xff] %v1076_v46  ;;  %1079 = vst [vmem:[%s14584_s12 + $0xb78] sm:$0xff] %v1078_v47  ;;  %v1082_v49 = vld [vmem:[%s14576_s30 + $0x1708] sm:$0xff] }
  0xcb   : > { %1081 = vst [vmem:[%s14584_s12 + $0xb80] sm:$0xff] %v1080_v48  ;;  %v1084_v50 = vld [vmem:[%s14576_s30 + $0x1720] sm:$0xff]  ;;  %v1086_v51 = vld [vmem:[%s14576_s30 + $0x1728] sm:$0xff]  ;;  %1083 = vst [vmem:[%s14584_s12 + $0xb88] sm:$0xff] %v1082_v49 }
  0xcc   : > { %1085 = vst [vmem:[%s14584_s12 + $0xb90] sm:$0xff] %v1084_v50  ;;  %1087 = vst [vmem:[%s14584_s12 + $0xb98] sm:$0xff] %v1086_v51  ;;  %v1088_v52 = vld [vmem:[%s14576_s30 + $0x1740] sm:$0xff]  ;;  %v1090_v53 = vld [vmem:[%s14576_s30 + $0x1748] sm:$0xff] }
  0xcd   : > { %v1092_v54 = vld [vmem:[%s14576_s30 + $0x1760] sm:$0xff]  ;;  %1089 = vst [vmem:[%s14584_s12 + $0xba0] sm:$0xff] %v1088_v52  ;;  %1091 = vst [vmem:[%s14584_s12 + $0xba8] sm:$0xff] %v1090_v53  ;;  %v1094_v55 = vld [vmem:[%s14576_s30 + $0x1768] sm:$0xff] }
  0xce   : > { %1093 = vst [vmem:[%s14584_s12 + $0xbb0] sm:$0xff] %v1092_v54  ;;  %v1096_v56 = vld [vmem:[%s14576_s30 + $0x1780] sm:$0xff]  ;;  %v1098_v57 = vld [vmem:[%s14576_s30 + $0x1788] sm:$0xff]  ;;  %1095 = vst [vmem:[%s14584_s12 + $0xbb8] sm:$0xff] %v1094_v55 }
  0xcf   : > { %1097 = vst [vmem:[%s14584_s12 + $0xbc0] sm:$0xff] %v1096_v56  ;;  %1099 = vst [vmem:[%s14584_s12 + $0xbc8] sm:$0xff] %v1098_v57  ;;  %v1100_v58 = vld [vmem:[%s14576_s30 + $0x17a0] sm:$0xff]  ;;  %v1102_v59 = vld [vmem:[%s14576_s30 + $0x17a8] sm:$0xff] }
  0xd0   : > { %v1104_v60 = vld [vmem:[%s14576_s30 + $0x17c0] sm:$0xff]  ;;  %1101 = vst [vmem:[%s14584_s12 + $0xbd0] sm:$0xff] %v1100_v58  ;;  %1103 = vst [vmem:[%s14584_s12 + $0xbd8] sm:$0xff] %v1102_v59  ;;  %v1106_v61 = vld [vmem:[%s14576_s30 + $0x17c8] sm:$0xff] }
  0xd1   : > { %1105 = vst [vmem:[%s14584_s12 + $0xbe0] sm:$0xff] %v1104_v60  ;;  %v1108_v62 = vld [vmem:[%s14576_s30 + $0x17e0] sm:$0xff]  ;;  %v1110_v63 = vld [vmem:[%s14576_s30 + $0x17e8] sm:$0xff]  ;;  %1107 = vst [vmem:[%s14584_s12 + $0xbe8] sm:$0xff] %v1106_v61 }
  0xd2   : > { %1109 = vst [vmem:[%s14584_s12 + $0xbf0] sm:$0xff] %v1108_v62  ;;  %1111 = vst [vmem:[%s14584_s12 + $0xbf8] sm:$0xff] %v1110_v63  ;;  %v1112_v0 = vld [vmem:[%s14576_s30 + $0x1800] sm:$0xff]  ;;  %v1114_v1 = vld [vmem:[%s14576_s30 + $0x1808] sm:$0xff] }
  0xd3   : > { %v1116_v2 = vld [vmem:[%s14576_s30 + $0x1820] sm:$0xff]  ;;  %1113 = vst [vmem:[%s14584_s12 + $0xc00] sm:$0xff] %v1112_v0  ;;  %1115 = vst [vmem:[%s14584_s12 + $0xc08] sm:$0xff] %v1114_v1  ;;  %v1118_v3 = vld [vmem:[%s14576_s30 + $0x1828] sm:$0xff] }
  0xd4   : > { %1117 = vst [vmem:[%s14584_s12 + $0xc10] sm:$0xff] %v1116_v2  ;;  %v1120_v4 = vld [vmem:[%s14576_s30 + $0x1840] sm:$0xff]  ;;  %v1122_v5 = vld [vmem:[%s14576_s30 + $0x1848] sm:$0xff]  ;;  %1119 = vst [vmem:[%s14584_s12 + $0xc18] sm:$0xff] %v1118_v3 }
  0xd5   : > { %1121 = vst [vmem:[%s14584_s12 + $0xc20] sm:$0xff] %v1120_v4  ;;  %1123 = vst [vmem:[%s14584_s12 + $0xc28] sm:$0xff] %v1122_v5  ;;  %v1124_v6 = vld [vmem:[%s14576_s30 + $0x1860] sm:$0xff]  ;;  %v1126_v7 = vld [vmem:[%s14576_s30 + $0x1868] sm:$0xff] }
  0xd6   : > { %v1128_v8 = vld [vmem:[%s14576_s30 + $0x1880] sm:$0xff]  ;;  %1125 = vst [vmem:[%s14584_s12 + $0xc30] sm:$0xff] %v1124_v6  ;;  %1127 = vst [vmem:[%s14584_s12 + $0xc38] sm:$0xff] %v1126_v7  ;;  %v1130_v9 = vld [vmem:[%s14576_s30 + $0x1888] sm:$0xff] }
  0xd7   : > { %1129 = vst [vmem:[%s14584_s12 + $0xc40] sm:$0xff] %v1128_v8  ;;  %v1132_v10 = vld [vmem:[%s14576_s30 + $0x18a0] sm:$0xff]  ;;  %v1134_v11 = vld [vmem:[%s14576_s30 + $0x18a8] sm:$0xff]  ;;  %1131 = vst [vmem:[%s14584_s12 + $0xc48] sm:$0xff] %v1130_v9 }
  0xd8   : > { %1133 = vst [vmem:[%s14584_s12 + $0xc50] sm:$0xff] %v1132_v10  ;;  %1135 = vst [vmem:[%s14584_s12 + $0xc58] sm:$0xff] %v1134_v11  ;;  %v1136_v12 = vld [vmem:[%s14576_s30 + $0x18c0] sm:$0xff]  ;;  %v1138_v13 = vld [vmem:[%s14576_s30 + $0x18c8] sm:$0xff] }
  0xd9   : > { %v1140_v14 = vld [vmem:[%s14576_s30 + $0x18e0] sm:$0xff]  ;;  %1137 = vst [vmem:[%s14584_s12 + $0xc60] sm:$0xff] %v1136_v12  ;;  %1139 = vst [vmem:[%s14584_s12 + $0xc68] sm:$0xff] %v1138_v13  ;;  %v1142_v15 = vld [vmem:[%s14576_s30 + $0x18e8] sm:$0xff] }
  0xda   : > { %1141 = vst [vmem:[%s14584_s12 + $0xc70] sm:$0xff] %v1140_v14  ;;  %v1144_v16 = vld [vmem:[%s14576_s30 + $0x1900] sm:$0xff]  ;;  %v1146_v17 = vld [vmem:[%s14576_s30 + $0x1908] sm:$0xff]  ;;  %1143 = vst [vmem:[%s14584_s12 + $0xc78] sm:$0xff] %v1142_v15 }
  0xdb   : > { %1145 = vst [vmem:[%s14584_s12 + $0xc80] sm:$0xff] %v1144_v16  ;;  %1147 = vst [vmem:[%s14584_s12 + $0xc88] sm:$0xff] %v1146_v17  ;;  %v1148_v18 = vld [vmem:[%s14576_s30 + $0x1920] sm:$0xff]  ;;  %v1150_v19 = vld [vmem:[%s14576_s30 + $0x1928] sm:$0xff] }
  0xdc   : > { %v1152_v20 = vld [vmem:[%s14576_s30 + $0x1940] sm:$0xff]  ;;  %1149 = vst [vmem:[%s14584_s12 + $0xc90] sm:$0xff] %v1148_v18  ;;  %1151 = vst [vmem:[%s14584_s12 + $0xc98] sm:$0xff] %v1150_v19  ;;  %v1154_v21 = vld [vmem:[%s14576_s30 + $0x1948] sm:$0xff] }
  0xdd   : > { %1153 = vst [vmem:[%s14584_s12 + $0xca0] sm:$0xff] %v1152_v20  ;;  %v1156_v22 = vld [vmem:[%s14576_s30 + $0x1960] sm:$0xff]  ;;  %v1158_v23 = vld [vmem:[%s14576_s30 + $0x1968] sm:$0xff]  ;;  %1155 = vst [vmem:[%s14584_s12 + $0xca8] sm:$0xff] %v1154_v21 }
  0xde   : > { %1157 = vst [vmem:[%s14584_s12 + $0xcb0] sm:$0xff] %v1156_v22  ;;  %1159 = vst [vmem:[%s14584_s12 + $0xcb8] sm:$0xff] %v1158_v23  ;;  %v1160_v24 = vld [vmem:[%s14576_s30 + $0x1980] sm:$0xff]  ;;  %v1162_v25 = vld [vmem:[%s14576_s30 + $0x1988] sm:$0xff] }
  0xdf   : > { %v1164_v26 = vld [vmem:[%s14576_s30 + $0x19a0] sm:$0xff]  ;;  %1161 = vst [vmem:[%s14584_s12 + $0xcc0] sm:$0xff] %v1160_v24  ;;  %1163 = vst [vmem:[%s14584_s12 + $0xcc8] sm:$0xff] %v1162_v25  ;;  %v1166_v27 = vld [vmem:[%s14576_s30 + $0x19a8] sm:$0xff] }
  0xe0   : > { %1165 = vst [vmem:[%s14584_s12 + $0xcd0] sm:$0xff] %v1164_v26  ;;  %v1168_v28 = vld [vmem:[%s14576_s30 + $0x19c0] sm:$0xff]  ;;  %v1170_v29 = vld [vmem:[%s14576_s30 + $0x19c8] sm:$0xff]  ;;  %1167 = vst [vmem:[%s14584_s12 + $0xcd8] sm:$0xff] %v1166_v27 }
  0xe1   : > { %1169 = vst [vmem:[%s14584_s12 + $0xce0] sm:$0xff] %v1168_v28  ;;  %1171 = vst [vmem:[%s14584_s12 + $0xce8] sm:$0xff] %v1170_v29  ;;  %v1172_v30 = vld [vmem:[%s14576_s30 + $0x19e0] sm:$0xff]  ;;  %v1174_v31 = vld [vmem:[%s14576_s30 + $0x19e8] sm:$0xff] }
  0xe2   : > { %v1176_v32 = vld [vmem:[%s14576_s30 + $0x1a00] sm:$0xff]  ;;  %1173 = vst [vmem:[%s14584_s12 + $0xcf0] sm:$0xff] %v1172_v30  ;;  %1175 = vst [vmem:[%s14584_s12 + $0xcf8] sm:$0xff] %v1174_v31  ;;  %v1178_v33 = vld [vmem:[%s14576_s30 + $0x1a08] sm:$0xff] }
  0xe3   : > { %1177 = vst [vmem:[%s14584_s12 + $0xd00] sm:$0xff] %v1176_v32  ;;  %v1180_v34 = vld [vmem:[%s14576_s30 + $0x1a20] sm:$0xff]  ;;  %v1182_v35 = vld [vmem:[%s14576_s30 + $0x1a28] sm:$0xff]  ;;  %1179 = vst [vmem:[%s14584_s12 + $0xd08] sm:$0xff] %v1178_v33 }
  0xe4   : > { %1181 = vst [vmem:[%s14584_s12 + $0xd10] sm:$0xff] %v1180_v34  ;;  %1183 = vst [vmem:[%s14584_s12 + $0xd18] sm:$0xff] %v1182_v35  ;;  %v1184_v36 = vld [vmem:[%s14576_s30 + $0x1a40] sm:$0xff]  ;;  %v1186_v37 = vld [vmem:[%s14576_s30 + $0x1a48] sm:$0xff] }
  0xe5   : > { %v1188_v38 = vld [vmem:[%s14576_s30 + $0x1a60] sm:$0xff]  ;;  %1185 = vst [vmem:[%s14584_s12 + $0xd20] sm:$0xff] %v1184_v36  ;;  %1187 = vst [vmem:[%s14584_s12 + $0xd28] sm:$0xff] %v1186_v37  ;;  %v1190_v39 = vld [vmem:[%s14576_s30 + $0x1a68] sm:$0xff] }
  0xe6   : > { %1189 = vst [vmem:[%s14584_s12 + $0xd30] sm:$0xff] %v1188_v38  ;;  %v1192_v40 = vld [vmem:[%s14576_s30 + $0x1a80] sm:$0xff]  ;;  %v1194_v41 = vld [vmem:[%s14576_s30 + $0x1a88] sm:$0xff]  ;;  %1191 = vst [vmem:[%s14584_s12 + $0xd38] sm:$0xff] %v1190_v39 }
  0xe7   : > { %1193 = vst [vmem:[%s14584_s12 + $0xd40] sm:$0xff] %v1192_v40  ;;  %1195 = vst [vmem:[%s14584_s12 + $0xd48] sm:$0xff] %v1194_v41  ;;  %v1196_v42 = vld [vmem:[%s14576_s30 + $0x1aa0] sm:$0xff]  ;;  %v1198_v43 = vld [vmem:[%s14576_s30 + $0x1aa8] sm:$0xff] }
  0xe8   : > { %v1200_v44 = vld [vmem:[%s14576_s30 + $0x1ac0] sm:$0xff]  ;;  %1197 = vst [vmem:[%s14584_s12 + $0xd50] sm:$0xff] %v1196_v42  ;;  %1199 = vst [vmem:[%s14584_s12 + $0xd58] sm:$0xff] %v1198_v43  ;;  %v1202_v45 = vld [vmem:[%s14576_s30 + $0x1ac8] sm:$0xff] }
  0xe9   : > { %1201 = vst [vmem:[%s14584_s12 + $0xd60] sm:$0xff] %v1200_v44  ;;  %v1204_v46 = vld [vmem:[%s14576_s30 + $0x1ae0] sm:$0xff]  ;;  %v1206_v47 = vld [vmem:[%s14576_s30 + $0x1ae8] sm:$0xff]  ;;  %1203 = vst [vmem:[%s14584_s12 + $0xd68] sm:$0xff] %v1202_v45 }
  0xea   : > { %1205 = vst [vmem:[%s14584_s12 + $0xd70] sm:$0xff] %v1204_v46  ;;  %1207 = vst [vmem:[%s14584_s12 + $0xd78] sm:$0xff] %v1206_v47  ;;  %v1208_v48 = vld [vmem:[%s14576_s30 + $0x1b00] sm:$0xff]  ;;  %v1210_v49 = vld [vmem:[%s14576_s30 + $0x1b08] sm:$0xff] }
  0xeb   : > { %v1212_v50 = vld [vmem:[%s14576_s30 + $0x1b20] sm:$0xff]  ;;  %1209 = vst [vmem:[%s14584_s12 + $0xd80] sm:$0xff] %v1208_v48  ;;  %1211 = vst [vmem:[%s14584_s12 + $0xd88] sm:$0xff] %v1210_v49  ;;  %v1214_v51 = vld [vmem:[%s14576_s30 + $0x1b28] sm:$0xff] }
  0xec   : > { %1213 = vst [vmem:[%s14584_s12 + $0xd90] sm:$0xff] %v1212_v50  ;;  %v1216_v52 = vld [vmem:[%s14576_s30 + $0x1b40] sm:$0xff]  ;;  %v1218_v53 = vld [vmem:[%s14576_s30 + $0x1b48] sm:$0xff]  ;;  %1215 = vst [vmem:[%s14584_s12 + $0xd98] sm:$0xff] %v1214_v51 }
  0xed   : > { %1217 = vst [vmem:[%s14584_s12 + $0xda0] sm:$0xff] %v1216_v52  ;;  %1219 = vst [vmem:[%s14584_s12 + $0xda8] sm:$0xff] %v1218_v53  ;;  %v1220_v54 = vld [vmem:[%s14576_s30 + $0x1b60] sm:$0xff]  ;;  %v1222_v55 = vld [vmem:[%s14576_s30 + $0x1b68] sm:$0xff] }
  0xee   : > { %v1224_v56 = vld [vmem:[%s14576_s30 + $0x1b80] sm:$0xff]  ;;  %1221 = vst [vmem:[%s14584_s12 + $0xdb0] sm:$0xff] %v1220_v54  ;;  %1223 = vst [vmem:[%s14584_s12 + $0xdb8] sm:$0xff] %v1222_v55  ;;  %v1226_v57 = vld [vmem:[%s14576_s30 + $0x1b88] sm:$0xff] }
  0xef   : > { %1225 = vst [vmem:[%s14584_s12 + $0xdc0] sm:$0xff] %v1224_v56  ;;  %v1228_v58 = vld [vmem:[%s14576_s30 + $0x1ba0] sm:$0xff]  ;;  %v1230_v59 = vld [vmem:[%s14576_s30 + $0x1ba8] sm:$0xff]  ;;  %1227 = vst [vmem:[%s14584_s12 + $0xdc8] sm:$0xff] %v1226_v57 }
  0xf0   : > { %1229 = vst [vmem:[%s14584_s12 + $0xdd0] sm:$0xff] %v1228_v58  ;;  %1231 = vst [vmem:[%s14584_s12 + $0xdd8] sm:$0xff] %v1230_v59  ;;  %v1232_v60 = vld [vmem:[%s14576_s30 + $0x1bc0] sm:$0xff]  ;;  %v1234_v61 = vld [vmem:[%s14576_s30 + $0x1bc8] sm:$0xff] }
  0xf1   : > { %v1236_v62 = vld [vmem:[%s14576_s30 + $0x1be0] sm:$0xff]  ;;  %1233 = vst [vmem:[%s14584_s12 + $0xde0] sm:$0xff] %v1232_v60  ;;  %1235 = vst [vmem:[%s14584_s12 + $0xde8] sm:$0xff] %v1234_v61  ;;  %v1238_v63 = vld [vmem:[%s14576_s30 + $0x1be8] sm:$0xff] }
  0xf2   : > { %1237 = vst [vmem:[%s14584_s12 + $0xdf0] sm:$0xff] %v1236_v62  ;;  %v1240_v0 = vld [vmem:[%s14576_s30 + $0x1c00] sm:$0xff]  ;;  %v1242_v1 = vld [vmem:[%s14576_s30 + $0x1c08] sm:$0xff]  ;;  %1239 = vst [vmem:[%s14584_s12 + $0xdf8] sm:$0xff] %v1238_v63 }
  0xf3   : > { %1241 = vst [vmem:[%s14584_s12 + $0xe00] sm:$0xff] %v1240_v0  ;;  %1243 = vst [vmem:[%s14584_s12 + $0xe08] sm:$0xff] %v1242_v1  ;;  %v1244_v2 = vld [vmem:[%s14576_s30 + $0x1c20] sm:$0xff]  ;;  %v1246_v3 = vld [vmem:[%s14576_s30 + $0x1c28] sm:$0xff] }
  0xf4   : > { %v1248_v4 = vld [vmem:[%s14576_s30 + $0x1c40] sm:$0xff]  ;;  %1245 = vst [vmem:[%s14584_s12 + $0xe10] sm:$0xff] %v1244_v2  ;;  %1247 = vst [vmem:[%s14584_s12 + $0xe18] sm:$0xff] %v1246_v3  ;;  %v1250_v5 = vld [vmem:[%s14576_s30 + $0x1c48] sm:$0xff] }
  0xf5   : > { %1249 = vst [vmem:[%s14584_s12 + $0xe20] sm:$0xff] %v1248_v4  ;;  %v1252_v6 = vld [vmem:[%s14576_s30 + $0x1c60] sm:$0xff]  ;;  %v1254_v7 = vld [vmem:[%s14576_s30 + $0x1c68] sm:$0xff]  ;;  %1251 = vst [vmem:[%s14584_s12 + $0xe28] sm:$0xff] %v1250_v5 }
  0xf6   : > { %1253 = vst [vmem:[%s14584_s12 + $0xe30] sm:$0xff] %v1252_v6  ;;  %1255 = vst [vmem:[%s14584_s12 + $0xe38] sm:$0xff] %v1254_v7  ;;  %v1256_v8 = vld [vmem:[%s14576_s30 + $0x1c80] sm:$0xff]  ;;  %v1258_v9 = vld [vmem:[%s14576_s30 + $0x1c88] sm:$0xff] }
  0xf7   : > { %v1260_v10 = vld [vmem:[%s14576_s30 + $0x1ca0] sm:$0xff]  ;;  %1257 = vst [vmem:[%s14584_s12 + $0xe40] sm:$0xff] %v1256_v8  ;;  %1259 = vst [vmem:[%s14584_s12 + $0xe48] sm:$0xff] %v1258_v9  ;;  %v1262_v11 = vld [vmem:[%s14576_s30 + $0x1ca8] sm:$0xff] }
  0xf8   : > { %1261 = vst [vmem:[%s14584_s12 + $0xe50] sm:$0xff] %v1260_v10  ;;  %v1264_v12 = vld [vmem:[%s14576_s30 + $0x1cc0] sm:$0xff]  ;;  %v1266_v13 = vld [vmem:[%s14576_s30 + $0x1cc8] sm:$0xff]  ;;  %1263 = vst [vmem:[%s14584_s12 + $0xe58] sm:$0xff] %v1262_v11 }
  0xf9   : > { %1265 = vst [vmem:[%s14584_s12 + $0xe60] sm:$0xff] %v1264_v12  ;;  %1267 = vst [vmem:[%s14584_s12 + $0xe68] sm:$0xff] %v1266_v13  ;;  %v1268_v14 = vld [vmem:[%s14576_s30 + $0x1ce0] sm:$0xff]  ;;  %v1270_v15 = vld [vmem:[%s14576_s30 + $0x1ce8] sm:$0xff] }
  0xfa   : > { %v1272_v16 = vld [vmem:[%s14576_s30 + $0x1d00] sm:$0xff]  ;;  %1269 = vst [vmem:[%s14584_s12 + $0xe70] sm:$0xff] %v1268_v14  ;;  %1271 = vst [vmem:[%s14584_s12 + $0xe78] sm:$0xff] %v1270_v15  ;;  %v1274_v17 = vld [vmem:[%s14576_s30 + $0x1d08] sm:$0xff] }
  0xfb   : > { %1273 = vst [vmem:[%s14584_s12 + $0xe80] sm:$0xff] %v1272_v16  ;;  %v1276_v18 = vld [vmem:[%s14576_s30 + $0x1d20] sm:$0xff]  ;;  %v1278_v19 = vld [vmem:[%s14576_s30 + $0x1d28] sm:$0xff]  ;;  %1275 = vst [vmem:[%s14584_s12 + $0xe88] sm:$0xff] %v1274_v17 }
  0xfc   : > { %1277 = vst [vmem:[%s14584_s12 + $0xe90] sm:$0xff] %v1276_v18  ;;  %1279 = vst [vmem:[%s14584_s12 + $0xe98] sm:$0xff] %v1278_v19  ;;  %v1280_v20 = vld [vmem:[%s14576_s30 + $0x1d40] sm:$0xff]  ;;  %v1282_v21 = vld [vmem:[%s14576_s30 + $0x1d48] sm:$0xff] }
  0xfd   : > { %v1284_v22 = vld [vmem:[%s14576_s30 + $0x1d60] sm:$0xff]  ;;  %1281 = vst [vmem:[%s14584_s12 + $0xea0] sm:$0xff] %v1280_v20  ;;  %1283 = vst [vmem:[%s14584_s12 + $0xea8] sm:$0xff] %v1282_v21  ;;  %v1286_v23 = vld [vmem:[%s14576_s30 + $0x1d68] sm:$0xff] }
  0xfe   : > { %1285 = vst [vmem:[%s14584_s12 + $0xeb0] sm:$0xff] %v1284_v22  ;;  %v1288_v24 = vld [vmem:[%s14576_s30 + $0x1d80] sm:$0xff]  ;;  %v1290_v25 = vld [vmem:[%s14576_s30 + $0x1d88] sm:$0xff]  ;;  %1287 = vst [vmem:[%s14584_s12 + $0xeb8] sm:$0xff] %v1286_v23 }
  0xff   : > { %1289 = vst [vmem:[%s14584_s12 + $0xec0] sm:$0xff] %v1288_v24  ;;  %1291 = vst [vmem:[%s14584_s12 + $0xec8] sm:$0xff] %v1290_v25  ;;  %v1292_v26 = vld [vmem:[%s14576_s30 + $0x1da0] sm:$0xff]  ;;  %v1294_v27 = vld [vmem:[%s14576_s30 + $0x1da8] sm:$0xff] }
 0x100   : > { %v1296_v28 = vld [vmem:[%s14576_s30 + $0x1dc0] sm:$0xff]  ;;  %1293 = vst [vmem:[%s14584_s12 + $0xed0] sm:$0xff] %v1292_v26  ;;  %1295 = vst [vmem:[%s14584_s12 + $0xed8] sm:$0xff] %v1294_v27  ;;  %v1298_v29 = vld [vmem:[%s14576_s30 + $0x1dc8] sm:$0xff] }
 0x101   : > { %1297 = vst [vmem:[%s14584_s12 + $0xee0] sm:$0xff] %v1296_v28  ;;  %v1300_v30 = vld [vmem:[%s14576_s30 + $0x1de0] sm:$0xff]  ;;  %v1302_v31 = vld [vmem:[%s14576_s30 + $0x1de8] sm:$0xff]  ;;  %1299 = vst [vmem:[%s14584_s12 + $0xee8] sm:$0xff] %v1298_v29 }
 0x102   : > { %1301 = vst [vmem:[%s14584_s12 + $0xef0] sm:$0xff] %v1300_v30  ;;  %1303 = vst [vmem:[%s14584_s12 + $0xef8] sm:$0xff] %v1302_v31  ;;  %v1304_v32 = vld [vmem:[%s14576_s30 + $0x1e00] sm:$0xff]  ;;  %v1306_v33 = vld [vmem:[%s14576_s30 + $0x1e08] sm:$0xff] }
 0x103   : > { %v1308_v34 = vld [vmem:[%s14576_s30 + $0x1e20] sm:$0xff]  ;;  %1305 = vst [vmem:[%s14584_s12 + $0xf00] sm:$0xff] %v1304_v32  ;;  %1307 = vst [vmem:[%s14584_s12 + $0xf08] sm:$0xff] %v1306_v33  ;;  %v1310_v35 = vld [vmem:[%s14576_s30 + $0x1e28] sm:$0xff] }
 0x104   : > { %1309 = vst [vmem:[%s14584_s12 + $0xf10] sm:$0xff] %v1308_v34  ;;  %v1312_v36 = vld [vmem:[%s14576_s30 + $0x1e40] sm:$0xff]  ;;  %v1314_v37 = vld [vmem:[%s14576_s30 + $0x1e48] sm:$0xff]  ;;  %1311 = vst [vmem:[%s14584_s12 + $0xf18] sm:$0xff] %v1310_v35 }
 0x105   : > { %1313 = vst [vmem:[%s14584_s12 + $0xf20] sm:$0xff] %v1312_v36  ;;  %1315 = vst [vmem:[%s14584_s12 + $0xf28] sm:$0xff] %v1314_v37  ;;  %v1316_v38 = vld [vmem:[%s14576_s30 + $0x1e60] sm:$0xff]  ;;  %v1318_v39 = vld [vmem:[%s14576_s30 + $0x1e68] sm:$0xff] }
 0x106   : > { %v1320_v40 = vld [vmem:[%s14576_s30 + $0x1e80] sm:$0xff]  ;;  %1317 = vst [vmem:[%s14584_s12 + $0xf30] sm:$0xff] %v1316_v38  ;;  %1319 = vst [vmem:[%s14584_s12 + $0xf38] sm:$0xff] %v1318_v39  ;;  %v1322_v41 = vld [vmem:[%s14576_s30 + $0x1e88] sm:$0xff] }
 0x107   : > { %1321 = vst [vmem:[%s14584_s12 + $0xf40] sm:$0xff] %v1320_v40  ;;  %v1324_v42 = vld [vmem:[%s14576_s30 + $0x1ea0] sm:$0xff]  ;;  %v1326_v43 = vld [vmem:[%s14576_s30 + $0x1ea8] sm:$0xff]  ;;  %1323 = vst [vmem:[%s14584_s12 + $0xf48] sm:$0xff] %v1322_v41 }
 0x108   : > { %1325 = vst [vmem:[%s14584_s12 + $0xf50] sm:$0xff] %v1324_v42  ;;  %1327 = vst [vmem:[%s14584_s12 + $0xf58] sm:$0xff] %v1326_v43  ;;  %v1328_v44 = vld [vmem:[%s14576_s30 + $0x1ec0] sm:$0xff]  ;;  %v1330_v45 = vld [vmem:[%s14576_s30 + $0x1ec8] sm:$0xff] }
 0x109   : > { %v1332_v46 = vld [vmem:[%s14576_s30 + $0x1ee0] sm:$0xff]  ;;  %1329 = vst [vmem:[%s14584_s12 + $0xf60] sm:$0xff] %v1328_v44  ;;  %1331 = vst [vmem:[%s14584_s12 + $0xf68] sm:$0xff] %v1330_v45  ;;  %v1334_v47 = vld [vmem:[%s14576_s30 + $0x1ee8] sm:$0xff] }
 0x10a   : > { %1333 = vst [vmem:[%s14584_s12 + $0xf70] sm:$0xff] %v1332_v46  ;;  %v1336_v48 = vld [vmem:[%s14576_s30 + $0x1f00] sm:$0xff]  ;;  %v1338_v49 = vld [vmem:[%s14576_s30 + $0x1f08] sm:$0xff]  ;;  %1335 = vst [vmem:[%s14584_s12 + $0xf78] sm:$0xff] %v1334_v47 }
 0x10b   : > { %1337 = vst [vmem:[%s14584_s12 + $0xf80] sm:$0xff] %v1336_v48  ;;  %1339 = vst [vmem:[%s14584_s12 + $0xf88] sm:$0xff] %v1338_v49  ;;  %v1340_v50 = vld [vmem:[%s14576_s30 + $0x1f20] sm:$0xff]  ;;  %v1342_v51 = vld [vmem:[%s14576_s30 + $0x1f28] sm:$0xff] }
 0x10c   : > { %v1344_v52 = vld [vmem:[%s14576_s30 + $0x1f40] sm:$0xff]  ;;  %1341 = vst [vmem:[%s14584_s12 + $0xf90] sm:$0xff] %v1340_v50  ;;  %1343 = vst [vmem:[%s14584_s12 + $0xf98] sm:$0xff] %v1342_v51  ;;  %v1346_v53 = vld [vmem:[%s14576_s30 + $0x1f48] sm:$0xff] }
 0x10d   : > { %1345 = vst [vmem:[%s14584_s12 + $0xfa0] sm:$0xff] %v1344_v52  ;;  %v1348_v54 = vld [vmem:[%s14576_s30 + $0x1f60] sm:$0xff]  ;;  %v1350_v55 = vld [vmem:[%s14576_s30 + $0x1f68] sm:$0xff]  ;;  %1347 = vst [vmem:[%s14584_s12 + $0xfa8] sm:$0xff] %v1346_v53 }
 0x10e   : > { %1349 = vst [vmem:[%s14584_s12 + $0xfb0] sm:$0xff] %v1348_v54  ;;  %1351 = vst [vmem:[%s14584_s12 + $0xfb8] sm:$0xff] %v1350_v55  ;;  %v1352_v56 = vld [vmem:[%s14576_s30 + $0x1f80] sm:$0xff]  ;;  %v1354_v57 = vld [vmem:[%s14576_s30 + $0x1f88] sm:$0xff] }
 0x10f   : > { %v1356_v58 = vld [vmem:[%s14576_s30 + $0x1fa0] sm:$0xff]  ;;  %1353 = vst [vmem:[%s14584_s12 + $0xfc0] sm:$0xff] %v1352_v56  ;;  %1355 = vst [vmem:[%s14584_s12 + $0xfc8] sm:$0xff] %v1354_v57  ;;  %v1358_v59 = vld [vmem:[%s14576_s30 + $0x1fa8] sm:$0xff] }
 0x110   : > { %1357 = vst [vmem:[%s14584_s12 + $0xfd0] sm:$0xff] %v1356_v58  ;;  %v1360_v60 = vld [vmem:[%s14576_s30 + $0x1fc0] sm:$0xff]  ;;  %v1362_v61 = vld [vmem:[%s14576_s30 + $0x1fc8] sm:$0xff]  ;;  %1359 = vst [vmem:[%s14584_s12 + $0xfd8] sm:$0xff] %v1358_v59 }
 0x111   : > { %1361 = vst [vmem:[%s14584_s12 + $0xfe0] sm:$0xff] %v1360_v60  ;;  %1363 = vst [vmem:[%s14584_s12 + $0xfe8] sm:$0xff] %v1362_v61  ;;  %v1364_v62 = vld [vmem:[%s14576_s30 + $0x1fe0] sm:$0xff]  ;;  %v1366_v63 = vld [vmem:[%s14576_s30 + $0x1fe8] sm:$0xff] }
 0x112   : > { %v1368_v0 = vld [vmem:[%s14576_s30 + $0x2000] sm:$0xff]  ;;  %1365 = vst [vmem:[%s14584_s12 + $0xff0] sm:$0xff] %v1364_v62  ;;  %1367 = vst [vmem:[%s14584_s12 + $0xff8] sm:$0xff] %v1366_v63  ;;  %v1370_v1 = vld [vmem:[%s14576_s30 + $0x2008] sm:$0xff] }
 0x113   : > { %1369 = vst [vmem:[%s14584_s12 + $0x1000] sm:$0xff] %v1368_v0  ;;  %v1372_v2 = vld [vmem:[%s14576_s30 + $0x2020] sm:$0xff]  ;;  %v1374_v3 = vld [vmem:[%s14576_s30 + $0x2028] sm:$0xff]  ;;  %1371 = vst [vmem:[%s14584_s12 + $0x1008] sm:$0xff] %v1370_v1 }
 0x114   : > { %1373 = vst [vmem:[%s14584_s12 + $0x1010] sm:$0xff] %v1372_v2  ;;  %1375 = vst [vmem:[%s14584_s12 + $0x1018] sm:$0xff] %v1374_v3  ;;  %v1376_v4 = vld [vmem:[%s14576_s30 + $0x2040] sm:$0xff]  ;;  %v1378_v5 = vld [vmem:[%s14576_s30 + $0x2048] sm:$0xff] }
 0x115   : > { %v1380_v6 = vld [vmem:[%s14576_s30 + $0x2060] sm:$0xff]  ;;  %1377 = vst [vmem:[%s14584_s12 + $0x1020] sm:$0xff] %v1376_v4  ;;  %1379 = vst [vmem:[%s14584_s12 + $0x1028] sm:$0xff] %v1378_v5  ;;  %v1382_v7 = vld [vmem:[%s14576_s30 + $0x2068] sm:$0xff] }
 0x116   : > { %1381 = vst [vmem:[%s14584_s12 + $0x1030] sm:$0xff] %v1380_v6  ;;  %v1384_v8 = vld [vmem:[%s14576_s30 + $0x2080] sm:$0xff]  ;;  %v1386_v9 = vld [vmem:[%s14576_s30 + $0x2088] sm:$0xff]  ;;  %1383 = vst [vmem:[%s14584_s12 + $0x1038] sm:$0xff] %v1382_v7 }
 0x117   : > { %1385 = vst [vmem:[%s14584_s12 + $0x1040] sm:$0xff] %v1384_v8  ;;  %1387 = vst [vmem:[%s14584_s12 + $0x1048] sm:$0xff] %v1386_v9  ;;  %v1388_v10 = vld [vmem:[%s14576_s30 + $0x20a0] sm:$0xff]  ;;  %v1390_v11 = vld [vmem:[%s14576_s30 + $0x20a8] sm:$0xff] }
 0x118   : > { %v1392_v12 = vld [vmem:[%s14576_s30 + $0x20c0] sm:$0xff]  ;;  %1389 = vst [vmem:[%s14584_s12 + $0x1050] sm:$0xff] %v1388_v10  ;;  %1391 = vst [vmem:[%s14584_s12 + $0x1058] sm:$0xff] %v1390_v11  ;;  %v1394_v13 = vld [vmem:[%s14576_s30 + $0x20c8] sm:$0xff] }
 0x119   : > { %1393 = vst [vmem:[%s14584_s12 + $0x1060] sm:$0xff] %v1392_v12  ;;  %v1396_v14 = vld [vmem:[%s14576_s30 + $0x20e0] sm:$0xff]  ;;  %v1398_v15 = vld [vmem:[%s14576_s30 + $0x20e8] sm:$0xff]  ;;  %1395 = vst [vmem:[%s14584_s12 + $0x1068] sm:$0xff] %v1394_v13 }
 0x11a   : > { %1397 = vst [vmem:[%s14584_s12 + $0x1070] sm:$0xff] %v1396_v14  ;;  %1399 = vst [vmem:[%s14584_s12 + $0x1078] sm:$0xff] %v1398_v15  ;;  %v1400_v16 = vld [vmem:[%s14576_s30 + $0x2100] sm:$0xff]  ;;  %v1402_v17 = vld [vmem:[%s14576_s30 + $0x2108] sm:$0xff] }
 0x11b   : > { %v1404_v18 = vld [vmem:[%s14576_s30 + $0x2120] sm:$0xff]  ;;  %1401 = vst [vmem:[%s14584_s12 + $0x1080] sm:$0xff] %v1400_v16  ;;  %1403 = vst [vmem:[%s14584_s12 + $0x1088] sm:$0xff] %v1402_v17  ;;  %v1406_v19 = vld [vmem:[%s14576_s30 + $0x2128] sm:$0xff] }
 0x11c   : > { %1405 = vst [vmem:[%s14584_s12 + $0x1090] sm:$0xff] %v1404_v18  ;;  %v1408_v20 = vld [vmem:[%s14576_s30 + $0x2140] sm:$0xff]  ;;  %v1410_v21 = vld [vmem:[%s14576_s30 + $0x2148] sm:$0xff]  ;;  %1407 = vst [vmem:[%s14584_s12 + $0x1098] sm:$0xff] %v1406_v19 }
 0x11d   : > { %1409 = vst [vmem:[%s14584_s12 + $0x10a0] sm:$0xff] %v1408_v20  ;;  %1411 = vst [vmem:[%s14584_s12 + $0x10a8] sm:$0xff] %v1410_v21  ;;  %v1412_v22 = vld [vmem:[%s14576_s30 + $0x2160] sm:$0xff]  ;;  %v1414_v23 = vld [vmem:[%s14576_s30 + $0x2168] sm:$0xff] }
 0x11e   : > { %v1416_v24 = vld [vmem:[%s14576_s30 + $0x2180] sm:$0xff]  ;;  %1413 = vst [vmem:[%s14584_s12 + $0x10b0] sm:$0xff] %v1412_v22  ;;  %1415 = vst [vmem:[%s14584_s12 + $0x10b8] sm:$0xff] %v1414_v23  ;;  %v1418_v25 = vld [vmem:[%s14576_s30 + $0x2188] sm:$0xff] }
 0x11f   : > { %1417 = vst [vmem:[%s14584_s12 + $0x10c0] sm:$0xff] %v1416_v24  ;;  %v1420_v26 = vld [vmem:[%s14576_s30 + $0x21a0] sm:$0xff]  ;;  %v1422_v27 = vld [vmem:[%s14576_s30 + $0x21a8] sm:$0xff]  ;;  %1419 = vst [vmem:[%s14584_s12 + $0x10c8] sm:$0xff] %v1418_v25 }
 0x120   : > { %1421 = vst [vmem:[%s14584_s12 + $0x10d0] sm:$0xff] %v1420_v26  ;;  %1423 = vst [vmem:[%s14584_s12 + $0x10d8] sm:$0xff] %v1422_v27  ;;  %v1424_v28 = vld [vmem:[%s14576_s30 + $0x21c0] sm:$0xff]  ;;  %v1426_v29 = vld [vmem:[%s14576_s30 + $0x21c8] sm:$0xff] }
 0x121   : > { %v1428_v30 = vld [vmem:[%s14576_s30 + $0x21e0] sm:$0xff]  ;;  %1425 = vst [vmem:[%s14584_s12 + $0x10e0] sm:$0xff] %v1424_v28  ;;  %1427 = vst [vmem:[%s14584_s12 + $0x10e8] sm:$0xff] %v1426_v29  ;;  %v1430_v31 = vld [vmem:[%s14576_s30 + $0x21e8] sm:$0xff] }
 0x122   : > { %1429 = vst [vmem:[%s14584_s12 + $0x10f0] sm:$0xff] %v1428_v30  ;;  %v1432_v32 = vld [vmem:[%s14576_s30 + $0x2200] sm:$0xff]  ;;  %v1434_v33 = vld [vmem:[%s14576_s30 + $0x2208] sm:$0xff]  ;;  %1431 = vst [vmem:[%s14584_s12 + $0x10f8] sm:$0xff] %v1430_v31 }
 0x123   : > { %1433 = vst [vmem:[%s14584_s12 + $0x1100] sm:$0xff] %v1432_v32  ;;  %1435 = vst [vmem:[%s14584_s12 + $0x1108] sm:$0xff] %v1434_v33  ;;  %v1436_v34 = vld [vmem:[%s14576_s30 + $0x2220] sm:$0xff]  ;;  %v1438_v35 = vld [vmem:[%s14576_s30 + $0x2228] sm:$0xff] }
 0x124   : > { %v1440_v36 = vld [vmem:[%s14576_s30 + $0x2240] sm:$0xff]  ;;  %1437 = vst [vmem:[%s14584_s12 + $0x1110] sm:$0xff] %v1436_v34  ;;  %1439 = vst [vmem:[%s14584_s12 + $0x1118] sm:$0xff] %v1438_v35  ;;  %v1442_v37 = vld [vmem:[%s14576_s30 + $0x2248] sm:$0xff] }
 0x125   : > { %1441 = vst [vmem:[%s14584_s12 + $0x1120] sm:$0xff] %v1440_v36  ;;  %v1444_v38 = vld [vmem:[%s14576_s30 + $0x2260] sm:$0xff]  ;;  %v1446_v39 = vld [vmem:[%s14576_s30 + $0x2268] sm:$0xff]  ;;  %1443 = vst [vmem:[%s14584_s12 + $0x1128] sm:$0xff] %v1442_v37 }
 0x126   : > { %1445 = vst [vmem:[%s14584_s12 + $0x1130] sm:$0xff] %v1444_v38  ;;  %1447 = vst [vmem:[%s14584_s12 + $0x1138] sm:$0xff] %v1446_v39  ;;  %v1448_v40 = vld [vmem:[%s14576_s30 + $0x2280] sm:$0xff]  ;;  %v1450_v41 = vld [vmem:[%s14576_s30 + $0x2288] sm:$0xff] }
 0x127   : > { %v1452_v42 = vld [vmem:[%s14576_s30 + $0x22a0] sm:$0xff]  ;;  %1449 = vst [vmem:[%s14584_s12 + $0x1140] sm:$0xff] %v1448_v40  ;;  %1451 = vst [vmem:[%s14584_s12 + $0x1148] sm:$0xff] %v1450_v41  ;;  %v1454_v43 = vld [vmem:[%s14576_s30 + $0x22a8] sm:$0xff] }
 0x128   : > { %1453 = vst [vmem:[%s14584_s12 + $0x1150] sm:$0xff] %v1452_v42  ;;  %v1456_v44 = vld [vmem:[%s14576_s30 + $0x22c0] sm:$0xff]  ;;  %v1458_v45 = vld [vmem:[%s14576_s30 + $0x22c8] sm:$0xff]  ;;  %1455 = vst [vmem:[%s14584_s12 + $0x1158] sm:$0xff] %v1454_v43 }
 0x129   : > { %1457 = vst [vmem:[%s14584_s12 + $0x1160] sm:$0xff] %v1456_v44  ;;  %1459 = vst [vmem:[%s14584_s12 + $0x1168] sm:$0xff] %v1458_v45  ;;  %v1460_v46 = vld [vmem:[%s14576_s30 + $0x22e0] sm:$0xff]  ;;  %v1462_v47 = vld [vmem:[%s14576_s30 + $0x22e8] sm:$0xff] }
 0x12a   : > { %v1464_v48 = vld [vmem:[%s14576_s30 + $0x2300] sm:$0xff]  ;;  %1461 = vst [vmem:[%s14584_s12 + $0x1170] sm:$0xff] %v1460_v46  ;;  %1463 = vst [vmem:[%s14584_s12 + $0x1178] sm:$0xff] %v1462_v47  ;;  %v1466_v49 = vld [vmem:[%s14576_s30 + $0x2308] sm:$0xff] }
 0x12b   : > { %1465 = vst [vmem:[%s14584_s12 + $0x1180] sm:$0xff] %v1464_v48  ;;  %v1468_v50 = vld [vmem:[%s14576_s30 + $0x2320] sm:$0xff]  ;;  %v1470_v51 = vld [vmem:[%s14576_s30 + $0x2328] sm:$0xff]  ;;  %1467 = vst [vmem:[%s14584_s12 + $0x1188] sm:$0xff] %v1466_v49 }
 0x12c   : > { %1469 = vst [vmem:[%s14584_s12 + $0x1190] sm:$0xff] %v1468_v50  ;;  %1471 = vst [vmem:[%s14584_s12 + $0x1198] sm:$0xff] %v1470_v51  ;;  %v1472_v52 = vld [vmem:[%s14576_s30 + $0x2340] sm:$0xff]  ;;  %v1474_v53 = vld [vmem:[%s14576_s30 + $0x2348] sm:$0xff] }
 0x12d   : > { %v1476_v54 = vld [vmem:[%s14576_s30 + $0x2360] sm:$0xff]  ;;  %1473 = vst [vmem:[%s14584_s12 + $0x11a0] sm:$0xff] %v1472_v52  ;;  %1475 = vst [vmem:[%s14584_s12 + $0x11a8] sm:$0xff] %v1474_v53  ;;  %v1478_v55 = vld [vmem:[%s14576_s30 + $0x2368] sm:$0xff] }
 0x12e   : > { %1477 = vst [vmem:[%s14584_s12 + $0x11b0] sm:$0xff] %v1476_v54  ;;  %v1480_v56 = vld [vmem:[%s14576_s30 + $0x2380] sm:$0xff]  ;;  %v1482_v57 = vld [vmem:[%s14576_s30 + $0x2388] sm:$0xff]  ;;  %1479 = vst [vmem:[%s14584_s12 + $0x11b8] sm:$0xff] %v1478_v55 }
 0x12f   : > { %1481 = vst [vmem:[%s14584_s12 + $0x11c0] sm:$0xff] %v1480_v56  ;;  %1483 = vst [vmem:[%s14584_s12 + $0x11c8] sm:$0xff] %v1482_v57  ;;  %v1484_v58 = vld [vmem:[%s14576_s30 + $0x23a0] sm:$0xff]  ;;  %v1486_v59 = vld [vmem:[%s14576_s30 + $0x23a8] sm:$0xff] }
 0x130   : > { %v1488_v60 = vld [vmem:[%s14576_s30 + $0x23c0] sm:$0xff]  ;;  %1485 = vst [vmem:[%s14584_s12 + $0x11d0] sm:$0xff] %v1484_v58  ;;  %1487 = vst [vmem:[%s14584_s12 + $0x11d8] sm:$0xff] %v1486_v59  ;;  %v1490_v61 = vld [vmem:[%s14576_s30 + $0x23c8] sm:$0xff] }
 0x131   : > { %1489 = vst [vmem:[%s14584_s12 + $0x11e0] sm:$0xff] %v1488_v60  ;;  %v1492_v62 = vld [vmem:[%s14576_s30 + $0x23e0] sm:$0xff]  ;;  %v1494_v63 = vld [vmem:[%s14576_s30 + $0x23e8] sm:$0xff]  ;;  %1491 = vst [vmem:[%s14584_s12 + $0x11e8] sm:$0xff] %v1490_v61 }
 0x132   : > { %1493 = vst [vmem:[%s14584_s12 + $0x11f0] sm:$0xff] %v1492_v62  ;;  %1495 = vst [vmem:[%s14584_s12 + $0x11f8] sm:$0xff] %v1494_v63  ;;  %v1496_v0 = vld [vmem:[%s14576_s30 + $0x2400] sm:$0xff]  ;;  %v1498_v1 = vld [vmem:[%s14576_s30 + $0x2408] sm:$0xff] }
 0x133   : > { %v1500_v2 = vld [vmem:[%s14576_s30 + $0x2420] sm:$0xff]  ;;  %1497 = vst [vmem:[%s14584_s12 + $0x1200] sm:$0xff] %v1496_v0  ;;  %1499 = vst [vmem:[%s14584_s12 + $0x1208] sm:$0xff] %v1498_v1  ;;  %v1502_v3 = vld [vmem:[%s14576_s30 + $0x2428] sm:$0xff] }
 0x134   : > { %1501 = vst [vmem:[%s14584_s12 + $0x1210] sm:$0xff] %v1500_v2  ;;  %v1504_v4 = vld [vmem:[%s14576_s30 + $0x2440] sm:$0xff]  ;;  %v1506_v5 = vld [vmem:[%s14576_s30 + $0x2448] sm:$0xff]  ;;  %1503 = vst [vmem:[%s14584_s12 + $0x1218] sm:$0xff] %v1502_v3 }
 0x135   : > { %1505 = vst [vmem:[%s14584_s12 + $0x1220] sm:$0xff] %v1504_v4  ;;  %1507 = vst [vmem:[%s14584_s12 + $0x1228] sm:$0xff] %v1506_v5  ;;  %v1508_v6 = vld [vmem:[%s14576_s30 + $0x2460] sm:$0xff]  ;;  %v1510_v7 = vld [vmem:[%s14576_s30 + $0x2468] sm:$0xff] }
 0x136   : > { %v1512_v8 = vld [vmem:[%s14576_s30 + $0x2480] sm:$0xff]  ;;  %1509 = vst [vmem:[%s14584_s12 + $0x1230] sm:$0xff] %v1508_v6  ;;  %1511 = vst [vmem:[%s14584_s12 + $0x1238] sm:$0xff] %v1510_v7  ;;  %v1514_v9 = vld [vmem:[%s14576_s30 + $0x2488] sm:$0xff] }
 0x137   : > { %1513 = vst [vmem:[%s14584_s12 + $0x1240] sm:$0xff] %v1512_v8  ;;  %v1516_v10 = vld [vmem:[%s14576_s30 + $0x24a0] sm:$0xff]  ;;  %v1518_v11 = vld [vmem:[%s14576_s30 + $0x24a8] sm:$0xff]  ;;  %1515 = vst [vmem:[%s14584_s12 + $0x1248] sm:$0xff] %v1514_v9 }
 0x138   : > { %1517 = vst [vmem:[%s14584_s12 + $0x1250] sm:$0xff] %v1516_v10  ;;  %1519 = vst [vmem:[%s14584_s12 + $0x1258] sm:$0xff] %v1518_v11  ;;  %v1520_v12 = vld [vmem:[%s14576_s30 + $0x24c0] sm:$0xff]  ;;  %v1522_v13 = vld [vmem:[%s14576_s30 + $0x24c8] sm:$0xff] }
 0x139   : > { %v1524_v14 = vld [vmem:[%s14576_s30 + $0x24e0] sm:$0xff]  ;;  %1521 = vst [vmem:[%s14584_s12 + $0x1260] sm:$0xff] %v1520_v12  ;;  %1523 = vst [vmem:[%s14584_s12 + $0x1268] sm:$0xff] %v1522_v13  ;;  %v1526_v15 = vld [vmem:[%s14576_s30 + $0x24e8] sm:$0xff] }
 0x13a   : > { %1525 = vst [vmem:[%s14584_s12 + $0x1270] sm:$0xff] %v1524_v14  ;;  %v1528_v16 = vld [vmem:[%s14576_s30 + $0x2500] sm:$0xff]  ;;  %v1530_v17 = vld [vmem:[%s14576_s30 + $0x2508] sm:$0xff]  ;;  %1527 = vst [vmem:[%s14584_s12 + $0x1278] sm:$0xff] %v1526_v15 }
 0x13b   : > { %1529 = vst [vmem:[%s14584_s12 + $0x1280] sm:$0xff] %v1528_v16  ;;  %1531 = vst [vmem:[%s14584_s12 + $0x1288] sm:$0xff] %v1530_v17  ;;  %v1532_v18 = vld [vmem:[%s14576_s30 + $0x2520] sm:$0xff]  ;;  %v1534_v19 = vld [vmem:[%s14576_s30 + $0x2528] sm:$0xff] }
 0x13c   : > { %v1536_v20 = vld [vmem:[%s14576_s30 + $0x2540] sm:$0xff]  ;;  %1533 = vst [vmem:[%s14584_s12 + $0x1290] sm:$0xff] %v1532_v18  ;;  %1535 = vst [vmem:[%s14584_s12 + $0x1298] sm:$0xff] %v1534_v19  ;;  %v1538_v21 = vld [vmem:[%s14576_s30 + $0x2548] sm:$0xff] }
 0x13d   : > { %1537 = vst [vmem:[%s14584_s12 + $0x12a0] sm:$0xff] %v1536_v20  ;;  %v1540_v22 = vld [vmem:[%s14576_s30 + $0x2560] sm:$0xff]  ;;  %v1542_v23 = vld [vmem:[%s14576_s30 + $0x2568] sm:$0xff]  ;;  %1539 = vst [vmem:[%s14584_s12 + $0x12a8] sm:$0xff] %v1538_v21 }
 0x13e   : > { %1541 = vst [vmem:[%s14584_s12 + $0x12b0] sm:$0xff] %v1540_v22  ;;  %1543 = vst [vmem:[%s14584_s12 + $0x12b8] sm:$0xff] %v1542_v23  ;;  %v1544_v24 = vld [vmem:[%s14576_s30 + $0x2580] sm:$0xff]  ;;  %v1546_v25 = vld [vmem:[%s14576_s30 + $0x2588] sm:$0xff] }
 0x13f   : > { %v1548_v26 = vld [vmem:[%s14576_s30 + $0x25a0] sm:$0xff]  ;;  %1545 = vst [vmem:[%s14584_s12 + $0x12c0] sm:$0xff] %v1544_v24  ;;  %1547 = vst [vmem:[%s14584_s12 + $0x12c8] sm:$0xff] %v1546_v25  ;;  %v1550_v27 = vld [vmem:[%s14576_s30 + $0x25a8] sm:$0xff] }
 0x140   : > { %1549 = vst [vmem:[%s14584_s12 + $0x12d0] sm:$0xff] %v1548_v26  ;;  %v1552_v28 = vld [vmem:[%s14576_s30 + $0x25c0] sm:$0xff]  ;;  %v1554_v29 = vld [vmem:[%s14576_s30 + $0x25c8] sm:$0xff]  ;;  %1551 = vst [vmem:[%s14584_s12 + $0x12d8] sm:$0xff] %v1550_v27 }
 0x141   : > { %1553 = vst [vmem:[%s14584_s12 + $0x12e0] sm:$0xff] %v1552_v28  ;;  %1555 = vst [vmem:[%s14584_s12 + $0x12e8] sm:$0xff] %v1554_v29  ;;  %v1556_v30 = vld [vmem:[%s14576_s30 + $0x25e0] sm:$0xff]  ;;  %v1558_v31 = vld [vmem:[%s14576_s30 + $0x25e8] sm:$0xff] }
 0x142   : > { %v1560_v32 = vld [vmem:[%s14576_s30 + $0x2600] sm:$0xff]  ;;  %1557 = vst [vmem:[%s14584_s12 + $0x12f0] sm:$0xff] %v1556_v30  ;;  %1559 = vst [vmem:[%s14584_s12 + $0x12f8] sm:$0xff] %v1558_v31  ;;  %v1562_v33 = vld [vmem:[%s14576_s30 + $0x2608] sm:$0xff] }
 0x143   : > { %1561 = vst [vmem:[%s14584_s12 + $0x1300] sm:$0xff] %v1560_v32  ;;  %v1564_v34 = vld [vmem:[%s14576_s30 + $0x2620] sm:$0xff]  ;;  %v1566_v35 = vld [vmem:[%s14576_s30 + $0x2628] sm:$0xff]  ;;  %1563 = vst [vmem:[%s14584_s12 + $0x1308] sm:$0xff] %v1562_v33 }
 0x144   : > { %1565 = vst [vmem:[%s14584_s12 + $0x1310] sm:$0xff] %v1564_v34  ;;  %1567 = vst [vmem:[%s14584_s12 + $0x1318] sm:$0xff] %v1566_v35  ;;  %v1568_v36 = vld [vmem:[%s14576_s30 + $0x2640] sm:$0xff]  ;;  %v1570_v37 = vld [vmem:[%s14576_s30 + $0x2648] sm:$0xff] }
 0x145   : > { %v1572_v38 = vld [vmem:[%s14576_s30 + $0x2660] sm:$0xff]  ;;  %1569 = vst [vmem:[%s14584_s12 + $0x1320] sm:$0xff] %v1568_v36  ;;  %1571 = vst [vmem:[%s14584_s12 + $0x1328] sm:$0xff] %v1570_v37  ;;  %v1574_v39 = vld [vmem:[%s14576_s30 + $0x2668] sm:$0xff] }
 0x146   : > { %1573 = vst [vmem:[%s14584_s12 + $0x1330] sm:$0xff] %v1572_v38  ;;  %v1576_v40 = vld [vmem:[%s14576_s30 + $0x2680] sm:$0xff]  ;;  %v1578_v41 = vld [vmem:[%s14576_s30 + $0x2688] sm:$0xff]  ;;  %1575 = vst [vmem:[%s14584_s12 + $0x1338] sm:$0xff] %v1574_v39 }
 0x147   : > { %1577 = vst [vmem:[%s14584_s12 + $0x1340] sm:$0xff] %v1576_v40  ;;  %1579 = vst [vmem:[%s14584_s12 + $0x1348] sm:$0xff] %v1578_v41  ;;  %v1580_v42 = vld [vmem:[%s14576_s30 + $0x26a0] sm:$0xff]  ;;  %v1582_v43 = vld [vmem:[%s14576_s30 + $0x26a8] sm:$0xff] }
 0x148   : > { %v1584_v44 = vld [vmem:[%s14576_s30 + $0x26c0] sm:$0xff]  ;;  %1581 = vst [vmem:[%s14584_s12 + $0x1350] sm:$0xff] %v1580_v42  ;;  %1583 = vst [vmem:[%s14584_s12 + $0x1358] sm:$0xff] %v1582_v43  ;;  %v1586_v45 = vld [vmem:[%s14576_s30 + $0x26c8] sm:$0xff] }
 0x149   : > { %1585 = vst [vmem:[%s14584_s12 + $0x1360] sm:$0xff] %v1584_v44  ;;  %v1588_v46 = vld [vmem:[%s14576_s30 + $0x26e0] sm:$0xff]  ;;  %v1590_v47 = vld [vmem:[%s14576_s30 + $0x26e8] sm:$0xff]  ;;  %1587 = vst [vmem:[%s14584_s12 + $0x1368] sm:$0xff] %v1586_v45 }
 0x14a   : > { %1589 = vst [vmem:[%s14584_s12 + $0x1370] sm:$0xff] %v1588_v46  ;;  %1591 = vst [vmem:[%s14584_s12 + $0x1378] sm:$0xff] %v1590_v47  ;;  %v1592_v48 = vld [vmem:[%s14576_s30 + $0x2700] sm:$0xff]  ;;  %v1594_v49 = vld [vmem:[%s14576_s30 + $0x2708] sm:$0xff] }
 0x14b   : > { %v1596_v50 = vld [vmem:[%s14576_s30 + $0x2720] sm:$0xff]  ;;  %1593 = vst [vmem:[%s14584_s12 + $0x1380] sm:$0xff] %v1592_v48  ;;  %1595 = vst [vmem:[%s14584_s12 + $0x1388] sm:$0xff] %v1594_v49  ;;  %v1598_v51 = vld [vmem:[%s14576_s30 + $0x2728] sm:$0xff] }
 0x14c   : > { %1597 = vst [vmem:[%s14584_s12 + $0x1390] sm:$0xff] %v1596_v50  ;;  %v1600_v52 = vld [vmem:[%s14576_s30 + $0x2740] sm:$0xff]  ;;  %v1602_v53 = vld [vmem:[%s14576_s30 + $0x2748] sm:$0xff]  ;;  %1599 = vst [vmem:[%s14584_s12 + $0x1398] sm:$0xff] %v1598_v51 }
 0x14d   : > { %1601 = vst [vmem:[%s14584_s12 + $0x13a0] sm:$0xff] %v1600_v52  ;;  %1603 = vst [vmem:[%s14584_s12 + $0x13a8] sm:$0xff] %v1602_v53  ;;  %v1604_v54 = vld [vmem:[%s14576_s30 + $0x2760] sm:$0xff]  ;;  %v1606_v55 = vld [vmem:[%s14576_s30 + $0x2768] sm:$0xff] }
 0x14e   : > { %v1608_v56 = vld [vmem:[%s14576_s30 + $0x2780] sm:$0xff]  ;;  %1605 = vst [vmem:[%s14584_s12 + $0x13b0] sm:$0xff] %v1604_v54  ;;  %1607 = vst [vmem:[%s14584_s12 + $0x13b8] sm:$0xff] %v1606_v55  ;;  %v1610_v57 = vld [vmem:[%s14576_s30 + $0x2788] sm:$0xff] }
 0x14f   : > { %1609 = vst [vmem:[%s14584_s12 + $0x13c0] sm:$0xff] %v1608_v56  ;;  %v1612_v58 = vld [vmem:[%s14576_s30 + $0x27a0] sm:$0xff]  ;;  %v1614_v59 = vld [vmem:[%s14576_s30 + $0x27a8] sm:$0xff]  ;;  %1611 = vst [vmem:[%s14584_s12 + $0x13c8] sm:$0xff] %v1610_v57 }
 0x150   : > { %1613 = vst [vmem:[%s14584_s12 + $0x13d0] sm:$0xff] %v1612_v58  ;;  %1615 = vst [vmem:[%s14584_s12 + $0x13d8] sm:$0xff] %v1614_v59  ;;  %v1616_v60 = vld [vmem:[%s14576_s30 + $0x27c0] sm:$0xff]  ;;  %v1618_v61 = vld [vmem:[%s14576_s30 + $0x27c8] sm:$0xff] }
 0x151   : > { %v1620_v62 = vld [vmem:[%s14576_s30 + $0x27e0] sm:$0xff]  ;;  %1617 = vst [vmem:[%s14584_s12 + $0x13e0] sm:$0xff] %v1616_v60  ;;  %1619 = vst [vmem:[%s14584_s12 + $0x13e8] sm:$0xff] %v1618_v61  ;;  %v1622_v63 = vld [vmem:[%s14576_s30 + $0x27e8] sm:$0xff] }
 0x152   : > { %1621 = vst [vmem:[%s14584_s12 + $0x13f0] sm:$0xff] %v1620_v62  ;;  %v1624_v0 = vld [vmem:[%s14576_s30 + $0x2800] sm:$0xff]  ;;  %v1626_v1 = vld [vmem:[%s14576_s30 + $0x2808] sm:$0xff]  ;;  %1623 = vst [vmem:[%s14584_s12 + $0x13f8] sm:$0xff] %v1622_v63 }
 0x153   : > { %1625 = vst [vmem:[%s14584_s12 + $0x1400] sm:$0xff] %v1624_v0  ;;  %1627 = vst [vmem:[%s14584_s12 + $0x1408] sm:$0xff] %v1626_v1  ;;  %v1628_v2 = vld [vmem:[%s14576_s30 + $0x2820] sm:$0xff]  ;;  %v1630_v3 = vld [vmem:[%s14576_s30 + $0x2828] sm:$0xff] }
 0x154   : > { %v1632_v4 = vld [vmem:[%s14576_s30 + $0x2840] sm:$0xff]  ;;  %1629 = vst [vmem:[%s14584_s12 + $0x1410] sm:$0xff] %v1628_v2  ;;  %1631 = vst [vmem:[%s14584_s12 + $0x1418] sm:$0xff] %v1630_v3  ;;  %v1634_v5 = vld [vmem:[%s14576_s30 + $0x2848] sm:$0xff] }
 0x155   : > { %1633 = vst [vmem:[%s14584_s12 + $0x1420] sm:$0xff] %v1632_v4  ;;  %v1636_v6 = vld [vmem:[%s14576_s30 + $0x2860] sm:$0xff]  ;;  %v1638_v7 = vld [vmem:[%s14576_s30 + $0x2868] sm:$0xff]  ;;  %1635 = vst [vmem:[%s14584_s12 + $0x1428] sm:$0xff] %v1634_v5 }
 0x156   : > { %1637 = vst [vmem:[%s14584_s12 + $0x1430] sm:$0xff] %v1636_v6  ;;  %1639 = vst [vmem:[%s14584_s12 + $0x1438] sm:$0xff] %v1638_v7  ;;  %v1640_v8 = vld [vmem:[%s14576_s30 + $0x2880] sm:$0xff]  ;;  %v1642_v9 = vld [vmem:[%s14576_s30 + $0x2888] sm:$0xff] }
 0x157   : > { %v1644_v10 = vld [vmem:[%s14576_s30 + $0x28a0] sm:$0xff]  ;;  %1641 = vst [vmem:[%s14584_s12 + $0x1440] sm:$0xff] %v1640_v8  ;;  %1643 = vst [vmem:[%s14584_s12 + $0x1448] sm:$0xff] %v1642_v9  ;;  %v1646_v11 = vld [vmem:[%s14576_s30 + $0x28a8] sm:$0xff] }
 0x158   : > { %1645 = vst [vmem:[%s14584_s12 + $0x1450] sm:$0xff] %v1644_v10  ;;  %v1648_v12 = vld [vmem:[%s14576_s30 + $0x28c0] sm:$0xff]  ;;  %v1650_v13 = vld [vmem:[%s14576_s30 + $0x28c8] sm:$0xff]  ;;  %1647 = vst [vmem:[%s14584_s12 + $0x1458] sm:$0xff] %v1646_v11 }
 0x159   : > { %1649 = vst [vmem:[%s14584_s12 + $0x1460] sm:$0xff] %v1648_v12  ;;  %1651 = vst [vmem:[%s14584_s12 + $0x1468] sm:$0xff] %v1650_v13  ;;  %v1652_v14 = vld [vmem:[%s14576_s30 + $0x28e0] sm:$0xff]  ;;  %v1654_v15 = vld [vmem:[%s14576_s30 + $0x28e8] sm:$0xff] }
 0x15a   : > { %v1656_v16 = vld [vmem:[%s14576_s30 + $0x2900] sm:$0xff]  ;;  %1653 = vst [vmem:[%s14584_s12 + $0x1470] sm:$0xff] %v1652_v14  ;;  %1655 = vst [vmem:[%s14584_s12 + $0x1478] sm:$0xff] %v1654_v15  ;;  %v1658_v17 = vld [vmem:[%s14576_s30 + $0x2908] sm:$0xff] }
 0x15b   : > { %1657 = vst [vmem:[%s14584_s12 + $0x1480] sm:$0xff] %v1656_v16  ;;  %v1660_v18 = vld [vmem:[%s14576_s30 + $0x2920] sm:$0xff]  ;;  %v1662_v19 = vld [vmem:[%s14576_s30 + $0x2928] sm:$0xff]  ;;  %1659 = vst [vmem:[%s14584_s12 + $0x1488] sm:$0xff] %v1658_v17 }
 0x15c   : > { %1661 = vst [vmem:[%s14584_s12 + $0x1490] sm:$0xff] %v1660_v18  ;;  %1663 = vst [vmem:[%s14584_s12 + $0x1498] sm:$0xff] %v1662_v19  ;;  %v1664_v20 = vld [vmem:[%s14576_s30 + $0x2940] sm:$0xff]  ;;  %v1666_v21 = vld [vmem:[%s14576_s30 + $0x2948] sm:$0xff] }
 0x15d   : > { %v1668_v22 = vld [vmem:[%s14576_s30 + $0x2960] sm:$0xff]  ;;  %1665 = vst [vmem:[%s14584_s12 + $0x14a0] sm:$0xff] %v1664_v20  ;;  %1667 = vst [vmem:[%s14584_s12 + $0x14a8] sm:$0xff] %v1666_v21  ;;  %v1670_v23 = vld [vmem:[%s14576_s30 + $0x2968] sm:$0xff] }
 0x15e   : > { %1669 = vst [vmem:[%s14584_s12 + $0x14b0] sm:$0xff] %v1668_v22  ;;  %v1672_v24 = vld [vmem:[%s14576_s30 + $0x2980] sm:$0xff]  ;;  %v1674_v25 = vld [vmem:[%s14576_s30 + $0x2988] sm:$0xff]  ;;  %1671 = vst [vmem:[%s14584_s12 + $0x14b8] sm:$0xff] %v1670_v23 }
 0x15f   : > { %1673 = vst [vmem:[%s14584_s12 + $0x14c0] sm:$0xff] %v1672_v24  ;;  %1675 = vst [vmem:[%s14584_s12 + $0x14c8] sm:$0xff] %v1674_v25  ;;  %v1676_v26 = vld [vmem:[%s14576_s30 + $0x29a0] sm:$0xff]  ;;  %v1678_v27 = vld [vmem:[%s14576_s30 + $0x29a8] sm:$0xff] }
 0x160   : > { %v1680_v28 = vld [vmem:[%s14576_s30 + $0x29c0] sm:$0xff]  ;;  %1677 = vst [vmem:[%s14584_s12 + $0x14d0] sm:$0xff] %v1676_v26  ;;  %1679 = vst [vmem:[%s14584_s12 + $0x14d8] sm:$0xff] %v1678_v27  ;;  %v1682_v29 = vld [vmem:[%s14576_s30 + $0x29c8] sm:$0xff] }
 0x161   : > { %1681 = vst [vmem:[%s14584_s12 + $0x14e0] sm:$0xff] %v1680_v28  ;;  %v1684_v30 = vld [vmem:[%s14576_s30 + $0x29e0] sm:$0xff]  ;;  %v1686_v31 = vld [vmem:[%s14576_s30 + $0x29e8] sm:$0xff]  ;;  %1683 = vst [vmem:[%s14584_s12 + $0x14e8] sm:$0xff] %v1682_v29 }
 0x162   : > { %1685 = vst [vmem:[%s14584_s12 + $0x14f0] sm:$0xff] %v1684_v30  ;;  %1687 = vst [vmem:[%s14584_s12 + $0x14f8] sm:$0xff] %v1686_v31  ;;  %v1688_v32 = vld [vmem:[%s14576_s30 + $0x2a00] sm:$0xff]  ;;  %v1690_v33 = vld [vmem:[%s14576_s30 + $0x2a08] sm:$0xff] }
 0x163   : > { %v1692_v34 = vld [vmem:[%s14576_s30 + $0x2a20] sm:$0xff]  ;;  %1689 = vst [vmem:[%s14584_s12 + $0x1500] sm:$0xff] %v1688_v32  ;;  %1691 = vst [vmem:[%s14584_s12 + $0x1508] sm:$0xff] %v1690_v33  ;;  %v1694_v35 = vld [vmem:[%s14576_s30 + $0x2a28] sm:$0xff] }
 0x164   : > { %1693 = vst [vmem:[%s14584_s12 + $0x1510] sm:$0xff] %v1692_v34  ;;  %v1696_v36 = vld [vmem:[%s14576_s30 + $0x2a40] sm:$0xff]  ;;  %v1698_v37 = vld [vmem:[%s14576_s30 + $0x2a48] sm:$0xff]  ;;  %1695 = vst [vmem:[%s14584_s12 + $0x1518] sm:$0xff] %v1694_v35 }
 0x165   : > { %1697 = vst [vmem:[%s14584_s12 + $0x1520] sm:$0xff] %v1696_v36  ;;  %1699 = vst [vmem:[%s14584_s12 + $0x1528] sm:$0xff] %v1698_v37  ;;  %v1700_v38 = vld [vmem:[%s14576_s30 + $0x2a60] sm:$0xff]  ;;  %v1702_v39 = vld [vmem:[%s14576_s30 + $0x2a68] sm:$0xff] }
 0x166   : > { %v1704_v40 = vld [vmem:[%s14576_s30 + $0x2a80] sm:$0xff]  ;;  %1701 = vst [vmem:[%s14584_s12 + $0x1530] sm:$0xff] %v1700_v38  ;;  %1703 = vst [vmem:[%s14584_s12 + $0x1538] sm:$0xff] %v1702_v39  ;;  %v1706_v41 = vld [vmem:[%s14576_s30 + $0x2a88] sm:$0xff] }
 0x167   : > { %1705 = vst [vmem:[%s14584_s12 + $0x1540] sm:$0xff] %v1704_v40  ;;  %v1708_v42 = vld [vmem:[%s14576_s30 + $0x2aa0] sm:$0xff]  ;;  %v1710_v43 = vld [vmem:[%s14576_s30 + $0x2aa8] sm:$0xff]  ;;  %1707 = vst [vmem:[%s14584_s12 + $0x1548] sm:$0xff] %v1706_v41 }
 0x168   : > { %1709 = vst [vmem:[%s14584_s12 + $0x1550] sm:$0xff] %v1708_v42  ;;  %1711 = vst [vmem:[%s14584_s12 + $0x1558] sm:$0xff] %v1710_v43  ;;  %v1712_v44 = vld [vmem:[%s14576_s30 + $0x2ac0] sm:$0xff]  ;;  %v1714_v45 = vld [vmem:[%s14576_s30 + $0x2ac8] sm:$0xff] }
 0x169   : > { %v1716_v46 = vld [vmem:[%s14576_s30 + $0x2ae0] sm:$0xff]  ;;  %1713 = vst [vmem:[%s14584_s12 + $0x1560] sm:$0xff] %v1712_v44  ;;  %1715 = vst [vmem:[%s14584_s12 + $0x1568] sm:$0xff] %v1714_v45  ;;  %v1718_v47 = vld [vmem:[%s14576_s30 + $0x2ae8] sm:$0xff] }
 0x16a   : > { %1717 = vst [vmem:[%s14584_s12 + $0x1570] sm:$0xff] %v1716_v46  ;;  %v1720_v48 = vld [vmem:[%s14576_s30 + $0x2b00] sm:$0xff]  ;;  %v1722_v49 = vld [vmem:[%s14576_s30 + $0x2b08] sm:$0xff]  ;;  %1719 = vst [vmem:[%s14584_s12 + $0x1578] sm:$0xff] %v1718_v47 }
 0x16b   : > { %1721 = vst [vmem:[%s14584_s12 + $0x1580] sm:$0xff] %v1720_v48  ;;  %1723 = vst [vmem:[%s14584_s12 + $0x1588] sm:$0xff] %v1722_v49  ;;  %v1724_v50 = vld [vmem:[%s14576_s30 + $0x2b20] sm:$0xff]  ;;  %v1726_v51 = vld [vmem:[%s14576_s30 + $0x2b28] sm:$0xff] }
 0x16c   : > { %v1728_v52 = vld [vmem:[%s14576_s30 + $0x2b40] sm:$0xff]  ;;  %1725 = vst [vmem:[%s14584_s12 + $0x1590] sm:$0xff] %v1724_v50  ;;  %1727 = vst [vmem:[%s14584_s12 + $0x1598] sm:$0xff] %v1726_v51  ;;  %v1730_v53 = vld [vmem:[%s14576_s30 + $0x2b48] sm:$0xff] }
 0x16d   : > { %1729 = vst [vmem:[%s14584_s12 + $0x15a0] sm:$0xff] %v1728_v52  ;;  %v1732_v54 = vld [vmem:[%s14576_s30 + $0x2b60] sm:$0xff]  ;;  %v1734_v55 = vld [vmem:[%s14576_s30 + $0x2b68] sm:$0xff]  ;;  %1731 = vst [vmem:[%s14584_s12 + $0x15a8] sm:$0xff] %v1730_v53 }
 0x16e   : > { %1733 = vst [vmem:[%s14584_s12 + $0x15b0] sm:$0xff] %v1732_v54  ;;  %1735 = vst [vmem:[%s14584_s12 + $0x15b8] sm:$0xff] %v1734_v55  ;;  %v1736_v56 = vld [vmem:[%s14576_s30 + $0x2b80] sm:$0xff]  ;;  %v1738_v57 = vld [vmem:[%s14576_s30 + $0x2b88] sm:$0xff] }
 0x16f   : > { %v1740_v58 = vld [vmem:[%s14576_s30 + $0x2ba0] sm:$0xff]  ;;  %1737 = vst [vmem:[%s14584_s12 + $0x15c0] sm:$0xff] %v1736_v56  ;;  %1739 = vst [vmem:[%s14584_s12 + $0x15c8] sm:$0xff] %v1738_v57  ;;  %v1742_v59 = vld [vmem:[%s14576_s30 + $0x2ba8] sm:$0xff] }
 0x170   : > { %1741 = vst [vmem:[%s14584_s12 + $0x15d0] sm:$0xff] %v1740_v58  ;;  %v1744_v60 = vld [vmem:[%s14576_s30 + $0x2bc0] sm:$0xff]  ;;  %v1746_v61 = vld [vmem:[%s14576_s30 + $0x2bc8] sm:$0xff]  ;;  %1743 = vst [vmem:[%s14584_s12 + $0x15d8] sm:$0xff] %v1742_v59 }
 0x171   : > { %1745 = vst [vmem:[%s14584_s12 + $0x15e0] sm:$0xff] %v1744_v60  ;;  %1747 = vst [vmem:[%s14584_s12 + $0x15e8] sm:$0xff] %v1746_v61  ;;  %v1748_v62 = vld [vmem:[%s14576_s30 + $0x2be0] sm:$0xff]  ;;  %v1750_v63 = vld [vmem:[%s14576_s30 + $0x2be8] sm:$0xff] }
 0x172   : > { %v1752_v0 = vld [vmem:[%s14576_s30 + $0x2c00] sm:$0xff]  ;;  %1749 = vst [vmem:[%s14584_s12 + $0x15f0] sm:$0xff] %v1748_v62  ;;  %1751 = vst [vmem:[%s14584_s12 + $0x15f8] sm:$0xff] %v1750_v63  ;;  %v1754_v1 = vld [vmem:[%s14576_s30 + $0x2c08] sm:$0xff] }
 0x173   : > { %1753 = vst [vmem:[%s14584_s12 + $0x1600] sm:$0xff] %v1752_v0  ;;  %v1756_v2 = vld [vmem:[%s14576_s30 + $0x2c20] sm:$0xff]  ;;  %v1758_v3 = vld [vmem:[%s14576_s30 + $0x2c28] sm:$0xff]  ;;  %1755 = vst [vmem:[%s14584_s12 + $0x1608] sm:$0xff] %v1754_v1 }
 0x174   : > { %1757 = vst [vmem:[%s14584_s12 + $0x1610] sm:$0xff] %v1756_v2  ;;  %1759 = vst [vmem:[%s14584_s12 + $0x1618] sm:$0xff] %v1758_v3  ;;  %v1760_v4 = vld [vmem:[%s14576_s30 + $0x2c40] sm:$0xff]  ;;  %v1762_v5 = vld [vmem:[%s14576_s30 + $0x2c48] sm:$0xff] }
 0x175   : > { %v1764_v6 = vld [vmem:[%s14576_s30 + $0x2c60] sm:$0xff]  ;;  %1761 = vst [vmem:[%s14584_s12 + $0x1620] sm:$0xff] %v1760_v4  ;;  %1763 = vst [vmem:[%s14584_s12 + $0x1628] sm:$0xff] %v1762_v5  ;;  %v1766_v7 = vld [vmem:[%s14576_s30 + $0x2c68] sm:$0xff] }
 0x176   : > { %1765 = vst [vmem:[%s14584_s12 + $0x1630] sm:$0xff] %v1764_v6  ;;  %v1768_v8 = vld [vmem:[%s14576_s30 + $0x2c80] sm:$0xff]  ;;  %v1770_v9 = vld [vmem:[%s14576_s30 + $0x2c88] sm:$0xff]  ;;  %1767 = vst [vmem:[%s14584_s12 + $0x1638] sm:$0xff] %v1766_v7 }
 0x177   : > { %1769 = vst [vmem:[%s14584_s12 + $0x1640] sm:$0xff] %v1768_v8  ;;  %1771 = vst [vmem:[%s14584_s12 + $0x1648] sm:$0xff] %v1770_v9  ;;  %v1772_v10 = vld [vmem:[%s14576_s30 + $0x2ca0] sm:$0xff]  ;;  %v1774_v11 = vld [vmem:[%s14576_s30 + $0x2ca8] sm:$0xff] }
 0x178   : > { %v1776_v12 = vld [vmem:[%s14576_s30 + $0x2cc0] sm:$0xff]  ;;  %1773 = vst [vmem:[%s14584_s12 + $0x1650] sm:$0xff] %v1772_v10  ;;  %1775 = vst [vmem:[%s14584_s12 + $0x1658] sm:$0xff] %v1774_v11  ;;  %v1778_v13 = vld [vmem:[%s14576_s30 + $0x2cc8] sm:$0xff] }
 0x179   : > { %1777 = vst [vmem:[%s14584_s12 + $0x1660] sm:$0xff] %v1776_v12  ;;  %v1780_v14 = vld [vmem:[%s14576_s30 + $0x2ce0] sm:$0xff]  ;;  %v1782_v15 = vld [vmem:[%s14576_s30 + $0x2ce8] sm:$0xff]  ;;  %1779 = vst [vmem:[%s14584_s12 + $0x1668] sm:$0xff] %v1778_v13 }
 0x17a   : > { %1781 = vst [vmem:[%s14584_s12 + $0x1670] sm:$0xff] %v1780_v14  ;;  %1783 = vst [vmem:[%s14584_s12 + $0x1678] sm:$0xff] %v1782_v15  ;;  %v1784_v16 = vld [vmem:[%s14576_s30 + $0x2d00] sm:$0xff]  ;;  %v1786_v17 = vld [vmem:[%s14576_s30 + $0x2d08] sm:$0xff] }
 0x17b   : > { %v1788_v18 = vld [vmem:[%s14576_s30 + $0x2d20] sm:$0xff]  ;;  %1785 = vst [vmem:[%s14584_s12 + $0x1680] sm:$0xff] %v1784_v16  ;;  %1787 = vst [vmem:[%s14584_s12 + $0x1688] sm:$0xff] %v1786_v17  ;;  %v1790_v19 = vld [vmem:[%s14576_s30 + $0x2d28] sm:$0xff] }
 0x17c   : > { %1789 = vst [vmem:[%s14584_s12 + $0x1690] sm:$0xff] %v1788_v18  ;;  %v1792_v20 = vld [vmem:[%s14576_s30 + $0x2d40] sm:$0xff]  ;;  %v1794_v21 = vld [vmem:[%s14576_s30 + $0x2d48] sm:$0xff]  ;;  %1791 = vst [vmem:[%s14584_s12 + $0x1698] sm:$0xff] %v1790_v19 }
 0x17d   : > { %1793 = vst [vmem:[%s14584_s12 + $0x16a0] sm:$0xff] %v1792_v20  ;;  %1795 = vst [vmem:[%s14584_s12 + $0x16a8] sm:$0xff] %v1794_v21  ;;  %v1796_v22 = vld [vmem:[%s14576_s30 + $0x2d60] sm:$0xff]  ;;  %v1798_v23 = vld [vmem:[%s14576_s30 + $0x2d68] sm:$0xff] }
 0x17e   : > { %v1800_v24 = vld [vmem:[%s14576_s30 + $0x2d80] sm:$0xff]  ;;  %1797 = vst [vmem:[%s14584_s12 + $0x16b0] sm:$0xff] %v1796_v22  ;;  %1799 = vst [vmem:[%s14584_s12 + $0x16b8] sm:$0xff] %v1798_v23  ;;  %v1802_v25 = vld [vmem:[%s14576_s30 + $0x2d88] sm:$0xff] }
 0x17f   : > { %1801 = vst [vmem:[%s14584_s12 + $0x16c0] sm:$0xff] %v1800_v24  ;;  %v1804_v26 = vld [vmem:[%s14576_s30 + $0x2da0] sm:$0xff]  ;;  %v1806_v27 = vld [vmem:[%s14576_s30 + $0x2da8] sm:$0xff]  ;;  %1803 = vst [vmem:[%s14584_s12 + $0x16c8] sm:$0xff] %v1802_v25 }
 0x180   : > { %1805 = vst [vmem:[%s14584_s12 + $0x16d0] sm:$0xff] %v1804_v26  ;;  %1807 = vst [vmem:[%s14584_s12 + $0x16d8] sm:$0xff] %v1806_v27  ;;  %v1808_v28 = vld [vmem:[%s14576_s30 + $0x2dc0] sm:$0xff]  ;;  %v1810_v29 = vld [vmem:[%s14576_s30 + $0x2dc8] sm:$0xff] }
 0x181   : > { %v1812_v30 = vld [vmem:[%s14576_s30 + $0x2de0] sm:$0xff]  ;;  %1809 = vst [vmem:[%s14584_s12 + $0x16e0] sm:$0xff] %v1808_v28  ;;  %1811 = vst [vmem:[%s14584_s12 + $0x16e8] sm:$0xff] %v1810_v29  ;;  %v1814_v31 = vld [vmem:[%s14576_s30 + $0x2de8] sm:$0xff] }
 0x182   : > { %1813 = vst [vmem:[%s14584_s12 + $0x16f0] sm:$0xff] %v1812_v30  ;;  %v1816_v32 = vld [vmem:[%s14576_s30 + $0x2e00] sm:$0xff]  ;;  %v1818_v33 = vld [vmem:[%s14576_s30 + $0x2e08] sm:$0xff]  ;;  %1815 = vst [vmem:[%s14584_s12 + $0x16f8] sm:$0xff] %v1814_v31 }
 0x183   : > { %1817 = vst [vmem:[%s14584_s12 + $0x1700] sm:$0xff] %v1816_v32  ;;  %1819 = vst [vmem:[%s14584_s12 + $0x1708] sm:$0xff] %v1818_v33  ;;  %v1820_v34 = vld [vmem:[%s14576_s30 + $0x2e20] sm:$0xff]  ;;  %v1822_v35 = vld [vmem:[%s14576_s30 + $0x2e28] sm:$0xff] }
 0x184   : > { %v1824_v36 = vld [vmem:[%s14576_s30 + $0x2e40] sm:$0xff]  ;;  %1821 = vst [vmem:[%s14584_s12 + $0x1710] sm:$0xff] %v1820_v34  ;;  %1823 = vst [vmem:[%s14584_s12 + $0x1718] sm:$0xff] %v1822_v35  ;;  %v1826_v37 = vld [vmem:[%s14576_s30 + $0x2e48] sm:$0xff] }
 0x185   : > { %1825 = vst [vmem:[%s14584_s12 + $0x1720] sm:$0xff] %v1824_v36  ;;  %v1828_v38 = vld [vmem:[%s14576_s30 + $0x2e60] sm:$0xff]  ;;  %v1830_v39 = vld [vmem:[%s14576_s30 + $0x2e68] sm:$0xff]  ;;  %1827 = vst [vmem:[%s14584_s12 + $0x1728] sm:$0xff] %v1826_v37 }
 0x186   : > { %1829 = vst [vmem:[%s14584_s12 + $0x1730] sm:$0xff] %v1828_v38  ;;  %1831 = vst [vmem:[%s14584_s12 + $0x1738] sm:$0xff] %v1830_v39  ;;  %v1832_v40 = vld [vmem:[%s14576_s30 + $0x2e80] sm:$0xff]  ;;  %v1834_v41 = vld [vmem:[%s14576_s30 + $0x2e88] sm:$0xff] }
 0x187   : > { %v1836_v42 = vld [vmem:[%s14576_s30 + $0x2ea0] sm:$0xff]  ;;  %1833 = vst [vmem:[%s14584_s12 + $0x1740] sm:$0xff] %v1832_v40  ;;  %1835 = vst [vmem:[%s14584_s12 + $0x1748] sm:$0xff] %v1834_v41  ;;  %v1838_v43 = vld [vmem:[%s14576_s30 + $0x2ea8] sm:$0xff] }
 0x188   : > { %1837 = vst [vmem:[%s14584_s12 + $0x1750] sm:$0xff] %v1836_v42  ;;  %v1840_v44 = vld [vmem:[%s14576_s30 + $0x2ec0] sm:$0xff]  ;;  %v1842_v45 = vld [vmem:[%s14576_s30 + $0x2ec8] sm:$0xff]  ;;  %1839 = vst [vmem:[%s14584_s12 + $0x1758] sm:$0xff] %v1838_v43 }
 0x189   : > { %1841 = vst [vmem:[%s14584_s12 + $0x1760] sm:$0xff] %v1840_v44  ;;  %1843 = vst [vmem:[%s14584_s12 + $0x1768] sm:$0xff] %v1842_v45  ;;  %v1844_v46 = vld [vmem:[%s14576_s30 + $0x2ee0] sm:$0xff]  ;;  %v1846_v47 = vld [vmem:[%s14576_s30 + $0x2ee8] sm:$0xff] }
 0x18a   : > { %v1848_v48 = vld [vmem:[%s14576_s30 + $0x2f00] sm:$0xff]  ;;  %1845 = vst [vmem:[%s14584_s12 + $0x1770] sm:$0xff] %v1844_v46  ;;  %1847 = vst [vmem:[%s14584_s12 + $0x1778] sm:$0xff] %v1846_v47  ;;  %v1850_v49 = vld [vmem:[%s14576_s30 + $0x2f08] sm:$0xff] }
 0x18b   : > { %1849 = vst [vmem:[%s14584_s12 + $0x1780] sm:$0xff] %v1848_v48  ;;  %v1852_v50 = vld [vmem:[%s14576_s30 + $0x2f20] sm:$0xff]  ;;  %v1854_v51 = vld [vmem:[%s14576_s30 + $0x2f28] sm:$0xff]  ;;  %1851 = vst [vmem:[%s14584_s12 + $0x1788] sm:$0xff] %v1850_v49 }
 0x18c   : > { %1853 = vst [vmem:[%s14584_s12 + $0x1790] sm:$0xff] %v1852_v50  ;;  %1855 = vst [vmem:[%s14584_s12 + $0x1798] sm:$0xff] %v1854_v51  ;;  %v1856_v52 = vld [vmem:[%s14576_s30 + $0x2f40] sm:$0xff]  ;;  %v1858_v53 = vld [vmem:[%s14576_s30 + $0x2f48] sm:$0xff] }
 0x18d   : > { %v1860_v54 = vld [vmem:[%s14576_s30 + $0x2f60] sm:$0xff]  ;;  %1857 = vst [vmem:[%s14584_s12 + $0x17a0] sm:$0xff] %v1856_v52  ;;  %1859 = vst [vmem:[%s14584_s12 + $0x17a8] sm:$0xff] %v1858_v53  ;;  %v1862_v55 = vld [vmem:[%s14576_s30 + $0x2f68] sm:$0xff] }
 0x18e   : > { %1861 = vst [vmem:[%s14584_s12 + $0x17b0] sm:$0xff] %v1860_v54  ;;  %v1864_v56 = vld [vmem:[%s14576_s30 + $0x2f80] sm:$0xff]  ;;  %v1866_v57 = vld [vmem:[%s14576_s30 + $0x2f88] sm:$0xff]  ;;  %1863 = vst [vmem:[%s14584_s12 + $0x17b8] sm:$0xff] %v1862_v55 }
 0x18f   : > { %1865 = vst [vmem:[%s14584_s12 + $0x17c0] sm:$0xff] %v1864_v56  ;;  %1867 = vst [vmem:[%s14584_s12 + $0x17c8] sm:$0xff] %v1866_v57  ;;  %v1868_v58 = vld [vmem:[%s14576_s30 + $0x2fa0] sm:$0xff]  ;;  %v1870_v59 = vld [vmem:[%s14576_s30 + $0x2fa8] sm:$0xff] }
 0x190   : > { %v1872_v60 = vld [vmem:[%s14576_s30 + $0x2fc0] sm:$0xff]  ;;  %1869 = vst [vmem:[%s14584_s12 + $0x17d0] sm:$0xff] %v1868_v58  ;;  %1871 = vst [vmem:[%s14584_s12 + $0x17d8] sm:$0xff] %v1870_v59  ;;  %v1874_v61 = vld [vmem:[%s14576_s30 + $0x2fc8] sm:$0xff] }
 0x191   : > { %1873 = vst [vmem:[%s14584_s12 + $0x17e0] sm:$0xff] %v1872_v60  ;;  %v1876_v62 = vld [vmem:[%s14576_s30 + $0x2fe0] sm:$0xff]  ;;  %v1878_v63 = vld [vmem:[%s14576_s30 + $0x2fe8] sm:$0xff]  ;;  %1875 = vst [vmem:[%s14584_s12 + $0x17e8] sm:$0xff] %v1874_v61 }
 0x192   : > { %1877 = vst [vmem:[%s14584_s12 + $0x17f0] sm:$0xff] %v1876_v62  ;;  %1879 = vst [vmem:[%s14584_s12 + $0x17f8] sm:$0xff] %v1878_v63  ;;  %v1880_v0 = vld [vmem:[%s14576_s30 + $0x3000] sm:$0xff]  ;;  %v1882_v1 = vld [vmem:[%s14576_s30 + $0x3008] sm:$0xff] }
 0x193   : > { %v1884_v2 = vld [vmem:[%s14576_s30 + $0x3020] sm:$0xff]  ;;  %1881 = vst [vmem:[%s14584_s12 + $0x1800] sm:$0xff] %v1880_v0  ;;  %1883 = vst [vmem:[%s14584_s12 + $0x1808] sm:$0xff] %v1882_v1  ;;  %v1886_v3 = vld [vmem:[%s14576_s30 + $0x3028] sm:$0xff] }
 0x194   : > { %1885 = vst [vmem:[%s14584_s12 + $0x1810] sm:$0xff] %v1884_v2  ;;  %v1888_v4 = vld [vmem:[%s14576_s30 + $0x3040] sm:$0xff]  ;;  %v1890_v5 = vld [vmem:[%s14576_s30 + $0x3048] sm:$0xff]  ;;  %1887 = vst [vmem:[%s14584_s12 + $0x1818] sm:$0xff] %v1886_v3 }
 0x195   : > { %1889 = vst [vmem:[%s14584_s12 + $0x1820] sm:$0xff] %v1888_v4  ;;  %1891 = vst [vmem:[%s14584_s12 + $0x1828] sm:$0xff] %v1890_v5  ;;  %v1892_v6 = vld [vmem:[%s14576_s30 + $0x3060] sm:$0xff]  ;;  %v1894_v7 = vld [vmem:[%s14576_s30 + $0x3068] sm:$0xff] }
 0x196   : > { %v1896_v8 = vld [vmem:[%s14576_s30 + $0x3080] sm:$0xff]  ;;  %1893 = vst [vmem:[%s14584_s12 + $0x1830] sm:$0xff] %v1892_v6  ;;  %1895 = vst [vmem:[%s14584_s12 + $0x1838] sm:$0xff] %v1894_v7  ;;  %v1898_v9 = vld [vmem:[%s14576_s30 + $0x3088] sm:$0xff] }
 0x197   : > { %1897 = vst [vmem:[%s14584_s12 + $0x1840] sm:$0xff] %v1896_v8  ;;  %v1900_v10 = vld [vmem:[%s14576_s30 + $0x30a0] sm:$0xff]  ;;  %v1902_v11 = vld [vmem:[%s14576_s30 + $0x30a8] sm:$0xff]  ;;  %1899 = vst [vmem:[%s14584_s12 + $0x1848] sm:$0xff] %v1898_v9 }
 0x198   : > { %1901 = vst [vmem:[%s14584_s12 + $0x1850] sm:$0xff] %v1900_v10  ;;  %1903 = vst [vmem:[%s14584_s12 + $0x1858] sm:$0xff] %v1902_v11  ;;  %v1904_v12 = vld [vmem:[%s14576_s30 + $0x30c0] sm:$0xff]  ;;  %v1906_v13 = vld [vmem:[%s14576_s30 + $0x30c8] sm:$0xff] }
 0x199   : > { %v1908_v14 = vld [vmem:[%s14576_s30 + $0x30e0] sm:$0xff]  ;;  %1905 = vst [vmem:[%s14584_s12 + $0x1860] sm:$0xff] %v1904_v12  ;;  %1907 = vst [vmem:[%s14584_s12 + $0x1868] sm:$0xff] %v1906_v13  ;;  %v1910_v15 = vld [vmem:[%s14576_s30 + $0x30e8] sm:$0xff] }
 0x19a   : > { %1909 = vst [vmem:[%s14584_s12 + $0x1870] sm:$0xff] %v1908_v14  ;;  %v1912_v16 = vld [vmem:[%s14576_s30 + $0x3100] sm:$0xff]  ;;  %v1914_v17 = vld [vmem:[%s14576_s30 + $0x3108] sm:$0xff]  ;;  %1911 = vst [vmem:[%s14584_s12 + $0x1878] sm:$0xff] %v1910_v15 }
 0x19b   : > { %1913 = vst [vmem:[%s14584_s12 + $0x1880] sm:$0xff] %v1912_v16  ;;  %1915 = vst [vmem:[%s14584_s12 + $0x1888] sm:$0xff] %v1914_v17  ;;  %v1916_v18 = vld [vmem:[%s14576_s30 + $0x3120] sm:$0xff]  ;;  %v1918_v19 = vld [vmem:[%s14576_s30 + $0x3128] sm:$0xff] }
 0x19c   : > { %v1920_v20 = vld [vmem:[%s14576_s30 + $0x3140] sm:$0xff]  ;;  %1917 = vst [vmem:[%s14584_s12 + $0x1890] sm:$0xff] %v1916_v18  ;;  %1919 = vst [vmem:[%s14584_s12 + $0x1898] sm:$0xff] %v1918_v19  ;;  %v1922_v21 = vld [vmem:[%s14576_s30 + $0x3148] sm:$0xff] }
 0x19d   : > { %1921 = vst [vmem:[%s14584_s12 + $0x18a0] sm:$0xff] %v1920_v20  ;;  %v1924_v22 = vld [vmem:[%s14576_s30 + $0x3160] sm:$0xff]  ;;  %v1926_v23 = vld [vmem:[%s14576_s30 + $0x3168] sm:$0xff]  ;;  %1923 = vst [vmem:[%s14584_s12 + $0x18a8] sm:$0xff] %v1922_v21 }
 0x19e   : > { %1925 = vst [vmem:[%s14584_s12 + $0x18b0] sm:$0xff] %v1924_v22  ;;  %1927 = vst [vmem:[%s14584_s12 + $0x18b8] sm:$0xff] %v1926_v23  ;;  %v1928_v24 = vld [vmem:[%s14576_s30 + $0x3180] sm:$0xff]  ;;  %v1930_v25 = vld [vmem:[%s14576_s30 + $0x3188] sm:$0xff] }
 0x19f   : > { %v1932_v26 = vld [vmem:[%s14576_s30 + $0x31a0] sm:$0xff]  ;;  %1929 = vst [vmem:[%s14584_s12 + $0x18c0] sm:$0xff] %v1928_v24  ;;  %1931 = vst [vmem:[%s14584_s12 + $0x18c8] sm:$0xff] %v1930_v25  ;;  %v1934_v27 = vld [vmem:[%s14576_s30 + $0x31a8] sm:$0xff] }
 0x1a0   : > { %1933 = vst [vmem:[%s14584_s12 + $0x18d0] sm:$0xff] %v1932_v26  ;;  %v1936_v28 = vld [vmem:[%s14576_s30 + $0x31c0] sm:$0xff]  ;;  %v1938_v29 = vld [vmem:[%s14576_s30 + $0x31c8] sm:$0xff]  ;;  %1935 = vst [vmem:[%s14584_s12 + $0x18d8] sm:$0xff] %v1934_v27 }
 0x1a1   : > { %1937 = vst [vmem:[%s14584_s12 + $0x18e0] sm:$0xff] %v1936_v28  ;;  %1939 = vst [vmem:[%s14584_s12 + $0x18e8] sm:$0xff] %v1938_v29  ;;  %v1940_v30 = vld [vmem:[%s14576_s30 + $0x31e0] sm:$0xff]  ;;  %v1942_v31 = vld [vmem:[%s14576_s30 + $0x31e8] sm:$0xff] }
 0x1a2   : > { %1941 = vst [vmem:[%s14584_s12 + $0x18f0] sm:$0xff] %v1940_v30  ;;  %1943 = vst [vmem:[%s14584_s12 + $0x18f8] sm:$0xff] %v1942_v31 }
 0x1a3 PF: > { %p11266_p5 = scmp.ge.s32.totalorder %s14471_s19, 1  ;;  %p1956_p6 = scmp.lt.s32.totalorder %s14471_s19, 3 }
 0x1a5   : > { %p1957_p7 = pnand %p11266_p5, %p1956_p6 }
 0x1a6   : > { %s1963_s13 = sand.u32 (!%p1957_p7), 1, %s14463_s17   ;;  %s11267_s14 = sshll.u32 (!%p1957_p7), %s14556_s20, 2 }
 0x1a7   : > { %1960 = sbr.rel (%p1957_p7) target bundleno = 3215 (0xc8f), region = 75  ;;  %p2003_p8 = scmp.lt.s32.totalorder (!%p1957_p7), %s11267_s14, 7 }
 0x1a8   : > { %s13083_s15 = smul.u32 (!%p1957_p7), 6400, %s1963_s13  ;;  %p11268_p9 = scmp.ne.s32.totalorder (!%p1957_p7), %s14556_s20, 0 }
 0x1aa   : > { %s16190_s25 = scalar_lea.vmem (!%p1957_p7), [#allocation4], %s13083_s15 }
 0x1ae   : > { %s19876_s14 = smov (!%p2003_p8, %s11267_s14), 7  ;;  %2011 = sbr.rel (%p11268_p9) target bundleno = 1308 (0x51c), region = 83 }
 0x1af   : > { %s2005_s23 = scalar_lea.vmem %s19767_s6, %s19876_s14 }
 0x1b5   : > { %v2038_v32 = vld [vmem:[%s19762_s1 + $0x8] sm:$0xff]  ;;  %v2037_v34 = vld [vmem:[%s19762_s1] sm:$0xff]  ;;  %v14473_v39 = vmov 0.0   ;;  %v2040_v16 = vld [vmem:[%s19762_s1 + $0x18] sm:$0xff] }
 0x1b6   : > { %v2046_v33 = vld [vmem:[%s19762_s1 + $0x48] sm:$0xff]  ;;  %v2045_v36 = vld [vmem:[%s19762_s1 + $0x40] sm:$0xff]  ;;  %2271 = vmatprep.mubr.f32.mxu1 %v14473_v39  ;;  %2701 = vmatprep.mubr.f32.mxu0 %v14473_v39  ;;  %v2048_v17 = vld [vmem:[%s19762_s1 + $0x58] sm:$0xff] }
 0x1b7   : > { %v12384_v35 = vpack.c.bf16 %v2046_v33, %v2038_v32  ;;  %v2054_v37 = vld [vmem:[%s19762_s1 + $0x88] sm:$0xff]  ;;  %v12386_v40 = vpack.c.bf16 %v2045_v36, %v2037_v34  ;;  %v2053_v42 = vld [vmem:[%s19762_s1 + $0x80] sm:$0xff]  ;;  %v12416_v19 = vpack.c.bf16 %v2048_v17, %v2040_v16  ;;  %v2039_v20 = vld [vmem:[%s19762_s1 + $0x10] sm:$0xff] }
 0x1b8   : > { %v2062_v38 = vld [vmem:[%s19762_s1 + $0xc8] sm:$0xff]  ;;  %v2061_v43 = vld [vmem:[%s19762_s1 + $0xc0] sm:$0xff]  ;;  %v2047_v21 = vld [vmem:[%s19762_s1 + $0x50] sm:$0xff] }
 0x1b9   : > { %v12388_v41 = vpack.c.bf16 %v2062_v38, %v2054_v37  ;;  %v2070_v44 = vld [vmem:[%s19762_s1 + $0x108] sm:$0xff]  ;;  %12385 = vmatprep.subr.bf16.mxu1 %v12384_v35  ;;  %v12390_v46 = vpack.c.bf16 %v2061_v43, %v2053_v42  ;;  %v2069_v48 = vld [vmem:[%s19762_s1 + $0x100] sm:$0xff]  ;;  %v2056_v22 = vld [vmem:[%s19762_s1 + $0x98] sm:$0xff]  ;;  %v12418_v25 = vpack.c.bf16 %v2047_v21, %v2039_v20 }
 0x1ba   : > { %v2078_v45 = vld [vmem:[%s19762_s1 + $0x148] sm:$0xff]  ;;  %12387 = vmatpush1.bf16.msra.mxu1 %v12386_v40  ;;  %v2077_v49 = vld [vmem:[%s19762_s1 + $0x140] sm:$0xff]  ;;  %v2064_v23 = vld [vmem:[%s19762_s1 + $0xd8] sm:$0xff] }
 0x1bb   : > { %12389 = vmatprep.subr.bf16.mxu1 %v12388_v41  ;;  %v12392_v47 = vpack.c.bf16 %v2078_v45, %v2070_v44  ;;  %v2086_v50 = vld [vmem:[%s19762_s1 + $0x188] sm:$0xff]  ;;  %v12394_v52 = vpack.c.bf16 %v2077_v49, %v2069_v48  ;;  %v2085_v54 = vld [vmem:[%s19762_s1 + $0x180] sm:$0xff]  ;;  %v12420_v26 = vpack.c.bf16 %v2064_v23, %v2056_v22  ;;  %v2055_v27 = vld [vmem:[%s19762_s1 + $0x90] sm:$0xff] }
 0x1bc   : > { %v2094_v51 = vld [vmem:[%s19762_s1 + $0x1c8] sm:$0xff]  ;;  %v2093_v55 = vld [vmem:[%s19762_s1 + $0x1c0] sm:$0xff]  ;;  %v2063_v28 = vld [vmem:[%s19762_s1 + $0xd0] sm:$0xff] }
 0x1bd   : > { %v12396_v53 = vpack.c.bf16 %v2094_v51, %v2086_v50  ;;  %v2102_v56 = vld [vmem:[%s19762_s1 + $0x208] sm:$0xff]  ;;  %v12398_v58 = vpack.c.bf16 %v2093_v55, %v2085_v54  ;;  %v2101_v60 = vld [vmem:[%s19762_s1 + $0x200] sm:$0xff]  ;;  %v2072_v29 = vld [vmem:[%s19762_s1 + $0x118] sm:$0xff]  ;;  %v12422_v32 = vpack.c.bf16 %v2063_v28, %v2055_v27 }
 0x1be   : > { %12391 = vmatpush1.bf16.msra.mxu1 %v12390_v46  ;;  %v2110_v57 = vld [vmem:[%s19762_s1 + $0x248] sm:$0xff]  ;;  %v2109_v61 = vld [vmem:[%s19762_s1 + $0x240] sm:$0xff]  ;;  %v2080_v30 = vld [vmem:[%s19762_s1 + $0x158] sm:$0xff] }
 0x1bf   : > { %12393 = vmatprep.subr.bf16.mxu1 %v12392_v47  ;;  %v12400_v59 = vpack.c.bf16 %v2110_v57, %v2102_v56  ;;  %v2118_v62 = vld [vmem:[%s19762_s1 + $0x288] sm:$0xff]  ;;  %v12402_v0 = vpack.c.bf16 %v2109_v61, %v2101_v60  ;;  %v2117_v2 = vld [vmem:[%s19762_s1 + $0x280] sm:$0xff]  ;;  %v12424_v33 = vpack.c.bf16 %v2080_v30, %v2072_v29  ;;  %v2071_v34 = vld [vmem:[%s19762_s1 + $0x110] sm:$0xff] }
 0x1c0   : > { %v2126_v63 = vld [vmem:[%s19762_s1 + $0x2c8] sm:$0xff]  ;;  %v2125_v3 = vld [vmem:[%s19762_s1 + $0x2c0] sm:$0xff]  ;;  %v2079_v35 = vld [vmem:[%s19762_s1 + $0x150] sm:$0xff] }
 0x1c1   : > { %v12404_v1 = vpack.c.bf16 %v2126_v63, %v2118_v62  ;;  %v2134_v4 = vld [vmem:[%s19762_s1 + $0x308] sm:$0xff]  ;;  %v12406_v6 = vpack.c.bf16 %v2125_v3, %v2117_v2  ;;  %v2133_v8 = vld [vmem:[%s19762_s1 + $0x300] sm:$0xff]  ;;  %v2088_v36 = vld [vmem:[%s19762_s1 + $0x198] sm:$0xff]  ;;  %v12426_v40 = vpack.c.bf16 %v2079_v35, %v2071_v34 }
 0x1c2   : > { %12395 = vmatpush1.bf16.msra.mxu1 %v12394_v52  ;;  %v2142_v5 = vld [vmem:[%s19762_s1 + $0x348] sm:$0xff]  ;;  %v2141_v9 = vld [vmem:[%s19762_s1 + $0x340] sm:$0xff]  ;;  %v2096_v37 = vld [vmem:[%s19762_s1 + $0x1d8] sm:$0xff] }
 0x1c3   : > { %12397 = vmatprep.subr.bf16.mxu1 %v12396_v53  ;;  %v12408_v7 = vpack.c.bf16 %v2142_v5, %v2134_v4  ;;  %v2150_v10 = vld [vmem:[%s19762_s1 + $0x388] sm:$0xff]  ;;  %v12410_v12 = vpack.c.bf16 %v2141_v9, %v2133_v8  ;;  %v2149_v14 = vld [vmem:[%s19762_s1 + $0x380] sm:$0xff]  ;;  %v16350_v38 = vld [vmem:[%s19761_s0 + $0x10] sm:$0xff]  ;;  %v12428_v41 = vpack.c.bf16 %v2096_v37, %v2088_v36 }
 0x1c4   : > { %v2158_v11 = vld [vmem:[%s19762_s1 + $0x3c8] sm:$0xff]  ;;  %v2157_v15 = vld [vmem:[%s19762_s1 + $0x3c0] sm:$0xff]  ;;  %v2087_v42 = vld [vmem:[%s19762_s1 + $0x190] sm:$0xff] }
 0x1c5   : > { %v12412_v13 = vpack.c.bf16 %v2158_v11, %v2150_v10  ;;  %v12414_v18 = vpack.c.bf16 %v2157_v15, %v2149_v14  ;;  %v16312_v24 = vld [vmem:[%s19761_s0] sm:$0xff]  ;;  %v16331_v31 = vld [vmem:[%s19761_s0 + $0x8] sm:$0xff]  ;;  %v2095_v43 = vld [vmem:[%s19762_s1 + $0x1d0] sm:$0xff] }
 0x1c6   : > { %12399 = vmatpush1.bf16.msra.mxu1 %v12398_v58  ;;  %v2104_v44 = vld [vmem:[%s19762_s1 + $0x218] sm:$0xff]  ;;  %v12430_v47 = vpack.c.bf16 %v2095_v43, %v2087_v42  ;;  %v2103_v49 = vld [vmem:[%s19762_s1 + $0x210] sm:$0xff]  ;;  %v16388_v53 = vld [vmem:[%s19761_s0 + $0x20] sm:$0xff] }
 0x1c7   : > { %12401 = vmatprep.subr.bf16.mxu1 %v12400_v59  ;;  %v2112_v45 = vld [vmem:[%s19762_s1 + $0x258] sm:$0xff]  ;;  %v2111_v50 = vld [vmem:[%s19762_s1 + $0x250] sm:$0xff]  ;;  %v16407_v60 = vld [vmem:[%s19761_s0 + $0x28] sm:$0xff] }
 0x1c8   : > { %v16369_v46 = vld [vmem:[%s19761_s0 + $0x18] sm:$0xff]  ;;  %v12432_v48 = vpack.c.bf16 %v2112_v45, %v2104_v44  ;;  %v12434_v54 = vpack.c.bf16 %v2111_v50, %v2103_v49  ;;  %v2119_v56 = vld [vmem:[%s19762_s1 + $0x290] sm:$0xff]  ;;  %v16446_v10 = vld [vmem:[%s19761_s0 + $0x40] sm:$0xff] }
 0x1c9   : > { %v2120_v51 = vld [vmem:[%s19762_s1 + $0x298] sm:$0xff]  ;;  %v2127_v57 = vld [vmem:[%s19762_s1 + $0x2d0] sm:$0xff]  ;;  %v16453_v11 = vld [vmem:[%s19761_s0 + $0x48] sm:$0xff] }
 0x1ca   : > { %12403 = vmatpush1.bf16.msra.mxu1 %v12402_v0  ;;  %v2128_v52 = vld [vmem:[%s19762_s1 + $0x2d8] sm:$0xff]  ;;  %v12438_v61 = vpack.c.bf16 %v2127_v57, %v2119_v56  ;;  %v2135_v63 = vld [vmem:[%s19762_s1 + $0x310] sm:$0xff]  ;;  %v2041_v15 = vld [vmem:[%s19762_s1 + $0x20] sm:$0xff] }
 0x1cb   : > { %12405 = vmatprep.subr.bf16.mxu1 %v12404_v1  ;;  %v12436_v55 = vpack.c.bf16 %v2128_v52, %v2120_v51  ;;  %v2136_v58 = vld [vmem:[%s19762_s1 + $0x318] sm:$0xff]  ;;  %v2143_v0 = vld [vmem:[%s19762_s1 + $0x350] sm:$0xff]  ;;  %v2049_v16 = vld [vmem:[%s19762_s1 + $0x60] sm:$0xff] }
 0x1cc   : > { %v2144_v59 = vld [vmem:[%s19762_s1 + $0x358] sm:$0xff]  ;;  %v16426_v3 = vld [vmem:[%s19761_s0 + $0x30] sm:$0xff]  ;;  %v12442_v4 = vpack.c.bf16 %v2143_v0, %v2135_v63  ;;  %v12450_v17 = vpack.c.bf16 %v2049_v16, %v2041_v15  ;;  %v2058_v22 = vld [vmem:[%s19762_s1 + $0xa8] sm:$0xff] }
 0x1cd   : > { %v12440_v62 = vpack.c.bf16 %v2144_v59, %v2136_v58  ;;  %v2152_v1 = vld [vmem:[%s19762_s1 + $0x398] sm:$0xff]  ;;  %v2066_v23 = vld [vmem:[%s19762_s1 + $0xe8] sm:$0xff]  ;;  %v2081_v34 = vld [vmem:[%s19762_s1 + $0x160] sm:$0xff] }
 0x1ce   : > { %12407 = vmatpush1.bf16.msra.mxu1 %v12406_v6  ;;  %v2160_v2 = vld [vmem:[%s19762_s1 + $0x3d8] sm:$0xff]  ;;  %v2151_v6 = vld [vmem:[%s19762_s1 + $0x390] sm:$0xff]  ;;  %v12452_v27 = vpack.c.bf16 %v2066_v23, %v2058_v22  ;;  %v2074_v30 = vld [vmem:[%s19762_s1 + $0x128] sm:$0xff] }
 0x1cf   : > { %12409 = vmatprep.subr.bf16.mxu1 %v12408_v7  ;;  %v12444_v5 = vpack.c.bf16 %v2160_v2, %v2152_v1  ;;  %v2159_v7 = vld [vmem:[%s19762_s1 + $0x3d0] sm:$0xff]  ;;  %v16439_v8 = vld [vmem:[%s19761_s0 + $0x38] sm:$0xff]  ;;  %v16516_v37 = vld [vmem:[%s19761_s0 + $0x60] sm:$0xff] }
 0x1d0   : > { %v12446_v9 = vpack.c.bf16 %v2159_v7, %v2151_v6  ;;  %v2052_v20 = vld [vmem:[%s19762_s1 + $0x78] sm:$0xff]  ;;  %v2089_v42 = vld [vmem:[%s19762_s1 + $0x1a0] sm:$0xff]  ;;  %v2114_v49 = vld [vmem:[%s19762_s1 + $0x268] sm:$0xff] }
 0x1d1   : > { %v16497_v29 = vld [vmem:[%s19761_s0 + $0x58] sm:$0xff]  ;;  %v2097_v43 = vld [vmem:[%s19762_s1 + $0x1e0] sm:$0xff]  ;;  %v2122_v56 = vld [vmem:[%s19762_s1 + $0x2a8] sm:$0xff] }
 0x1d2   : > { %12411 = vmatpush1.bf16.msra.mxu1 %v12410_v12  ;;  %v2042_v12 = vld [vmem:[%s19762_s1 + $0x28] sm:$0xff]  ;;  %v12462_v45 = vpack.c.bf16 %v2097_v43, %v2089_v42  ;;  %v2105_v50 = vld [vmem:[%s19762_s1 + $0x220] sm:$0xff]  ;;  %v16573_v63 = vld [vmem:[%s19761_s0 + $0x78] sm:$0xff] }
 0x1d3   : > { %12413 = vmatprep.subr.bf16.mxu1 %v12412_v13  ;;  %v2050_v13 = vld [vmem:[%s19762_s1 + $0x68] sm:$0xff]  ;;  %v2113_v51 = vld [vmem:[%s19762_s1 + $0x260] sm:$0xff]  ;;  %v16654_v23 = vld [vmem:[%s19761_s0 + $0xb0] sm:$0xff] }
 0x1d4   : > { %v12448_v14 = vpack.c.bf16 %v2050_v13, %v2042_v12  ;;  %v2130_v57 = vld [vmem:[%s19762_s1 + $0x2e8] sm:$0xff]  ;;  %v2121_v58 = vld [vmem:[%s19762_s1 + $0x2a0] sm:$0xff]  ;;  %v2059_v42 = vld [vmem:[%s19762_s1 + $0xb0] sm:$0xff] }
 0x1d5   : > { %v2129_v59 = vld [vmem:[%s19762_s1 + $0x2e0] sm:$0xff]  ;;  %v2138_v0 = vld [vmem:[%s19762_s1 + $0x328] sm:$0xff]  ;;  %v2067_v43 = vld [vmem:[%s19762_s1 + $0xf0] sm:$0xff] }
 0x1d6   : > { %12415 = vmatpush1.bf16.msra.mxu1 %v12414_v18  ;;  %v16472_v18 = vld [vmem:[%s19761_s0 + $0x50] sm:$0xff]  ;;  %12449 = vmatprep.subr.bf16.mxu0 %v12448_v14  ;;  %v2146_v1 = vld [vmem:[%s19762_s1 + $0x368] sm:$0xff]  ;;  %v2137_v2 = vld [vmem:[%s19762_s1 + $0x320] sm:$0xff] }
 0x1d7   : > { %12417 = vmatprep.subr.bf16.mxu1 %v12416_v19  ;;  %v2044_v19 = vld [vmem:[%s19762_s1 + $0x38] sm:$0xff]  ;;  %12451 = vmatpush1.bf16.msra.mxu0 %v12450_v17  ;;  %v16592_v7 = vld [vmem:[%s19761_s0 + $0x80] sm:$0xff]  ;;  %v2162_v12 = vld [vmem:[%s19762_s1 + $0x3e8] sm:$0xff] }
 0x1d8   : > { %v12480_v21 = vpack.c.bf16 %v2052_v20, %v2044_v19  ;;  %12453 = vmatprep.subr.bf16.mxu0 %v12452_v27  ;;  %v2153_v13 = vld [vmem:[%s19762_s1 + $0x3a0] sm:$0xff]  ;;  %v16611_v17 = vld [vmem:[%s19761_s0 + $0x88] sm:$0xff]  ;;  %v16618_v19 = vld [vmem:[%s19761_s0 + $0x90] sm:$0xff] }
 0x1d9   : > { %2272 = vmatmul.mubr.f32.vlgmr.msra.gmra.mrb[0].mxu1 %v16312_v24  ;;  %v2161_v14 = vld [vmem:[%s19762_s1 + $0x3e0] sm:$0xff]  ;;  %v16627_v20 = vld [vmem:[%s19761_s0 + $0x98] sm:$0xff]  ;;  %v16645_v22 = vld [vmem:[%s19761_s0 + $0xa8] sm:$0xff] }
 0x1da   : > { %12419 = vmatpush1.bf16.msra.mxu1 %v12418_v25  ;;  %2277 = vmatprep.mubr.f32.mxu1 %v14473_v39  ;;  %v2057_v25 = vld [vmem:[%s19762_s1 + $0xa0] sm:$0xff]  ;;  %v12478_v16 = vpack.c.bf16 %v2161_v14, %v2153_v13  ;;  %v2043_v27 = vld [vmem:[%s19762_s1 + $0x30] sm:$0xff] }
 0x1db   : > { %12421 = vmatprep.subr.bf16.mxu1 %v12420_v26  ;;  %v2065_v26 = vld [vmem:[%s19762_s1 + $0xe0] sm:$0xff]  ;;  %v2107_v13 = vld [vmem:[%s19762_s1 + $0x230] sm:$0xff] }
 0x1dc   : > { %v12454_v28 = vpack.c.bf16 %v2065_v26, %v2057_v25  ;;  %v16663_v25 = vld [vmem:[%s19761_s0 + $0xb8] sm:$0xff]  ;;  %v16672_v26 = vld [vmem:[%s19761_s0 + $0xc0] sm:$0xff]  ;;  %v2115_v14 = vld [vmem:[%s19762_s1 + $0x270] sm:$0xff] }
 0x1dd   : > { %2278 = vmatmul.mubr.f32.gmra.mrb[2].mxu1 %v16331_v31 }
 0x1de   : > { %2283 = vmatprep.mubr.f32.mxu1 %v14473_v39  ;;  %12423 = vmatpush1.bf16.msra.mxu1 %v12422_v32  ;;  %v2082_v32 = vld [vmem:[%s19762_s1 + $0x168] sm:$0xff] }
 0x1df   : > { %12425 = vmatprep.subr.bf16.mxu1 %v12424_v33  ;;  %12455 = vmatpush1.bf16.msra.mxu0 %v12454_v28  ;;  %v2073_v33 = vld [vmem:[%s19762_s1 + $0x120] sm:$0xff]  ;;  %v12456_v35 = vpack.c.bf16 %v2082_v32, %v2074_v30  ;;  %v2051_v28 = vld [vmem:[%s19762_s1 + $0x70] sm:$0xff]  ;;  %v2060_v30 = vld [vmem:[%s19762_s1 + $0xb8] sm:$0xff] }
 0x1e0   : > { %v12458_v36 = vpack.c.bf16 %v2081_v34, %v2073_v33  ;;  %v2068_v32 = vld [vmem:[%s19762_s1 + $0xf8] sm:$0xff]  ;;  %v19773_v33 = vmov 0.0|0.0   ;;  %v3699_v34 = vld [vmem:[%s19764_s3 + $0x100] sm:$0xff] }
 0x1e1   : > { %2284 = vmatmul.mubr.f32.gmra.mrb[4].mxu1 %v16350_v38  ;;  %12457 = vmatprep.subr.bf16.mxu0 %v12456_v35  ;;  %v3700_v35 = vld [vmem:[%s19764_s3 + $0x108] sm:$0xff] }
 0x1e2   : > { %2289 = vmatprep.mubr.f32.mxu1 %v14473_v39  ;;  %12427 = vmatpush1.bf16.msra.mxu1 %v12426_v40  ;;  %v2090_v40 = vld [vmem:[%s19762_s1 + $0x1a8] sm:$0xff] }
 0x1e3   : > { %12429 = vmatprep.subr.bf16.mxu1 %v12428_v41  ;;  %12459 = vmatpush1.bf16.msra.mxu0 %v12458_v36  ;;  %v2098_v41 = vld [vmem:[%s19762_s1 + $0x1e8] sm:$0xff]  ;;  %v12561_v36 = vpack.c.bf16 %v3700_v35, %v3699_v34  ;;  %v3705_v34 = vld [vmem:[%s19764_s3 + $0x130] sm:$0xff]  ;;  %v3706_v35 = vld [vmem:[%s19764_s3 + $0x138] sm:$0xff] }
 0x1e4   : > { %v12460_v44 = vpack.c.bf16 %v2098_v41, %v2090_v40  ;;  %v12482_v40 = vpack.c.bf16 %v2051_v28, %v2043_v27  ;;  %v12484_v41 = vpack.c.bf16 %v2068_v32, %v2060_v30  ;;  %v12498_v27 = vpack.c.bf16 %v2115_v14, %v2107_v13  ;;  %v2123_v28 = vld [vmem:[%s19762_s1 + $0x2b0] sm:$0xff]  ;;  %v3716_v13 = vld [vmem:[%s19764_s3 + $0x188] sm:$0xff] }
 0x1e5   : > { %2290 = vmatmul.mubr.f32.gmra.mrb[6].mxu1 %v16369_v46  ;;  %v2131_v32 = vld [vmem:[%s19762_s1 + $0x2f0] sm:$0xff] }
 0x1e6   : > { %2295 = vmatprep.mubr.f32.mxu1 %v14473_v39  ;;  %12431 = vmatpush1.bf16.msra.mxu1 %v12430_v47  ;;  %v16535_v47 = vld [vmem:[%s19761_s0 + $0x68] sm:$0xff] }
 0x1e7   : > { %12433 = vmatprep.subr.bf16.mxu1 %v12432_v48  ;;  %12461 = vmatprep.subr.bf16.mxu0 %v12460_v44  ;;  %v2106_v48 = vld [vmem:[%s19762_s1 + $0x228] sm:$0xff]  ;;  %v2076_v44 = vld [vmem:[%s19762_s1 + $0x138] sm:$0xff] }
 0x1e8   : > { %12463 = vmatpush1.bf16.msra.mxu0 %v12462_v45  ;;  %v12464_v52 = vpack.c.bf16 %v2114_v49, %v2106_v48  ;;  %v2084_v45 = vld [vmem:[%s19762_s1 + $0x178] sm:$0xff]  ;;  %v12486_v48 = vpack.c.bf16 %v2067_v43, %v2059_v42  ;;  %v2075_v49 = vld [vmem:[%s19762_s1 + $0x130] sm:$0xff]  ;;  %v12502_v42 = vpack.c.bf16 %v2131_v32, %v2123_v28  ;;  %v3719_v28 = vld [vmem:[%s19764_s3 + $0x1a0] sm:$0xff] }
 0x1e9   : > { %2296 = vmatmul.mubr.f32.gmra.mrb[8].mxu1 %v16388_v53 }
 0x1ea   : > { %2301 = vmatprep.mubr.f32.mxu1 %v14473_v39  ;;  %12435 = vmatpush1.bf16.msra.mxu1 %v12434_v54  ;;  %v12466_v54 = vpack.c.bf16 %v2113_v51, %v2105_v50  ;;  %v12488_v50 = vpack.c.bf16 %v2084_v45, %v2076_v44  ;;  %v2083_v51 = vld [vmem:[%s19762_s1 + $0x170] sm:$0xff] }
 0x1eb   : > { %12437 = vmatprep.subr.bf16.mxu1 %v12436_v55  ;;  %v16554_v55 = vld [vmem:[%s19761_s0 + $0x70] sm:$0xff]  ;;  %12465 = vmatprep.subr.bf16.mxu0 %v12464_v52 }
 0x1ec   : > { %12467 = vmatpush1.bf16.msra.mxu0 %v12466_v54  ;;  %v3701_v52 = vld [vmem:[%s19764_s3 + $0x110] sm:$0xff]  ;;  %v3702_v54 = vld [vmem:[%s19764_s3 + $0x118] sm:$0xff] }
 0x1ed   : > { %2302 = vmatmul.mubr.f32.gmra.mrb[10].mxu1 %v16407_v60  ;;  %v2139_v44 = vld [vmem:[%s19762_s1 + $0x330] sm:$0xff] }
 0x1ee   : > { %2307 = vmatprep.mubr.f32.mxu1 %v14473_v39  ;;  %12439 = vmatpush1.bf16.msra.mxu1 %v12438_v61  ;;  %v12468_v61 = vpack.c.bf16 %v2130_v57, %v2122_v56  ;;  %v2092_v56 = vld [vmem:[%s19762_s1 + $0x1b8] sm:$0xff]  ;;  %v2147_v45 = vld [vmem:[%s19762_s1 + $0x370] sm:$0xff] }
 0x1ef   : > { %12441 = vmatprep.subr.bf16.mxu1 %v12440_v62  ;;  %v12470_v62 = vpack.c.bf16 %v2129_v59, %v2121_v58  ;;  %v2100_v57 = vld [vmem:[%s19762_s1 + $0x1f8] sm:$0xff]  ;;  %v12564_v58 = vpack.c.bf16 %v3702_v54, %v3701_v52  ;;  %v12490_v59 = vpack.c.bf16 %v2083_v51, %v2075_v49  ;;  %v3708_v51 = vld [vmem:[%s19764_s3 + $0x148] sm:$0xff]  ;;  %v12506_v54 = vpack.c.bf16 %v2147_v45, %v2139_v44 }
 0x1f0   : > { %12469 = vmatprep.subr.bf16.mxu0 %v12468_v61  ;;  %v12492_v61 = vpack.c.bf16 %v2100_v57, %v2092_v56  ;;  %v2164_v49 = vld [vmem:[%s19762_s1 + $0x3f8] sm:$0xff]  ;;  %v2155_v57 = vld [vmem:[%s19762_s1 + $0x3b0] sm:$0xff] }
 0x1f1   : > { %2308 = vmatmul.mubr.f32.gmra.mrb[12].mxu1 %v16426_v3  ;;  %12471 = vmatpush1.bf16.msra.mxu0 %v12470_v62  ;;  %v2091_v62 = vld [vmem:[%s19762_s1 + $0x1b0] sm:$0xff]  ;;  %v3726_v44 = vld [vmem:[%s19764_s3 + $0x1d8] sm:$0xff] }
 0x1f2   : > { %2313 = vmatprep.mubr.f32.mxu1 %v14473_v39  ;;  %12443 = vmatpush1.bf16.msra.mxu1 %v12442_v4  ;;  %v2145_v4 = vld [vmem:[%s19762_s1 + $0x360] sm:$0xff] }
 0x1f3   : > { %12445 = vmatprep.subr.bf16.mxu1 %v12444_v5  ;;  %v12472_v5 = vpack.c.bf16 %v2146_v1, %v2138_v0  ;;  %v12474_v6 = vpack.c.bf16 %v2145_v4, %v2137_v2  ;;  %v2099_v0 = vld [vmem:[%s19762_s1 + $0x1f0] sm:$0xff]  ;;  %v2108_v1 = vld [vmem:[%s19762_s1 + $0x238] sm:$0xff]  ;;  %v3703_v4 = vld [vmem:[%s19764_s3 + $0x120] sm:$0xff] }
 0x1f4   : > { %v2116_v2 = vld [vmem:[%s19762_s1 + $0x278] sm:$0xff] }
 0x1f5   : > { %2314 = vmatmul.mubr.f32.gmra.mrb[14].mxu1 %v16439_v8  ;;  %12473 = vmatprep.subr.bf16.mxu0 %v12472_v5  ;;  %v3704_v5 = vld [vmem:[%s19764_s3 + $0x128] sm:$0xff] }
 0x1f6   : > { %2319 = vmatprep.mubr.f32.mxu1 %v14473_v39  ;;  %12447 = vmatpush1.bf16.msra.mxu1 %v12446_v9  ;;  %v2154_v9 = vld [vmem:[%s19762_s1 + $0x3a8] sm:$0xff] }
 0x1f7   : > { %12481 = vmatprep.subr.bf16.mxu1 %v12480_v21  ;;  %12475 = vmatpush1.bf16.msra.mxu0 %v12474_v6  ;;  %v12476_v15 = vpack.c.bf16 %v2162_v12, %v2154_v9  ;;  %v16636_v21 = vld [vmem:[%s19761_s0 + $0xa0] sm:$0xff]  ;;  %v12567_v6 = vpack.c.bf16 %v3704_v5, %v3703_v4  ;;  %v12494_v9 = vpack.c.bf16 %v2099_v0, %v2091_v62  ;;  %v3710_v62 = vld [vmem:[%s19764_s3 + $0x158] sm:$0xff]  ;;  %v3713_v5 = vld [vmem:[%s19764_s3 + $0x170] sm:$0xff] }
 0x1f8   : > { %v12496_v12 = vpack.c.bf16 %v2116_v2, %v2108_v1  ;;  %v3711_v1 = vld [vmem:[%s19764_s3 + $0x160] sm:$0xff]  ;;  %v3712_v2 = vld [vmem:[%s19764_s3 + $0x168] sm:$0xff] }
 0x1f9   : > { %2320 = vmatmul.mubr.f32.gmra.mrb[16].mxu1 %v16446_v10  ;;  %12477 = vmatprep.subr.bf16.mxu0 %v12476_v15  ;;  %v2124_v15 = vld [vmem:[%s19762_s1 + $0x2b8] sm:$0xff]  ;;  %v12579_v4 = vpack.c.bf16 %v3712_v2, %v3711_v1  ;;  %v3672_v1 = vld [vmem:[%s19764_s3 + $0x28] sm:$0xff]  ;;  %v3673_v2 = vld [vmem:[%s19764_s3 + $0x30] sm:$0xff] }
 0x1fa   : > { %2325 = vmatprep.mubr.f32.mxu1 %v14473_v39 }
 0x1fb   : > { %12479 = vmatpush1.bf16.msra.mxu0 %v12478_v16  ;;  %v2132_v16 = vld [vmem:[%s19762_s1 + $0x2f8] sm:$0xff] }
 0x1fc   : > { %12560 = vmatprep.subr.bf16.mxu0 %v19773_v33  ;;  %v12500_v30 = vpack.c.bf16 %v2132_v16, %v2124_v15  ;;  %v3717_v15 = vld [vmem:[%s19764_s3 + $0x190] sm:$0xff]  ;;  %v3718_v16 = vld [vmem:[%s19764_s3 + $0x198] sm:$0xff] }
 0x1fd   : > { %2326 = vmatmul.mubr.f32.gmra.mrb[18].mxu1 %v16453_v11 }
 0x1fe   : > { %2331 = vmatprep.mubr.f32.mxu1 %v14473_v39  ;;  %2702 = vmatmul.mubr.f32.vlgmr.msra.gmra.mrb[0].mxu0 %v16312_v24 }
 0x1ff   : > { %2707 = vmatprep.mubr.f32.mxu0 %v14473_v39  ;;  %12562 = vmatpush1.bf16.msra.mxu0 %v12561_v36  ;;  %v2140_v36 = vld [vmem:[%s19762_s1 + $0x338] sm:$0xff] }
 0x200   : > { %12563 = vmatprep.subr.bf16.mxu0 %v19773_v33 }
 0x201   : > { %2332 = vmatmul.mubr.f32.gmra.mrb[20].mxu1 %v16472_v18 }
 0x202   : > { %2337 = vmatprep.mubr.f32.mxu1 %v14473_v39  ;;  %2708 = vmatmul.mubr.f32.gmra.mrb[2].mxu0 %v16331_v31 }
 0x203   : > { %2713 = vmatprep.mubr.f32.mxu0 %v14473_v39  ;;  %12565 = vmatpush1.bf16.msra.mxu0 %v12564_v58  ;;  %v2163_v58 = vld [vmem:[%s19762_s1 + $0x3f0] sm:$0xff] }
 0x204   : > { %12566 = vmatprep.subr.bf16.mxu0 %v19773_v33 }
 0x205   : > { %2338 = vmatmul.mubr.f32.gmra.mrb[22].mxu1 %v16497_v29 }
 0x206   : > { %2343 = vmatprep.mubr.f32.mxu1 %v14473_v39  ;;  %2714 = vmatmul.mubr.f32.gmra.mrb[4].mxu0 %v16350_v38 }
 0x207   : > { %2719 = vmatprep.mubr.f32.mxu0 %v14473_v39  ;;  %12568 = vmatpush1.bf16.msra.mxu0 %v12567_v6  ;;  %v3714_v6 = vld [vmem:[%s19764_s3 + $0x178] sm:$0xff] }
 0x208   : > { %12569 = vmatprep.subr.bf16.mxu0 %v19773_v33 }
 0x209   : > { %2344 = vmatmul.mubr.f32.gmra.mrb[24].mxu1 %v16516_v37 }
 0x20a   : > { %2349 = vmatprep.mubr.f32.mxu1 %v14473_v39  ;;  %2720 = vmatmul.mubr.f32.gmra.mrb[6].mxu0 %v16369_v46 }
 0x20b   : > { %2725 = vmatprep.mubr.f32.mxu0 %v14473_v39 }
 0x20d   : > { %2350 = vmatmul.mubr.f32.gmra.mrb[26].mxu1 %v16535_v47 }
 0x20e   : > { %2355 = vmatprep.mubr.f32.mxu1 %v14473_v39  ;;  %2726 = vmatmul.mubr.f32.gmra.mrb[8].mxu0 %v16388_v53 }
 0x20f   : > { %2731 = vmatprep.mubr.f32.mxu0 %v14473_v39 }
 0x211   : > { %2356 = vmatmul.mubr.f32.gmra.mrb[28].mxu1 %v16554_v55 }
 0x212   : > { %2361 = vmatprep.mubr.f32.mxu1 %v14473_v39  ;;  %2732 = vmatmul.mubr.f32.gmra.mrb[10].mxu0 %v16407_v60 }
 0x213   : > { %2737 = vmatprep.mubr.f32.mxu0 %v14473_v39 }
 0x215   : > { %2362 = vmatmul.mubr.f32.gmra.mrb[30].mxu1 %v16573_v63 }
 0x216   : > { %2367 = vmatprep.mubr.f32.mxu1 %v14473_v39  ;;  %2738 = vmatmul.mubr.f32.gmra.mrb[12].mxu0 %v16426_v3 }
 0x217   : > { %2743 = vmatprep.mubr.f32.mxu0 %v14473_v39 }
 0x219   : > { %2368 = vmatmul.mubr.f32.gmra.mrb[32].mxu1 %v16592_v7 }
 0x21a   : > { %2373 = vmatprep.mubr.f32.mxu1 %v14473_v39  ;;  %2744 = vmatmul.mubr.f32.gmra.mrb[14].mxu0 %v16439_v8 }
 0x21b   : > { %2749 = vmatprep.mubr.f32.mxu0 %v14473_v39 }
 0x21d   : > { %2374 = vmatmul.mubr.f32.gmra.mrb[34].mxu1 %v16611_v17 }
 0x21e   : > { %2379 = vmatprep.mubr.f32.mxu1 %v14473_v39  ;;  %2750 = vmatmul.mubr.f32.gmra.mrb[16].mxu0 %v16446_v10 }
 0x21f   : > { %2755 = vmatprep.mubr.f32.mxu0 %v14473_v39 }
 0x221   : > { %2380 = vmatmul.mubr.f32.gmra.mrb[36].mxu1 %v16618_v19 }
 0x222   : > { %2385 = vmatprep.mubr.f32.mxu1 %v14473_v39  ;;  %2756 = vmatmul.mubr.f32.gmra.mrb[18].mxu0 %v16453_v11 }
 0x223   : > { %2761 = vmatprep.mubr.f32.mxu0 %v14473_v39 }
 0x225   : > { %2386 = vmatmul.mubr.f32.gmra.mrb[38].mxu1 %v16627_v20 }
 0x226   : > { %2391 = vmatprep.mubr.f32.mxu1 %v14473_v39  ;;  %2762 = vmatmul.mubr.f32.gmra.mrb[20].mxu0 %v16472_v18 }
 0x227   : > { %2767 = vmatprep.mubr.f32.mxu0 %v14473_v39 }
 0x229   : > { %2392 = vmatmul.mubr.f32.gmra.mrb[40].mxu1 %v16636_v21 }
 0x22a   : > { %2397 = vmatprep.mubr.f32.mxu1 %v14473_v39  ;;  %2768 = vmatmul.mubr.f32.gmra.mrb[22].mxu0 %v16497_v29 }
 0x22b   : > { %2773 = vmatprep.mubr.f32.mxu0 %v14473_v39 }
 0x22d   : > { %2398 = vmatmul.mubr.f32.gmra.mrb[42].mxu1 %v16645_v22 }
 0x22e   : > { %2403 = vmatprep.mubr.f32.mxu1 %v14473_v39  ;;  %2774 = vmatmul.mubr.f32.gmra.mrb[24].mxu0 %v16516_v37 }
 0x22f   : > { %2779 = vmatprep.mubr.f32.mxu0 %v14473_v39 }
 0x231   : > { %2404 = vmatmul.mubr.f32.gmra.mrb[44].mxu1 %v16654_v23 }
 0x232   : > { %2409 = vmatprep.mubr.f32.mxu1 %v14473_v39  ;;  %2780 = vmatmul.mubr.f32.gmra.mrb[26].mxu0 %v16535_v47 }
 0x233   : > { %2785 = vmatprep.mubr.f32.mxu0 %v14473_v39 }
 0x235   : > { %2410 = vmatmul.mubr.f32.gmra.mrb[46].mxu1 %v16663_v25 }
 0x236   : > { %2415 = vmatprep.mubr.f32.mxu1 %v14473_v39  ;;  %2786 = vmatmul.mubr.f32.gmra.mrb[28].mxu0 %v16554_v55 }
 0x237   : > { %2791 = vmatprep.mubr.f32.mxu0 %v14473_v39 }
 0x239   : > { %2416 = vmatmul.mubr.f32.gmra.mrb[48].mxu1 %v16672_v26 }
 0x23a   : > { %2486 = vmatprep.mubr.f32.mxu1 %v14473_v39  ;;  %2792 = vmatmul.mubr.f32.gmra.mrb[30].mxu0 %v16573_v63 }
 0x23b   : > { %2797 = vmatprep.mubr.f32.mxu0 %v14473_v39 }
 0x23d   : > { %2487 = vmatmul.mubr.f32.vlgmr.msra.gmra.mrb[50].mxu1 %v16312_v24 }
 0x23e   : > { %2492 = vmatprep.mubr.f32.mxu1 %v14473_v39  ;;  %12483 = vmatpush1.bf16.msra.mxu1 %v12482_v40  ;;  %v2148_v40 = vld [vmem:[%s19762_s1 + $0x378] sm:$0xff] }
 0x23f   : > { %12485 = vmatprep.subr.bf16.mxu1 %v12484_v41  ;;  %v12570_v41 = vpack.c.bf16 %v3706_v35, %v3705_v34  ;;  %v12504_v43 = vpack.c.bf16 %v2148_v40, %v2140_v36  ;;  %2798 = vmatmul.mubr.f32.gmra.mrb[32].mxu0 %v16592_v7  ;;  %v3721_v34 = vld [vmem:[%s19764_s3 + $0x1b0] sm:$0xff]  ;;  %v3722_v35 = vld [vmem:[%s19764_s3 + $0x1b8] sm:$0xff]  ;;  %v3723_v40 = vld [vmem:[%s19764_s3 + $0x1c0] sm:$0xff] }
 0x240   : > { %2803 = vmatprep.mubr.f32.mxu0 %v14473_v39  ;;  %v12594_v36 = vpack.c.bf16 %v3722_v35, %v3721_v34  ;;  %v3681_v34 = vld [vmem:[%s19764_s3 + $0x70] sm:$0xff]  ;;  %v3682_v35 = vld [vmem:[%s19764_s3 + $0x78] sm:$0xff] }
 0x241   : > { %2493 = vmatmul.mubr.f32.gmra.mrb[52].mxu1 %v16331_v31  ;;  %12571 = vmatpush1.bf16.msra.mxu0 %v12570_v41  ;;  %v3724_v41 = vld [vmem:[%s19764_s3 + $0x1c8] sm:$0xff] }
 0x242   : > { %2498 = vmatprep.mubr.f32.mxu1 %v14473_v39  ;;  %12487 = vmatpush1.bf16.msra.mxu1 %v12486_v48  ;;  %v2156_v48 = vld [vmem:[%s19762_s1 + $0x3b8] sm:$0xff] }
 0x243   : > { %12489 = vmatprep.subr.bf16.mxu1 %v12488_v50  ;;  %12572 = vmatprep.subr.bf16.mxu0 %v19773_v33  ;;  %v3707_v50 = vld [vmem:[%s19764_s3 + $0x140] sm:$0xff]  ;;  %v12508_v56 = vpack.c.bf16 %v2164_v49, %v2156_v48  ;;  %v3728_v49 = vld [vmem:[%s19764_s3 + $0x1e8] sm:$0xff] }
 0x244   : > { %v12573_v52 = vpack.c.bf16 %v3708_v51, %v3707_v50  ;;  %2804 = vmatmul.mubr.f32.gmra.mrb[34].mxu0 %v16611_v17  ;;  %v3727_v48 = vld [vmem:[%s19764_s3 + $0x1e0] sm:$0xff]  ;;  %v3729_v51 = vld [vmem:[%s19764_s3 + $0x1f0] sm:$0xff] }
 0x245   : > { %2499 = vmatmul.mubr.f32.gmra.mrb[54].mxu1 %v16350_v38  ;;  %2809 = vmatprep.mubr.f32.mxu0 %v14473_v39  ;;  %v12603_v50 = vpack.c.bf16 %v3728_v49, %v3727_v48  ;;  %v3686_v48 = vld [vmem:[%s19764_s3 + $0x98] sm:$0xff] }
 0x246   : > { %2504 = vmatprep.mubr.f32.mxu1 %v14473_v39  ;;  %12491 = vmatpush1.bf16.msra.mxu1 %v12490_v59  ;;  %v12510_v59 = vpack.c.bf16 %v2163_v58, %v2155_v57  ;;  %v3668_v57 = vld [vmem:[%s19764_s3 + $0x8] sm:$0xff] }
 0x247   : > { %12493 = vmatprep.subr.bf16.mxu1 %v12492_v61  ;;  %12574 = vmatpush1.bf16.msra.mxu0 %v12573_v52  ;;  %v3709_v61 = vld [vmem:[%s19764_s3 + $0x150] sm:$0xff]  ;;  %v3730_v52 = vld [vmem:[%s19764_s3 + $0x1f8] sm:$0xff] }
 0x248   : > { %12575 = vmatprep.subr.bf16.mxu0 %v19773_v33  ;;  %v12576_v0 = vpack.c.bf16 %v3710_v62, %v3709_v61  ;;  %2810 = vmatmul.mubr.f32.gmra.mrb[36].mxu0 %v16618_v19  ;;  %v3670_v61 = vld [vmem:[%s19764_s3 + $0x18] sm:$0xff] }
 0x249   : > { %2505 = vmatmul.mubr.f32.gmra.mrb[56].mxu1 %v16369_v46  ;;  %2815 = vmatprep.mubr.f32.mxu0 %v14473_v39 }
 0x24a   : > { %2510 = vmatprep.mubr.f32.mxu1 %v14473_v39  ;;  %12495 = vmatpush1.bf16.msra.mxu1 %v12494_v9  ;;  %v12582_v9 = vpack.c.bf16 %v3714_v6, %v3713_v5  ;;  %v3675_v5 = vld [vmem:[%s19764_s3 + $0x40] sm:$0xff]  ;;  %v3676_v6 = vld [vmem:[%s19764_s3 + $0x48] sm:$0xff] }
 0x24b   : > { %12497 = vmatprep.subr.bf16.mxu1 %v12496_v12  ;;  %12577 = vmatpush1.bf16.msra.mxu0 %v12576_v0  ;;  %v3715_v12 = vld [vmem:[%s19764_s3 + $0x180] sm:$0xff] }
 0x24c   : > { %12578 = vmatprep.subr.bf16.mxu0 %v19773_v33  ;;  %v12585_v14 = vpack.c.bf16 %v3716_v13, %v3715_v12  ;;  %2816 = vmatmul.mubr.f32.gmra.mrb[38].mxu0 %v16627_v20  ;;  %v3671_v0 = vld [vmem:[%s19764_s3 + $0x20] sm:$0xff]  ;;  %v3677_v13 = vld [vmem:[%s19764_s3 + $0x50] sm:$0xff] }
 0x24d   : > { %2511 = vmatmul.mubr.f32.gmra.mrb[58].mxu1 %v16388_v53  ;;  %2821 = vmatprep.mubr.f32.mxu0 %v14473_v39 }
 0x24e   : > { %2516 = vmatprep.mubr.f32.mxu1 %v14473_v39  ;;  %12499 = vmatpush1.bf16.msra.mxu1 %v12498_v27  ;;  %v12588_v27 = vpack.c.bf16 %v3718_v16, %v3717_v15 }
 0x24f   : > { %12501 = vmatprep.subr.bf16.mxu1 %v12500_v30  ;;  %12580 = vmatpush1.bf16.msra.mxu0 %v12579_v4  ;;  %v3720_v30 = vld [vmem:[%s19764_s3 + $0x1a8] sm:$0xff]  ;;  %v3674_v4 = vld [vmem:[%s19764_s3 + $0x38] sm:$0xff] }
 0x250   : > { %12581 = vmatprep.subr.bf16.mxu0 %v19773_v33  ;;  %2822 = vmatmul.mubr.f32.gmra.mrb[40].mxu0 %v16636_v21  ;;  %v12591_v32 = vpack.c.bf16 %v3720_v30, %v3719_v28  ;;  %v3680_v28 = vld [vmem:[%s19764_s3 + $0x68] sm:$0xff] }
 0x251   : > { %2517 = vmatmul.mubr.f32.gmra.mrb[60].mxu1 %v16407_v60  ;;  %2827 = vmatprep.mubr.f32.mxu0 %v14473_v39 }
 0x252   : > { %2522 = vmatprep.mubr.f32.mxu1 %v14473_v39  ;;  %12503 = vmatpush1.bf16.msra.mxu1 %v12502_v42  ;;  %v12597_v42 = vpack.c.bf16 %v3724_v41, %v3723_v40  ;;  %v3683_v41 = vld [vmem:[%s19764_s3 + $0x80] sm:$0xff] }
 0x253   : > { %12505 = vmatprep.subr.bf16.mxu1 %v12504_v43  ;;  %12583 = vmatpush1.bf16.msra.mxu0 %v12582_v9  ;;  %v3725_v43 = vld [vmem:[%s19764_s3 + $0x1d0] sm:$0xff] }
 0x254   : > { %12584 = vmatprep.subr.bf16.mxu0 %v19773_v33  ;;  %2828 = vmatmul.mubr.f32.gmra.mrb[42].mxu0 %v16645_v22  ;;  %v12600_v45 = vpack.c.bf16 %v3726_v44, %v3725_v43 }
 0x255   : > { %2523 = vmatmul.mubr.f32.gmra.mrb[62].mxu1 %v16426_v3  ;;  %2833 = vmatprep.mubr.f32.mxu0 %v14473_v39 }
 0x256   : > { %2528 = vmatprep.mubr.f32.mxu1 %v14473_v39  ;;  %12507 = vmatpush1.bf16.msra.mxu1 %v12506_v54  ;;  %v12606_v54 = vpack.c.bf16 %v3730_v52, %v3729_v51  ;;  %v3687_v51 = vld [vmem:[%s19764_s3 + $0xa0] sm:$0xff]  ;;  %v3688_v52 = vld [vmem:[%s19764_s3 + $0xa8] sm:$0xff] }
 0x257   : > { %12509 = vmatprep.subr.bf16.mxu1 %v12508_v56  ;;  %12586 = vmatpush1.bf16.msra.mxu0 %v12585_v14  ;;  %v3667_v56 = vld [vmem:[%s19764_s3] sm:$0xff]  ;;  %v3678_v14 = vld [vmem:[%s19764_s3 + $0x58] sm:$0xff] }
 0x258   : > { %12587 = vmatprep.subr.bf16.mxu0 %v19773_v33  ;;  %2834 = vmatmul.mubr.f32.gmra.mrb[44].mxu0 %v16654_v23  ;;  %v12513_v58 = vpack.c.bf16 %v3668_v57, %v3667_v56  ;;  %v3689_v57 = vld [vmem:[%s19764_s3 + $0xb0] sm:$0xff] }
 0x259   : > { %2529 = vmatmul.mubr.f32.gmra.mrb[64].mxu1 %v16439_v8  ;;  %2839 = vmatprep.mubr.f32.mxu0 %v14473_v39 }
 0x25a   : > { %2534 = vmatprep.mubr.f32.mxu1 %v14473_v39  ;;  %12511 = vmatpush1.bf16.msra.mxu1 %v12510_v59  ;;  %v3669_v59 = vld [vmem:[%s19764_s3 + $0x10] sm:$0xff] }
 0x25b   : > { %12512 = vmatprep.subr.bf16.mxu1 %v19773_v33  ;;  %12589 = vmatpush1.bf16.msra.mxu0 %v12588_v27  ;;  %v12516_v62 = vpack.c.bf16 %v3670_v61, %v3669_v59  ;;  %v3679_v27 = vld [vmem:[%s19764_s3 + $0x60] sm:$0xff] }
 0x25c   : > { %12590 = vmatprep.subr.bf16.mxu0 %v19773_v33  ;;  %2840 = vmatmul.mubr.f32.gmra.mrb[46].mxu0 %v16663_v25 }
 0x25d   : > { %2535 = vmatmul.mubr.f32.gmra.mrb[66].mxu1 %v16446_v10  ;;  %2845 = vmatprep.mubr.f32.mxu0 %v14473_v39 }
 0x25e   : > { %2540 = vmatprep.mubr.f32.mxu1 %v14473_v39 }
 0x25f   : > { %12592 = vmatpush1.bf16.msra.mxu0 %v12591_v32 }
 0x260   : > { %12593 = vmatprep.subr.bf16.mxu0 %v19773_v33  ;;  %2846 = vmatmul.mubr.f32.gmra.mrb[48].mxu0 %v16672_v26 }
 0x261   : > { %2541 = vmatmul.mubr.f32.gmra.mrb[68].mxu1 %v16453_v11 }
 0x262   : > { %2546 = vmatprep.mubr.f32.mxu1 %v14473_v39 }
 0x263   : > { %12595 = vmatpush1.bf16.msra.mxu0 %v12594_v36 }
 0x264   : > { %12596 = vmatprep.subr.bf16.mxu0 %v19773_v33 }
 0x265   : > { %2547 = vmatmul.mubr.f32.gmra.mrb[70].mxu1 %v16472_v18 }
 0x266   : > { %2552 = vmatprep.mubr.f32.mxu1 %v14473_v39 }
 0x267   : > { %12598 = vmatpush1.bf16.msra.mxu0 %v12597_v42  ;;  %v3684_v42 = vld [vmem:[%s19764_s3 + $0x88] sm:$0xff] }
 0x268   : > { %12599 = vmatprep.subr.bf16.mxu0 %v19773_v33 }
 0x269   : > { %2553 = vmatmul.mubr.f32.gmra.mrb[72].mxu1 %v16497_v29 }
 0x26a   : > { %2558 = vmatprep.mubr.f32.mxu1 %v14473_v39 }
 0x26b   : > { %12601 = vmatpush1.bf16.msra.mxu0 %v12600_v45  ;;  %v3685_v45 = vld [vmem:[%s19764_s3 + $0x90] sm:$0xff] }
 0x26c   : > { %12602 = vmatprep.subr.bf16.mxu0 %v19773_v33 }
 0x26d   : > { %2559 = vmatmul.mubr.f32.gmra.mrb[74].mxu1 %v16516_v37 }
 0x26e   : > { %2564 = vmatprep.mubr.f32.mxu1 %v14473_v39 }
 0x26f   : > { %12604 = vmatpush1.bf16.msra.mxu0 %v12603_v50 }
 0x270   : > { %12605 = vmatprep.subr.bf16.mxu0 %v19773_v33 }
 0x271   : > { %2565 = vmatmul.mubr.f32.gmra.mrb[76].mxu1 %v16535_v47 }
 0x272   : > { %2570 = vmatprep.mubr.f32.mxu1 %v14473_v39 }
 0x273   : > { %12607 = vmatpush1.bf16.msra.mxu0 %v12606_v54 }
 0x274   : > { %12608 = vmatprep.subr.bf16.mxu0 %v19773_v33 }
 0x275   : > { %2571 = vmatmul.mubr.f32.gmra.mrb[78].mxu1 %v16554_v55 }
 0x276   : > { %2576 = vmatprep.mubr.f32.mxu1 %v14473_v39 }
 0x279   : > { %2577 = vmatmul.mubr.f32.gmra.mrb[80].mxu1 %v16573_v63 }
 0x27a   : > { %2582 = vmatprep.mubr.f32.mxu1 %v14473_v39 }
 0x27d   : > { %2583 = vmatmul.mubr.f32.gmra.mrb[82].mxu1 %v16592_v7 }
 0x27e   : > { %2588 = vmatprep.mubr.f32.mxu1 %v14473_v39 }
 0x281   : > { %2589 = vmatmul.mubr.f32.gmra.mrb[84].mxu1 %v16611_v17 }
 0x282   : > { %2594 = vmatprep.mubr.f32.mxu1 %v14473_v39 }
 0x285   : > { %2595 = vmatmul.mubr.f32.gmra.mrb[86].mxu1 %v16618_v19 }
 0x286   : > { %2600 = vmatprep.mubr.f32.mxu1 %v14473_v39 }
 0x289   : > { %2601 = vmatmul.mubr.f32.gmra.mrb[88].mxu1 %v16627_v20 }
 0x28a   : > { %2606 = vmatprep.mubr.f32.mxu1 %v14473_v39 }
 0x28d   : > { %2607 = vmatmul.mubr.f32.gmra.mrb[90].mxu1 %v16636_v21 }
 0x28e   : > { %2612 = vmatprep.mubr.f32.mxu1 %v14473_v39 }
 0x291   : > { %2613 = vmatmul.mubr.f32.gmra.mrb[92].mxu1 %v16645_v22 }
 0x292   : > { %2618 = vmatprep.mubr.f32.mxu1 %v14473_v39 }
 0x295   : > { %2619 = vmatmul.mubr.f32.gmra.mrb[94].mxu1 %v16654_v23 }
 0x296   : > { %2624 = vmatprep.mubr.f32.mxu1 %v14473_v39 }
 0x299   : > { %2625 = vmatmul.mubr.f32.gmra.mrb[96].mxu1 %v16663_v25 }
 0x29a   : > { %2630 = vmatprep.mubr.f32.mxu1 %v14473_v39 }
 0x29d   : > { %2631 = vmatmul.mubr.f32.gmra.mrb[98].mxu1 %v16672_v26 }
 0x29e   : > { %2916 = vmatprep.mubr.f32.mxu1 %v14473_v39 }
 0x2a1   : > { %2917 = vmatmul.mubr.f32.vlgmr.msra.gmra.mrb[100].mxu1 %v16312_v24  ;;  %v12519_v24 = vpack.c.bf16 %v3672_v1, %v3671_v0  ;;  %v3692_v0 = vld [vmem:[%s19764_s3 + $0xc8] sm:$0xff] }
 0x2a2   : > { %2922 = vmatprep.mubr.f32.mxu1 %v14473_v39  ;;  %12514 = vmatpush1.bf16.msra.mxu1 %v12513_v58  ;;  %v3690_v58 = vld [vmem:[%s19764_s3 + $0xb8] sm:$0xff] }
 0x2a3   : > { %12515 = vmatprep.subr.bf16.mxu1 %v19773_v33 }
 0x2a5   : > { %2923 = vmatmul.mubr.f32.gmra.mrb[102].mxu1 %v16331_v31  ;;  %v12522_v31 = vpack.c.bf16 %v3674_v4, %v3673_v2  ;;  %v3693_v2 = vld [vmem:[%s19764_s3 + $0xd0] sm:$0xff]  ;;  %v3694_v4 = vld [vmem:[%s19764_s3 + $0xd8] sm:$0xff] }
 0x2a6   : > { %2928 = vmatprep.mubr.f32.mxu1 %v14473_v39  ;;  %12517 = vmatpush1.bf16.msra.mxu1 %v12516_v62  ;;  %v3691_v62 = vld [vmem:[%s19764_s3 + $0xc0] sm:$0xff] }
 0x2a7   : > { %12518 = vmatprep.subr.bf16.mxu1 %v19773_v33 }
 0x2a9   : > { %2929 = vmatmul.mubr.f32.gmra.mrb[104].mxu1 %v16350_v38  ;;  %v12525_v38 = vpack.c.bf16 %v3676_v6, %v3675_v5  ;;  %v3695_v6 = vld [vmem:[%s19764_s3 + $0xe0] sm:$0xff] }
 0x2aa   : > { %2934 = vmatprep.mubr.f32.mxu1 %v14473_v39  ;;  %12520 = vmatpush1.bf16.msra.mxu1 %v12519_v24 }
 0x2ab   : > { %12521 = vmatprep.subr.bf16.mxu1 %v19773_v33 }
 0x2ac   : > { %v17006_v9 = vpop.f32.mrb[0].mxu1 }
 0x2ad   : > { %v17008_v12 = vpop.f32.mrb[1].mxu1  ;;  %2935 = vmatmul.mubr.f32.gmra.mrb[106].mxu1 %v16369_v46  ;;  %v12528_v46 = vpack.c.bf16 %v3678_v14, %v3677_v13 }
 0x2ae   : > { %2940 = vmatprep.mubr.f32.mxu1 %v14473_v39  ;;  %12523 = vmatpush1.bf16.msra.mxu1 %v12522_v31 }
 0x2af   : > { %12524 = vmatprep.subr.bf16.mxu1 %v19773_v33 }
 0x2b0   : > { %v17019_v15 = vpop.f32.mrb[2].mxu1 }
 0x2b1   : > { %v17021_v16 = vpop.f32.mrb[3].mxu1  ;;  %2941 = vmatmul.mubr.f32.gmra.mrb[108].mxu1 %v16388_v53  ;;  %v12531_v53 = vpack.c.bf16 %v3680_v28, %v3679_v27  ;;  %v3698_v27 = vld [vmem:[%s19764_s3 + $0xf8] sm:$0xff] }
 0x2b2   : > { %2946 = vmatprep.mubr.f32.mxu1 %v14473_v39  ;;  %12526 = vmatpush1.bf16.msra.mxu1 %v12525_v38  ;;  %v3696_v38 = vld [vmem:[%s19764_s3 + $0xe8] sm:$0xff] }
 0x2b3   : > { %12527 = vmatprep.subr.bf16.mxu1 %v19773_v33 }
 0x2b4   : > { %v17032_v30 = vpop.f32.mrb[4].mxu1 }
 0x2b5   : > { %v17034_v32 = vpop.f32.mrb[5].mxu1  ;;  %2947 = vmatmul.mubr.f32.gmra.mrb[110].mxu1 %v16407_v60  ;;  %v12534_v60 = vpack.c.bf16 %v3682_v35, %v3681_v34 }
 0x2b6   : > { %2952 = vmatprep.mubr.f32.mxu1 %v14473_v39  ;;  %12529 = vmatpush1.bf16.msra.mxu1 %v12528_v46  ;;  %v3697_v46 = vld [vmem:[%s19764_s3 + $0xf0] sm:$0xff] }
 0x2b7   : > { %12530 = vmatprep.subr.bf16.mxu1 %v19773_v33 }
 0x2b8   : > { %v17045_v36 = vpop.f32.mrb[6].mxu1 }
 0x2b9   : > { %v17047_v40 = vpop.f32.mrb[7].mxu1  ;;  %2953 = vmatmul.mubr.f32.gmra.mrb[112].mxu1 %v16426_v3  ;;  %v12537_v3 = vpack.c.bf16 %v3684_v42, %v3683_v41 }
 0x2ba   : > { %2958 = vmatprep.mubr.f32.mxu1 %v14473_v39  ;;  %12532 = vmatpush1.bf16.msra.mxu1 %v12531_v53 }
 0x2bb   : > { %12533 = vmatprep.subr.bf16.mxu1 %v19773_v33 }
 0x2bc   : > { %v17058_v43 = vpop.f32.mrb[8].mxu1 }
 0x2bd   : > { %v17060_v44 = vpop.f32.mrb[9].mxu1  ;;  %2959 = vmatmul.mubr.f32.gmra.mrb[114].mxu1 %v16439_v8  ;;  %v12540_v8 = vpack.c.bf16 %v3686_v48, %v3685_v45 }
 0x2be   : > { %2964 = vmatprep.mubr.f32.mxu1 %v14473_v39  ;;  %12535 = vmatpush1.bf16.msra.mxu1 %v12534_v60 }
 0x2bf   : > { %12536 = vmatprep.subr.bf16.mxu1 %v19773_v33 }
 0x2c0   : > { %v17071_v49 = vpop.f32.mrb[10].mxu1 }
 0x2c1   : > { %v17073_v50 = vpop.f32.mrb[11].mxu1  ;;  %2965 = vmatmul.mubr.f32.gmra.mrb[116].mxu1 %v16446_v10  ;;  %v12543_v10 = vpack.c.bf16 %v3688_v52, %v3687_v51 }
 0x2c2   : > { %2970 = vmatprep.mubr.f32.mxu1 %v14473_v39  ;;  %12538 = vmatpush1.bf16.msra.mxu1 %v12537_v3  ;;  %v2167_v3 = vlaneseq }
 0x2c3   : > { %12539 = vmatprep.subr.bf16.mxu1 %v19773_v33 }
 0x2c4   : > { %v17084_v54 = vpop.f32.mrb[12].mxu1  ;;  %v17182_v48 = vshrl.u32 %v2167_v3, 7 }
 0x2c5   : > { %v17086_v56 = vpop.f32.mrb[13].mxu1  ;;  %2971 = vmatmul.mubr.f32.gmra.mrb[118].mxu1 %v16453_v11  ;;  %v12546_v11 = vpack.c.bf16 %v3690_v58, %v3689_v57 }
 0x2c6   : > { %2976 = vmatprep.mubr.f32.mxu1 %v14473_v39  ;;  %12541 = vmatpush1.bf16.msra.mxu1 %v12540_v8  ;;  %19777 = vst [vmem:[#allocation12_spill] sm:$0xff] %v17182_v48  ;;  %v2173_v51 = vsub.s32 1, %v17182_v48  ;;  %v2169_v57 = vsub.s32 0, %v17182_v48 }
 0x2c7   : > { %12542 = vmatprep.subr.bf16.mxu1 %v19773_v33 }
 0x2c8   : > { %v17097_v59 = vpop.f32.mrb[14].mxu1 }
 0x2c9   : > { %v17099_v61 = vpop.f32.mrb[15].mxu1  ;;  %2977 = vmatmul.mubr.f32.gmra.mrb[120].mxu1 %v16472_v18  ;;  %v12549_v18 = vpack.c.bf16 %v3692_v0, %v3691_v62 }
 0x2ca   : > { %2982 = vmatprep.mubr.f32.mxu1 %v14473_v39  ;;  %12544 = vmatpush1.bf16.msra.mxu1 %v12543_v10 }
 0x2cb   : > { %12545 = vmatprep.subr.bf16.mxu1 %v19773_v33 }
 0x2cc   : > { %v17110_v1 = vpop.f32.mrb[16].mxu1 }
 0x2cd   : > { %v17112_v24 = vpop.f32.mrb[17].mxu1  ;;  %2983 = vmatmul.mubr.f32.gmra.mrb[122].mxu1 %v16497_v29  ;;  %v12552_v29 = vpack.c.bf16 %v3694_v4, %v3693_v2 }
 0x2ce   : > { %2988 = vmatprep.mubr.f32.mxu1 %v14473_v39  ;;  %12547 = vmatpush1.bf16.msra.mxu1 %v12546_v11 }
 0x2cf   : > { %12548 = vmatprep.subr.bf16.mxu1 %v19773_v33 }
 0x2d0   : > { %v17123_v31 = vpop.f32.mrb[18].mxu1 }
 0x2d1   : > { %v17125_v5 = vpop.f32.mrb[19].mxu1  ;;  %2989 = vmatmul.mubr.f32.gmra.mrb[124].mxu1 %v16516_v37  ;;  %v12555_v37 = vpack.c.bf16 %v3696_v38, %v3695_v6  ;;  %v17200_v10 = vpop.f32.mrb[0].mxu0 }
 0x2d2   : > { %2994 = vmatprep.mubr.f32.mxu1 %v14473_v39  ;;  %12550 = vmatpush1.bf16.msra.mxu1 %v12549_v18  ;;  %19778 = vst [vmem:[#allocation13_spill] sm:$0xff] %v17200_v10  ;;  %v17306_v10 = vld [vmem:[%s19764_s3 + $0x220] sm:$0xff] }
 0x2d3   : > { %12551 = vmatprep.subr.bf16.mxu1 %v19773_v33 }
 0x2d4   : > { %v17136_v13 = vpop.f32.mrb[20].mxu1 }
 0x2d5   : > { %v17138_v14 = vpop.f32.mrb[21].mxu1  ;;  %2995 = vmatmul.mubr.f32.gmra.mrb[126].mxu1 %v16535_v47  ;;  %v12558_v47 = vpack.c.bf16 %v3698_v27, %v3697_v46 }
 0x2d6   : > { %3000 = vmatprep.mubr.f32.mxu1 %v14473_v39  ;;  %12553 = vmatpush1.bf16.msra.mxu1 %v12552_v29 }
 0x2d7   : > { %12554 = vmatprep.subr.bf16.mxu1 %v19773_v33 }
 0x2d8   : > { %v17149_v28 = vpop.f32.mrb[22].mxu1 }
 0x2d9   : > { %v17151_v53 = vpop.f32.mrb[23].mxu1  ;;  %3001 = vmatmul.mubr.f32.gmra.mrb[128].mxu1 %v16554_v55 }
 0x2da   : > { %3006 = vmatprep.mubr.f32.mxu1 %v14473_v39  ;;  %12556 = vmatpush1.bf16.msra.mxu1 %v12555_v37 }
 0x2db   : > { %12557 = vmatprep.subr.bf16.mxu1 %v19773_v33 }
 0x2dc   : > { %v17156_v34 = vpop.f32.mrb[24].mxu1 }
 0x2dd   : > { %v17158_v35 = vpop.f32.mrb[25].mxu1  ;;  %3007 = vmatmul.mubr.f32.gmra.mrb[130].mxu1 %v16573_v63 }
 0x2de   : > { %3012 = vmatprep.mubr.f32.mxu1 %v14473_v39  ;;  %12559 = vmatpush1.bf16.msra.mxu1 %v12558_v47 }
 0x2e0   : > { %v17162_v60 = vpop.f32.mrb[26].mxu1 }
 0x2e1   : > { %v17164_v41 = vpop.f32.mrb[27].mxu1  ;;  %3013 = vmatmul.mubr.f32.gmra.mrb[132].mxu1 %v16592_v7 }
 0x2e2   : > { %3018 = vmatprep.mubr.f32.mxu1 %v14473_v39 }
 0x2e4   : > { %v17168_v55 = vpop.f32.mrb[28].mxu1 }
 0x2e5   : > { %v17170_v42 = vpop.f32.mrb[29].mxu1  ;;  %3019 = vmatmul.mubr.f32.gmra.mrb[134].mxu1 %v16611_v17 }
 0x2e6   : > { %3024 = vmatprep.mubr.f32.mxu1 %v14473_v39 }
 0x2e8   : > { %v17174_v63 = vpop.f32.mrb[30].mxu1 }
 0x2e9   : > { %v17176_v45 = vpop.f32.mrb[31].mxu1  ;;  %3025 = vmatmul.mubr.f32.gmra.mrb[136].mxu1 %v16618_v19  ;;  %v17197_v19 = vld [vmem:[%s19763_s2] sm:$0xff] }
 0x2ea   : > { %3030 = vmatprep.mubr.f32.mxu1 %v14473_v39  ;;  %v17208_v11 = vrot.slane %v17197_v19, %v2173_v51  ;;  %v17219_v18 = vrot.slane %v17197_v19, %v2169_v57 }
 0x2ec   : > { %v17180_v7 = vpop.f32.mrb[32].mxu1  ;;  %v2276_v4 = vadd.f32 %v17008_v12, %v17208_v11  ;;  %v2274_v38 = vadd.f32 %v17006_v9, %v17219_v18  ;;  %v2282_v27 = vadd.f32 %v17021_v16, %v17208_v11  ;;  %v2280_v9 = vadd.f32 %v17019_v15, %v17219_v18 }
 0x2ed   : > { %v17184_v8 = vpop.f32.mrb[33].mxu1  ;;  %3031 = vmatmul.mubr.f32.gmra.mrb[138].mxu1 %v16627_v20  ;;  %v17202_v20 = vpop.f32.mrb[1].mxu0  ;;  %v2288_v16 = vadd.f32 %v17034_v32, %v17208_v11  ;;  %v2177_v32 = vsub.s32 2, %v17182_v48 }
 0x2ee   : > { %3036 = vmatprep.mubr.f32.mxu1 %v14473_v39  ;;  %19779 = vst [vmem:[#allocation14_spill] sm:$0xff] %v17202_v20  ;;  %v3268_v46 = vmul.f32 0.2, %v2276_v4  ;;  %vm3068_vm0 = vcmp.ge.f32.partialorder %v2276_v4, 0.0  ;;  %v3267_v3 = vmul.f32 0.2, %v2274_v38  ;;  %v2306_v20 = vadd.f32 %v17073_v50, %v17208_v11 }
 0x2ef   : > { %vm3067_vm1 = vcmp.ge.f32.partialorder %v2274_v38, 0.0  ;;  %v3276_v57 = vmul.f32 0.2, %v2282_v27  ;;  %vm3076_vm2 = vcmp.ge.f32.partialorder %v2282_v27, 0.0  ;;  %v3275_v15 = vmul.f32 0.2, %v2280_v9 }
 0x2f0   : > { %v17188_v17 = vpop.f32.mrb[34].mxu1  ;;  %vm3075_vm3 = vcmp.ge.f32.partialorder %v2280_v9, 0.0  ;;  %vm3084_vm4 = vcmp.ge.f32.partialorder %v2288_v16, 0.0  ;;  %v17336_v50 = vld [vmem:[%s19764_s3 + $0x230] sm:$0xff]  ;;  %vm3108_vm10 = vcmp.ge.f32.partialorder %v2306_v20, 0.0 }
 0x2f1   : > { %v17191_v52 = vpop.f32.mrb[35].mxu1  ;;  %3037 = vmatmul.mubr.f32.gmra.mrb[140].mxu1 %v16636_v21  ;;  %v17214_v21 = vpop.f32.mrb[2].mxu0 }
 0x2f2   : > { %3042 = vmatprep.mubr.f32.mxu1 %v14473_v39  ;;  %19781 = vst [vmem:[#allocation16_spill] sm:$0xff] %v17214_v21  ;;  %v17216_v0 = vpop.f32.mrb[3].mxu0 }
 0x2f3   : > { %19782 = vst [vmem:[#allocation17_spill] sm:$0xff] %v17216_v0  ;;  %v2304_v0 = vadd.f32 %v17071_v49, %v17219_v18  ;;  %v2310_v49 = vadd.f32 %v17084_v54, %v17219_v18 }
 0x2f4   : > { %v17205_v58 = vpop.f32.mrb[36].mxu1 }
 0x2f5   : > { %19780 = vst [vmem:[#allocation15_spill] sm:$0xff] %v17205_v58  ;;  %v17210_v62 = vpop.f32.mrb[37].mxu1  ;;  %3043 = vmatmul.mubr.f32.gmra.mrb[142].mxu1 %v16645_v22  ;;  %v17229_v22 = vpop.f32.mrb[4].mxu0  ;;  %vm3107_vm11 = vcmp.ge.f32.partialorder %v2304_v0, 0.0  ;;  %vm3115_vm12 = vcmp.ge.f32.partialorder %v2310_v49, 0.0 }
 0x2f6   : > { %3048 = vmatprep.mubr.f32.mxu1 %v14473_v39  ;;  %19785 = vst [vmem:[#allocation20_spill] sm:$0xff] %v17229_v22  ;;  %v17231_v6 = vpop.f32.mrb[5].mxu0  ;;  %v3467_v22 = vsel %vm3067_vm1, %v2274_v38, %v3267_v3  ;;  %v2181_v38 = vsub.s32 3, %v17182_v48 }
 0x2f7   : > { %19786 = vst [vmem:[#allocation21_spill] sm:$0xff] %v17231_v6  ;;  %v3284_v6 = vmul.f32 0.2, %v2288_v16 }
 0x2f8   : > { %v17221_v2 = vpop.f32.mrb[38].mxu1  ;;  %v17323_v48 = vrot.slane %v17197_v19, %v2181_v38 }
 0x2f9   : > { %19783 = vst [vmem:[#allocation18_spill] sm:$0xff] %v17221_v2  ;;  %v17225_v29 = vpop.f32.mrb[39].mxu1  ;;  %3049 = vmatmul.mubr.f32.gmra.mrb[144].mxu1 %v16654_v23  ;;  %v17243_v23 = vpop.f32.mrb[6].mxu0 }
 0x2fa   : > { %19784 = vst [vmem:[#allocation19_spill] sm:$0xff] %v17225_v29  ;;  %3054 = vmatprep.mubr.f32.mxu1 %v14473_v39  ;;  %19789 = vst [vmem:[#allocation24_spill] sm:$0xff] %v17243_v23  ;;  %v17245_v47 = vpop.f32.mrb[7].mxu0 }
 0x2fb   : > { %19790 = vst [vmem:[#allocation25_spill] sm:$0xff] %v17245_v47  ;;  %v2286_v47 = vadd.f32 %v17032_v30, %v17219_v18  ;;  %v2292_v30 = vadd.f32 %v17045_v36, %v17219_v18  ;;  %v2298_v36 = vadd.f32 %v17058_v43, %v17219_v18  ;;  %v17311_v43 = vld [vmem:[%s19764_s3 + $0x228] sm:$0xff] }
 0x2fc   : > { %v17235_v37 = vpop.f32.mrb[40].mxu1 }
 0x2fd   : > { %19787 = vst [vmem:[#allocation22_spill] sm:$0xff] %v17235_v37  ;;  %v17239_v12 = vpop.f32.mrb[41].mxu1  ;;  %3055 = vmatmul.mubr.f32.gmra.mrb[146].mxu1 %v16663_v25  ;;  %v17256_v25 = vpop.f32.mrb[8].mxu0  ;;  %vm3083_vm5 = vcmp.ge.f32.partialorder %v2286_v47, 0.0  ;;  %vm3091_vm7 = vcmp.ge.f32.partialorder %v2292_v30, 0.0  ;;  %vm3099_vm9 = vcmp.ge.f32.partialorder %v2298_v36, 0.0 }
 0x2fe   : > { %19788 = vst [vmem:[#allocation23_spill] sm:$0xff] %v17239_v12  ;;  %3060 = vmatprep.mubr.f32.mxu1 %v14473_v39  ;;  %v3468_v39 = vsel %vm3068_vm0, %v2276_v4, %v3268_v46  ;;  %19793 = vst [vmem:[#allocation28_spill] sm:$0xff] %v17256_v25  ;;  %v17258_v23 = vpop.f32.mrb[9].mxu0  ;;  %v3476_v46 = vsel %vm3076_vm2, %v2282_v27, %v3276_v57  ;;  %v3283_v57 = vmul.f32 0.2, %v2286_v47 }
 0x2ff   : > { %19794 = vst [vmem:[#allocation29_spill] sm:$0xff] %v17258_v23  ;;  %v17270_v3 = vpop.f32.mrb[10].mxu0  ;;  %v17296_v25 = vrot.slane %v17197_v19, %v2177_v32  ;;  %v17301_v23 = vld [vmem:[%s19764_s3 + $0x218] sm:$0xff]  ;;  %v3484_v32 = vsel %vm3084_vm4, %v2288_v16, %v3284_v6  ;;  %v17346_v16 = vld [vmem:[%s19764_s3 + $0x240] sm:$0xff] }
 0x300   : > { %v17249_v51 = vpop.f32.mrb[42].mxu1  ;;  %19797 = vst [vmem:[#allocation32_spill] sm:$0xff] %v17270_v3  ;;  %v17289_v27 = vpop.f32.mrb[11].mxu0  ;;  %v3475_v3 = vsel %vm3075_vm3, %v2280_v9, %v3275_v15  ;;  %v2300_v9 = vadd.f32 %v17060_v44, %v17208_v11  ;;  %v3291_v44 = vmul.f32 0.2, %v2292_v30  ;;  %v17341_v19 = vld [vmem:[%s19764_s3 + $0x238] sm:$0xff] }
 0x301   : > { %19791 = vst [vmem:[#allocation26_spill] sm:$0xff] %v17249_v51  ;;  %v17253_v33 = vpop.f32.mrb[43].mxu1  ;;  %3061 = vmatmul.mubr.f32.gmra.mrb[148].mxu1 %v16672_v26  ;;  %v2294_v26 = vadd.f32 %v17047_v40, %v17208_v11  ;;  %v17282_v40 = vld [vmem:[%s19764_s3 + $0x208] sm:$0xff]  ;;  %19798 = vst [vmem:[#allocation33_spill] sm:$0xff] %v17289_v27  ;;  %v3315_v51 = vmul.f32 0.2, %v2310_v49 }
 0x302   : > { %19792 = vst [vmem:[#allocation27_spill] sm:$0xff] %v17253_v33  ;;  %3866 = vmatprep.mubr.f32.mxu1 %v3468_v39  ;;  %v17277_v39 = vld [vmem:[%s19764_s3 + $0x200] sm:$0xff]  ;;  %vm3100_vm8 = vcmp.ge.f32.partialorder %v2300_v9, 0.0  ;;  %v3491_v33 = vsel %vm3091_vm7, %v2292_v30, %v3291_v44 }
 0x303   : > { %v3292_v27 = vmul.f32 0.2, %v2294_v26  ;;  %vm3092_vm6 = vcmp.ge.f32.partialorder %v2294_v26, 0.0 }
 0x304   : > { %v17262_v21 = vpop.f32.mrb[44].mxu1 }
 0x305   : > { %19795 = vst [vmem:[#allocation30_spill] sm:$0xff] %v17262_v21  ;;  %v17267_v4 = vpop.f32.mrb[45].mxu1  ;;  %3867 = vmatmul.mubr.f32.vlgmr.msra.gmra.mrb[150].mxu1 %v3467_v22  ;;  %v17287_v22 = vld [vmem:[%s19764_s3 + $0x210] sm:$0xff]  ;;  %v3492_v54 = vsel %vm3092_vm6, %v2294_v26, %v3292_v27  ;;  %v17380_v26 = vld [vmem:[%s19764_s3 + $0x260] sm:$0xff]  ;;  %v17385_v27 = vld [vmem:[%s19764_s3 + $0x268] sm:$0xff] }
 0x306   : > { %19796 = vst [vmem:[#allocation31_spill] sm:$0xff] %v17267_v4  ;;  %3871 = vmatprep.mubr.f32.mxu1 %v3476_v46  ;;  %v2312_v4 = vadd.f32 %v17086_v56, %v17208_v11 }
 0x308   : > { %v17293_v46 = vpop.f32.mrb[46].mxu1  ;;  %vm3116_vm13 = vcmp.ge.f32.partialorder %v2312_v4, 0.0 }
 0x309   : > { %19799 = vst [vmem:[#allocation34_spill] sm:$0xff] %v17293_v46  ;;  %v17315_v15 = vpop.f32.mrb[47].mxu1  ;;  %3872 = vmatmul.mubr.f32.gmra.mrb[152].mxu1 %v3475_v3  ;;  %v17325_v46 = vpop.f32.mrb[12].mxu0  ;;  %v3483_v3 = vsel %vm3083_vm5, %v2286_v47, %v3283_v57  ;;  %v17371_v47 = vld [vmem:[%s19764_s3 + $0x258] sm:$0xff]  ;;  %v3307_v57 = vmul.f32 0.2, %v2304_v0 }
 0x30a   : > { %19800 = vst [vmem:[#allocation35_spill] sm:$0xff] %v17315_v15  ;;  %3876 = vmatprep.mubr.f32.mxu1 %v3484_v32  ;;  %19801 = vst [vmem:[#allocation36_spill] sm:$0xff] %v17325_v46  ;;  %v17348_v38 = vpop.f32.mrb[13].mxu0  ;;  %v3299_v32 = vmul.f32 0.2, %v2298_v36  ;;  %v17358_v46 = vld [vmem:[%s19764_s3 + $0x248] sm:$0xff] }
 0x30b   : > { %19802 = vst [vmem:[#allocation37_spill] sm:$0xff] %v17348_v38  ;;  %v17363_v15 = vld [vmem:[%s19764_s3 + $0x250] sm:$0xff]  ;;  %v3300_v38 = vmul.f32 0.2, %v2300_v9  ;;  %v3507_v44 = vsel %vm3107_vm11, %v2304_v0, %v3307_v57  ;;  %v2322_v57 = vadd.f32 %v17110_v1, %v17219_v18  ;;  %v17437_v1 = vld [vmem:[%s19764_s3 + $0x280] sm:$0xff] }
 0x30c   : > { %v17352_v6 = vpop.f32.mrb[48].mxu1  ;;  %v3499_v37 = vsel %vm3099_vm9, %v2298_v36, %v3299_v32 }
 0x30d   : > { %19803 = vst [vmem:[#allocation38_spill] sm:$0xff] %v17352_v6  ;;  %v17365_v21 = vpop.f32.mrb[49].mxu1  ;;  %3877 = vmatmul.mubr.f32.gmra.mrb[154].mxu1 %v3483_v3  ;;  %v3308_v6 = vmul.f32 0.2, %v2306_v20  ;;  %v2316_v3 = vadd.f32 %v17097_v59, %v17219_v18  ;;  %v3500_v58 = vsel %vm3100_vm8, %v2300_v9, %v3300_v38  ;;  %v2318_v38 = vadd.f32 %v17099_v61, %v17208_v11 }
 0x30e   : > { %19804 = vst [vmem:[#allocation39_spill] sm:$0xff] %v17365_v21  ;;  %3881 = vmatprep.mubr.f32.mxu1 %v3492_v54  ;;  %v17391_v54 = vpop.f32.mrb[14].mxu0  ;;  %vm3131_vm4 = vcmp.ge.f32.partialorder %v2322_v57, 0.0 }
 0x30f   : > { %19805 = vst [vmem:[#allocation40_spill] sm:$0xff] %v17391_v54  ;;  %v17397_v2 = vpop.f32.mrb[15].mxu0  ;;  %v3316_v54 = vmul.f32 0.2, %v2312_v4  ;;  %v3508_v36 = vsel %vm3108_vm10, %v2306_v20, %v3308_v6  ;;  %v3323_v9 = vmul.f32 0.2, %v2316_v3  ;;  %v3515_v6 = vsel %vm3115_vm12, %v2310_v49, %v3315_v51 }
 0x310   : > { %v2488_v21 = vpop.f32.mrb[50].mxu1  ;;  %19806 = vst [vmem:[#allocation41_spill] sm:$0xff] %v17397_v2  ;;  %vm3123_vm0 = vcmp.ge.f32.partialorder %v2316_v3, 0.0  ;;  %vm3124_vm1 = vcmp.ge.f32.partialorder %v2318_v38, 0.0 }
 0x311   : > { %v2489_v59 = vadd.f32 %v2488_v21, %v17296_v25  ;;  %v2490_v29 = vpop.f32.mrb[51].mxu1  ;;  %3882 = vmatmul.mubr.f32.gmra.mrb[156].mxu1 %v3491_v33  ;;  %v17409_v21 = vld [vmem:[%s19764_s3 + $0x270] sm:$0xff]  ;;  %v17414_v33 = vld [vmem:[%s19764_s3 + $0x278] sm:$0xff]  ;;  %v3516_v49 = vsel %vm3116_vm13, %v2312_v4, %v3316_v54  ;;  %v3523_v54 = vsel %vm3123_vm0, %v2316_v3, %v3323_v9 }
 0x312   : > { %v2491_v30 = vadd.f32 %v2490_v29, %v17323_v48  ;;  %3886 = vmatprep.mubr.f32.mxu1 %v3500_v58  ;;  %v17418_v58 = vpop.f32.mrb[16].mxu0 }
 0x313   : > { %v3269_v29 = vmul.f32 0.2, %v2489_v59  ;;  %19807 = vst [vmem:[#allocation42_spill] sm:$0xff] %v17418_v58  ;;  %vm3069_vm14 = vcmp.ge.f32.partialorder %v2489_v59, 0.0  ;;  %v17421_v32 = vpop.f32.mrb[17].mxu0  ;;  %v17430_v58 = vadd.f32 %v17112_v24, %v17208_v11 }
 0x314   : > { %v3270_v20 = vmul.f32 0.2, %v2491_v30  ;;  %v2494_v0 = vpop.f32.mrb[52].mxu1  ;;  %vm3070_vm15 = vcmp.ge.f32.partialorder %v2491_v30, 0.0  ;;  %19808 = vst [vmem:[#allocation43_spill] sm:$0xff] %v17421_v32  ;;  %v2328_v32 = vadd.f32 %v17123_v31, %v17219_v18  ;;  %v17463_v31 = vadd.f32 %v17125_v5, %v17208_v11 }
 0x315   : > { %v2495_v56 = vadd.f32 %v2494_v0, %v17296_v25  ;;  %v2496_v12 = vpop.f32.mrb[53].mxu1  ;;  %3887 = vmatmul.mubr.f32.gmra.mrb[158].mxu1 %v3499_v37  ;;  %v17442_v37 = vld [vmem:[%s19764_s3 + $0x288] sm:$0xff]  ;;  %v3324_v0 = vmul.f32 0.2, %v2318_v38  ;;  %v3469_v24 = vsel %vm3069_vm14, %v2489_v59, %v3269_v29  ;;  %vm3132_vm5 = vcmp.ge.f32.partialorder %v17430_v58, 0.0 }
 0x316   : > { %v2497_v2 = vadd.f32 %v2496_v12, %v17323_v48  ;;  %3891 = vmatprep.mubr.f32.mxu1 %v3508_v36  ;;  %v3470_v51 = vsel %vm3070_vm15, %v2491_v30, %v3270_v20  ;;  %v17445_v12 = vpop.f32.mrb[18].mxu0  ;;  %v3331_v20 = vmul.f32 0.2, %v2322_v57  ;;  %v2334_v5 = vadd.f32 %v17136_v13, %v17219_v18 }
 0x317   : > { %v3277_v61 = vmul.f32 0.2, %v2495_v56  ;;  %4056 = vmatprep.mubr.f32.mxu0 %v3470_v51  ;;  %19809 = vst [vmem:[#allocation44_spill] sm:$0xff] %v17445_v12  ;;  %vm3077_vm3 = vcmp.ge.f32.partialorder %v2495_v56, 0.0  ;;  %v17448_v36 = vpop.f32.mrb[19].mxu0  ;;  %v19811_v51 = vpack.c.bf16 %v17282_v40, %v17277_v39  ;;  %vm3139_vm8 = vcmp.ge.f32.partialorder %v2328_v32, 0.0 }
 0x318   : > { %v3278_v30 = vmul.f32 0.2, %v2497_v2  ;;  %v2500_v4 = vpop.f32.mrb[54].mxu1  ;;  %4057 = vmatmul.mubr.f32.vlgmr.msra.gmra.mrb[50].mxu0 %v3469_v24  ;;  %vm3078_vm2 = vcmp.ge.f32.partialorder %v2497_v2, 0.0  ;;  %19810 = vst [vmem:[#allocation45_spill] sm:$0xff] %v17448_v36  ;;  %v12633_v24 = vpack.c.bf16 %v17442_v37, %v17437_v1  ;;  %v19812_v36 = vmov 0.0|0.0  }
 0x319   : > { %v2501_v59 = vadd.f32 %v2500_v4, %v17296_v25  ;;  %v2502_v29 = vpop.f32.mrb[55].mxu1  ;;  %3892 = vmatmul.mubr.f32.gmra.mrb[160].mxu1 %v3507_v44  ;;  %12610 = vmatpush1.bf16.msra.mxu0 %v19811_v51  ;;  %v3332_v12 = vmul.f32 0.2, %v17430_v58  ;;  %v3477_v39 = vsel %vm3077_vm3, %v2495_v56, %v3277_v61  ;;  %v19813_v56 = vpack.c.bf16 %v17301_v23, %v17287_v22  ;;  %v17702_v37 = vld [vmem:[%s19764_s3 + $0x2d8] sm:$0xff] }
 0x31a   : > { %v2503_v3 = vadd.f32 %v2502_v29, %v17323_v48  ;;  %3896 = vmatprep.mubr.f32.mxu1 %v3516_v49  ;;  %v3478_v9 = vsel %vm3078_vm2, %v2497_v2, %v3278_v30  ;;  %12611 = vmatprep.subr.bf16.mxu0 %v19812_v36  ;;  %v3524_v29 = vsel %vm3124_vm1, %v2318_v38, %v3324_v0  ;;  %v17468_v2 = vpop.f32.mrb[20].mxu0  ;;  %v3339_v49 = vmul.f32 0.2, %v2328_v32 }
 0x31b   : > { %v3285_v44 = vmul.f32 0.2, %v2501_v59  ;;  %4061 = vmatprep.mubr.f32.mxu0 %v3478_v9  ;;  %vm3085_vm7 = vcmp.ge.f32.partialorder %v2501_v59, 0.0  ;;  %v3531_v61 = vsel %vm3131_vm4, %v2322_v57, %v3331_v20  ;;  %v17477_v9 = vpop.f32.mrb[21].mxu0  ;;  %v2336_v38 = vadd.f32 %v17138_v14, %v17208_v11 }
 0x31c   : > { %v3286_v40 = vmul.f32 0.2, %v2503_v3  ;;  %v2506_v4 = vpop.f32.mrb[56].mxu1  ;;  %4062 = vmatmul.mubr.f32.gmra.mrb[52].mxu0 %v3477_v39  ;;  %vm3086_vm6 = vcmp.ge.f32.partialorder %v2503_v3, 0.0  ;;  %v3340_v13 = vmul.f32 0.2, %v17463_v31  ;;  %v3532_v22 = vsel %vm3132_vm5, %v17430_v58, %v3332_v12 }
 0x31d   : > { %v2507_v30 = vadd.f32 %v2506_v4, %v17296_v25  ;;  %v2508_v51 = vpop.f32.mrb[57].mxu1  ;;  %3897 = vmatmul.mubr.f32.gmra.mrb[162].mxu1 %v3515_v6  ;;  %12613 = vmatpush1.bf16.msra.mxu0 %v19813_v56  ;;  %v3485_v23 = vsel %vm3085_vm7, %v2501_v59, %v3285_v44  ;;  %v17488_v57 = vpop.f32.mrb[22].mxu0  ;;  %vm3140_vm11 = vcmp.ge.f32.partialorder %v17463_v31, 0.0  ;;  %v19814_v58 = vpack.c.bf16 %v17311_v43, %v17306_v10  ;;  %v17501_v44 = vld [vmem:[%s19764_s3 + $0x290] sm:$0xff] }
 0x31e   : > { %v2509_v0 = vadd.f32 %v2508_v51, %v17323_v48  ;;  %3901 = vmatprep.mubr.f32.mxu1 %v3524_v29  ;;  %v3486_v39 = vsel %vm3086_vm6, %v2503_v3, %v3286_v40  ;;  %12614 = vmatprep.subr.bf16.mxu0 %v19812_v36  ;;  %v3347_v3 = vmul.f32 0.2, %v2334_v5  ;;  %v2340_v40 = vadd.f32 %v17149_v28, %v17219_v18  ;;  %v17506_v29 = vld [vmem:[%s19764_s3 + $0x298] sm:$0xff]  ;;  %v17508_v28 = vpop.f32.mrb[23].mxu0 }
 0x31f   : > { %v3293_v6 = vmul.f32 0.2, %v2507_v30  ;;  %4066 = vmatprep.mubr.f32.mxu0 %v3486_v39  ;;  %vm3093_vm10 = vcmp.ge.f32.partialorder %v2507_v30, 0.0  ;;  %v3539_v12 = vsel %vm3139_vm8, %v2328_v32, %v3339_v49  ;;  %v3348_v51 = vmul.f32 0.2, %v2336_v38  ;;  %v17518_v56 = vpop.f32.mrb[24].mxu0 }
 0x320   : > { %v3294_v14 = vmul.f32 0.2, %v2509_v0  ;;  %v2512_v20 = vpop.f32.mrb[58].mxu1  ;;  %4067 = vmatmul.mubr.f32.gmra.mrb[54].mxu0 %v3485_v23  ;;  %vm3094_vm9 = vcmp.ge.f32.partialorder %v2509_v0, 0.0  ;;  %vm3147_vm12 = vcmp.ge.f32.partialorder %v2334_v5, 0.0  ;;  %v17515_v43 = vadd.f32 %v17151_v53, %v17208_v11 }
 0x321   : > { %v2513_v4 = vadd.f32 %v2512_v20, %v17296_v25  ;;  %v2514_v59 = vpop.f32.mrb[59].mxu1  ;;  %3902 = vmatmul.mubr.f32.gmra.mrb[164].mxu1 %v3523_v54  ;;  %12616 = vmatpush1.bf16.msra.mxu0 %v19814_v58  ;;  %v3493_v49 = vsel %vm3093_vm10, %v2507_v30, %v3293_v6  ;;  %vm3148_vm13 = vcmp.ge.f32.partialorder %v2336_v38, 0.0  ;;  %v3540_v30 = vsel %vm3140_vm11, %v17463_v31, %v3340_v13  ;;  %v17538_v58 = vld [vmem:[%s19764_s3 + $0x2a8] sm:$0xff] }
 0x322   : > { %v2515_v54 = vadd.f32 %v2514_v59, %v17323_v48  ;;  %3906 = vmatprep.mubr.f32.mxu1 %v3532_v22  ;;  %v3494_v10 = vsel %vm3094_vm9, %v2509_v0, %v3294_v14  ;;  %12617 = vmatprep.subr.bf16.mxu0 %v19812_v36  ;;  %v12636_v0 = vpack.c.bf16 %v17506_v29, %v17501_v44  ;;  %v3355_v22 = vmul.f32 0.2, %v2340_v40  ;;  %v17533_v59 = vld [vmem:[%s19764_s3 + $0x2a0] sm:$0xff] }
 0x323   : > { %v3301_v32 = vmul.f32 0.2, %v2513_v4  ;;  %4071 = vmatprep.mubr.f32.mxu0 %v3494_v10  ;;  %vm3101_vm15 = vcmp.ge.f32.partialorder %v2513_v4, 0.0  ;;  %v19815_v6 = vpack.c.bf16 %v17341_v19, %v17336_v50  ;;  %v3547_v20 = vsel %vm3147_vm12, %v2334_v5, %v3347_v3  ;;  %v17728_v29 = vld [vmem:[%s19764_s3 + $0x2e0] sm:$0xff] }
 0x324   : > { %v3302_v39 = vmul.f32 0.2, %v2515_v54  ;;  %v2518_v23 = vpop.f32.mrb[60].mxu1  ;;  %4072 = vmatmul.mubr.f32.gmra.mrb[56].mxu0 %v3493_v49  ;;  %vm3102_vm14 = vcmp.ge.f32.partialorder %v2515_v54, 0.0  ;;  %v3548_v50 = vsel %vm3148_vm13, %v2336_v38, %v3348_v51  ;;  %vm3155_vm0 = vcmp.ge.f32.partialorder %v2340_v40, 0.0 }
 0x325   : > { %v2519_v14 = vadd.f32 %v2518_v23, %v17296_v25  ;;  %v2520_v53 = vpop.f32.mrb[61].mxu1  ;;  %3907 = vmatmul.mubr.f32.gmra.mrb[166].mxu1 %v3531_v61  ;;  %12619 = vmatpush1.bf16.msra.mxu0 %v19815_v6  ;;  %v17540_v61 = vpop.f32.mrb[25].mxu0  ;;  %v3356_v19 = vmul.f32 0.2, %v17515_v43  ;;  %v17548_v5 = vadd.f32 %v17156_v34, %v17219_v18  ;;  %v3501_v10 = vsel %vm3101_vm15, %v2513_v4, %v3301_v32 }
 0x326   : > { %v2521_v31 = vadd.f32 %v2520_v53, %v17323_v48  ;;  %3911 = vmatprep.mubr.f32.mxu1 %v3540_v30  ;;  %v3502_v13 = vsel %vm3102_vm14, %v2515_v54, %v3302_v39  ;;  %12620 = vmatprep.subr.bf16.mxu0 %v19812_v36  ;;  %v17551_v49 = vpop.f32.mrb[26].mxu0  ;;  %v12639_v38 = vpack.c.bf16 %v17538_v58, %v17533_v59  ;;  %vm3156_vm3 = vcmp.ge.f32.partialorder %v17515_v43, 0.0 }
 0x327   : > { %v3309_v3 = vmul.f32 0.2, %v2519_v14  ;;  %4076 = vmatprep.mubr.f32.mxu0 %v3502_v13  ;;  %vm3109_vm2 = vcmp.ge.f32.partialorder %v2519_v14, 0.0  ;;  %v2348_v51 = vadd.f32 %v17158_v35, %v17208_v11  ;;  %v3555_v4 = vsel %vm3155_vm0, %v2340_v40, %v3355_v22  ;;  %v17563_v39 = vpop.f32.mrb[27].mxu0 }
 0x328   : > { %v3310_v23 = vmul.f32 0.2, %v2521_v31  ;;  %v2524_v53 = vpop.f32.mrb[62].mxu1  ;;  %4077 = vmatmul.mubr.f32.gmra.mrb[58].mxu0 %v3501_v10  ;;  %vm3110_vm1 = vcmp.ge.f32.partialorder %v2521_v31, 0.0  ;;  %v19816_v32 = vpack.c.bf16 %v17358_v46, %v17346_v16  ;;  %v17567_v30 = vadd.f32 %v17162_v60, %v17219_v18  ;;  %v17577_v22 = vpop.f32.mrb[28].mxu0 }
 0x329   : > { %v2525_v34 = vadd.f32 %v2524_v53, %v17296_v25  ;;  %v2526_v54 = vpop.f32.mrb[63].mxu1  ;;  %3912 = vmatmul.mubr.f32.gmra.mrb[168].mxu1 %v3539_v12  ;;  %v3363_v12 = vmul.f32 0.2, %v17548_v5  ;;  %v17574_v40 = vadd.f32 %v17164_v41, %v17208_v11  ;;  %v3509_v16 = vsel %vm3109_vm2, %v2519_v14, %v3309_v3  ;;  %v17587_v3 = vpop.f32.mrb[29].mxu0 }
 0x32a   : > { %12622 = vmatpush1.bf16.msra.mxu0 %v19816_v32  ;;  %v2527_v35 = vadd.f32 %v2526_v54, %v17323_v48  ;;  %3916 = vmatprep.mubr.f32.mxu1 %v3548_v50  ;;  %v3510_v6 = vsel %vm3110_vm1, %v2521_v31, %v3310_v23  ;;  %v3556_v31 = vsel %vm3156_vm3, %v17515_v43, %v3356_v19  ;;  %v3364_v50 = vmul.f32 0.2, %v2348_v51  ;;  %v17609_v32 = vpop.f32.mrb[30].mxu0 }
 0x32b   : > { %12623 = vmatprep.subr.bf16.mxu0 %v19812_v36  ;;  %v3317_v46 = vmul.f32 0.2, %v2525_v34  ;;  %4081 = vmatprep.mubr.f32.mxu0 %v3510_v6  ;;  %vm3117_vm5 = vcmp.ge.f32.partialorder %v2525_v34, 0.0  ;;  %vm3164_vm6 = vcmp.ge.f32.partialorder %v2348_v51, 0.0  ;;  %vm3163_vm7 = vcmp.ge.f32.partialorder %v17548_v5, 0.0 }
 0x32c   : > { %v3318_v60 = vmul.f32 0.2, %v2527_v35  ;;  %v2530_v13 = vpop.f32.mrb[64].mxu1  ;;  %4082 = vmatmul.mubr.f32.gmra.mrb[60].mxu0 %v3509_v16  ;;  %vm3118_vm4 = vcmp.ge.f32.partialorder %v2527_v35, 0.0  ;;  %v19817_v14 = vpack.c.bf16 %v17371_v47, %v17363_v15  ;;  %v3371_v23 = vmul.f32 0.2, %v17567_v30 }
 0x32d   : > { %v2531_v10 = vadd.f32 %v2530_v13, %v17296_v25  ;;  %v2532_v41 = vpop.f32.mrb[65].mxu1  ;;  %3917 = vmatmul.mubr.f32.gmra.mrb[170].mxu1 %v3547_v20  ;;  %v17592_v43 = vadd.f32 %v17168_v55, %v17219_v18  ;;  %v17599_v20 = vld [vmem:[%s19764_s3 + $0x2b0] sm:$0xff]  ;;  %v17604_v15 = vld [vmem:[%s19764_s3 + $0x2b8] sm:$0xff]  ;;  %v3372_v47 = vmul.f32 0.2, %v17574_v40  ;;  %v3517_v54 = vsel %vm3117_vm5, %v2525_v34, %v3317_v46 }
 0x32e   : > { %12625 = vmatpush1.bf16.msra.mxu0 %v19817_v14  ;;  %v2533_v19 = vadd.f32 %v2532_v41, %v17323_v48  ;;  %3921 = vmatprep.mubr.f32.mxu1 %v3556_v31  ;;  %v3518_v53 = vsel %vm3118_vm4, %v2527_v35, %v3318_v60  ;;  %vm3171_vm8 = vcmp.ge.f32.partialorder %v17567_v30, 0.0  ;;  %v3563_v16 = vsel %vm3163_vm7, %v17548_v5, %v3363_v12  ;;  %v17614_v60 = vpop.f32.mrb[31].mxu0 }
 0x32f   : > { %12626 = vmatprep.subr.bf16.mxu0 %v19812_v36  ;;  %v3325_v55 = vmul.f32 0.2, %v2531_v10  ;;  %4086 = vmatprep.mubr.f32.mxu0 %v3518_v53  ;;  %vm3125_vm10 = vcmp.ge.f32.partialorder %v2531_v10, 0.0  ;;  %v2360_v13 = vadd.f32 %v17170_v42, %v17208_v11  ;;  %v3564_v31 = vsel %vm3164_vm6, %v2348_v51, %v3364_v50  ;;  %v17640_v50 = vld [vmem:[%s19764_s3 + $0x2c0] sm:$0xff] }
 0x330   : > { %v3326_v35 = vmul.f32 0.2, %v2533_v19  ;;  %v2536_v6 = vpop.f32.mrb[66].mxu1  ;;  %4087 = vmatmul.mubr.f32.gmra.mrb[62].mxu0 %v3517_v54  ;;  %vm3126_vm9 = vcmp.ge.f32.partialorder %v2533_v19, 0.0  ;;  %vm3172_vm11 = vcmp.ge.f32.partialorder %v17574_v40, 0.0  ;;  %v19818_v41 = vpack.c.bf16 %v17385_v27, %v17380_v26 }
 0x331   : > { %v2537_v34 = vadd.f32 %v2536_v6, %v17296_v25  ;;  %v2538_v46 = vpop.f32.mrb[67].mxu1  ;;  %3922 = vmatmul.mubr.f32.gmra.mrb[172].mxu1 %v3555_v4  ;;  %v3379_v14 = vmul.f32 0.2, %v17592_v43  ;;  %v12642_v42 = vpack.c.bf16 %v17604_v15, %v17599_v20  ;;  %v17631_v51 = vadd.f32 %v17174_v63, %v17219_v18  ;;  %v17647_v63 = vpop.f32.mrb[32].mxu0 }
 0x332   : > { %12628 = vmatpush1.bf16.msra.mxu0 %v19818_v41  ;;  %v2539_v5 = vadd.f32 %v2538_v46, %v17323_v48  ;;  %3926 = vmatprep.mubr.f32.mxu1 %v3564_v31  ;;  %v3526_v12 = vsel %vm3126_vm9, %v2533_v19, %v3326_v35  ;;  %v3525_v26 = vsel %vm3125_vm10, %v2531_v10, %v3325_v55  ;;  %v17645_v19 = vld [vmem:[%s19764_s3 + $0x2c8] sm:$0xff]  ;;  %vm3179_vm14 = vcmp.ge.f32.partialorder %v17592_v43, 0.0 }
 0x333   : > { %12629 = vmatprep.subr.bf16.mxu0 %v19812_v36  ;;  %v3333_v4 = vmul.f32 0.2, %v2537_v34  ;;  %4091 = vmatprep.mubr.f32.mxu0 %v3526_v12  ;;  %v3571_v27 = vsel %vm3171_vm8, %v17567_v30, %v3371_v23  ;;  %v3572_v10 = vsel %vm3172_vm11, %v17574_v40, %v3372_v47  ;;  %vm3133_vm13 = vcmp.ge.f32.partialorder %v2537_v34, 0.0  ;;  %v17652_v30 = vpop.f32.mrb[33].mxu0 }
 0x334   : > { %v3334_v53 = vmul.f32 0.2, %v2539_v5  ;;  %v2542_v54 = vpop.f32.mrb[68].mxu1  ;;  %4092 = vmatmul.mubr.f32.gmra.mrb[64].mxu0 %v3525_v26  ;;  %vm3134_vm12 = vcmp.ge.f32.partialorder %v2539_v5, 0.0  ;;  %v3380_v23 = vmul.f32 0.2, %v2360_v13  ;;  %v2366_v55 = vadd.f32 %v17176_v45, %v17208_v11 }
 0x335   : > { %v2543_v35 = vadd.f32 %v2542_v54, %v17296_v25  ;;  %v2544_v6 = vpop.f32.mrb[69].mxu1  ;;  %3927 = vmatmul.mubr.f32.gmra.mrb[174].mxu1 %v3563_v16  ;;  %v19819_v46 = vpack.c.bf16 %v17414_v33, %v17409_v21  ;;  %vm3180_vm15 = vcmp.ge.f32.partialorder %v2360_v13, 0.0  ;;  %v12645_v45 = vpack.c.bf16 %v17645_v19, %v17640_v50  ;;  %v17671_v33 = vpop.f32.mrb[34].mxu0 }
 0x336   : > { %v2545_v40 = vadd.f32 %v2544_v6, %v17323_v48  ;;  %3931 = vmatprep.mubr.f32.mxu1 %v3572_v10  ;;  %v3534_v47 = vsel %vm3134_vm12, %v2539_v5, %v3334_v53  ;;  %v3387_v31 = vmul.f32 0.2, %v17631_v51  ;;  %v17668_v16 = vadd.f32 %v17184_v8, %v17208_v11  ;;  %v17676_v53 = vpop.f32.mrb[35].mxu0 }
 0x337   : > { %12631 = vmatpush1.bf16.msra.mxu0 %v19819_v46  ;;  %v3341_v41 = vmul.f32 0.2, %v2543_v35  ;;  %4096 = vmatprep.mubr.f32.mxu0 %v3534_v47  ;;  %v3533_v21 = vsel %vm3133_vm13, %v2537_v34, %v3333_v4  ;;  %vm3141_vm1 = vcmp.ge.f32.partialorder %v2543_v35, 0.0  ;;  %v3579_v26 = vsel %vm3179_vm14, %v17592_v43, %v3379_v14 }
 0x338   : > { %12632 = vmatprep.subr.bf16.mxu0 %v19812_v36  ;;  %v3342_v12 = vmul.f32 0.2, %v2545_v40  ;;  %v2548_v5 = vpop.f32.mrb[70].mxu1  ;;  %4097 = vmatmul.mubr.f32.gmra.mrb[66].mxu0 %v3533_v21  ;;  %vm3142_vm0 = vcmp.ge.f32.partialorder %v2545_v40, 0.0  ;;  %v3388_v54 = vmul.f32 0.2, %v2366_v55  ;;  %v3580_v34 = vsel %vm3180_vm15, %v2360_v13, %v3380_v23 }
 0x339   : > { %v2549_v8 = vadd.f32 %v2548_v5, %v17296_v25  ;;  %v2550_v10 = vpop.f32.mrb[71].mxu1  ;;  %3932 = vmatmul.mubr.f32.gmra.mrb[176].mxu1 %v3571_v27  ;;  %vm3187_vm2 = vcmp.ge.f32.partialorder %v17631_v51, 0.0  ;;  %v2370_v4 = vadd.f32 %v17180_v7, %v17219_v18  ;;  %vm3188_vm3 = vcmp.ge.f32.partialorder %v2366_v55, 0.0  ;;  %v17697_v7 = vld [vmem:[%s19764_s3 + $0x2d0] sm:$0xff] }
 0x33a   : > { %v2551_v43 = vadd.f32 %v2550_v10, %v17323_v48  ;;  %3936 = vmatprep.mubr.f32.mxu1 %v3580_v34  ;;  %v3542_v14 = vsel %vm3142_vm0, %v2545_v40, %v3342_v12  ;;  %v3396_v27 = vmul.f32 0.2, %v17668_v16  ;;  %v17691_v13 = vadd.f32 %v17188_v17, %v17219_v18 }
 0x33b   : > { %12634 = vmatpush1.bf16.msra.mxu0 %v12633_v24  ;;  %v3349_v23 = vmul.f32 0.2, %v2549_v8  ;;  %4101 = vmatprep.mubr.f32.mxu0 %v3542_v14  ;;  %v3541_v1 = vsel %vm3141_vm1, %v2543_v35, %v3341_v41  ;;  %vm3149_vm5 = vcmp.ge.f32.partialorder %v2549_v8, 0.0  ;;  %v3587_v17 = vsel %vm3187_vm2, %v17631_v51, %v3387_v31  ;;  %v17707_v35 = vpop.f32.mrb[36].mxu0 }
 0x33c   : > { %12635 = vmatprep.subr.bf16.mxu0 %v19812_v36  ;;  %v3350_v24 = vmul.f32 0.2, %v2551_v43  ;;  %v2554_v6 = vpop.f32.mrb[72].mxu1  ;;  %4102 = vmatmul.mubr.f32.gmra.mrb[68].mxu0 %v3541_v1  ;;  %vm3150_vm4 = vcmp.ge.f32.partialorder %v2551_v43, 0.0  ;;  %v2378_v46 = vadd.f32 %v17191_v52, %v17208_v11  ;;  %v3588_v41 = vsel %vm3188_vm3, %v2366_v55, %v3388_v54  ;;  %v17717_v21 = vpop.f32.mrb[37].mxu0 }
 0x33d   : > { %v2555_v40 = vadd.f32 %v2554_v6, %v17296_v25  ;;  %v2556_v47 = vpop.f32.mrb[73].mxu1  ;;  %3937 = vmatmul.mubr.f32.gmra.mrb[178].mxu1 %v3579_v26  ;;  %vm3196_vm6 = vcmp.ge.f32.partialorder %v17668_v16, 0.0  ;;  %v3395_v51 = vmul.f32 0.2, %v2370_v4  ;;  %vm3195_vm7 = vcmp.ge.f32.partialorder %v2370_v4, 0.0 }
 0x33e   : > { %v2557_v31 = vadd.f32 %v2556_v47, %v17323_v48  ;;  %3941 = vmatprep.mubr.f32.mxu1 %v3588_v41  ;;  %v3550_v12 = vsel %vm3150_vm4, %v2551_v43, %v3350_v24  ;;  %v3403_v52 = vmul.f32 0.2, %v17691_v13  ;;  %v3549_v55 = vsel %vm3149_vm5, %v2549_v8, %v3349_v23  ;;  %v17738_v8 = vld [vmem:[%s19764_s3 + $0x2e8] sm:$0xff] }
 0x33f   : > { %12637 = vmatpush1.bf16.msra.mxu0 %v12636_v0  ;;  %v3357_v5 = vmul.f32 0.2, %v2555_v40  ;;  %4106 = vmatprep.mubr.f32.mxu0 %v3550_v12  ;;  %v12648_v44 = vpack.c.bf16 %v17702_v37, %v17697_v7  ;;  %v17730_v0 = vpop.f32.mrb[38].mxu0  ;;  %v3596_v10 = vsel %vm3196_vm6, %v17668_v16, %v3396_v27  ;;  %vm3157_vm9 = vcmp.ge.f32.partialorder %v2555_v40, 0.0 }
 0x340   : > { %12638 = vmatprep.subr.bf16.mxu0 %v19812_v36  ;;  %v3358_v26 = vmul.f32 0.2, %v2557_v31  ;;  %v2560_v54 = vpop.f32.mrb[74].mxu1  ;;  %4107 = vmatmul.mubr.f32.gmra.mrb[70].mxu0 %v3549_v55  ;;  %vm3158_vm8 = vcmp.ge.f32.partialorder %v2557_v31, 0.0  ;;  %v3404_v34 = vmul.f32 0.2, %v2378_v46  ;;  %v2384_v43 = vadd.f32 %v17210_v62, %v17208_v11 }
 0x341   : > { %v2561_v14 = vadd.f32 %v2560_v54, %v17296_v25  ;;  %v2562_v23 = vpop.f32.mrb[75].mxu1  ;;  %3942 = vmatmul.mubr.f32.gmra.mrb[180].mxu1 %v3587_v17  ;;  %vm3203_vm10 = vcmp.ge.f32.partialorder %v17691_v13, 0.0  ;;  %v17747_v16 = vpop.f32.mrb[39].mxu0  ;;  %v3595_v24 = vsel %vm3195_vm7, %v2370_v4, %v3395_v51  ;;  %vm3204_vm11 = vcmp.ge.f32.partialorder %v2378_v46, 0.0  ;;  %v19820_v62 = vld [vmem:[#allocation15_spill] sm:$0xff]  ;;  %v19822_v54 = vld [vmem:[#allocation18_spill] sm:$0xff] }
 0x342   : > { %v2563_v27 = vadd.f32 %v2562_v23, %v17323_v48  ;;  %3946 = vmatprep.mubr.f32.mxu1 %v3596_v10  ;;  %v3558_v1 = vsel %vm3158_vm8, %v2557_v31, %v3358_v26  ;;  %v17754_v6 = vadd.f32 %v19820_v62, %v17219_v18  ;;  %v3557_v59 = vsel %vm3157_vm9, %v2555_v40, %v3357_v5  ;;  %v19821_v31 = vld [vmem:[#allocation19_spill] sm:$0xff]  ;;  %v17774_v26 = vld [vmem:[%s19764_s3 + $0x2f0] sm:$0xff] }
 0x343   : > { %12640 = vmatpush1.bf16.msra.mxu0 %v12639_v38  ;;  %v3365_v17 = vmul.f32 0.2, %v2561_v14  ;;  %4111 = vmatprep.mubr.f32.mxu0 %v3558_v1  ;;  %v12651_v58 = vpack.c.bf16 %v17738_v8, %v17728_v29  ;;  %v17759_v38 = vpop.f32.mrb[40].mxu0  ;;  %vm3165_vm13 = vcmp.ge.f32.partialorder %v2561_v14, 0.0  ;;  %v3603_v4 = vsel %vm3203_vm10, %v17691_v13, %v3403_v52  ;;  %v17779_v13 = vld [vmem:[%s19764_s3 + $0x2f8] sm:$0xff] }
 0x344   : > { %12641 = vmatprep.subr.bf16.mxu0 %v19812_v36  ;;  %v3366_v47 = vmul.f32 0.2, %v2563_v27  ;;  %v2566_v41 = vpop.f32.mrb[76].mxu1  ;;  %4112 = vmatmul.mubr.f32.gmra.mrb[72].mxu0 %v3557_v59  ;;  %vm3166_vm12 = vcmp.ge.f32.partialorder %v2563_v27, 0.0  ;;  %v3412_v51 = vmul.f32 0.2, %v2384_v43  ;;  %v2390_v12 = vadd.f32 %v19821_v31, %v17208_v11 }
 0x345   : > { %v2567_v40 = vadd.f32 %v2566_v41, %v17296_v25  ;;  %v2568_v5 = vpop.f32.mrb[77].mxu1  ;;  %3947 = vmatmul.mubr.f32.gmra.mrb[182].mxu1 %v3595_v24  ;;  %v3604_v55 = vsel %vm3204_vm11, %v2378_v46, %v3404_v34  ;;  %v17781_v52 = vpop.f32.mrb[41].mxu0  ;;  %v17785_v10 = vadd.f32 %v19822_v54, %v17219_v18  ;;  %vm3212_vm14 = vcmp.ge.f32.partialorder %v2384_v43, 0.0  ;;  %v19823_v59 = vld [vmem:[#allocation23_spill] sm:$0xff] }
 0x346   : > { %v2569_v46 = vadd.f32 %v2568_v5, %v17323_v48  ;;  %3951 = vmatprep.mubr.f32.mxu1 %v3604_v55  ;;  %v3566_v20 = vsel %vm3166_vm12, %v2563_v27, %v3366_v47  ;;  %v3411_v15 = vmul.f32 0.2, %v17754_v6  ;;  %v3565_v34 = vsel %vm3165_vm13, %v2561_v14, %v3365_v17  ;;  %v17793_v23 = vpop.f32.mrb[42].mxu0 }
 0x347   : > { %12643 = vmatpush1.bf16.msra.mxu0 %v12642_v42  ;;  %v3373_v42 = vmul.f32 0.2, %v2567_v40  ;;  %4116 = vmatprep.mubr.f32.mxu0 %v3566_v20  ;;  %vm3211_vm15 = vcmp.ge.f32.partialorder %v17754_v6, 0.0  ;;  %vm3173_vm1 = vcmp.ge.f32.partialorder %v2567_v40, 0.0  ;;  %v12654_v27 = vpack.c.bf16 %v17779_v13, %v17774_v26  ;;  %v17804_v17 = vpop.f32.mrb[43].mxu0  ;;  %v19824_v20 = vld [vmem:[#allocation22_spill] sm:$0xff] }
 0x348   : > { %12644 = vmatprep.subr.bf16.mxu0 %v19812_v36  ;;  %v3374_v1 = vmul.f32 0.2, %v2569_v46  ;;  %v2572_v24 = vpop.f32.mrb[78].mxu1  ;;  %4117 = vmatmul.mubr.f32.gmra.mrb[74].mxu0 %v3565_v34  ;;  %vm3174_vm0 = vcmp.ge.f32.partialorder %v2569_v46, 0.0  ;;  %v3420_v62 = vmul.f32 0.2, %v2390_v12  ;;  %v2396_v47 = vadd.f32 %v19823_v59, %v17208_v11 }
 0x349   : > { %v2573_v41 = vadd.f32 %v2572_v24, %v17296_v25  ;;  %v2574_v31 = vpop.f32.mrb[79].mxu1  ;;  %3952 = vmatmul.mubr.f32.gmra.mrb[184].mxu1 %v3603_v4  ;;  %v3612_v14 = vsel %vm3212_vm14, %v2384_v43, %v3412_v51  ;;  %v3419_v5 = vmul.f32 0.2, %v17785_v10  ;;  %vm3220_vm2 = vcmp.ge.f32.partialorder %v2390_v12, 0.0  ;;  %v17813_v50 = vpop.f32.mrb[44].mxu0  ;;  %v19825_v24 = vld [vmem:[#allocation27_spill] sm:$0xff] }
 0x34a   : > { %v2575_v55 = vadd.f32 %v2574_v31, %v17323_v48  ;;  %3956 = vmatprep.mubr.f32.mxu1 %v3612_v14  ;;  %v3574_v54 = vsel %vm3174_vm0, %v2569_v46, %v3374_v1  ;;  %v2394_v4 = vadd.f32 %v19824_v20, %v17219_v18  ;;  %v3573_v43 = vsel %vm3173_vm1, %v2567_v40, %v3373_v42  ;;  %v17818_v46 = vpop.f32.mrb[45].mxu0 }
 0x34b   : > { %12646 = vmatpush1.bf16.msra.mxu0 %v12645_v45  ;;  %v3381_v34 = vmul.f32 0.2, %v2573_v41  ;;  %4121 = vmatprep.mubr.f32.mxu0 %v3574_v54  ;;  %vm3219_vm3 = vcmp.ge.f32.partialorder %v17785_v10, 0.0  ;;  %v3611_v51 = vsel %vm3211_vm15, %v17754_v6, %v3411_v15  ;;  %vm3181_vm5 = vcmp.ge.f32.partialorder %v2573_v41, 0.0  ;;  %v19826_v6 = vld [vmem:[#allocation26_spill] sm:$0xff]  ;;  %v17835_v37 = vpop.f32.mrb[46].mxu0 }
 0x34c   : > { %12647 = vmatprep.subr.bf16.mxu0 %v19812_v36  ;;  %v3382_v19 = vmul.f32 0.2, %v2575_v55  ;;  %v2578_v45 = vpop.f32.mrb[80].mxu1  ;;  %4122 = vmatmul.mubr.f32.gmra.mrb[76].mxu0 %v3573_v43  ;;  %vm3182_vm4 = vcmp.ge.f32.partialorder %v2575_v55, 0.0  ;;  %v3428_v1 = vmul.f32 0.2, %v2396_v47  ;;  %v2402_v59 = vadd.f32 %v19825_v24, %v17208_v11 }
 0x34d   : > { %v2579_v40 = vadd.f32 %v2578_v45, %v17296_v25  ;;  %v2580_v42 = vpop.f32.mrb[81].mxu1  ;;  %3957 = vmatmul.mubr.f32.gmra.mrb[186].mxu1 %v3611_v51  ;;  %v3620_v31 = vsel %vm3220_vm2, %v2390_v12, %v3420_v62  ;;  %v2400_v15 = vadd.f32 %v19826_v6, %v17219_v18  ;;  %vm3228_vm6 = vcmp.ge.f32.partialorder %v2396_v47, 0.0 }
 0x34e   : > { %v2581_v14 = vadd.f32 %v2580_v42, %v17323_v48  ;;  %3961 = vmatprep.mubr.f32.mxu1 %v3620_v31  ;;  %v3582_v54 = vsel %vm3182_vm4, %v2575_v55, %v3382_v19  ;;  %v3427_v20 = vmul.f32 0.2, %v2394_v4  ;;  %v3581_v45 = vsel %vm3181_vm5, %v2573_v41, %v3381_v34  ;;  %v19827_v55 = vld [vmem:[#allocation31_spill] sm:$0xff]  ;;  %v19828_v31 = vld [vmem:[#allocation30_spill] sm:$0xff] }
 0x34f   : > { %12649 = vmatpush1.bf16.msra.mxu0 %v12648_v44  ;;  %v3389_v43 = vmul.f32 0.2, %v2579_v40  ;;  %4126 = vmatprep.mubr.f32.mxu0 %v3582_v54  ;;  %v3619_v7 = vsel %vm3219_vm3, %v17785_v10, %v3419_v5  ;;  %vm3189_vm8 = vcmp.ge.f32.partialorder %v2579_v40, 0.0  ;;  %vm3227_vm9 = vcmp.ge.f32.partialorder %v2394_v4, 0.0  ;;  %v17844_v10 = vpop.f32.mrb[47].mxu0 }
 0x350   : > { %12650 = vmatprep.subr.bf16.mxu0 %v19812_v36  ;;  %v3390_v44 = vmul.f32 0.2, %v2581_v14  ;;  %v2584_v12 = vpop.f32.mrb[82].mxu1  ;;  %4127 = vmatmul.mubr.f32.gmra.mrb[78].mxu0 %v3581_v45  ;;  %vm3190_vm7 = vcmp.ge.f32.partialorder %v2581_v14, 0.0  ;;  %v3436_v62 = vmul.f32 0.2, %v2402_v59  ;;  %v2408_v19 = vadd.f32 %v19827_v55, %v17208_v11 }
 0x351   : > { %v2585_v51 = vadd.f32 %v2584_v12, %v17296_v25  ;;  %v2586_v24 = vpop.f32.mrb[83].mxu1  ;;  %3962 = vmatmul.mubr.f32.gmra.mrb[188].mxu1 %v3619_v7  ;;  %v3628_v41 = vsel %vm3228_vm6, %v2396_v47, %v3428_v1  ;;  %v3435_v5 = vmul.f32 0.2, %v2400_v15  ;;  %vm3236_vm10 = vcmp.ge.f32.partialorder %v2402_v59, 0.0  ;;  %v17851_v29 = vpop.f32.mrb[48].mxu0  ;;  %v19829_v7 = vld [vmem:[#allocation35_spill] sm:$0xff] }
 0x352   : > { %v2587_v34 = vadd.f32 %v2586_v24, %v17323_v48  ;;  %3966 = vmatprep.mubr.f32.mxu1 %v3628_v41  ;;  %v3590_v42 = vsel %vm3190_vm7, %v2581_v14, %v3390_v44  ;;  %v2406_v6 = vadd.f32 %v19828_v31, %v17219_v18  ;;  %v3589_v47 = vsel %vm3189_vm8, %v2579_v40, %v3389_v43  ;;  %v17854_v14 = vpop.f32.mrb[49].mxu0  ;;  %v19830_v41 = vld [vmem:[#allocation34_spill] sm:$0xff] }
 0x353   : > { %12652 = vmatpush1.bf16.msra.mxu0 %v12651_v58  ;;  %v3397_v54 = vmul.f32 0.2, %v2585_v51  ;;  %4131 = vmatprep.mubr.f32.mxu0 %v3590_v42  ;;  %vm3235_vm11 = vcmp.ge.f32.partialorder %v2400_v15, 0.0  ;;  %v3627_v1 = vsel %vm3227_vm9, %v2394_v4, %v3427_v20  ;;  %vm3197_vm13 = vcmp.ge.f32.partialorder %v2585_v51, 0.0 }
 0x354   : > { %12653 = vmatprep.subr.bf16.mxu0 %v19812_v36  ;;  %v3398_v8 = vmul.f32 0.2, %v2587_v34  ;;  %v2590_v58 = vpop.f32.mrb[84].mxu1  ;;  %4132 = vmatmul.mubr.f32.gmra.mrb[80].mxu0 %v3589_v47  ;;  %vm3198_vm12 = vcmp.ge.f32.partialorder %v2587_v34, 0.0  ;;  %v3444_v45 = vmul.f32 0.2, %v2408_v19  ;;  %v2414_v44 = vadd.f32 %v19829_v7, %v17208_v11 }
 0x355   : > { %v2591_v12 = vadd.f32 %v2590_v58, %v17296_v25  ;;  %v2592_v55 = vpop.f32.mrb[85].mxu1  ;;  %3967 = vmatmul.mubr.f32.gmra.mrb[190].mxu1 %v3627_v1  ;;  %v3636_v40 = vsel %vm3236_vm10, %v2402_v59, %v3436_v62  ;;  %v3635_v43 = vsel %vm3235_vm11, %v2400_v15, %v3435_v5  ;;  %vm3244_vm14 = vcmp.ge.f32.partialorder %v2408_v19, 0.0  ;;  %v19832_v58 = vld [vmem:[#allocation38_spill] sm:$0xff] }
 0x356   : > { %v2593_v4 = vadd.f32 %v2592_v55, %v17323_v48  ;;  %3971 = vmatprep.mubr.f32.mxu1 %v3636_v40  ;;  %v3598_v20 = vsel %vm3198_vm12, %v2587_v34, %v3398_v8  ;;  %v3443_v24 = vmul.f32 0.2, %v2406_v6  ;;  %v2412_v42 = vadd.f32 %v19830_v41, %v17219_v18 }
 0x357   : > { %12655 = vmatpush1.bf16.msra.mxu0 %v12654_v27  ;;  %v3405_v31 = vmul.f32 0.2, %v2591_v12  ;;  %4136 = vmatprep.mubr.f32.mxu0 %v3598_v20  ;;  %v3597_v59 = vsel %vm3197_vm13, %v2585_v51, %v3397_v54  ;;  %vm3205_vm0 = vcmp.ge.f32.partialorder %v2591_v12, 0.0  ;;  %vm3243_vm1 = vcmp.ge.f32.partialorder %v2406_v6, 0.0  ;;  %v19831_v27 = vld [vmem:[#allocation39_spill] sm:$0xff] }
 0x358   : > { %12656 = vmatprep.subr.bf16.mxu0 %v19812_v36  ;;  %v3406_v62 = vmul.f32 0.2, %v2593_v4  ;;  %v2596_v26 = vpop.f32.mrb[86].mxu1  ;;  %4137 = vmatmul.mubr.f32.gmra.mrb[82].mxu0 %v3597_v59  ;;  %vm3206_vm15 = vcmp.ge.f32.partialorder %v2593_v4, 0.0  ;;  %v3452_v13 = vmul.f32 0.2, %v2414_v44  ;;  %v2420_v15 = vadd.f32 %v19831_v27, %v17208_v11 }
 0x359   : > { %v2597_v5 = vadd.f32 %v2596_v26, %v17296_v25  ;;  %v2598_v34 = vpop.f32.mrb[87].mxu1  ;;  %3972 = vmatmul.mubr.f32.gmra.mrb[192].mxu1 %v3635_v43  ;;  %v3644_v47 = vsel %vm3244_vm14, %v2408_v19, %v3444_v45  ;;  %vm3252_vm2 = vcmp.ge.f32.partialorder %v2414_v44, 0.0  ;;  %v3451_v54 = vmul.f32 0.2, %v2412_v42 }
 0x35a   : > { %v2599_v8 = vadd.f32 %v2598_v34, %v17323_v48  ;;  %3976 = vmatprep.mubr.f32.mxu1 %v3644_v47  ;;  %v3606_v51 = vsel %vm3206_vm15, %v2593_v4, %v3406_v62  ;;  %v2418_v1 = vadd.f32 %v19832_v58, %v17219_v18  ;;  %v3605_v55 = vsel %vm3205_vm0, %v2591_v12, %v3405_v31 }
 0x35b   : > { %v3413_v7 = vmul.f32 0.2, %v2597_v5  ;;  %4141 = vmatprep.mubr.f32.mxu0 %v3606_v51  ;;  %v3643_v20 = vsel %vm3243_vm1, %v2406_v6, %v3443_v24  ;;  %vm3213_vm4 = vcmp.ge.f32.partialorder %v2597_v5, 0.0  ;;  %v3460_v19 = vmul.f32 0.2, %v2420_v15 }
 0x35c   : > { %v3414_v11 = vmul.f32 0.2, %v2599_v8  ;;  %v2602_v40 = vpop.f32.mrb[88].mxu1  ;;  %4142 = vmatmul.mubr.f32.gmra.mrb[84].mxu0 %v3605_v55  ;;  %vm3214_vm3 = vcmp.ge.f32.partialorder %v2599_v8, 0.0  ;;  %v3652_v43 = vsel %vm3252_vm2, %v2414_v44, %v3452_v13  ;;  %vm3251_vm5 = vcmp.ge.f32.partialorder %v2412_v42, 0.0  ;;  %v19833_v55 = vld [vmem:[#allocation12_spill] sm:$0xff] }
 0x35d   : > { %v2603_v45 = vadd.f32 %v2602_v40, %v17296_v25  ;;  %v2604_v4 = vpop.f32.mrb[89].mxu1  ;;  %3977 = vmatmul.mubr.f32.gmra.mrb[194].mxu1 %v3643_v20  ;;  %vm3260_vm6 = vcmp.ge.f32.partialorder %v2420_v15, 0.0  ;;  %v3459_v12 = vmul.f32 0.2, %v2418_v1  ;;  %v3613_v59 = vsel %vm3213_vm4, %v2597_v5, %v3413_v7 }
 0x35e   : > { %v2605_v18 = vadd.f32 %v2604_v4, %v17323_v48  ;;  %3981 = vmatprep.mubr.f32.mxu1 %v3652_v43  ;;  %v3614_v41 = vsel %vm3214_vm3, %v2599_v8, %v3414_v11  ;;  %v3651_v62 = vsel %vm3251_vm5, %v2412_v42, %v3451_v54  ;;  %v3660_v44 = vsel %vm3260_vm6, %v2420_v15, %v3460_v19 }
 0x35f   : > { %v3421_v31 = vmul.f32 0.2, %v2603_v45  ;;  %4146 = vmatprep.mubr.f32.mxu0 %v3614_v41  ;;  %vm3221_vm8 = vcmp.ge.f32.partialorder %v2603_v45, 0.0  ;;  %vm3259_vm9 = vcmp.ge.f32.partialorder %v2418_v1, 0.0  ;;  %v2189_v11 = vsub.s32 5, %v19833_v55  ;;  %v17891_v41 = vld [vmem:[%s19763_s2] sm:$0xff] }
 0x360   : > { %v3422_v6 = vmul.f32 0.2, %v2605_v18  ;;  %v2608_v24 = vpop.f32.mrb[90].mxu1  ;;  %4147 = vmatmul.mubr.f32.gmra.mrb[86].mxu0 %v3613_v59  ;;  %vm3222_vm7 = vcmp.ge.f32.partialorder %v2605_v18, 0.0  ;;  %v3659_v58 = vsel %vm3259_vm9, %v2418_v1, %v3459_v12 }
 0x361   : > { %v2609_v26 = vadd.f32 %v2608_v24, %v17296_v25  ;;  %v2610_v27 = vpop.f32.mrb[91].mxu1  ;;  %3982 = vmatmul.mubr.f32.gmra.mrb[196].mxu1 %v3651_v62  ;;  %v3621_v8 = vsel %vm3221_vm8, %v2603_v45, %v3421_v31  ;;  %v17894_v12 = vrot.slane %v17891_v41, %v2189_v11 }
 0x362   : > { %v2611_v13 = vadd.f32 %v2610_v27, %v17323_v48  ;;  %3986 = vmatprep.mubr.f32.mxu1 %v3660_v44  ;;  %v3622_v34 = vsel %vm3222_vm7, %v2605_v18, %v3422_v6  ;;  %v2185_v6 = vsub.s32 4, %v19833_v55 }
 0x363   : > { %v3429_v47 = vmul.f32 0.2, %v2609_v26  ;;  %4151 = vmatprep.mubr.f32.mxu0 %v3622_v34  ;;  %vm3229_vm11 = vcmp.ge.f32.partialorder %v2609_v26, 0.0  ;;  %v19834_v34 = vld [vmem:[#allocation14_spill] sm:$0xff] }
 0x364   : > { %v3430_v5 = vmul.f32 0.2, %v2611_v13  ;;  %v2614_v51 = vpop.f32.mrb[92].mxu1  ;;  %4152 = vmatmul.mubr.f32.gmra.mrb[88].mxu0 %v3621_v8  ;;  %vm3230_vm10 = vcmp.ge.f32.partialorder %v2611_v13, 0.0 }
 0x365   : > { %v2615_v42 = vadd.f32 %v2614_v51, %v17296_v25  ;;  %v2616_v54 = vpop.f32.mrb[93].mxu1  ;;  %3987 = vmatmul.mubr.f32.gmra.mrb[198].mxu1 %v3659_v58  ;;  %v3629_v20 = vsel %vm3229_vm11, %v2609_v26, %v3429_v47  ;;  %v2706_v47 = vadd.f32 %v19834_v34, %v17894_v12  ;;  %v17902_v51 = vrot.slane %v17891_v41, %v2185_v6 }
 0x366   : > { %v2617_v15 = vadd.f32 %v2616_v54, %v17323_v48  ;;  %v3630_v7 = vsel %vm3230_vm10, %v2611_v13, %v3430_v5 }
 0x367   : > { %v3437_v40 = vmul.f32 0.2, %v2615_v42  ;;  %4156 = vmatprep.mubr.f32.mxu0 %v3630_v7  ;;  %vm3237_vm13 = vcmp.ge.f32.partialorder %v2615_v42, 0.0  ;;  %v3272_v11 = vmul.f32 0.2, %v2706_v47  ;;  %vm3072_vm2 = vcmp.ge.f32.partialorder %v2706_v47, 0.0 }
 0x368   : > { %v3438_v19 = vmul.f32 0.2, %v2617_v15  ;;  %v2620_v45 = vpop.f32.mrb[94].mxu1  ;;  %4157 = vmatmul.mubr.f32.gmra.mrb[90].mxu0 %v3629_v20  ;;  %vm3238_vm12 = vcmp.ge.f32.partialorder %v2617_v15, 0.0  ;;  %v19835_v20 = vld [vmem:[#allocation17_spill] sm:$0xff] }
 0x369   : > { %v2621_v1 = vadd.f32 %v2620_v45, %v17296_v25  ;;  %v2622_v4 = vpop.f32.mrb[95].mxu1  ;;  %v3637_v59 = vsel %vm3237_vm13, %v2615_v42, %v3437_v40  ;;  %v3472_v6 = vsel %vm3072_vm2, %v2706_v47, %v3272_v11 }
 0x36a   : > { %v2623_v43 = vadd.f32 %v2622_v4, %v17323_v48  ;;  %v3638_v18 = vsel %vm3238_vm12, %v2617_v15, %v3438_v19  ;;  %v2712_v19 = vadd.f32 %v19835_v20, %v17894_v12 }
 0x36b   : > { %v3445_v31 = vmul.f32 0.2, %v2621_v1  ;;  %4161 = vmatprep.mubr.f32.mxu0 %v3638_v18  ;;  %vm3245_vm15 = vcmp.ge.f32.partialorder %v2621_v1, 0.0 }
 0x36c   : > { %v3446_v24 = vmul.f32 0.2, %v2623_v43  ;;  %v2626_v62 = vpop.f32.mrb[96].mxu1  ;;  %4162 = vmatmul.mubr.f32.gmra.mrb[92].mxu0 %v3637_v59  ;;  %vm3246_vm14 = vcmp.ge.f32.partialorder %v2623_v43, 0.0  ;;  %vm3080_vm5 = vcmp.ge.f32.partialorder %v2712_v19, 0.0 }
 0x36d   : > { %v2627_v26 = vadd.f32 %v2626_v62, %v17296_v25  ;;  %v2628_v27 = vpop.f32.mrb[97].mxu1  ;;  %v3645_v5 = vsel %vm3245_vm15, %v2621_v1, %v3445_v31  ;;  %v19836_v1 = vld [vmem:[#allocation13_spill] sm:$0xff] }
 0x36e   : > { %v2629_v44 = vadd.f32 %v2628_v27, %v17323_v48  ;;  %v3646_v13 = vsel %vm3246_vm14, %v2623_v43, %v3446_v24  ;;  %v2704_v4 = vadd.f32 %v19836_v1, %v17902_v51  ;;  %v19837_v24 = vld [vmem:[#allocation21_spill] sm:$0xff]  ;;  %v3763_v27 = vld [vmem:[%s19764_s3 + $0x300] sm:$0xff]  ;;  %v19840_v1 = vld [vmem:[#allocation20_spill] sm:$0xff] }
 0x36f   : > { %v3453_v8 = vmul.f32 0.2, %v2627_v26  ;;  %4166 = vmatprep.mubr.f32.mxu0 %v3646_v13  ;;  %vm3253_vm1 = vcmp.ge.f32.partialorder %v2627_v26, 0.0  ;;  %v2718_v62 = vadd.f32 %v19837_v24, %v17894_v12  ;;  %v19838_v13 = vld [vmem:[#allocation16_spill] sm:$0xff]  ;;  %v19841_v24 = vld [vmem:[#allocation29_spill] sm:$0xff] }
 0x370   : > { %v3454_v58 = vmul.f32 0.2, %v2629_v44  ;;  %v2632_v42 = vpop.f32.mrb[98].mxu1  ;;  %4167 = vmatmul.mubr.f32.gmra.mrb[94].mxu0 %v3645_v5  ;;  %vm3254_vm0 = vcmp.ge.f32.partialorder %v2629_v44, 0.0  ;;  %v2710_v34 = vadd.f32 %v19838_v13, %v17902_v51  ;;  %vm3071_vm6 = vcmp.ge.f32.partialorder %v2704_v4, 0.0  ;;  %v19842_v13 = vld [vmem:[#allocation24_spill] sm:$0xff] }
 0x371   : > { %v2633_v54 = vadd.f32 %v2632_v42, %v17296_v25  ;;  %v2634_v15 = vpop.f32.mrb[99].mxu1  ;;  %v3653_v43 = vsel %vm3253_vm1, %v2627_v26, %v3453_v8  ;;  %v3764_v26 = vld [vmem:[%s19764_s3 + $0x308] sm:$0xff]  ;;  %v3288_v42 = vmul.f32 0.2, %v2718_v62  ;;  %vm3088_vm7 = vcmp.ge.f32.partialorder %v2718_v62, 0.0 }
 0x372   : > { %v2635_v7 = vadd.f32 %v2634_v15, %v17323_v48  ;;  %v3654_v40 = vsel %vm3254_vm0, %v2629_v44, %v3454_v58  ;;  %v3280_v48 = vmul.f32 0.2, %v2712_v19  ;;  %v3271_v44 = vmul.f32 0.2, %v2704_v4 }
 0x373   : > { %v3461_v45 = vmul.f32 0.2, %v2633_v54  ;;  %4171 = vmatprep.mubr.f32.mxu0 %v3654_v40  ;;  %vm3261_vm4 = vcmp.ge.f32.partialorder %v2633_v54, 0.0  ;;  %v12657_v5 = vpack.c.bf16 %v3764_v26, %v3763_v27  ;;  %v3765_v40 = vld [vmem:[%s19764_s3 + $0x310] sm:$0xff]  ;;  %vm3079_vm8 = vcmp.ge.f32.partialorder %v2710_v34, 0.0  ;;  %v3768_v26 = vld [vmem:[%s19764_s3 + $0x328] sm:$0xff] }
 0x374   : > { %v3462_v18 = vmul.f32 0.2, %v2635_v7  ;;  %4172 = vmatmul.mubr.f32.gmra.mrb[96].mxu0 %v3653_v43  ;;  %vm3262_vm3 = vcmp.ge.f32.partialorder %v2635_v7, 0.0  ;;  %v17910_v25 = vpop.f32.mrb[100].mxu1  ;;  %v3480_v15 = vsel %vm3080_vm5, %v2712_v19, %v3280_v48  ;;  %v3471_v20 = vsel %vm3071_vm6, %v2704_v4, %v3271_v44  ;;  %v3767_v4 = vld [vmem:[%s19764_s3 + $0x320] sm:$0xff] }
 0x375   : > { %v17912_v31 = vpop.f32.mrb[101].mxu1  ;;  %v3661_v8 = vsel %vm3261_vm4, %v2633_v54, %v3461_v45  ;;  %v3766_v54 = vld [vmem:[%s19764_s3 + $0x318] sm:$0xff]  ;;  %v3279_v45 = vmul.f32 0.2, %v2710_v34  ;;  %v2716_v43 = vadd.f32 %v19840_v1, %v17902_v51  ;;  %v2730_v27 = vadd.f32 %v19841_v24, %v17894_v12 }
 0x376   : > { %v3662_v59 = vsel %vm3262_vm3, %v2635_v7, %v3462_v18  ;;  %v19839_v7 = vld [vmem:[#allocation25_spill] sm:$0xff]  ;;  %v12660_v18 = vpack.c.bf16 %v3766_v54, %v3765_v40 }
 0x377   : > { %4176 = vmatprep.mubr.f32.mxu0 %v3662_v59  ;;  %v2724_v11 = vadd.f32 %v19839_v7, %v17894_v12  ;;  %v3287_v44 = vmul.f32 0.2, %v2716_v43  ;;  %vm3087_vm10 = vcmp.ge.f32.partialorder %v2716_v43, 0.0  ;;  %v3304_v7 = vmul.f32 0.2, %v2730_v27  ;;  %v19844_v54 = vld [vmem:[#allocation33_spill] sm:$0xff] }
 0x378   : > { %4177 = vmatmul.mubr.f32.gmra.mrb[98].mxu0 %v3661_v8  ;;  %v17924_v47 = vpop.f32.mrb[102].mxu1  ;;  %v2722_v8 = vadd.f32 %v19842_v13, %v17902_v51  ;;  %vm3104_vm11 = vcmp.ge.f32.partialorder %v2730_v27, 0.0 }
 0x379   : > { %4246 = vmatprep.mubr.f32.mxu0 %v3472_v6  ;;  %v17926_v58 = vpop.f32.mrb[103].mxu1  ;;  %v3296_v59 = vmul.f32 0.2, %v2724_v11  ;;  %v3488_v6 = vsel %vm3088_vm7, %v2718_v62, %v3288_v42  ;;  %vm3096_vm9 = vcmp.ge.f32.partialorder %v2724_v11, 0.0  ;;  %v12663_v42 = vpack.c.bf16 %v3768_v26, %v3767_v4 }
 0x37a   : > { %v3295_v1 = vmul.f32 0.2, %v2722_v8  ;;  %v3487_v24 = vsel %vm3087_vm10, %v2716_v43, %v3287_v44  ;;  %vm3095_vm12 = vcmp.ge.f32.partialorder %v2722_v8, 0.0  ;;  %v3504_v13 = vsel %vm3104_vm11, %v2730_v27, %v3304_v7  ;;  %v3771_v43 = vld [vmem:[%s19764_s3 + $0x340] sm:$0xff]  ;;  %v3772_v44 = vld [vmem:[%s19764_s3 + $0x348] sm:$0xff] }
 0x37b   : > { %v3496_v40 = vsel %vm3096_vm9, %v2724_v11, %v3296_v59  ;;  %v12669_v7 = vpack.c.bf16 %v3772_v44, %v3771_v43 }
 0x37c   : > { %4247 = vmatmul.mubr.f32.vlgmr.msra.gmra.mrb[50].mxu0 %v3471_v20  ;;  %v17938_v19 = vpop.f32.mrb[104].mxu1  ;;  %v2736_v20 = vadd.f32 %v19844_v54, %v17894_v12 }
 0x37d   : > { %4251 = vmatprep.mubr.f32.mxu0 %v3480_v15  ;;  %12658 = vmatpush1.bf16.msra.mxu0 %v12657_v5  ;;  %v17940_v48 = vpop.f32.mrb[105].mxu1  ;;  %v3479_v5 = vsel %vm3079_vm8, %v2710_v34, %v3279_v45  ;;  %v3769_v34 = vld [vmem:[%s19764_s3 + $0x330] sm:$0xff]  ;;  %v3770_v45 = vld [vmem:[%s19764_s3 + $0x338] sm:$0xff] }
 0x37e   : > { %12659 = vmatprep.subr.bf16.mxu0 %v19812_v36  ;;  %v12666_v59 = vpack.c.bf16 %v3770_v45, %v3769_v34  ;;  %v3312_v26 = vmul.f32 0.2, %v2736_v20  ;;  %v3495_v45 = vsel %vm3095_vm12, %v2722_v8, %v3295_v1  ;;  %vm3112_vm13 = vcmp.ge.f32.partialorder %v2736_v20, 0.0  ;;  %v3773_v8 = vld [vmem:[%s19764_s3 + $0x350] sm:$0xff]  ;;  %v3774_v1 = vld [vmem:[%s19764_s3 + $0x358] sm:$0xff] }
 0x380   : > { %4252 = vmatmul.mubr.f32.gmra.mrb[52].mxu0 %v3479_v5  ;;  %v17953_v62 = vpop.f32.mrb[106].mxu1  ;;  %v19847_v5 = vld [vmem:[#allocation37_spill] sm:$0xff] }
 0x381   : > { %19843 = vst [vmem:[#allocation15_spill] sm:$0xff] %v17953_v62  ;;  %4256 = vmatprep.mubr.f32.mxu0 %v3488_v6  ;;  %12661 = vmatpush1.bf16.msra.mxu0 %v12660_v18  ;;  %v17955_v15 = vpop.f32.mrb[107].mxu1  ;;  %v19845_v18 = vld [vmem:[#allocation28_spill] sm:$0xff]  ;;  %v2742_v54 = vadd.f32 %v19847_v5, %v17894_v12  ;;  %v3512_v5 = vsel %vm3112_vm13, %v2736_v20, %v3312_v26 }
 0x382   : > { %12662 = vmatprep.subr.bf16.mxu0 %v19812_v36  ;;  %v2728_v6 = vadd.f32 %v19845_v18, %v17902_v51 }
 0x383   : > { %vm3120_vm15 = vcmp.ge.f32.partialorder %v2742_v54, 0.0 }
 0x384   : > { %4257 = vmatmul.mubr.f32.gmra.mrb[54].mxu0 %v3487_v24  ;;  %v17968_v11 = vpop.f32.mrb[108].mxu1  ;;  %vm3103_vm14 = vcmp.ge.f32.partialorder %v2728_v6, 0.0  ;;  %v3320_v24 = vmul.f32 0.2, %v2742_v54 }
 0x385   : > { %19846 = vst [vmem:[#allocation19_spill] sm:$0xff] %v17968_v11  ;;  %4261 = vmatprep.mubr.f32.mxu0 %v3496_v40  ;;  %12664 = vmatpush1.bf16.msra.mxu0 %v12663_v42  ;;  %v17970_v4 = vpop.f32.mrb[109].mxu1  ;;  %v3303_v40 = vmul.f32 0.2, %v2728_v6  ;;  %v19848_v42 = vld [vmem:[#allocation32_spill] sm:$0xff]  ;;  %v19851_v11 = vld [vmem:[#allocation41_spill] sm:$0xff] }
 0x386   : > { %12665 = vmatprep.subr.bf16.mxu0 %v19812_v36  ;;  %v2734_v34 = vadd.f32 %v19848_v42, %v17902_v51  ;;  %v2748_v62 = vadd.f32 %v19851_v11, %v17894_v12  ;;  %v12672_v11 = vpack.c.bf16 %v3774_v1, %v3773_v8 }
 0x387   : > { %v3503_v44 = vsel %vm3103_vm14, %v2728_v6, %v3303_v40  ;;  %v3775_v6 = vld [vmem:[%s19764_s3 + $0x360] sm:$0xff]  ;;  %v3776_v40 = vld [vmem:[%s19764_s3 + $0x368] sm:$0xff] }
 0x388   : > { %4262 = vmatmul.mubr.f32.gmra.mrb[56].mxu0 %v3495_v45  ;;  %v17983_v27 = vpop.f32.mrb[110].mxu1  ;;  %vm3111_vm0 = vcmp.ge.f32.partialorder %v2734_v34, 0.0  ;;  %v3328_v42 = vmul.f32 0.2, %v2748_v62  ;;  %v3520_v45 = vsel %vm3120_vm15, %v2742_v54, %v3320_v24  ;;  %vm3128_vm1 = vcmp.ge.f32.partialorder %v2748_v62, 0.0 }
 0x389   : > { %19849 = vst [vmem:[#allocation18_spill] sm:$0xff] %v17983_v27  ;;  %4266 = vmatprep.mubr.f32.mxu0 %v3504_v13  ;;  %12667 = vmatpush1.bf16.msra.mxu0 %v12666_v59  ;;  %v17985_v18 = vpop.f32.mrb[111].mxu1  ;;  %v3311_v13 = vmul.f32 0.2, %v2734_v34  ;;  %v19852_v59 = vld [vmem:[#allocation36_spill] sm:$0xff]  ;;  %v19855_v27 = vld [vmem:[#allocation43_spill] sm:$0xff] }
 0x38a   : > { %19850 = vst [vmem:[#allocation23_spill] sm:$0xff] %v17985_v18  ;;  %12668 = vmatprep.subr.bf16.mxu0 %v19812_v36  ;;  %v2740_v43 = vadd.f32 %v19852_v59, %v17902_v51  ;;  %v2754_v18 = vadd.f32 %v19855_v27, %v17894_v12  ;;  %v12675_v27 = vpack.c.bf16 %v3776_v40, %v3775_v6 }
 0x38b   : > { %v3511_v1 = vsel %vm3111_vm0, %v2734_v34, %v3311_v13  ;;  %v3777_v34 = vld [vmem:[%s19764_s3 + $0x370] sm:$0xff]  ;;  %v3778_v13 = vld [vmem:[%s19764_s3 + $0x378] sm:$0xff] }
 0x38c   : > { %4267 = vmatmul.mubr.f32.gmra.mrb[58].mxu0 %v3503_v44  ;;  %v17998_v20 = vpop.f32.mrb[112].mxu1  ;;  %vm3119_vm2 = vcmp.ge.f32.partialorder %v2740_v43, 0.0  ;;  %v3336_v59 = vmul.f32 0.2, %v2754_v18  ;;  %v3528_v44 = vsel %vm3128_vm1, %v2748_v62, %v3328_v42  ;;  %vm3136_vm3 = vcmp.ge.f32.partialorder %v2754_v18, 0.0 }
 0x38d   : > { %19853 = vst [vmem:[#allocation22_spill] sm:$0xff] %v17998_v20  ;;  %4271 = vmatprep.mubr.f32.mxu0 %v3512_v5  ;;  %12670 = vmatpush1.bf16.msra.mxu0 %v12669_v7  ;;  %v18000_v26 = vpop.f32.mrb[113].mxu1  ;;  %v3319_v5 = vmul.f32 0.2, %v2740_v43  ;;  %v19856_v7 = vld [vmem:[#allocation40_spill] sm:$0xff]  ;;  %v19858_v20 = vld [vmem:[#allocation45_spill] sm:$0xff] }
 0x38e   : > { %19854 = vst [vmem:[#allocation27_spill] sm:$0xff] %v18000_v26  ;;  %12671 = vmatprep.subr.bf16.mxu0 %v19812_v36  ;;  %v2746_v8 = vadd.f32 %v19856_v7, %v17902_v51  ;;  %v2760_v26 = vadd.f32 %v19858_v20, %v17894_v12  ;;  %v12678_v20 = vpack.c.bf16 %v3778_v13, %v3777_v34 }
 0x38f   : > { %v3519_v40 = vsel %vm3119_vm2, %v2740_v43, %v3319_v5  ;;  %v3779_v43 = vld [vmem:[%s19764_s3 + $0x380] sm:$0xff]  ;;  %v3780_v5 = vld [vmem:[%s19764_s3 + $0x388] sm:$0xff] }
 0x390   : > { %4272 = vmatmul.mubr.f32.gmra.mrb[60].mxu0 %v3511_v1  ;;  %v18013_v54 = vpop.f32.mrb[114].mxu1  ;;  %vm3127_vm4 = vcmp.ge.f32.partialorder %v2746_v8, 0.0  ;;  %v3344_v7 = vmul.f32 0.2, %v2760_v26  ;;  %v3536_v1 = vsel %vm3136_vm3, %v2754_v18, %v3336_v59  ;;  %vm3144_vm5 = vcmp.ge.f32.partialorder %v2760_v26, 0.0 }
 0x391   : > { %19857 = vst [vmem:[#allocation26_spill] sm:$0xff] %v18013_v54  ;;  %4276 = vmatprep.mubr.f32.mxu0 %v3520_v45  ;;  %12673 = vmatpush1.bf16.msra.mxu0 %v12672_v11  ;;  %v18015_v24 = vpop.f32.mrb[115].mxu1  ;;  %v3327_v45 = vmul.f32 0.2, %v2746_v8  ;;  %v19859_v11 = vld [vmem:[#allocation42_spill] sm:$0xff]  ;;  %v2766_v54 = vadd.f32 %v17477_v9, %v17894_v12  ;;  %v12681_v9 = vpack.c.bf16 %v3780_v5, %v3779_v43 }
 0x392   : > { %12674 = vmatprep.subr.bf16.mxu0 %v19812_v36  ;;  %v2752_v6 = vadd.f32 %v19859_v11, %v17902_v51 }
 0x393   : > { %v3527_v13 = vsel %vm3127_vm4, %v2746_v8, %v3327_v45  ;;  %v3352_v11 = vmul.f32 0.2, %v2766_v54  ;;  %v3781_v8 = vld [vmem:[%s19764_s3 + $0x390] sm:$0xff]  ;;  %v3782_v45 = vld [vmem:[%s19764_s3 + $0x398] sm:$0xff]  ;;  %vm3152_vm7 = vcmp.ge.f32.partialorder %v2766_v54, 0.0 }
 0x394   : > { %4277 = vmatmul.mubr.f32.gmra.mrb[62].mxu0 %v3519_v40  ;;  %v18028_v62 = vpop.f32.mrb[116].mxu1  ;;  %vm3135_vm6 = vcmp.ge.f32.partialorder %v2752_v6, 0.0  ;;  %v3544_v40 = vsel %vm3144_vm5, %v2760_v26, %v3344_v7 }
 0x395   : > { %19860 = vst [vmem:[#allocation31_spill] sm:$0xff] %v18028_v62  ;;  %4281 = vmatprep.mubr.f32.mxu0 %v3528_v44  ;;  %12676 = vmatpush1.bf16.msra.mxu0 %v12675_v27  ;;  %v18030_v42 = vpop.f32.mrb[117].mxu1  ;;  %v3335_v44 = vmul.f32 0.2, %v2752_v6  ;;  %v19861_v27 = vld [vmem:[#allocation44_spill] sm:$0xff]  ;;  %v2772_v62 = vadd.f32 %v17508_v28, %v17894_v12  ;;  %v12684_v28 = vpack.c.bf16 %v3782_v45, %v3781_v8 }
 0x396   : > { %12677 = vmatprep.subr.bf16.mxu0 %v19812_v36  ;;  %v2758_v34 = vadd.f32 %v19861_v27, %v17902_v51  ;;  %v3552_v27 = vsel %vm3152_vm7, %v2766_v54, %v3352_v11 }
 0x397   : > { %v3535_v43 = vsel %vm3135_vm6, %v2752_v6, %v3335_v44  ;;  %v3360_v5 = vmul.f32 0.2, %v2772_v62  ;;  %v3784_v6 = vld [vmem:[%s19764_s3 + $0x3a8] sm:$0xff]  ;;  %vm3160_vm9 = vcmp.ge.f32.partialorder %v2772_v62, 0.0 }
 0x398   : > { %4282 = vmatmul.mubr.f32.gmra.mrb[64].mxu0 %v3527_v13  ;;  %v18043_v18 = vpop.f32.mrb[118].mxu1  ;;  %vm3143_vm8 = vcmp.ge.f32.partialorder %v2758_v34, 0.0  ;;  %v2778_v13 = vadd.f32 %v17540_v61, %v17894_v12 }
 0x399   : > { %4286 = vmatprep.mubr.f32.mxu0 %v3536_v1  ;;  %12679 = vmatpush1.bf16.msra.mxu0 %v12678_v20  ;;  %v18045_v59 = vpop.f32.mrb[119].mxu1  ;;  %v3343_v1 = vmul.f32 0.2, %v2758_v34  ;;  %v2764_v20 = vadd.f32 %v17468_v2, %v17902_v51  ;;  %v3783_v2 = vld [vmem:[%s19764_s3 + $0x3a0] sm:$0xff]  ;;  %v3560_v45 = vsel %vm3160_vm9, %v2772_v62, %v3360_v5 }
 0x39a   : > { %12680 = vmatprep.subr.bf16.mxu0 %v19812_v36  ;;  %v12687_v61 = vpack.c.bf16 %v3784_v6, %v3783_v2  ;;  %v3368_v8 = vmul.f32 0.2, %v2778_v13  ;;  %vm3168_vm11 = vcmp.ge.f32.partialorder %v2778_v13, 0.0 }
 0x39b   : > { %v3351_v44 = vmul.f32 0.2, %v2764_v20  ;;  %vm3151_vm10 = vcmp.ge.f32.partialorder %v2764_v20, 0.0 }
 0x39c   : > { %4287 = vmatmul.mubr.f32.gmra.mrb[66].mxu0 %v3535_v43  ;;  %v18058_v26 = vpop.f32.mrb[120].mxu1  ;;  %v2784_v43 = vadd.f32 %v17563_v39, %v17894_v12  ;;  %v3568_v6 = vsel %vm3168_vm11, %v2778_v13, %v3368_v8 }
 0x39d   : > { %4291 = vmatprep.mubr.f32.mxu0 %v3544_v40  ;;  %12682 = vmatpush1.bf16.msra.mxu0 %v12681_v9  ;;  %v18060_v7 = vpop.f32.mrb[121].mxu1  ;;  %v2770_v9 = vadd.f32 %v17488_v57, %v17902_v51  ;;  %v3543_v40 = vsel %vm3143_vm8, %v2758_v34, %v3343_v1  ;;  %v3785_v57 = vld [vmem:[%s19764_s3 + $0x3b0] sm:$0xff]  ;;  %v3786_v34 = vld [vmem:[%s19764_s3 + $0x3b8] sm:$0xff] }
 0x39e   : > { %12683 = vmatprep.subr.bf16.mxu0 %v19812_v36  ;;  %v12690_v5 = vpack.c.bf16 %v3786_v34, %v3785_v57  ;;  %v3376_v2 = vmul.f32 0.2, %v2784_v43  ;;  %vm3176_vm13 = vcmp.ge.f32.partialorder %v2784_v43, 0.0 }
 0x39f   : > { %v3359_v1 = vmul.f32 0.2, %v2770_v9  ;;  %vm3159_vm12 = vcmp.ge.f32.partialorder %v2770_v9, 0.0 }
 0x3a0   : > { %4292 = vmatmul.mubr.f32.gmra.mrb[68].mxu0 %v3543_v40  ;;  %v18073_v54 = vpop.f32.mrb[122].mxu1  ;;  %v2790_v40 = vadd.f32 %v17587_v3, %v17894_v12  ;;  %v3576_v34 = vsel %vm3176_vm13, %v2784_v43, %v3376_v2 }
 0x3a1   : > { %4296 = vmatprep.mubr.f32.mxu0 %v3552_v27  ;;  %12685 = vmatpush1.bf16.msra.mxu0 %v12684_v28  ;;  %v18075_v11 = vpop.f32.mrb[123].mxu1  ;;  %v2776_v28 = vadd.f32 %v17518_v56, %v17902_v51  ;;  %v3551_v27 = vsel %vm3151_vm10, %v2764_v20, %v3351_v44  ;;  %v3787_v56 = vld [vmem:[%s19764_s3 + $0x3c0] sm:$0xff]  ;;  %v3788_v20 = vld [vmem:[%s19764_s3 + $0x3c8] sm:$0xff] }
 0x3a2   : > { %12686 = vmatprep.subr.bf16.mxu0 %v19812_v36  ;;  %v12693_v8 = vpack.c.bf16 %v3788_v20, %v3787_v56  ;;  %v3384_v57 = vmul.f32 0.2, %v2790_v40  ;;  %vm3184_vm15 = vcmp.ge.f32.partialorder %v2790_v40, 0.0 }
 0x3a3   : > { %v3367_v44 = vmul.f32 0.2, %v2776_v28  ;;  %vm3167_vm14 = vcmp.ge.f32.partialorder %v2776_v28, 0.0 }
 0x3a4   : > { %4297 = vmatmul.mubr.f32.gmra.mrb[70].mxu0 %v3551_v27  ;;  %v18088_v62 = vpop.f32.mrb[124].mxu1  ;;  %v2796_v27 = vadd.f32 %v17614_v60, %v17894_v12  ;;  %v3584_v20 = vsel %vm3184_vm15, %v2790_v40, %v3384_v57 }
 0x3a5   : > { %4301 = vmatprep.mubr.f32.mxu0 %v3560_v45  ;;  %12688 = vmatpush1.bf16.msra.mxu0 %v12687_v61  ;;  %v18090_v39 = vpop.f32.mrb[125].mxu1  ;;  %v2782_v61 = vadd.f32 %v17551_v49, %v17902_v51  ;;  %v3559_v45 = vsel %vm3159_vm12, %v2770_v9, %v3359_v1  ;;  %v3789_v49 = vld [vmem:[%s19764_s3 + $0x3d0] sm:$0xff]  ;;  %v3790_v9 = vld [vmem:[%s19764_s3 + $0x3d8] sm:$0xff] }
 0x3a6   : > { %12689 = vmatprep.subr.bf16.mxu0 %v19812_v36  ;;  %v12696_v2 = vpack.c.bf16 %v3790_v9, %v3789_v49  ;;  %v3392_v56 = vmul.f32 0.2, %v2796_v27  ;;  %vm3192_vm1 = vcmp.ge.f32.partialorder %v2796_v27, 0.0 }
 0x3a7   : > { %v3375_v1 = vmul.f32 0.2, %v2782_v61  ;;  %vm3175_vm0 = vcmp.ge.f32.partialorder %v2782_v61, 0.0 }
 0x3a8   : > { %4302 = vmatmul.mubr.f32.gmra.mrb[72].mxu0 %v3559_v45  ;;  %v18103_v13 = vpop.f32.mrb[126].mxu1  ;;  %v2802_v45 = vadd.f32 %v17652_v30, %v17894_v12  ;;  %v3592_v9 = vsel %vm3192_vm1, %v2796_v27, %v3392_v56 }
 0x3a9   : > { %4306 = vmatprep.mubr.f32.mxu0 %v3568_v6  ;;  %v18105_v3 = vpop.f32.mrb[127].mxu1  ;;  %12691 = vmatpush1.bf16.msra.mxu0 %v12690_v5  ;;  %v2788_v5 = vadd.f32 %v17577_v22, %v17902_v51  ;;  %v3567_v6 = vsel %vm3167_vm14, %v2776_v28, %v3367_v44  ;;  %v3791_v22 = vld [vmem:[%s19764_s3 + $0x3e0] sm:$0xff]  ;;  %v3792_v28 = vld [vmem:[%s19764_s3 + $0x3e8] sm:$0xff] }
 0x3aa   : > { %12692 = vmatprep.subr.bf16.mxu0 %v19812_v36  ;;  %v12699_v57 = vpack.c.bf16 %v3792_v28, %v3791_v22  ;;  %v3400_v49 = vmul.f32 0.2, %v2802_v45  ;;  %vm3200_vm3 = vcmp.ge.f32.partialorder %v2802_v45, 0.0 }
 0x3ab   : > { %v3383_v44 = vmul.f32 0.2, %v2788_v5  ;;  %vm3183_vm2 = vcmp.ge.f32.partialorder %v2788_v5, 0.0 }
 0x3ac   : > { %4307 = vmatmul.mubr.f32.gmra.mrb[74].mxu0 %v3567_v6  ;;  %v18118_v43 = vpop.f32.mrb[128].mxu1  ;;  %v2808_v6 = vadd.f32 %v17676_v53, %v17894_v12  ;;  %v3600_v28 = vsel %vm3200_vm3, %v2802_v45, %v3400_v49 }
 0x3ad   : > { %4311 = vmatprep.mubr.f32.mxu0 %v3576_v34  ;;  %v18120_v60 = vpop.f32.mrb[129].mxu1  ;;  %12694 = vmatpush1.bf16.msra.mxu0 %v12693_v8  ;;  %v2794_v8 = vadd.f32 %v17609_v32, %v17902_v51  ;;  %v3575_v34 = vsel %vm3175_vm0, %v2782_v61, %v3375_v1  ;;  %v3793_v32 = vld [vmem:[%s19764_s3 + $0x3f0] sm:$0xff]  ;;  %v3794_v61 = vld [vmem:[%s19764_s3 + $0x3f8] sm:$0xff] }
 0x3ae   : > { %12695 = vmatprep.subr.bf16.mxu0 %v19812_v36  ;;  %v12702_v56 = vpack.c.bf16 %v3794_v61, %v3793_v32  ;;  %v3408_v22 = vmul.f32 0.2, %v2808_v6  ;;  %vm3208_vm5 = vcmp.ge.f32.partialorder %v2808_v6, 0.0 }
 0x3af   : > { %v3391_v1 = vmul.f32 0.2, %v2794_v8  ;;  %vm3191_vm4 = vcmp.ge.f32.partialorder %v2794_v8, 0.0 }
 0x3b0   : > { %4312 = vmatmul.mubr.f32.gmra.mrb[76].mxu0 %v3575_v34  ;;  %v18133_v40 = vpop.f32.mrb[130].mxu1  ;;  %v2814_v34 = vadd.f32 %v17717_v21, %v17894_v12  ;;  %v3608_v49 = vsel %vm3208_vm5, %v2808_v6, %v3408_v22  ;;  %v2820_v21 = vadd.f32 %v17747_v16, %v17894_v12  ;;  %v2826_v6 = vadd.f32 %v17781_v52, %v17894_v12 }
 0x3b1   : > { %19862 = vst [vmem:[#allocation30_spill] sm:$0xff] %v18133_v40  ;;  %4316 = vmatprep.mubr.f32.mxu0 %v3584_v20  ;;  %v18135_v30 = vpop.f32.mrb[131].mxu1  ;;  %12697 = vmatpush1.bf16.msra.mxu0 %v12696_v2  ;;  %v2800_v2 = vadd.f32 %v17647_v63, %v17902_v51  ;;  %v3583_v20 = vsel %vm3183_vm2, %v2788_v5, %v3383_v44 }
 0x3b2   : > { %12698 = vmatprep.subr.bf16.mxu0 %v19812_v36  ;;  %v2806_v63 = vadd.f32 %v17671_v33, %v17902_v51  ;;  %v3591_v5 = vsel %vm3191_vm4, %v2794_v8, %v3391_v1  ;;  %v3416_v45 = vmul.f32 0.2, %v2814_v34  ;;  %vm3216_vm7 = vcmp.ge.f32.partialorder %v2814_v34, 0.0 }
 0x3b3   : > { %v3399_v40 = vmul.f32 0.2, %v2800_v2  ;;  %vm3199_vm6 = vcmp.ge.f32.partialorder %v2800_v2, 0.0  ;;  %v3424_v61 = vmul.f32 0.2, %v2820_v21  ;;  %v2818_v16 = vadd.f32 %v17730_v0, %v17902_v51 }
 0x3b4   : > { %4317 = vmatmul.mubr.f32.gmra.mrb[78].mxu0 %v3583_v20  ;;  %v18148_v27 = vpop.f32.mrb[132].mxu1  ;;  %vm3207_vm8 = vcmp.ge.f32.partialorder %v2806_v63, 0.0  ;;  %v3616_v1 = vsel %vm3216_vm7, %v2814_v34, %v3416_v45  ;;  %vm3224_vm9 = vcmp.ge.f32.partialorder %v2820_v21, 0.0  ;;  %v2824_v52 = vadd.f32 %v17759_v38, %v17902_v51 }
 0x3b5   : > { %4321 = vmatprep.mubr.f32.mxu0 %v3592_v9  ;;  %v18150_v53 = vpop.f32.mrb[133].mxu1  ;;  %12700 = vmatpush1.bf16.msra.mxu0 %v12699_v57  ;;  %v2812_v9 = vadd.f32 %v17707_v35, %v17902_v51  ;;  %v3599_v33 = vsel %vm3199_vm6, %v2800_v2, %v3399_v40  ;;  %v3432_v2 = vmul.f32 0.2, %v2826_v6  ;;  %v3624_v22 = vsel %vm3224_vm9, %v2820_v21, %v3424_v61 }
 0x3b6   : > { %12701 = vmatprep.subr.bf16.mxu0 %v19812_v36  ;;  %v3407_v36 = vmul.f32 0.2, %v2806_v63  ;;  %v3423_v34 = vmul.f32 0.2, %v2818_v16  ;;  %vm3232_vm11 = vcmp.ge.f32.partialorder %v2826_v6, 0.0  ;;  %vm3223_vm12 = vcmp.ge.f32.partialorder %v2818_v16, 0.0 }
 0x3b7   : > { %v3415_v20 = vmul.f32 0.2, %v2812_v9  ;;  %vm3215_vm10 = vcmp.ge.f32.partialorder %v2812_v9, 0.0  ;;  %v2838_v21 = vadd.f32 %v17818_v46, %v17894_v12  ;;  %vm3231_vm14 = vcmp.ge.f32.partialorder %v2824_v52, 0.0 }
 0x3b8   : > { %4322 = vmatmul.mubr.f32.gmra.mrb[80].mxu0 %v3591_v5  ;;  %v18157_v44 = vpop.f32.mrb[134].mxu1  ;;  %v2197_v61 = vsub.s32 7, %v19833_v55  ;;  %v2844_v46 = vadd.f32 %v17844_v10, %v17894_v12 }
 0x3b9   : > { %4326 = vmatprep.mubr.f32.mxu0 %v3600_v28  ;;  %v18159_v57 = vpop.f32.mrb[135].mxu1  ;;  %12703 = vmatpush1.bf16.msra.mxu0 %v12702_v56  ;;  %v3607_v56 = vsel %vm3207_vm8, %v2806_v63, %v3407_v36  ;;  %v2832_v28 = vadd.f32 %v17804_v17, %v17894_v12  ;;  %v3615_v5 = vsel %vm3215_vm10, %v2812_v9, %v3415_v20  ;;  %v3431_v36 = vmul.f32 0.2, %v2824_v52 }
 0x3ba   : > { %v2830_v17 = vadd.f32 %v17793_v23, %v17902_v51  ;;  %v2836_v23 = vadd.f32 %v17813_v50, %v17902_v51  ;;  %vm3248_vm15 = vcmp.ge.f32.partialorder %v2838_v21, 0.0  ;;  %vm3256_vm1 = vcmp.ge.f32.partialorder %v2844_v46, 0.0 }
 0x3bb   : > { %v3440_v45 = vmul.f32 0.2, %v2832_v28  ;;  %vm3240_vm13 = vcmp.ge.f32.partialorder %v2832_v28, 0.0 }
 0x3bc   : > { %4327 = vmatmul.mubr.f32.gmra.mrb[82].mxu0 %v3599_v33  ;;  %v18165_v8 = vpop.f32.mrb[136].mxu1  ;;  %v3623_v33 = vsel %vm3223_vm12, %v2818_v16, %v3423_v34  ;;  %v3439_v20 = vmul.f32 0.2, %v2830_v17  ;;  %v3631_v16 = vsel %vm3231_vm14, %v2824_v52, %v3431_v36  ;;  %vm3239_vm0 = vcmp.ge.f32.partialorder %v2830_v17, 0.0 }
 0x3bd   : > { %4331 = vmatprep.mubr.f32.mxu0 %v3608_v49  ;;  %v18167_v32 = vpop.f32.mrb[137].mxu1  ;;  %v3632_v49 = vsel %vm3232_vm11, %v2826_v6, %v3432_v2  ;;  %v3640_v6 = vsel %vm3240_vm13, %v2832_v28, %v3440_v45  ;;  %v2193_v2 = vsub.s32 6, %v19833_v55  ;;  %v18204_v28 = vrot.slane %v17891_v41, %v2197_v61 }
 0x3be   : > { %v3456_v34 = vmul.f32 0.2, %v2844_v46  ;;  %v3447_v50 = vmul.f32 0.2, %v2836_v23  ;;  %v2842_v52 = vadd.f32 %v17835_v37, %v17902_v51  ;;  %v3639_v45 = vsel %vm3239_vm0, %v2830_v17, %v3439_v20 }
 0x3bf   : > { %vm3247_vm2 = vcmp.ge.f32.partialorder %v2836_v23, 0.0  ;;  %v18215_v36 = vrot.slane %v17891_v41, %v2193_v2  ;;  %v2848_v37 = vadd.f32 %v17851_v29, %v17902_v51  ;;  %v2933_v2 = vadd.f32 %v17940_v48, %v18204_v28 }
 0x3c0   : > { %4332 = vmatmul.mubr.f32.gmra.mrb[84].mxu0 %v3607_v56  ;;  %v18173_v35 = vpop.f32.mrb[138].mxu1  ;;  %v3647_v17 = vsel %vm3247_vm2, %v2836_v23, %v3447_v50  ;;  %vm3255_vm4 = vcmp.ge.f32.partialorder %v2842_v52, 0.0 }
 0x3c1   : > { %4336 = vmatprep.mubr.f32.mxu0 %v3616_v1  ;;  %v18175_v40 = vpop.f32.mrb[139].mxu1  ;;  %v3448_v1 = vmul.f32 0.2, %v2838_v21  ;;  %v3463_v20 = vmul.f32 0.2, %v2848_v37  ;;  %vm3263_vm6 = vcmp.ge.f32.partialorder %v2848_v37, 0.0 }
 0x3c2   : > { %vm3090_vm9 = vcmp.ge.f32.partialorder %v2933_v2, 0.0 }
 0x3c3   : > { %v3648_v10 = vsel %vm3248_vm15, %v2838_v21, %v3448_v1  ;;  %v2921_v21 = vadd.f32 %v17912_v31, %v18204_v28 }
 0x3c4   : > { %4337 = vmatmul.mubr.f32.gmra.mrb[86].mxu0 %v3615_v5  ;;  %v18181_v0 = vpop.f32.mrb[140].mxu1  ;;  %v2850_v5 = vadd.f32 %v17854_v14, %v17894_v12  ;;  %v3656_v12 = vsel %vm3256_vm1, %v2844_v46, %v3456_v34  ;;  %v2919_v46 = vadd.f32 %v17910_v25, %v18215_v36 }
 0x3c5   : > { %4341 = vmatprep.mubr.f32.mxu0 %v3624_v22  ;;  %v18183_v63 = vpop.f32.mrb[141].mxu1  ;;  %v3274_v41 = vmul.f32 0.2, %v2921_v21  ;;  %vm3074_vm5 = vcmp.ge.f32.partialorder %v2921_v21, 0.0 }
 0x3c6   : > { %v3464_v14 = vmul.f32 0.2, %v2850_v5  ;;  %vm3264_vm3 = vcmp.ge.f32.partialorder %v2850_v5, 0.0  ;;  %vm3073_vm8 = vcmp.ge.f32.partialorder %v2919_v46, 0.0 }
 0x3c7   : > { %v3474_v34 = vsel %vm3074_vm5, %v2921_v21, %v3274_v41  ;;  %v2931_v21 = vadd.f32 %v17938_v19, %v18215_v36 }
 0x3c8   : > { %4342 = vmatmul.mubr.f32.gmra.mrb[88].mxu0 %v3623_v33  ;;  %v18189_v38 = vpop.f32.mrb[142].mxu1  ;;  %v3455_v33 = vmul.f32 0.2, %v2842_v52  ;;  %v3664_v31 = vsel %vm3264_vm3, %v2850_v5, %v3464_v14  ;;  %v3663_v5 = vsel %vm3263_vm6, %v2848_v37, %v3463_v20 }
 0x3c9   : > { %4346 = vmatprep.mubr.f32.mxu0 %v3632_v49  ;;  %v18191_v9 = vpop.f32.mrb[143].mxu1  ;;  %vm3089_vm12 = vcmp.ge.f32.partialorder %v2931_v21, 0.0 }
 0x3cc   : > { %4347 = vmatmul.mubr.f32.gmra.mrb[90].mxu0 %v3631_v16  ;;  %v18198_v56 = vpop.f32.mrb[144].mxu1  ;;  %v3655_v16 = vsel %vm3255_vm4, %v2842_v52, %v3455_v33  ;;  %v3290_v52 = vmul.f32 0.2, %v2933_v2 }
 0x3cd   : > { %4351 = vmatprep.mubr.f32.mxu0 %v3640_v6  ;;  %v18201_v22 = vpop.f32.mrb[145].mxu1  ;;  %v2927_v6 = vadd.f32 %v17926_v58, %v18204_v28  ;;  %v2925_v58 = vadd.f32 %v17924_v47, %v18215_v36 }
 0x3ce   : > { %v3490_v41 = vsel %vm3090_vm9, %v2933_v2, %v3290_v52 }
 0x3cf   : > { %v3282_v23 = vmul.f32 0.2, %v2927_v6  ;;  %vm3082_vm7 = vcmp.ge.f32.partialorder %v2927_v6, 0.0  ;;  %v3281_v48 = vmul.f32 0.2, %v2925_v58  ;;  %vm3081_vm10 = vcmp.ge.f32.partialorder %v2925_v58, 0.0 }
 0x3d0   : > { %4352 = vmatmul.mubr.f32.gmra.mrb[92].mxu0 %v3639_v45  ;;  %v18210_v49 = vpop.f32.mrb[146].mxu1  ;;  %v2939_v45 = vadd.f32 %v17955_v15, %v18204_v28  ;;  %v19863_v15 = vld [vmem:[#allocation15_spill] sm:$0xff] }
 0x3d1   : > { %4356 = vmatprep.mubr.f32.mxu0 %v3648_v10  ;;  %v18212_v55 = vpop.f32.mrb[147].mxu1  ;;  %v3273_v10 = vmul.f32 0.2, %v2919_v46  ;;  %v3482_v14 = vsel %vm3082_vm7, %v2927_v6, %v3282_v23  ;;  %v2937_v6 = vadd.f32 %v19863_v15, %v18215_v36 }
 0x3d2   : > { %v3298_v37 = vmul.f32 0.2, %v2939_v45  ;;  %vm3098_vm11 = vcmp.ge.f32.partialorder %v2939_v45, 0.0 }
 0x3d3   : > { %vm3097_vm14 = vcmp.ge.f32.partialorder %v2937_v6, 0.0 }
 0x3d4   : > { %4357 = vmatmul.mubr.f32.gmra.mrb[94].mxu0 %v3647_v17  ;;  %v18221_v61 = vpop.f32.mrb[148].mxu1  ;;  %v2945_v17 = vadd.f32 %v17970_v4, %v18204_v28  ;;  %v19865_v4 = vld [vmem:[#allocation19_spill] sm:$0xff] }
 0x3d5   : > { %4361 = vmatprep.mubr.f32.mxu0 %v3656_v12  ;;  %v18223_v1 = vpop.f32.mrb[149].mxu1  ;;  %v3473_v12 = vsel %vm3073_vm8, %v2919_v46, %v3273_v10  ;;  %v3481_v46 = vsel %vm3081_vm10, %v2925_v58, %v3281_v48  ;;  %v3297_v10 = vmul.f32 0.2, %v2937_v6  ;;  %v2943_v2 = vadd.f32 %v19865_v4, %v18215_v36 }
 0x3d6   : > { %vm3106_vm13 = vcmp.ge.f32.partialorder %v2945_v17, 0.0 }
 0x3d7   : > { %vm3105_vm0 = vcmp.ge.f32.partialorder %v2943_v2, 0.0 }
 0x3d8   : > { %v18229_v29 = vpop.f32.mrb[150].mxu1  ;;  %4362 = vmatmul.mubr.f32.gmra.mrb[96].mxu0 %v3655_v16  ;;  %v3306_v16 = vmul.f32 0.2, %v2945_v17 }
 0x3d9   : > { %v3870_v51 = vpop.f32.mrb[151].mxu1  ;;  %4366 = vmatprep.mubr.f32.mxu0 %v3664_v31  ;;  %v3289_v31 = vmul.f32 0.2, %v2931_v21 }
 0x3da   : > { %v19864_v51 = vld [vmem:[#allocation23_spill] sm:$0xff]  ;;  %v3506_v48 = vsel %vm3106_vm13, %v2945_v17, %v3306_v16  ;;  %v19868_v17 = vld [vmem:[#allocation22_spill] sm:$0xff] }
 0x3db   : > { %v2951_v23 = vadd.f32 %v19864_v51, %v18204_v28  ;;  %v2955_v16 = vadd.f32 %v19868_v17, %v18215_v36  ;;  %v2981_v17 = vadd.f32 %v18060_v7, %v18204_v28  ;;  %v2979_v7 = vadd.f32 %v18058_v26, %v18215_v36 }
 0x3dc   : > { %v18235_v25 = vpop.f32.mrb[152].mxu1  ;;  %4367 = vmatmul.mubr.f32.gmra.mrb[98].mxu0 %v3663_v5  ;;  %v3489_v5 = vsel %vm3089_vm12, %v2931_v21, %v3289_v31 }
 0x3dd   : > { %v3875_v50 = vpop.f32.mrb[153].mxu1  ;;  %4436 = vmatprep.mubr.f32.mxu0 %v3474_v34  ;;  %v3498_v34 = vsel %vm3098_vm11, %v2939_v45, %v3298_v37  ;;  %v3314_v52 = vmul.f32 0.2, %v2951_v23  ;;  %v19867_v45 = vld [vmem:[#allocation18_spill] sm:$0xff]  ;;  %vm3114_vm15 = vcmp.ge.f32.partialorder %v2951_v23, 0.0  ;;  %vm3121_vm4 = vcmp.ge.f32.partialorder %v2955_v16, 0.0 }
 0x3de   : > { %v2949_v37 = vadd.f32 %v19867_v45, %v18215_v36  ;;  %v2975_v45 = vadd.f32 %v18045_v59, %v18204_v28  ;;  %v2973_v59 = vadd.f32 %v18043_v18, %v18215_v36  ;;  %vm3154_vm9 = vcmp.ge.f32.partialorder %v2981_v17, 0.0 }
 0x3df   : > { %vm3153_vm12 = vcmp.ge.f32.partialorder %v2979_v7, 0.0 }
 0x3e0   : > { %v18241_v47 = vpop.f32.mrb[154].mxu1  ;;  %4437 = vmatmul.mubr.f32.vlgmr.msra.gmra.mrb[50].mxu0 %v3473_v12  ;;  %v3313_v51 = vmul.f32 0.2, %v2949_v37  ;;  %vm3113_vm2 = vcmp.ge.f32.partialorder %v2949_v37, 0.0  ;;  %vm3146_vm7 = vcmp.ge.f32.partialorder %v2975_v45, 0.0  ;;  %vm3145_vm10 = vcmp.ge.f32.partialorder %v2973_v59, 0.0 }
 0x3e1   : > { %v3880_v33 = vpop.f32.mrb[155].mxu1  ;;  %4441 = vmatprep.mubr.f32.mxu0 %v3482_v14  ;;  %v19866_v14 = vld [vmem:[#allocation27_spill] sm:$0xff] }
 0x3e2   : > { %v2957_v12 = vadd.f32 %v19866_v14, %v18204_v28  ;;  %v3305_v33 = vmul.f32 0.2, %v2943_v2  ;;  %v3321_v14 = vmul.f32 0.2, %v2955_v16 }
 0x3e4   : > { %v18247_v20 = vpop.f32.mrb[156].mxu1  ;;  %4442 = vmatmul.mubr.f32.gmra.mrb[52].mxu0 %v3481_v46  ;;  %v3322_v31 = vmul.f32 0.2, %v2957_v12  ;;  %v2963_v46 = vadd.f32 %v18015_v24, %v18204_v28  ;;  %vm3122_vm1 = vcmp.ge.f32.partialorder %v2957_v12, 0.0  ;;  %v19869_v24 = vld [vmem:[#allocation26_spill] sm:$0xff] }
 0x3e5   : > { %v3885_v19 = vpop.f32.mrb[157].mxu1  ;;  %4446 = vmatprep.mubr.f32.mxu0 %v3490_v41  ;;  %v3497_v41 = vsel %vm3097_vm14, %v2937_v6, %v3297_v10 }
 0x3e6   : > { %v3514_v19 = vsel %vm3114_vm15, %v2951_v23, %v3314_v52  ;;  %v3330_v10 = vmul.f32 0.2, %v2963_v46  ;;  %v2961_v23 = vadd.f32 %v19869_v24, %v18215_v36  ;;  %v3513_v52 = vsel %vm3113_vm2, %v2949_v37, %v3313_v51 }
 0x3e7   : > { %vm3130_vm3 = vcmp.ge.f32.partialorder %v2963_v46, 0.0  ;;  %v3346_v51 = vmul.f32 0.2, %v2975_v45 }
 0x3e8   : > { %v18253_v50 = vpop.f32.mrb[158].mxu1  ;;  %4447 = vmatmul.mubr.f32.gmra.mrb[54].mxu0 %v3489_v5  ;;  %v2969_v5 = vadd.f32 %v18030_v42, %v18204_v28  ;;  %v19870_v42 = vld [vmem:[#allocation31_spill] sm:$0xff]  ;;  %vm3129_vm6 = vcmp.ge.f32.partialorder %v2961_v23, 0.0 }
 0x3e9   : > { %v3890_v58 = vpop.f32.mrb[159].mxu1  ;;  %4451 = vmatprep.mubr.f32.mxu0 %v3498_v34  ;;  %v3505_v34 = vsel %vm3105_vm0, %v2943_v2, %v3305_v33  ;;  %v3546_v24 = vsel %vm3146_vm7, %v2975_v45, %v3346_v51 }
 0x3ea   : > { %v3522_v58 = vsel %vm3122_vm1, %v2957_v12, %v3322_v31  ;;  %v3338_v33 = vmul.f32 0.2, %v2969_v5  ;;  %v2967_v12 = vadd.f32 %v19870_v42, %v18215_v36  ;;  %v3521_v31 = vsel %vm3121_vm4, %v2955_v16, %v3321_v14 }
 0x3eb   : > { %vm3138_vm5 = vcmp.ge.f32.partialorder %v2969_v5, 0.0  ;;  %v2987_v14 = vadd.f32 %v18075_v11, %v18204_v28  ;;  %v2985_v11 = vadd.f32 %v18073_v54, %v18215_v36 }
 0x3ec   : > { %v18259_v15 = vpop.f32.mrb[160].mxu1  ;;  %4452 = vmatmul.mubr.f32.gmra.mrb[56].mxu0 %v3497_v41  ;;  %v3530_v41 = vsel %vm3130_vm3, %v2963_v46, %v3330_v10  ;;  %vm3137_vm8 = vcmp.ge.f32.partialorder %v2967_v12, 0.0 }
 0x3ed   : > { %v3895_v21 = vpop.f32.mrb[161].mxu1  ;;  %4456 = vmatprep.mubr.f32.mxu0 %v3506_v48  ;;  %vm3162_vm11 = vcmp.ge.f32.partialorder %v2987_v14, 0.0  ;;  %v3361_v51 = vmul.f32 0.2, %v2985_v11  ;;  %vm3161_vm14 = vcmp.ge.f32.partialorder %v2985_v11, 0.0 }
 0x3ee   : > { %v3329_v21 = vmul.f32 0.2, %v2961_v23 }
 0x3f0   : > { %v18265_v4 = vpop.f32.mrb[162].mxu1  ;;  %4457 = vmatmul.mubr.f32.gmra.mrb[58].mxu0 %v3505_v34  ;;  %v3538_v34 = vsel %vm3138_vm5, %v2969_v5, %v3338_v33  ;;  %v3529_v46 = vsel %vm3129_vm6, %v2961_v23, %v3329_v21  ;;  %v2993_v33 = vadd.f32 %v18090_v39, %v18204_v28  ;;  %v3353_v21 = vmul.f32 0.2, %v2979_v7 }
 0x3f1   : > { %v3900_v6 = vpop.f32.mrb[163].mxu1  ;;  %4461 = vmatprep.mubr.f32.mxu0 %v3514_v19  ;;  %v2991_v39 = vadd.f32 %v18088_v62, %v18215_v36 }
 0x3f2   : > { %v3337_v6 = vmul.f32 0.2, %v2967_v12  ;;  %vm3170_vm13 = vcmp.ge.f32.partialorder %v2993_v33, 0.0 }
 0x3f3   : > { %vm3169_vm0 = vcmp.ge.f32.partialorder %v2991_v39, 0.0 }
 0x3f4   : > { %v18271_v48 = vpop.f32.mrb[164].mxu1  ;;  %4462 = vmatmul.mubr.f32.gmra.mrb[60].mxu0 %v3513_v52  ;;  %v3345_v52 = vmul.f32 0.2, %v2973_v59  ;;  %v3537_v5 = vsel %vm3137_vm8, %v2967_v12, %v3337_v6  ;;  %v3370_v12 = vmul.f32 0.2, %v2993_v33 }
 0x3f5   : > { %v3905_v2 = vpop.f32.mrb[165].mxu1  ;;  %4466 = vmatprep.mubr.f32.mxu0 %v3522_v58  ;;  %v3354_v58 = vmul.f32 0.2, %v2981_v17 }
 0x3f6   : > { %v3362_v2 = vmul.f32 0.2, %v2987_v14  ;;  %v3545_v45 = vsel %vm3145_vm10, %v2973_v59, %v3345_v52  ;;  %v3005_v59 = vadd.f32 %v18120_v60, %v18204_v28  ;;  %v3011_v52 = vadd.f32 %v18135_v30, %v18204_v28  ;;  %v19871_v30 = vld [vmem:[#allocation30_spill] sm:$0xff] }
 0x3f7   : > { %v3003_v60 = vadd.f32 %v18118_v43, %v18215_v36 }
 0x3f8   : > { %v18277_v19 = vpop.f32.mrb[166].mxu1  ;;  %4467 = vmatmul.mubr.f32.gmra.mrb[62].mxu0 %v3521_v31  ;;  %v2999_v31 = vadd.f32 %v18105_v3, %v18204_v28  ;;  %v2997_v3 = vadd.f32 %v18103_v13, %v18215_v36  ;;  %vm3186_vm1 = vcmp.ge.f32.partialorder %v3005_v59, 0.0  ;;  %vm3194_vm3 = vcmp.ge.f32.partialorder %v3011_v52, 0.0 }
 0x3f9   : > { %v3910_v37 = vpop.f32.mrb[167].mxu1  ;;  %4471 = vmatprep.mubr.f32.mxu0 %v3530_v41  ;;  %v3554_v41 = vsel %vm3154_vm9, %v2981_v17, %v3354_v58  ;;  %v3553_v17 = vsel %vm3153_vm12, %v2979_v7, %v3353_v21  ;;  %v3561_v58 = vsel %vm3161_vm14, %v2985_v11, %v3361_v51  ;;  %v3385_v11 = vmul.f32 0.2, %v3003_v60 }
 0x3fa   : > { %v3562_v37 = vsel %vm3162_vm11, %v2987_v14, %v3362_v2  ;;  %v3378_v6 = vmul.f32 0.2, %v2999_v31  ;;  %vm3178_vm15 = vcmp.ge.f32.partialorder %v2999_v31, 0.0  ;;  %vm3177_vm2 = vcmp.ge.f32.partialorder %v2997_v3, 0.0 }
 0x3fb   : > { %vm3185_vm4 = vcmp.ge.f32.partialorder %v3003_v60, 0.0 }
 0x3fc   : > { %v18283_v10 = vpop.f32.mrb[168].mxu1  ;;  %4472 = vmatmul.mubr.f32.gmra.mrb[64].mxu0 %v3529_v46  ;;  %v3570_v46 = vsel %vm3170_vm13, %v2993_v33, %v3370_v12  ;;  %v3578_v7 = vsel %vm3178_vm15, %v2999_v31, %v3378_v6  ;;  %v3394_v33 = vmul.f32 0.2, %v3011_v52 }
 0x3fd   : > { %v3915_v16 = vpop.f32.mrb[169].mxu1  ;;  %4476 = vmatprep.mubr.f32.mxu0 %v3538_v34 }
 0x3fe   : > { %v3369_v16 = vmul.f32 0.2, %v2991_v39  ;;  %v3594_v51 = vsel %vm3194_vm3, %v3011_v52, %v3394_v33  ;;  %v3035_v52 = vadd.f32 %v18175_v40, %v18204_v28  ;;  %v3041_v33 = vadd.f32 %v18183_v63, %v18204_v28 }
 0x3ff   : > { %v3033_v40 = vadd.f32 %v18173_v35, %v18215_v36  ;;  %v3039_v63 = vadd.f32 %v18181_v0, %v18215_v36 }
 0x400   : > { %v18289_v18 = vpop.f32.mrb[170].mxu1  ;;  %4477 = vmatmul.mubr.f32.gmra.mrb[66].mxu0 %v3537_v5  ;;  %v3377_v5 = vmul.f32 0.2, %v2997_v3  ;;  %vm3226_vm11 = vcmp.ge.f32.partialorder %v3035_v52, 0.0  ;;  %vm3234_vm13 = vcmp.ge.f32.partialorder %v3041_v33, 0.0 }
 0x401   : > { %v3920_v23 = vpop.f32.mrb[171].mxu1  ;;  %4481 = vmatprep.mubr.f32.mxu0 %v3546_v24  ;;  %v3386_v24 = vmul.f32 0.2, %v3005_v59  ;;  %vm3225_vm14 = vcmp.ge.f32.partialorder %v3033_v40, 0.0 }
 0x402   : > { %v3569_v23 = vsel %vm3169_vm0, %v2991_v39, %v3369_v16  ;;  %vm3233_vm0 = vcmp.ge.f32.partialorder %v3039_v63, 0.0 }
 0x403   : > { %v3586_v21 = vsel %vm3186_vm1, %v3005_v59, %v3386_v24 }
 0x404   : > { %v18295_v26 = vpop.f32.mrb[172].mxu1  ;;  %4482 = vmatmul.mubr.f32.gmra.mrb[68].mxu0 %v3545_v45  ;;  %v3009_v45 = vadd.f32 %v19871_v30, %v18215_v36 }
 0x405   : > { %v3925_v42 = vpop.f32.mrb[173].mxu1  ;;  %4486 = vmatprep.mubr.f32.mxu0 %v3554_v41  ;;  %v3017_v41 = vadd.f32 %v18150_v53, %v18204_v28  ;;  %v3015_v53 = vadd.f32 %v18148_v27, %v18215_v36 }
 0x406   : > { %v3577_v42 = vsel %vm3177_vm2, %v2997_v3, %v3377_v5  ;;  %v3393_v39 = vmul.f32 0.2, %v3009_v45  ;;  %vm3193_vm6 = vcmp.ge.f32.partialorder %v3009_v45, 0.0 }
 0x407   : > { %v3402_v31 = vmul.f32 0.2, %v3017_v41  ;;  %vm3202_vm5 = vcmp.ge.f32.partialorder %v3017_v41, 0.0  ;;  %v3401_v3 = vmul.f32 0.2, %v3015_v53  ;;  %vm3201_vm8 = vcmp.ge.f32.partialorder %v3015_v53, 0.0 }
 0x408   : > { %v18301_v54 = vpop.f32.mrb[174].mxu1  ;;  %4487 = vmatmul.mubr.f32.gmra.mrb[70].mxu0 %v3553_v17  ;;  %v3585_v17 = vsel %vm3185_vm4, %v3003_v60, %v3385_v11 }
 0x409   : > { %v3930_v34 = vpop.f32.mrb[175].mxu1  ;;  %4491 = vmatprep.mubr.f32.mxu0 %v3562_v37  ;;  %v3023_v37 = vadd.f32 %v18159_v57, %v18204_v28  ;;  %v3602_v16 = vsel %vm3202_vm5, %v3017_v41, %v3402_v31  ;;  %v3021_v57 = vadd.f32 %v18157_v44, %v18215_v36  ;;  %v3601_v60 = vsel %vm3201_vm8, %v3015_v53, %v3401_v3 }
 0x40a   : > { %v3425_v31 = vmul.f32 0.2, %v3033_v40  ;;  %v3053_v53 = vadd.f32 %v18201_v22, %v18204_v28  ;;  %v3059_v3 = vadd.f32 %v18212_v55, %v18204_v28  ;;  %v3051_v22 = vadd.f32 %v18198_v56, %v18215_v36 }
 0x40b   : > { %v3410_v59 = vmul.f32 0.2, %v3023_v37  ;;  %vm3210_vm7 = vcmp.ge.f32.partialorder %v3023_v37, 0.0  ;;  %v3409_v5 = vmul.f32 0.2, %v3021_v57  ;;  %vm3209_vm10 = vcmp.ge.f32.partialorder %v3021_v57, 0.0 }
 0x40c   : > { %v18307_v62 = vpop.f32.mrb[176].mxu1  ;;  %4492 = vmatmul.mubr.f32.gmra.mrb[72].mxu0 %v3561_v58  ;;  %v3593_v58 = vsel %vm3193_vm6, %v3009_v45, %v3393_v39  ;;  %v3434_v45 = vmul.f32 0.2, %v3041_v33  ;;  %vm3250_vm1 = vcmp.ge.f32.partialorder %v3053_v53, 0.0  ;;  %v3057_v55 = vadd.f32 %v18210_v49, %v18215_v36 }
 0x40d   : > { %v3935_v14 = vpop.f32.mrb[177].mxu1  ;;  %4496 = vmatprep.mubr.f32.mxu0 %v3570_v46  ;;  %v3029_v46 = vadd.f32 %v18167_v32, %v18204_v28  ;;  %v3027_v32 = vadd.f32 %v18165_v8, %v18215_v36  ;;  %v3609_v11 = vsel %vm3209_vm10, %v3021_v57, %v3409_v5  ;;  %vm3258_vm3 = vcmp.ge.f32.partialorder %v3059_v3, 0.0 }
 0x40e   : > { %vm3249_vm4 = vcmp.ge.f32.partialorder %v3051_v22, 0.0  ;;  %vm3257_vm6 = vcmp.ge.f32.partialorder %v3057_v55, 0.0 }
 0x40f   : > { %v3418_v24 = vmul.f32 0.2, %v3029_v46  ;;  %vm3218_vm9 = vcmp.ge.f32.partialorder %v3029_v46, 0.0  ;;  %vm3217_vm12 = vcmp.ge.f32.partialorder %v3027_v32, 0.0 }
 0x410   : > { %v18313_v13 = vpop.f32.mrb[178].mxu1  ;;  %4497 = vmatmul.mubr.f32.gmra.mrb[74].mxu0 %v3569_v23 }
 0x411   : > { %v3940_v2 = vpop.f32.mrb[179].mxu1  ;;  %4501 = vmatprep.mubr.f32.mxu0 %v3578_v7  ;;  %v3610_v7 = vsel %vm3210_vm7, %v3023_v37, %v3410_v59  ;;  %v3618_v41 = vsel %vm3218_vm9, %v3029_v46, %v3418_v24  ;;  %v3625_v59 = vsel %vm3225_vm14, %v3033_v40, %v3425_v31 }
 0x412   : > { %v3426_v2 = vmul.f32 0.2, %v3035_v52 }
 0x414   : > { %v18319_v43 = vpop.f32.mrb[180].mxu1  ;;  %4502 = vmatmul.mubr.f32.gmra.mrb[76].mxu0 %v3577_v42  ;;  %v3047_v42 = vadd.f32 %v18191_v9, %v18204_v28  ;;  %v3045_v9 = vadd.f32 %v18189_v38, %v18215_v36 }
 0x415   : > { %v3945_v12 = vpop.f32.mrb[181].mxu1  ;;  %4506 = vmatprep.mubr.f32.mxu0 %v3586_v21  ;;  %v3417_v21 = vmul.f32 0.2, %v3027_v32 }
 0x416   : > { %v3626_v12 = vsel %vm3226_vm11, %v3035_v52, %v3426_v2  ;;  %v3442_v39 = vmul.f32 0.2, %v3047_v42  ;;  %vm3242_vm15 = vcmp.ge.f32.partialorder %v3047_v42, 0.0  ;;  %vm3241_vm2 = vcmp.ge.f32.partialorder %v3045_v9, 0.0 }
 0x417   : > { %v3617_v37 = vsel %vm3217_vm12, %v3027_v32, %v3417_v21  ;;  %v3458_v52 = vmul.f32 0.2, %v3059_v3  ;;  %v3449_v32 = vmul.f32 0.2, %v3051_v22  ;;  %v3063_v21 = vadd.f32 %v18221_v61, %v18215_v36  ;;  %v18376_v36 = vld [vmem:[%s19765_s4] ss:$0 sm:$0xff] }
 0x418   : > { %v18325_v34 = vpop.f32.mrb[182].mxu1  ;;  %4507 = vmatmul.mubr.f32.gmra.mrb[78].mxu0 %v3585_v17  ;;  %v3634_v17 = vsel %vm3234_vm13, %v3041_v33, %v3434_v45  ;;  %v3642_v57 = vsel %vm3242_vm15, %v3047_v42, %v3442_v39  ;;  %v3869_v61 = vadd.f32 %v18376_v36, %v18229_v29 }
 0x419   : > { %v3950_v6 = vpop.f32.mrb[183].mxu1  ;;  %4511 = vmatprep.mubr.f32.mxu0 %v3594_v51  ;;  %v3658_v33 = vsel %vm3258_vm3, %v3059_v3, %v3458_v52  ;;  %vm3265_vm7 = vcmp.ge.f32.partialorder %v3063_v21, 0.0 }
 0x41a   : > { %v3433_v6 = vmul.f32 0.2, %v3039_v63 }
 0x41c   : > { %v18331_v27 = vpop.f32.mrb[184].mxu1  ;;  %4512 = vmatmul.mubr.f32.gmra.mrb[80].mxu0 %v3593_v58  ;;  %v3441_v58 = vmul.f32 0.2, %v3045_v9 }
 0x41d   : > { %v3955_v14 = vpop.f32.mrb[185].mxu1  ;;  %4516 = vmatprep.mubr.f32.mxu0 %v3602_v16  ;;  %v3450_v16 = vmul.f32 0.2, %v3053_v53 }
 0x41e   : > { %v3633_v14 = vsel %vm3233_vm0, %v3039_v63, %v3433_v6  ;;  %v3874_v63 = vadd.f32 %v18376_v36, %v18235_v25 }
 0x41f   : > { %v3650_v5 = vsel %vm3250_vm1, %v3053_v53, %v3450_v16 }
 0x420   : > { %v18337_v44 = vpop.f32.mrb[186].mxu1  ;;  %4517 = vmatmul.mubr.f32.gmra.mrb[82].mxu0 %v3601_v60  ;;  %v3641_v60 = vsel %vm3241_vm2, %v3045_v9, %v3441_v58 }
 0x421   : > { %v3960_v23 = vpop.f32.mrb[187].mxu1  ;;  %4521 = vmatprep.mubr.f32.mxu0 %v3610_v7  ;;  %v3065_v7 = vadd.f32 %v18223_v1, %v18204_v28  ;;  %v3649_v28 = vsel %vm3249_vm4, %v3051_v22, %v3449_v32 }
 0x423   : > { %v3466_v2 = vmul.f32 0.2, %v3065_v7  ;;  %vm3266_vm5 = vcmp.ge.f32.partialorder %v3065_v7, 0.0 }
 0x424   : > { %v18343_v8 = vpop.f32.mrb[188].mxu1  ;;  %4522 = vmatmul.mubr.f32.gmra.mrb[84].mxu0 %v3609_v11  ;;  %v3465_v11 = vmul.f32 0.2, %v3063_v21 }
 0x425   : > { %v3965_v30 = vpop.f32.mrb[189].mxu1  ;;  %4526 = vmatprep.mubr.f32.mxu0 %v3618_v41  ;;  %v3457_v41 = vmul.f32 0.2, %v3057_v55  ;;  %v3666_v40 = vsel %vm3266_vm5, %v3065_v7, %v3466_v2 }
 0x426   : > { %v3665_v45 = vsel %vm3265_vm7, %v3063_v21, %v3465_v11 }
 0x427   : > { %v3657_v30 = vsel %vm3257_vm6, %v3057_v55, %v3457_v41 }
 0x428   : > { %v18349_v35 = vpop.f32.mrb[190].mxu1  ;;  %4527 = vmatmul.mubr.f32.gmra.mrb[86].mxu0 %v3617_v37 }
 0x429   : > { %v3970_v51 = vpop.f32.mrb[191].mxu1  ;;  %4531 = vmatprep.mubr.f32.mxu0 %v3626_v12 }
 0x42c   : > { %v18355_v0 = vpop.f32.mrb[192].mxu1  ;;  %4532 = vmatmul.mubr.f32.gmra.mrb[88].mxu0 %v3625_v59 }
 0x42d   : > { %v3975_v46 = vpop.f32.mrb[193].mxu1  ;;  %4536 = vmatprep.mubr.f32.mxu0 %v3634_v17  ;;  %v3879_v17 = vadd.f32 %v18376_v36, %v18241_v47  ;;  %v3889_v47 = vadd.f32 %v18376_v36, %v18253_v50  ;;  %v3899_v50 = vadd.f32 %v18376_v36, %v18265_v4  ;;  %v3909_v4 = vadd.f32 %v18376_v36, %v18277_v19 }
 0x42e   : > { %v3919_v19 = vadd.f32 %v18376_v36, %v18289_v18  ;;  %v3929_v18 = vadd.f32 %v18376_v36, %v18301_v54  ;;  %v3939_v54 = vadd.f32 %v18376_v36, %v18313_v13  ;;  %v3949_v13 = vadd.f32 %v18376_v36, %v18325_v34 }
 0x42f   : > { %v3959_v34 = vadd.f32 %v18376_v36, %v18337_v44  ;;  %v3969_v44 = vadd.f32 %v18376_v36, %v18349_v35 }
 0x430   : > { %v18361_v38 = vpop.f32.mrb[194].mxu1  ;;  %4537 = vmatmul.mubr.f32.gmra.mrb[90].mxu0 %v3633_v14 }
 0x431   : > { %v3980_v24 = vpop.f32.mrb[195].mxu1  ;;  %4541 = vmatprep.mubr.f32.mxu0 %v3642_v57  ;;  %v3884_v57 = vadd.f32 %v18376_v36, %v18247_v20  ;;  %v3894_v20 = vadd.f32 %v18376_v36, %v18259_v15  ;;  %v3904_v15 = vadd.f32 %v18376_v36, %v18271_v48  ;;  %v3914_v48 = vadd.f32 %v18376_v36, %v18283_v10 }
 0x432   : > { %v3924_v10 = vadd.f32 %v18376_v36, %v18295_v26  ;;  %v3934_v26 = vadd.f32 %v18376_v36, %v18307_v62  ;;  %v3944_v62 = vadd.f32 %v18376_v36, %v18319_v43  ;;  %v3954_v43 = vadd.f32 %v18376_v36, %v18331_v27 }
 0x433   : > { %v3964_v27 = vadd.f32 %v18376_v36, %v18343_v8  ;;  %v3974_v8 = vadd.f32 %v18376_v36, %v18355_v0  ;;  %v3979_v35 = vadd.f32 %v18376_v36, %v18361_v38 }
 0x434   : > { %v18367_v56 = vpop.f32.mrb[196].mxu1  ;;  %4542 = vmatmul.mubr.f32.gmra.mrb[92].mxu0 %v3641_v60 }
 0x435   : > { %v3985_v23 = vpop.f32.mrb[197].mxu1  ;;  %4546 = vmatprep.mubr.f32.mxu0 %v3650_v5  ;;  %v3984_v0 = vadd.f32 %v18376_v36, %v18367_v56 }
 0x438   : > { %v18371_v1 = vpop.f32.mrb[198].mxu1  ;;  %4547 = vmatmul.mubr.f32.gmra.mrb[94].mxu0 %v3649_v28 }
 0x439   : > { %v3990_v49 = vpop.f32.mrb[199].mxu1  ;;  %4551 = vmatprep.mubr.f32.mxu0 %v3658_v33  ;;  %v3989_v38 = vadd.f32 %v18376_v36, %v18371_v1 }
 0x43c   : > { %4552 = vmatmul.mubr.f32.gmra.mrb[96].mxu0 %v3657_v30 }
 0x43d   : > { %4556 = vmatprep.mubr.f32.mxu0 %v3666_v40 }
 0x440   : > { %4557 = vmatmul.mubr.f32.gmra.mrb[98].mxu0 %v3665_v45 }
 0x4b3   : > { %v4438_v42 = vpop.f32.mrb[50].mxu0 }
 0x4b4   : > { %v12833_v12 = vadd.f32 %v4438_v42, %v3869_v61  ;;  %v4440_v31 = vpop.f32.mrb[51].mxu0 }
 0x4b6   : > { %v4587_v51 = vmul.f32 0.2, %v12833_v12  ;;  %vm4562_vm8 = vcmp.ge.f32.partialorder %v12833_v12, 0.0 }
 0x4b7   : > { %v4443_v37 = vpop.f32.mrb[52].mxu0 }
 0x4b8   : > { %v12835_v39 = vadd.f32 %v4443_v37, %v3874_v63  ;;  %v4445_v53 = vpop.f32.mrb[53].mxu0  ;;  %v4612_v59 = vsel %vm4562_vm8, %v12833_v12, %v4587_v51 }
 0x4ba   : > { %vm4563_vm9 = vcmp.ge.f32.partialorder %v12835_v39, 0.0  ;;  %v4588_v6 = vmul.f32 0.2, %v12835_v39 }
 0x4bb   : > { %v4448_v9 = vpop.f32.mrb[54].mxu0 }
 0x4bc   : > { %v4613_v46 = vsel %vm4563_vm9, %v12835_v39, %v4588_v6  ;;  %v12837_v29 = vadd.f32 %v4448_v9, %v3879_v17  ;;  %v4450_v16 = vpop.f32.mrb[55].mxu0 }
 0x4bd   : > { %v12176_v3 = vpack.c.bf16 %v4613_v46, %v4612_v59 }
 0x4be   : > { %v4589_v58 = vmul.f32 0.2, %v12837_v29  ;;  %vm4564_vm10 = vcmp.ge.f32.partialorder %v12837_v29, 0.0 }
 0x4bf   : > { %12177 = vst [vmem:[#allocation2] sm:$0xff] %v12176_v3   ;;  %v4453_v25 = vpop.f32.mrb[56].mxu0 }
 0x4c0   : > { %v12839_v22 = vadd.f32 %v4453_v25, %v3884_v57  ;;  %v4455_v14 = vpop.f32.mrb[57].mxu0  ;;  %v4614_v7 = vsel %vm4564_vm10, %v12837_v29, %v4589_v58 }
 0x4c2   : > { %vm4565_vm11 = vcmp.ge.f32.partialorder %v12839_v22, 0.0  ;;  %v4590_v24 = vmul.f32 0.2, %v12839_v22 }
 0x4c3   : > { %v4458_v52 = vpop.f32.mrb[58].mxu0 }
 0x4c4   : > { %v4615_v5 = vsel %vm4565_vm11, %v12839_v22, %v4590_v24  ;;  %v12841_v32 = vadd.f32 %v4458_v52, %v3889_v47  ;;  %v4460_v55 = vpop.f32.mrb[59].mxu0 }
 0x4c5   : > { %v12181_v60 = vpack.c.bf16 %v4615_v5, %v4614_v7 }
 0x4c6   : > { %v4591_v2 = vmul.f32 0.2, %v12841_v32  ;;  %vm4566_vm12 = vcmp.ge.f32.partialorder %v12841_v32, 0.0 }
 0x4c7   : > { %12233 = vst [vmem:[#allocation2 + $0x8] sm:$0xff] %v12181_v60   ;;  %v4463_v23 = vpop.f32.mrb[60].mxu0 }
 0x4c8   : > { %v12843_v33 = vadd.f32 %v4463_v23, %v3894_v20  ;;  %v4465_v41 = vpop.f32.mrb[61].mxu0  ;;  %v4616_v49 = vsel %vm4566_vm12, %v12841_v32, %v4591_v2 }
 0x4ca   : > { %vm4567_vm13 = vcmp.ge.f32.partialorder %v12843_v33, 0.0  ;;  %v4592_v21 = vmul.f32 0.2, %v12843_v33 }
 0x4cb   : > { %v4468_v28 = vpop.f32.mrb[62].mxu0 }
 0x4cc   : > { %v4617_v40 = vsel %vm4567_vm13, %v12843_v33, %v4592_v21  ;;  %v12845_v11 = vadd.f32 %v4468_v28, %v3899_v50  ;;  %v4470_v30 = vpop.f32.mrb[63].mxu0 }
 0x4cd   : > { %v12186_v45 = vpack.c.bf16 %v4617_v40, %v4616_v49 }
 0x4ce   : > { %v4593_v42 = vmul.f32 0.2, %v12845_v11  ;;  %vm4568_vm14 = vcmp.ge.f32.partialorder %v12845_v11, 0.0 }
 0x4cf   : > { %12234 = vst [vmem:[#allocation2 + $0x10] sm:$0xff] %v12186_v45   ;;  %v4473_v61 = vpop.f32.mrb[64].mxu0 }
 0x4d0   : > { %v12847_v12 = vadd.f32 %v4473_v61, %v3904_v15  ;;  %v4475_v31 = vpop.f32.mrb[65].mxu0  ;;  %v4618_v51 = vsel %vm4568_vm14, %v12845_v11, %v4593_v42 }
 0x4d2   : > { %vm4569_vm15 = vcmp.ge.f32.partialorder %v12847_v12, 0.0  ;;  %v4594_v63 = vmul.f32 0.2, %v12847_v12 }
 0x4d3   : > { %v4478_v37 = vpop.f32.mrb[66].mxu0 }
 0x4d4   : > { %v4619_v39 = vsel %vm4569_vm15, %v12847_v12, %v4594_v63  ;;  %v12849_v53 = vadd.f32 %v4478_v37, %v3909_v4  ;;  %v4480_v17 = vpop.f32.mrb[67].mxu0 }
 0x4d5   : > { %v12191_v6 = vpack.c.bf16 %v4619_v39, %v4618_v51 }
 0x4d6   : > { %v4595_v59 = vmul.f32 0.2, %v12849_v53  ;;  %vm4570_vm0 = vcmp.ge.f32.partialorder %v12849_v53, 0.0 }
 0x4d7   : > { %12235 = vst [vmem:[#allocation2 + $0x18] sm:$0xff] %v12191_v6   ;;  %v4483_v9 = vpop.f32.mrb[68].mxu0 }
 0x4d8   : > { %v12851_v46 = vadd.f32 %v4483_v9, %v3914_v48  ;;  %v4485_v29 = vpop.f32.mrb[69].mxu0  ;;  %v4620_v57 = vsel %vm4570_vm0, %v12849_v53, %v4595_v59 }
 0x4da   : > { %vm4571_vm1 = vcmp.ge.f32.partialorder %v12851_v46, 0.0  ;;  %v4596_v16 = vmul.f32 0.2, %v12851_v46 }
 0x4db   : > { %v4488_v3 = vpop.f32.mrb[70].mxu0 }
 0x4dc   : > { %v4621_v25 = vsel %vm4571_vm1, %v12851_v46, %v4596_v16  ;;  %v12853_v58 = vadd.f32 %v4488_v3, %v3919_v19  ;;  %v4490_v22 = vpop.f32.mrb[71].mxu0 }
 0x4dd   : > { %v12196_v14 = vpack.c.bf16 %v4621_v25, %v4620_v57 }
 0x4de   : > { %v4597_v24 = vmul.f32 0.2, %v12853_v58  ;;  %vm4572_vm2 = vcmp.ge.f32.partialorder %v12853_v58, 0.0 }
 0x4df   : > { %12236 = vst [vmem:[#allocation2 + $0x20] sm:$0xff] %v12196_v14   ;;  %v4493_v47 = vpop.f32.mrb[72].mxu0 }
 0x4e0   : > { %v12855_v52 = vadd.f32 %v4493_v47, %v3924_v10  ;;  %v4495_v7 = vpop.f32.mrb[73].mxu0  ;;  %v4622_v55 = vsel %vm4572_vm2, %v12853_v58, %v4597_v24 }
 0x4e2   : > { %vm4573_vm3 = vcmp.ge.f32.partialorder %v12855_v52, 0.0  ;;  %v4598_v5 = vmul.f32 0.2, %v12855_v52 }
 0x4e3   : > { %v4498_v32 = vpop.f32.mrb[74].mxu0 }
 0x4e4   : > { %v4623_v60 = vsel %vm4573_vm3, %v12855_v52, %v4598_v5  ;;  %v12857_v20 = vadd.f32 %v4498_v32, %v3929_v18  ;;  %v4500_v23 = vpop.f32.mrb[75].mxu0 }
 0x4e5   : > { %v12201_v2 = vpack.c.bf16 %v4623_v60, %v4622_v55 }
 0x4e6   : > { %v4599_v41 = vmul.f32 0.2, %v12857_v20  ;;  %vm4574_vm4 = vcmp.ge.f32.partialorder %v12857_v20, 0.0 }
 0x4e7   : > { %12237 = vst [vmem:[#allocation2 + $0x28] sm:$0xff] %v12201_v2   ;;  %v4503_v33 = vpop.f32.mrb[76].mxu0 }
 0x4e8   : > { %v12859_v50 = vadd.f32 %v4503_v33, %v3934_v26  ;;  %v4505_v21 = vpop.f32.mrb[77].mxu0  ;;  %v4624_v40 = vsel %vm4574_vm4, %v12857_v20, %v4599_v41 }
 0x4ea   : > { %vm4575_vm5 = vcmp.ge.f32.partialorder %v12859_v50, 0.0  ;;  %v4600_v28 = vmul.f32 0.2, %v12859_v50 }
 0x4eb   : > { %v4508_v49 = vpop.f32.mrb[78].mxu0 }
 0x4ec   : > { %v4625_v11 = vsel %vm4575_vm5, %v12859_v50, %v4600_v28  ;;  %v12861_v30 = vadd.f32 %v4508_v49, %v3939_v54  ;;  %v4510_v45 = vpop.f32.mrb[79].mxu0 }
 0x4ed   : > { %v12206_v15 = vpack.c.bf16 %v4625_v11, %v4624_v40 }
 0x4ee   : > { %v4601_v42 = vmul.f32 0.2, %v12861_v30  ;;  %vm4576_vm6 = vcmp.ge.f32.partialorder %v12861_v30, 0.0 }
 0x4ef   : > { %12238 = vst [vmem:[#allocation2 + $0x30] sm:$0xff] %v12206_v15   ;;  %v4513_v61 = vpop.f32.mrb[80].mxu0 }
 0x4f0   : > { %v12863_v12 = vadd.f32 %v4513_v61, %v3944_v62  ;;  %v4515_v31 = vpop.f32.mrb[81].mxu0  ;;  %v4626_v37 = vsel %vm4576_vm6, %v12861_v30, %v4601_v42 }
 0x4f2   : > { %vm4577_vm7 = vcmp.ge.f32.partialorder %v12863_v12, 0.0  ;;  %v4602_v4 = vmul.f32 0.2, %v12863_v12 }
 0x4f3   : > { %v4518_v63 = vpop.f32.mrb[82].mxu0 }
 0x4f4   : > { %v4627_v51 = vsel %vm4577_vm7, %v12863_v12, %v4602_v4  ;;  %v12865_v39 = vadd.f32 %v4518_v63, %v3949_v13  ;;  %v4520_v53 = vpop.f32.mrb[83].mxu0 }
 0x4f5   : > { %v12211_v17 = vpack.c.bf16 %v4627_v51, %v4626_v37 }
 0x4f6   : > { %v4603_v48 = vmul.f32 0.2, %v12865_v39  ;;  %vm4578_vm8 = vcmp.ge.f32.partialorder %v12865_v39, 0.0 }
 0x4f7   : > { %12239 = vst [vmem:[#allocation2 + $0x38] sm:$0xff] %v12211_v17   ;;  %v4523_v6 = vpop.f32.mrb[84].mxu0 }
 0x4f8   : > { %v12867_v9 = vadd.f32 %v4523_v6, %v3954_v43  ;;  %v4525_v59 = vpop.f32.mrb[85].mxu0  ;;  %v4628_v19 = vsel %vm4578_vm8, %v12865_v39, %v4603_v48 }
 0x4fa   : > { %vm4579_vm9 = vcmp.ge.f32.partialorder %v12867_v9, 0.0  ;;  %v4604_v46 = vmul.f32 0.2, %v12867_v9 }
 0x4fb   : > { %v4528_v29 = vpop.f32.mrb[86].mxu0 }
 0x4fc   : > { %v4629_v16 = vsel %vm4579_vm9, %v12867_v9, %v4604_v46  ;;  %v12869_v3 = vadd.f32 %v4528_v29, %v3959_v34  ;;  %v4530_v57 = vpop.f32.mrb[87].mxu0 }
 0x4fd   : > { %v12216_v25 = vpack.c.bf16 %v4629_v16, %v4628_v19 }
 0x4fe   : > { %v4605_v22 = vmul.f32 0.2, %v12869_v3  ;;  %vm4580_vm10 = vcmp.ge.f32.partialorder %v12869_v3, 0.0 }
 0x4ff   : > { %12240 = vst [vmem:[#allocation2 + $0x40] sm:$0xff] %v12216_v25   ;;  %v4533_v58 = vpop.f32.mrb[88].mxu0 }
 0x500   : > { %v12871_v14 = vadd.f32 %v4533_v58, %v3964_v27  ;;  %v4535_v10 = vpop.f32.mrb[89].mxu0  ;;  %v4630_v52 = vsel %vm4580_vm10, %v12869_v3, %v4605_v22 }
 0x502   : > { %vm4581_vm11 = vcmp.ge.f32.partialorder %v12871_v14, 0.0  ;;  %v4606_v47 = vmul.f32 0.2, %v12871_v14 }
 0x503   : > { %v4538_v24 = vpop.f32.mrb[90].mxu0 }
 0x504   : > { %v4631_v7 = vsel %vm4581_vm11, %v12871_v14, %v4606_v47  ;;  %v12873_v18 = vadd.f32 %v4538_v24, %v3969_v44  ;;  %v4540_v5 = vpop.f32.mrb[91].mxu0 }
 0x505   : > { %v12221_v32 = vpack.c.bf16 %v4631_v7, %v4630_v52 }
 0x506   : > { %v4607_v60 = vmul.f32 0.2, %v12873_v18  ;;  %vm4582_vm12 = vcmp.ge.f32.partialorder %v12873_v18, 0.0 }
 0x507   : > { %12241 = vst [vmem:[#allocation2 + $0x48] sm:$0xff] %v12221_v32   ;;  %v4543_v55 = vpop.f32.mrb[92].mxu0 }
 0x508   : > { %v12875_v20 = vadd.f32 %v4543_v55, %v3974_v8  ;;  %v4545_v23 = vpop.f32.mrb[93].mxu0  ;;  %v4632_v33 = vsel %vm4582_vm12, %v12873_v18, %v4607_v60 }
 0x50a   : > { %vm4583_vm13 = vcmp.ge.f32.partialorder %v12875_v20, 0.0  ;;  %v4608_v2 = vmul.f32 0.2, %v12875_v20 }
 0x50b   : > { %v4548_v26 = vpop.f32.mrb[94].mxu0 }
 0x50c   : > { %v4633_v41 = vsel %vm4583_vm13, %v12875_v20, %v4608_v2  ;;  %v12877_v50 = vadd.f32 %v4548_v26, %v3979_v35  ;;  %v4550_v21 = vpop.f32.mrb[95].mxu0 }
 0x50d   : > { %v12226_v54 = vpack.c.bf16 %v4633_v41, %v4632_v33 }
 0x50e   : > { %v4609_v49 = vmul.f32 0.2, %v12877_v50  ;;  %vm4584_vm14 = vcmp.ge.f32.partialorder %v12877_v50, 0.0 }
 0x50f   : > { %12242 = vst [vmem:[#allocation2 + $0x50] sm:$0xff] %v12226_v54   ;;  %v4553_v28 = vpop.f32.mrb[96].mxu0 }
 0x510   : > { %v12879_v40 = vadd.f32 %v4553_v28, %v3984_v0  ;;  %v4555_v11 = vpop.f32.mrb[97].mxu0  ;;  %v4634_v15 = vsel %vm4584_vm14, %v12877_v50, %v4609_v49 }
 0x512   : > { %vm4585_vm15 = vcmp.ge.f32.partialorder %v12879_v40, 0.0  ;;  %v4610_v30 = vmul.f32 0.2, %v12879_v40 }
 0x513   : > { %v4558_v45 = vpop.f32.mrb[98].mxu0 }
 0x514   : > { %v4635_v62 = vsel %vm4585_vm15, %v12879_v40, %v4610_v30  ;;  %v12881_v61 = vadd.f32 %v4558_v45, %v3989_v38  ;;  %v4560_v42 = vpop.f32.mrb[99].mxu0 }
 0x515   : > { %v12231_v12 = vpack.c.bf16 %v4635_v62, %v4634_v15 }
 0x516   : > { %vm4586_vm0 = vcmp.ge.f32.partialorder %v12881_v61, 0.0  ;;  %v4611_v31 = vmul.f32 0.2, %v12881_v61 }
 0x517   : > { %12243 = vst [vmem:[#allocation2 + $0x58] sm:$0xff] %v12231_v12  }
 0x518   : > { %v4636_v56 = vsel %vm4586_vm0, %v12881_v61, %v4611_v31 }
 0x519   : > { %v4685_v13 = vpack.c.bf16 %v4636_v56, %v4636_v56 }
 0x51b   : > { %4686 = vst [vmem:[#allocation2 + $0x60] sm:$0xf] %v4685_v13 }
 0x51c PF: > { %v13134_v1 = vld [vmem:[%s16190_s25 + $0x4] ss:$16 sps:$4 sm:$0xff]   ;;  %v13136_v36 = vld [vmem:[%s16190_s25 + $0xc] ss:$16 sps:$4 sm:$0xff]   ;;  %v13138_v4 = vld [vmem:[%s16190_s25] ss:$16 sps:$4 sm:$0xff]  }
 0x51d   : > { %9610 = vmatprep.subr.bf16.mxu0 %v13134_v1  ;;  %v13139_v63 = vld [vmem:[%s16190_s25 + $0x8] ss:$16 sps:$4 sm:$0xff]   ;;  %10143 = vmatprep.subr.bf16.mxu1 %v13136_v36  ;;  %v13140_v37 = vld [vmem:[%s16190_s25 + $0x24] ss:$16 sps:$4 sm:$0xff]   ;;  %v13142_v51 = vld [vmem:[%s16190_s25 + $0x2c] ss:$16 sps:$4 sm:$0xff]  }
 0x51e   : > { %9611 = vmatpush1.bf16.msra.mxu0 %v13138_v4  ;;  %10144 = vmatpush1.bf16.msra.mxu1 %v13139_v63  ;;  %v13144_v39 = vld [vmem:[%s16190_s25 + $0x20] ss:$16 sps:$4 sm:$0xff]   ;;  %v13145_v53 = vld [vmem:[%s16190_s25 + $0x28] ss:$16 sps:$4 sm:$0xff]   ;;  %v13146_v17 = vld [vmem:[%s16190_s25 + $0x44] ss:$16 sps:$4 sm:$0xff]  }
 0x51f   : > { %9612 = vmatprep.subr.bf16.mxu0 %v13140_v37  ;;  %10145 = vmatprep.subr.bf16.mxu1 %v13142_v51  ;;  %v13148_v43 = vld [vmem:[%s16190_s25 + $0x4c] ss:$16 sps:$4 sm:$0xff]   ;;  %v13150_v6 = vld [vmem:[%s16190_s25 + $0x40] ss:$16 sps:$4 sm:$0xff]   ;;  %v13151_v48 = vld [vmem:[%s16190_s25 + $0x48] ss:$16 sps:$4 sm:$0xff]  }
 0x520   : > { %v13152_v9 = vld [vmem:[%s16190_s25 + $0x64] ss:$16 sps:$4 sm:$0xff]   ;;  %v13154_v59 = vld [vmem:[%s16190_s25 + $0x6c] ss:$16 sps:$4 sm:$0xff]   ;;  %v13156_v34 = vld [vmem:[%s16190_s25 + $0x60] ss:$16 sps:$4 sm:$0xff]  }
 0x521   : > { %v13157_v46 = vld [vmem:[%s16190_s25 + $0x68] ss:$16 sps:$4 sm:$0xff]   ;;  %v13158_v29 = vld [vmem:[%s16190_s25 + $0x84] ss:$16 sps:$4 sm:$0xff]   ;;  %v13160_v19 = vld [vmem:[%s16190_s25 + $0x8c] ss:$16 sps:$4 sm:$0xff]  }
 0x522   : > { %9613 = vmatpush1.bf16.msra.mxu0 %v13144_v39  ;;  %10146 = vmatpush1.bf16.msra.mxu1 %v13145_v53  ;;  %v13162_v16 = vld [vmem:[%s16190_s25 + $0x80] ss:$16 sps:$4 sm:$0xff]   ;;  %v13163_v3 = vld [vmem:[%s16190_s25 + $0x88] ss:$16 sps:$4 sm:$0xff]   ;;  %v13164_v57 = vld [vmem:[%s16190_s25 + $0xa4] ss:$16 sps:$4 sm:$0xff]  }
 0x523   : > { %9614 = vmatprep.subr.bf16.mxu0 %v13146_v17  ;;  %10147 = vmatprep.subr.bf16.mxu1 %v13148_v43  ;;  %v13166_v25 = vld [vmem:[%s16190_s25 + $0xac] ss:$16 sps:$4 sm:$0xff]   ;;  %v13168_v27 = vld [vmem:[%s16190_s25 + $0xa0] ss:$16 sps:$4 sm:$0xff]   ;;  %v13169_v58 = vld [vmem:[%s16190_s25 + $0xa8] ss:$16 sps:$4 sm:$0xff]  }
 0x524   : > { %v13170_v22 = vld [vmem:[%s16190_s25 + $0xc4] ss:$16 sps:$4 sm:$0xff]   ;;  %v13172_v14 = vld [vmem:[%s16190_s25 + $0xcc] ss:$16 sps:$4 sm:$0xff]   ;;  %v13174_v10 = vld [vmem:[%s16190_s25 + $0xc0] ss:$16 sps:$4 sm:$0xff]  }
 0x525   : > { %v13175_v44 = vld [vmem:[%s16190_s25 + $0xc8] ss:$16 sps:$4 sm:$0xff]   ;;  %v13176_v47 = vld [vmem:[%s16190_s25 + $0xe4] ss:$16 sps:$4 sm:$0xff]   ;;  %v13178_v24 = vld [vmem:[%s16190_s25 + $0xec] ss:$16 sps:$4 sm:$0xff]  }
 0x526   : > { %9615 = vmatpush1.bf16.msra.mxu0 %v13150_v6  ;;  %10148 = vmatpush1.bf16.msra.mxu1 %v13151_v48  ;;  %v13180_v52 = vld [vmem:[%s16190_s25 + $0xe0] ss:$16 sps:$4 sm:$0xff]   ;;  %v13181_v7 = vld [vmem:[%s16190_s25 + $0xe8] ss:$16 sps:$4 sm:$0xff]   ;;  %v13182_v18 = vld [vmem:[%s16190_s25 + $0x104] ss:$16 sps:$4 sm:$0xff]  }
 0x527   : > { %9616 = vmatprep.subr.bf16.mxu0 %v13152_v9  ;;  %10149 = vmatprep.subr.bf16.mxu1 %v13154_v59  ;;  %v13184_v5 = vld [vmem:[%s16190_s25 + $0x10c] ss:$16 sps:$4 sm:$0xff]   ;;  %v13186_v32 = vld [vmem:[%s16190_s25 + $0x100] ss:$16 sps:$4 sm:$0xff]   ;;  %v13187_v8 = vld [vmem:[%s16190_s25 + $0x108] ss:$16 sps:$4 sm:$0xff]  }
 0x528   : > { %v13188_v55 = vld [vmem:[%s16190_s25 + $0x124] ss:$16 sps:$4 sm:$0xff]   ;;  %v13190_v60 = vld [vmem:[%s16190_s25 + $0x12c] ss:$16 sps:$4 sm:$0xff]   ;;  %v13192_v20 = vld [vmem:[%s16190_s25 + $0x120] ss:$16 sps:$4 sm:$0xff]  }
 0x529   : > { %v13193_v23 = vld [vmem:[%s16190_s25 + $0x128] ss:$16 sps:$4 sm:$0xff]   ;;  %v13194_v35 = vld [vmem:[%s16190_s25 + $0x144] ss:$16 sps:$4 sm:$0xff]   ;;  %v13196_v2 = vld [vmem:[%s16190_s25 + $0x14c] ss:$16 sps:$4 sm:$0xff]  }
 0x52a   : > { %9617 = vmatpush1.bf16.msra.mxu0 %v13156_v34  ;;  %10150 = vmatpush1.bf16.msra.mxu1 %v13157_v46  ;;  %v13198_v26 = vld [vmem:[%s16190_s25 + $0x140] ss:$16 sps:$4 sm:$0xff]   ;;  %v13199_v33 = vld [vmem:[%s16190_s25 + $0x148] ss:$16 sps:$4 sm:$0xff]   ;;  %v13200_v41 = vld [vmem:[%s16190_s25 + $0x164] ss:$16 sps:$4 sm:$0xff]  }
 0x52b   : > { %9618 = vmatprep.subr.bf16.mxu0 %v13158_v29  ;;  %10151 = vmatprep.subr.bf16.mxu1 %v13160_v19  ;;  %v13202_v50 = vld [vmem:[%s16190_s25 + $0x16c] ss:$16 sps:$4 sm:$0xff]   ;;  %v13204_v54 = vld [vmem:[%s16190_s25 + $0x160] ss:$16 sps:$4 sm:$0xff]   ;;  %v13205_v28 = vld [vmem:[%s16190_s25 + $0x168] ss:$16 sps:$4 sm:$0xff]  }
 0x52c   : > { %v4687_v21 = vld [vmem:[#allocation2] sm:$0xff]  ;;  %v13206_v49 = vld [vmem:[%s16190_s25 + $0x184] ss:$16 sps:$4 sm:$0xff]   ;;  %v13211_v38 = vld [vmem:[%s16190_s25 + $0x188] ss:$16 sps:$4 sm:$0xff]   ;;  %p12097_p10 = scmp.ne.s32.totalorder %s14556_s20, 1 }
 0x52d   : > { %v11271_v0 = vcombine.high %v4687_v21, %v4687_v21  ;;  %v13208_v40 = vld [vmem:[%s16190_s25 + $0x18c] ss:$16 sps:$4 sm:$0xff]   ;;  %v13210_v11 = vld [vmem:[%s16190_s25 + $0x180] ss:$16 sps:$4 sm:$0xff]   ;;  %v13212_v30 = vld [vmem:[%s16190_s25 + $0x1a4] ss:$16 sps:$4 sm:$0xff]   ;;  %v11270_v37 = vcombine.low %v4687_v21, %v4687_v21 }
 0x52e   : > { %9619 = vmatpush1.bf16.msra.mxu0 %v13162_v16  ;;  %10152 = vmatpush1.bf16.msra.mxu1 %v13163_v3  ;;  %v13214_v45 = vld [vmem:[%s16190_s25 + $0x1ac] ss:$16 sps:$4 sm:$0xff]   ;;  %v13216_v15 = vld [vmem:[%s16190_s25 + $0x1a0] ss:$16 sps:$4 sm:$0xff]   ;;  %v13217_v62 = vld [vmem:[%s16190_s25 + $0x1a8] ss:$16 sps:$4 sm:$0xff]  }
 0x52f   : > { %9620 = vmatprep.subr.bf16.mxu0 %v13164_v57  ;;  %10153 = vmatprep.subr.bf16.mxu1 %v13166_v25  ;;  %v13218_v61 = vld [vmem:[%s16190_s25 + $0x1c4] ss:$16 sps:$4 sm:$0xff]   ;;  %v13220_v42 = vld [vmem:[%s16190_s25 + $0x1cc] ss:$16 sps:$4 sm:$0xff]   ;;  %v13222_v12 = vld [vmem:[%s16190_s25 + $0x1c0] ss:$16 sps:$4 sm:$0xff]  }
 0x530   : > { %9642 = vmatprep.mubr.bf16.mxu0 %v11271_v0  ;;  %10175 = vmatprep.mubr.bf16.mxu1 %v11271_v0  ;;  %v13223_v31 = vld [vmem:[%s16190_s25 + $0x1c8] ss:$16 sps:$4 sm:$0xff]   ;;  %v13224_v56 = vld [vmem:[%s16190_s25 + $0x1e4] ss:$16 sps:$4 sm:$0xff]   ;;  %v13226_v13 = vld [vmem:[%s16190_s25 + $0x1ec] ss:$16 sps:$4 sm:$0xff]  }
 0x531   : > { %v13228_v1 = vld [vmem:[%s16190_s25 + $0x1e0] ss:$16 sps:$4 sm:$0xff]   ;;  %v13229_v36 = vld [vmem:[%s16190_s25 + $0x1e8] ss:$16 sps:$4 sm:$0xff]   ;;  %v13234_v4 = vld [vmem:[%s16190_s25 + $0x204] ss:$16 sps:$4 sm:$0xff]  }
 0x532   : > { %9621 = vmatpush1.bf16.msra.mxu0 %v13168_v27  ;;  %10154 = vmatpush1.bf16.msra.mxu1 %v13169_v58  ;;  %v13237_v63 = vld [vmem:[%s16190_s25 + $0x20c] ss:$16 sps:$4 sm:$0xff]   ;;  %v13232_v51 = vld [vmem:[%s16190_s25 + $0x200] ss:$16 sps:$4 sm:$0xff]   ;;  %v13235_v39 = vld [vmem:[%s16190_s25 + $0x208] ss:$16 sps:$4 sm:$0xff]  }
 0x533   : > { %9622 = vmatprep.subr.bf16.mxu0 %v13170_v22  ;;  %10155 = vmatprep.subr.bf16.mxu1 %v13172_v14  ;;  %v13240_v53 = vld [vmem:[%s16190_s25 + $0x224] ss:$16 sps:$4 sm:$0xff]   ;;  %v13243_v17 = vld [vmem:[%s16190_s25 + $0x22c] ss:$16 sps:$4 sm:$0xff]   ;;  %v13238_v43 = vld [vmem:[%s16190_s25 + $0x220] ss:$16 sps:$4 sm:$0xff]  }
 0x534   : > { %v13241_v6 = vld [vmem:[%s16190_s25 + $0x228] ss:$16 sps:$4 sm:$0xff]   ;;  %v13246_v48 = vld [vmem:[%s16190_s25 + $0x244] ss:$16 sps:$4 sm:$0xff]   ;;  %v13249_v9 = vld [vmem:[%s16190_s25 + $0x24c] ss:$16 sps:$4 sm:$0xff]  }
 0x535   : > { %v13244_v59 = vld [vmem:[%s16190_s25 + $0x240] ss:$16 sps:$4 sm:$0xff]   ;;  %v13247_v34 = vld [vmem:[%s16190_s25 + $0x248] ss:$16 sps:$4 sm:$0xff]   ;;  %v13252_v46 = vld [vmem:[%s16190_s25 + $0x264] ss:$16 sps:$4 sm:$0xff]  }
 0x536   : > { %9623 = vmatpush1.bf16.msra.mxu0 %v13174_v10  ;;  %10156 = vmatpush1.bf16.msra.mxu1 %v13175_v44  ;;  %v13255_v29 = vld [vmem:[%s16190_s25 + $0x26c] ss:$16 sps:$4 sm:$0xff]   ;;  %v13250_v19 = vld [vmem:[%s16190_s25 + $0x260] ss:$16 sps:$4 sm:$0xff]   ;;  %v13253_v16 = vld [vmem:[%s16190_s25 + $0x268] ss:$16 sps:$4 sm:$0xff]  }
 0x537   : > { %9624 = vmatprep.subr.bf16.mxu0 %v13176_v47  ;;  %10157 = vmatprep.subr.bf16.mxu1 %v13178_v24  ;;  %v13258_v3 = vld [vmem:[%s16190_s25 + $0x284] ss:$16 sps:$4 sm:$0xff]   ;;  %v13261_v57 = vld [vmem:[%s16190_s25 + $0x28c] ss:$16 sps:$4 sm:$0xff]   ;;  %v13256_v25 = vld [vmem:[%s16190_s25 + $0x280] ss:$16 sps:$4 sm:$0xff]  }
 0x538   : > { %v13259_v27 = vld [vmem:[%s16190_s25 + $0x288] ss:$16 sps:$4 sm:$0xff]   ;;  %v13264_v58 = vld [vmem:[%s16190_s25 + $0x2a4] ss:$16 sps:$4 sm:$0xff]   ;;  %v13267_v22 = vld [vmem:[%s16190_s25 + $0x2ac] ss:$16 sps:$4 sm:$0xff]  }
 0x539   : > { %v13262_v14 = vld [vmem:[%s16190_s25 + $0x2a0] ss:$16 sps:$4 sm:$0xff]   ;;  %v13265_v10 = vld [vmem:[%s16190_s25 + $0x2a8] ss:$16 sps:$4 sm:$0xff]   ;;  %v13270_v44 = vld [vmem:[%s16190_s25 + $0x2c4] ss:$16 sps:$4 sm:$0xff]  }
 0x53a   : > { %9625 = vmatpush1.bf16.msra.mxu0 %v13180_v52  ;;  %10158 = vmatpush1.bf16.msra.mxu1 %v13181_v7  ;;  %v13273_v47 = vld [vmem:[%s16190_s25 + $0x2cc] ss:$16 sps:$4 sm:$0xff]   ;;  %v18518_v24 = vld [vmem:[#allocation2 + $0x8] sm:$0xff]  ;;  %v13268_v7 = vld [vmem:[%s16190_s25 + $0x2c0] ss:$16 sps:$4 sm:$0xff]   ;;  %vm11126_vm5 = vcmask (!%p12097_p10), 125952  }
 0x53b   : > { %9626 = vmatprep.subr.bf16.mxu0 %v13182_v18  ;;  %10159 = vmatprep.subr.bf16.mxu1 %v13184_v5  ;;  %v11273_v52 = vcombine.high %v18518_v24, %v18518_v24  ;;  %v13271_v18 = vld [vmem:[%s16190_s25 + $0x2c8] ss:$16 sps:$4 sm:$0xff]   ;;  %v13276_v5 = vld [vmem:[%s16190_s25 + $0x2e4] ss:$16 sps:$4 sm:$0xff]   ;;  %v13297_v21 = vld [vmem:[%s16190_s25 + $0x34c] ss:$16 sps:$4 sm:$0xff]  }
 0x53c   : > { %v13295_v0 = vld [vmem:[%s16190_s25 + $0x348] ss:$16 sps:$4 sm:$0xff]   ;;  %vm11134_vm6 = vcmask (!%p12097_p10), 208000   ;;  %s14476_s13 = smov (!%p12097_p10), 112   ;;  %vm11132_vm7 = vcmask (!%p12097_p10), 76800  }
 0x53e   : > { %9627 = vmatpush1.bf16.msra.mxu0 %v13186_v32  ;;  %10160 = vmatpush1.bf16.msra.mxu1 %v13187_v8  ;;  %v13279_v32 = vld [vmem:[%s16190_s25 + $0x2ec] ss:$16 sps:$4 sm:$0xff]   ;;  %v13274_v8 = vld [vmem:[%s16190_s25 + $0x2e0] ss:$16 sps:$4 sm:$0xff]  }
 0x53f   : > { %9628 = vmatprep.subr.bf16.mxu0 %v13188_v55  ;;  %10161 = vmatprep.subr.bf16.mxu1 %v13190_v60  ;;  %v13277_v55 = vld [vmem:[%s16190_s25 + $0x2e8] ss:$16 sps:$4 sm:$0xff]   ;;  %v13282_v60 = vld [vmem:[%s16190_s25 + $0x304] ss:$16 sps:$4 sm:$0xff]  }
 0x542   : > { %9629 = vmatpush1.bf16.msra.mxu0 %v13192_v20  ;;  %10162 = vmatpush1.bf16.msra.mxu1 %v13193_v23  ;;  %v13285_v20 = vld [vmem:[%s16190_s25 + $0x30c] ss:$16 sps:$4 sm:$0xff]   ;;  %v13280_v23 = vld [vmem:[%s16190_s25 + $0x300] ss:$16 sps:$4 sm:$0xff]  }
 0x543   : > { %9630 = vmatprep.subr.bf16.mxu0 %v13194_v35  ;;  %10163 = vmatprep.subr.bf16.mxu1 %v13196_v2  ;;  %v13283_v35 = vld [vmem:[%s16190_s25 + $0x308] ss:$16 sps:$4 sm:$0xff]   ;;  %v13288_v2 = vld [vmem:[%s16190_s25 + $0x324] ss:$16 sps:$4 sm:$0xff]  }
 0x546   : > { %9631 = vmatpush1.bf16.msra.mxu0 %v13198_v26  ;;  %10164 = vmatpush1.bf16.msra.mxu1 %v13199_v33  ;;  %v13291_v26 = vld [vmem:[%s16190_s25 + $0x32c] ss:$16 sps:$4 sm:$0xff]   ;;  %v13286_v33 = vld [vmem:[%s16190_s25 + $0x320] ss:$16 sps:$4 sm:$0xff]  }
 0x547   : > { %9632 = vmatprep.subr.bf16.mxu0 %v13200_v41  ;;  %10165 = vmatprep.subr.bf16.mxu1 %v13202_v50  ;;  %v13289_v41 = vld [vmem:[%s16190_s25 + $0x328] ss:$16 sps:$4 sm:$0xff]   ;;  %v13294_v50 = vld [vmem:[%s16190_s25 + $0x344] ss:$16 sps:$4 sm:$0xff]  }
 0x54a   : > { %9633 = vmatpush1.bf16.msra.mxu0 %v13204_v54  ;;  %10166 = vmatpush1.bf16.msra.mxu1 %v13205_v28  ;;  %v13292_v54 = vld [vmem:[%s16190_s25 + $0x340] ss:$16 sps:$4 sm:$0xff]   ;;  %v13300_v28 = vld [vmem:[%s16190_s25 + $0x364] ss:$16 sps:$4 sm:$0xff]  }
 0x54b   : > { %9634 = vmatprep.subr.bf16.mxu0 %v13206_v49  ;;  %10167 = vmatprep.subr.bf16.mxu1 %v13208_v40  ;;  %v13303_v49 = vld [vmem:[%s16190_s25 + $0x36c] ss:$16 sps:$4 sm:$0xff]   ;;  %v13298_v40 = vld [vmem:[%s16190_s25 + $0x360] ss:$16 sps:$4 sm:$0xff]  }
 0x54e   : > { %9635 = vmatpush1.bf16.msra.mxu0 %v13210_v11  ;;  %10168 = vmatpush1.bf16.msra.mxu1 %v13211_v38  ;;  %v13301_v11 = vld [vmem:[%s16190_s25 + $0x368] ss:$16 sps:$4 sm:$0xff]   ;;  %v13306_v38 = vld [vmem:[%s16190_s25 + $0x384] ss:$16 sps:$4 sm:$0xff]  }
 0x54f   : > { %9636 = vmatprep.subr.bf16.mxu0 %v13212_v30  ;;  %10169 = vmatprep.subr.bf16.mxu1 %v13214_v45  ;;  %v13309_v30 = vld [vmem:[%s16190_s25 + $0x38c] ss:$16 sps:$4 sm:$0xff]   ;;  %v13304_v45 = vld [vmem:[%s16190_s25 + $0x380] ss:$16 sps:$4 sm:$0xff]  }
 0x552   : > { %9637 = vmatpush1.bf16.msra.mxu0 %v13216_v15  ;;  %10170 = vmatpush1.bf16.msra.mxu1 %v13217_v62  ;;  %v13307_v15 = vld [vmem:[%s16190_s25 + $0x388] ss:$16 sps:$4 sm:$0xff]   ;;  %v13312_v62 = vld [vmem:[%s16190_s25 + $0x3a4] ss:$16 sps:$4 sm:$0xff]  }
 0x553   : > { %9638 = vmatprep.subr.bf16.mxu0 %v13218_v61  ;;  %10171 = vmatprep.subr.bf16.mxu1 %v13220_v42  ;;  %v13315_v61 = vld [vmem:[%s16190_s25 + $0x3ac] ss:$16 sps:$4 sm:$0xff]   ;;  %v13310_v42 = vld [vmem:[%s16190_s25 + $0x3a0] ss:$16 sps:$4 sm:$0xff]  }
 0x556   : > { %9639 = vmatpush1.bf16.msra.mxu0 %v13222_v12  ;;  %10172 = vmatpush1.bf16.msra.mxu1 %v13223_v31  ;;  %v13313_v12 = vld [vmem:[%s16190_s25 + $0x3a8] ss:$16 sps:$4 sm:$0xff]   ;;  %v13318_v31 = vld [vmem:[%s16190_s25 + $0x3c4] ss:$16 sps:$4 sm:$0xff]  }
 0x557   : > { %9640 = vmatprep.subr.bf16.mxu0 %v13224_v56  ;;  %10173 = vmatprep.subr.bf16.mxu1 %v13226_v13  ;;  %v13321_v56 = vld [vmem:[%s16190_s25 + $0x3cc] ss:$16 sps:$4 sm:$0xff]   ;;  %v13316_v13 = vld [vmem:[%s16190_s25 + $0x3c0] ss:$16 sps:$4 sm:$0xff]  }
 0x55a   : > { %9641 = vmatpush1.bf16.msra.mxu0 %v13228_v1  ;;  %10174 = vmatpush1.bf16.msra.mxu1 %v13229_v36  ;;  %v13319_v1 = vld [vmem:[%s16190_s25 + $0x3c8] ss:$16 sps:$4 sm:$0xff]   ;;  %v13324_v36 = vld [vmem:[%s16190_s25 + $0x3e4] ss:$16 sps:$4 sm:$0xff]  }
 0x55b   : > { %9651 = vmatprep.subr.bf16.mxu0 %v13234_v4  ;;  %10184 = vmatprep.subr.bf16.mxu1 %v13237_v63  ;;  %v13327_v4 = vld [vmem:[%s16190_s25 + $0x3ec] ss:$16 sps:$4 sm:$0xff]   ;;  %v13322_v63 = vld [vmem:[%s16190_s25 + $0x3e0] ss:$16 sps:$4 sm:$0xff]  }
 0x55d   : > { %9643 = vmatmul.mubr.bf16.vlgmr.msra.gmra.mrb[0].mxu0 %v11270_v37  ;;  %10176 = vmatmul.mubr.bf16.vlgmr.msra.gmra.mrb[0].mxu1 %v11270_v37  ;;  %v13325_v37 = vld [vmem:[%s16190_s25 + $0x3e8] ss:$16 sps:$4 sm:$0xff]  }
 0x55e   : > { %9652 = vmatpush1.bf16.msra.mxu0 %v13232_v51  ;;  %10185 = vmatpush1.bf16.msra.mxu1 %v13235_v39  ;;  %v13332_v51 = vld [vmem:[%s16190_s25 + $0x404] ss:$16 sps:$4 sm:$0xff]   ;;  %v13335_v39 = vld [vmem:[%s16190_s25 + $0x40c] ss:$16 sps:$4 sm:$0xff]  }
 0x55f   : > { %9653 = vmatprep.subr.bf16.mxu0 %v13240_v53  ;;  %10186 = vmatprep.subr.bf16.mxu1 %v13243_v17  ;;  %v11272_v53 = vcombine.low %v18518_v24, %v18518_v24  ;;  %v13330_v17 = vld [vmem:[%s16190_s25 + $0x400] ss:$16 sps:$4 sm:$0xff]   ;;  %v13365_v24 = vld [vmem:[%s16190_s25 + $0x4ac] ss:$16 sps:$4 sm:$0xff]  }
 0x560   : > { %9683 = vmatprep.mubr.bf16.mxu0 %v11273_v52  ;;  %10216 = vmatprep.mubr.bf16.mxu1 %v11273_v52  ;;  %v13360_v52 = vld [vmem:[%s16190_s25 + $0x4a0] ss:$16 sps:$4 sm:$0xff]  }
 0x562   : > { %9654 = vmatpush1.bf16.msra.mxu0 %v13238_v43  ;;  %10187 = vmatpush1.bf16.msra.mxu1 %v13241_v6  ;;  %v13333_v43 = vld [vmem:[%s16190_s25 + $0x408] ss:$16 sps:$4 sm:$0xff]   ;;  %v13338_v6 = vld [vmem:[%s16190_s25 + $0x424] ss:$16 sps:$4 sm:$0xff]  }
 0x563   : > { %9655 = vmatprep.subr.bf16.mxu0 %v13246_v48  ;;  %10188 = vmatprep.subr.bf16.mxu1 %v13249_v9  ;;  %v18567_v48 = vld [vmem:[#allocation2 + $0x10] sm:$0xff] }
 0x564   : > { %v13341_v9 = vld [vmem:[%s16190_s25 + $0x42c] ss:$16 sps:$4 sm:$0xff]  }
 0x566   : > { %9656 = vmatpush1.bf16.msra.mxu0 %v13244_v59  ;;  %10189 = vmatpush1.bf16.msra.mxu1 %v13247_v34  ;;  %v11275_v59 = vcombine.high %v18567_v48, %v18567_v48  ;;  %v13336_v34 = vld [vmem:[%s16190_s25 + $0x420] ss:$16 sps:$4 sm:$0xff]  }
 0x567   : > { %9657 = vmatprep.subr.bf16.mxu0 %v13252_v46  ;;  %10190 = vmatprep.subr.bf16.mxu1 %v13255_v29  ;;  %v13339_v46 = vld [vmem:[%s16190_s25 + $0x428] ss:$16 sps:$4 sm:$0xff]   ;;  %v13344_v29 = vld [vmem:[%s16190_s25 + $0x444] ss:$16 sps:$4 sm:$0xff]  }
 0x56a   : > { %9658 = vmatpush1.bf16.msra.mxu0 %v13250_v19  ;;  %10191 = vmatpush1.bf16.msra.mxu1 %v13253_v16  ;;  %v13347_v19 = vld [vmem:[%s16190_s25 + $0x44c] ss:$16 sps:$4 sm:$0xff]   ;;  %v13342_v16 = vld [vmem:[%s16190_s25 + $0x440] ss:$16 sps:$4 sm:$0xff]  }
 0x56b   : > { %9659 = vmatprep.subr.bf16.mxu0 %v13258_v3  ;;  %10192 = vmatprep.subr.bf16.mxu1 %v13261_v57  ;;  %v13345_v3 = vld [vmem:[%s16190_s25 + $0x448] ss:$16 sps:$4 sm:$0xff]   ;;  %v13350_v57 = vld [vmem:[%s16190_s25 + $0x464] ss:$16 sps:$4 sm:$0xff]  }
 0x56e   : > { %9660 = vmatpush1.bf16.msra.mxu0 %v13256_v25  ;;  %10193 = vmatpush1.bf16.msra.mxu1 %v13259_v27  ;;  %v13353_v25 = vld [vmem:[%s16190_s25 + $0x46c] ss:$16 sps:$4 sm:$0xff]   ;;  %v13348_v27 = vld [vmem:[%s16190_s25 + $0x460] ss:$16 sps:$4 sm:$0xff]  }
 0x56f   : > { %9661 = vmatprep.subr.bf16.mxu0 %v13264_v58  ;;  %10194 = vmatprep.subr.bf16.mxu1 %v13267_v22  ;;  %v13351_v58 = vld [vmem:[%s16190_s25 + $0x468] ss:$16 sps:$4 sm:$0xff]   ;;  %v13356_v22 = vld [vmem:[%s16190_s25 + $0x484] ss:$16 sps:$4 sm:$0xff]  }
 0x572   : > { %9662 = vmatpush1.bf16.msra.mxu0 %v13262_v14  ;;  %10195 = vmatpush1.bf16.msra.mxu1 %v13265_v10  ;;  %v13359_v14 = vld [vmem:[%s16190_s25 + $0x48c] ss:$16 sps:$4 sm:$0xff]   ;;  %v13354_v10 = vld [vmem:[%s16190_s25 + $0x480] ss:$16 sps:$4 sm:$0xff]  }
 0x573   : > { %9663 = vmatprep.subr.bf16.mxu0 %v13270_v44  ;;  %10196 = vmatprep.subr.bf16.mxu1 %v13273_v47  ;;  %v13357_v44 = vld [vmem:[%s16190_s25 + $0x488] ss:$16 sps:$4 sm:$0xff]   ;;  %v13362_v47 = vld [vmem:[%s16190_s25 + $0x4a4] ss:$16 sps:$4 sm:$0xff]  }
 0x576   : > { %9664 = vmatpush1.bf16.msra.mxu0 %v13268_v7  ;;  %10197 = vmatpush1.bf16.msra.mxu1 %v13271_v18  ;;  %v13363_v7 = vld [vmem:[%s16190_s25 + $0x4a8] ss:$16 sps:$4 sm:$0xff]   ;;  %v13368_v18 = vld [vmem:[%s16190_s25 + $0x4c4] ss:$16 sps:$4 sm:$0xff]  }
 0x577   : > { %9665 = vmatprep.subr.bf16.mxu0 %v13276_v5  ;;  %10198 = vmatprep.subr.bf16.mxu1 %v13279_v32  ;;  %v13371_v5 = vld [vmem:[%s16190_s25 + $0x4cc] ss:$16 sps:$4 sm:$0xff]   ;;  %v13366_v32 = vld [vmem:[%s16190_s25 + $0x4c0] ss:$16 sps:$4 sm:$0xff]  }
 0x57a   : > { %9666 = vmatpush1.bf16.msra.mxu0 %v13274_v8  ;;  %10199 = vmatpush1.bf16.msra.mxu1 %v13277_v55  ;;  %v13369_v8 = vld [vmem:[%s16190_s25 + $0x4c8] ss:$16 sps:$4 sm:$0xff]   ;;  %v13374_v55 = vld [vmem:[%s16190_s25 + $0x4e4] ss:$16 sps:$4 sm:$0xff]  }
 0x57b   : > { %9667 = vmatprep.subr.bf16.mxu0 %v13282_v60  ;;  %10200 = vmatprep.subr.bf16.mxu1 %v13285_v20  ;;  %v13377_v60 = vld [vmem:[%s16190_s25 + $0x4ec] ss:$16 sps:$4 sm:$0xff]   ;;  %v13372_v20 = vld [vmem:[%s16190_s25 + $0x4e0] ss:$16 sps:$4 sm:$0xff]  }
 0x57e   : > { %9668 = vmatpush1.bf16.msra.mxu0 %v13280_v23  ;;  %10201 = vmatpush1.bf16.msra.mxu1 %v13283_v35  ;;  %v13375_v23 = vld [vmem:[%s16190_s25 + $0x4e8] ss:$16 sps:$4 sm:$0xff]   ;;  %v13380_v35 = vld [vmem:[%s16190_s25 + $0x504] ss:$16 sps:$4 sm:$0xff]  }
 0x57f   : > { %9669 = vmatprep.subr.bf16.mxu0 %v13288_v2  ;;  %10202 = vmatprep.subr.bf16.mxu1 %v13291_v26  ;;  %v13383_v2 = vld [vmem:[%s16190_s25 + $0x50c] ss:$16 sps:$4 sm:$0xff]   ;;  %v13378_v26 = vld [vmem:[%s16190_s25 + $0x500] ss:$16 sps:$4 sm:$0xff]  }
 0x582   : > { %9670 = vmatpush1.bf16.msra.mxu0 %v13286_v33  ;;  %10203 = vmatpush1.bf16.msra.mxu1 %v13289_v41  ;;  %v13381_v33 = vld [vmem:[%s16190_s25 + $0x508] ss:$16 sps:$4 sm:$0xff]   ;;  %v13386_v41 = vld [vmem:[%s16190_s25 + $0x524] ss:$16 sps:$4 sm:$0xff]  }
 0x583   : > { %9671 = vmatprep.subr.bf16.mxu0 %v13294_v50  ;;  %10204 = vmatprep.subr.bf16.mxu1 %v13297_v21  ;;  %v13389_v50 = vld [vmem:[%s16190_s25 + $0x52c] ss:$16 sps:$4 sm:$0xff]   ;;  %v13384_v21 = vld [vmem:[%s16190_s25 + $0x520] ss:$16 sps:$4 sm:$0xff]  }
 0x586   : > { %9672 = vmatpush1.bf16.msra.mxu0 %v13292_v54  ;;  %10205 = vmatpush1.bf16.msra.mxu1 %v13295_v0  ;;  %v13387_v54 = vld [vmem:[%s16190_s25 + $0x528] ss:$16 sps:$4 sm:$0xff]   ;;  %v13392_v0 = vld [vmem:[%s16190_s25 + $0x544] ss:$16 sps:$4 sm:$0xff]  }
 0x587   : > { %9673 = vmatprep.subr.bf16.mxu0 %v13300_v28  ;;  %10206 = vmatprep.subr.bf16.mxu1 %v13303_v49  ;;  %v13395_v28 = vld [vmem:[%s16190_s25 + $0x54c] ss:$16 sps:$4 sm:$0xff]   ;;  %v13390_v49 = vld [vmem:[%s16190_s25 + $0x540] ss:$16 sps:$4 sm:$0xff]  }
 0x58a   : > { %9674 = vmatpush1.bf16.msra.mxu0 %v13298_v40  ;;  %10207 = vmatpush1.bf16.msra.mxu1 %v13301_v11  ;;  %v13393_v40 = vld [vmem:[%s16190_s25 + $0x548] ss:$16 sps:$4 sm:$0xff]   ;;  %v13398_v11 = vld [vmem:[%s16190_s25 + $0x564] ss:$16 sps:$4 sm:$0xff]  }
 0x58b   : > { %9675 = vmatprep.subr.bf16.mxu0 %v13306_v38  ;;  %10208 = vmatprep.subr.bf16.mxu1 %v13309_v30  ;;  %v13401_v38 = vld [vmem:[%s16190_s25 + $0x56c] ss:$16 sps:$4 sm:$0xff]   ;;  %v13396_v30 = vld [vmem:[%s16190_s25 + $0x560] ss:$16 sps:$4 sm:$0xff]  }
 0x58e   : > { %9676 = vmatpush1.bf16.msra.mxu0 %v13304_v45  ;;  %10209 = vmatpush1.bf16.msra.mxu1 %v13307_v15  ;;  %v13399_v45 = vld [vmem:[%s16190_s25 + $0x568] ss:$16 sps:$4 sm:$0xff]   ;;  %v13404_v15 = vld [vmem:[%s16190_s25 + $0x584] ss:$16 sps:$4 sm:$0xff]  }
 0x58f   : > { %9677 = vmatprep.subr.bf16.mxu0 %v13312_v62  ;;  %10210 = vmatprep.subr.bf16.mxu1 %v13315_v61  ;;  %v13407_v62 = vld [vmem:[%s16190_s25 + $0x58c] ss:$16 sps:$4 sm:$0xff]   ;;  %v13402_v61 = vld [vmem:[%s16190_s25 + $0x580] ss:$16 sps:$4 sm:$0xff]  }
 0x592   : > { %9678 = vmatpush1.bf16.msra.mxu0 %v13310_v42  ;;  %10211 = vmatpush1.bf16.msra.mxu1 %v13313_v12  ;;  %v13405_v42 = vld [vmem:[%s16190_s25 + $0x588] ss:$16 sps:$4 sm:$0xff]   ;;  %v13410_v12 = vld [vmem:[%s16190_s25 + $0x5a4] ss:$16 sps:$4 sm:$0xff]  }
 0x593   : > { %9679 = vmatprep.subr.bf16.mxu0 %v13318_v31  ;;  %10212 = vmatprep.subr.bf16.mxu1 %v13321_v56  ;;  %v13413_v31 = vld [vmem:[%s16190_s25 + $0x5ac] ss:$16 sps:$4 sm:$0xff]   ;;  %v13408_v56 = vld [vmem:[%s16190_s25 + $0x5a0] ss:$16 sps:$4 sm:$0xff]  }
 0x596   : > { %9680 = vmatpush1.bf16.msra.mxu0 %v13316_v13  ;;  %10213 = vmatpush1.bf16.msra.mxu1 %v13319_v1  ;;  %v13411_v13 = vld [vmem:[%s16190_s25 + $0x5a8] ss:$16 sps:$4 sm:$0xff]   ;;  %v13416_v1 = vld [vmem:[%s16190_s25 + $0x5c4] ss:$16 sps:$4 sm:$0xff]  }
 0x597   : > { %9681 = vmatprep.subr.bf16.mxu0 %v13324_v36  ;;  %10214 = vmatprep.subr.bf16.mxu1 %v13327_v4  ;;  %v13419_v36 = vld [vmem:[%s16190_s25 + $0x5cc] ss:$16 sps:$4 sm:$0xff]   ;;  %v13414_v4 = vld [vmem:[%s16190_s25 + $0x5c0] ss:$16 sps:$4 sm:$0xff]  }
 0x59a   : > { %9682 = vmatpush1.bf16.msra.mxu0 %v13322_v63  ;;  %10215 = vmatpush1.bf16.msra.mxu1 %v13325_v37  ;;  %v13417_v63 = vld [vmem:[%s16190_s25 + $0x5c8] ss:$16 sps:$4 sm:$0xff]   ;;  %v13422_v37 = vld [vmem:[%s16190_s25 + $0x5e4] ss:$16 sps:$4 sm:$0xff]  }
 0x59b   : > { %9692 = vmatprep.subr.bf16.mxu0 %v13332_v51  ;;  %10225 = vmatprep.subr.bf16.mxu1 %v13335_v39  ;;  %v13425_v51 = vld [vmem:[%s16190_s25 + $0x5ec] ss:$16 sps:$4 sm:$0xff]   ;;  %v13420_v39 = vld [vmem:[%s16190_s25 + $0x5e0] ss:$16 sps:$4 sm:$0xff]  }
 0x59d   : > { %9684 = vmatmul.mubr.bf16.vlgmr.msra.gmra.mrb[0].mxu0 %v11272_v53  ;;  %10217 = vmatmul.mubr.bf16.vlgmr.msra.gmra.mrb[0].mxu1 %v11272_v53  ;;  %v13423_v53 = vld [vmem:[%s16190_s25 + $0x5e8] ss:$16 sps:$4 sm:$0xff]  }
 0x59e   : > { %9693 = vmatpush1.bf16.msra.mxu0 %v13330_v17  ;;  %10226 = vmatpush1.bf16.msra.mxu1 %v13333_v43  ;;  %v13430_v17 = vld [vmem:[%s16190_s25 + $0x604] ss:$16 sps:$4 sm:$0xff]   ;;  %v13433_v43 = vld [vmem:[%s16190_s25 + $0x60c] ss:$16 sps:$4 sm:$0xff]  }
 0x59f   : > { %9694 = vmatprep.subr.bf16.mxu0 %v13338_v6  ;;  %10227 = vmatprep.subr.bf16.mxu1 %v13341_v9  ;;  %v13428_v6 = vld [vmem:[%s16190_s25 + $0x600] ss:$16 sps:$4 sm:$0xff]   ;;  %v11274_v9 = vcombine.low %v18567_v48, %v18567_v48 }
 0x5a0   : > { %9724 = vmatprep.mubr.bf16.mxu0 %v11275_v59  ;;  %10257 = vmatprep.mubr.bf16.mxu1 %v11275_v59  ;;  %v13431_v59 = vld [vmem:[%s16190_s25 + $0x608] ss:$16 sps:$4 sm:$0xff]   ;;  %v13434_v48 = vld [vmem:[%s16190_s25 + $0x620] ss:$16 sps:$4 sm:$0xff]  }
 0x5a2   : > { %9695 = vmatpush1.bf16.msra.mxu0 %v13336_v34  ;;  %10228 = vmatpush1.bf16.msra.mxu1 %v13339_v46  ;;  %v18636_v34 = vld [vmem:[#allocation2 + $0x18] sm:$0xff] }
 0x5a3   : > { %9696 = vmatprep.subr.bf16.mxu0 %v13344_v29  ;;  %10229 = vmatprep.subr.bf16.mxu1 %v13347_v19  ;;  %v13436_v46 = vld [vmem:[%s16190_s25 + $0x624] ss:$16 sps:$4 sm:$0xff]   ;;  %v13439_v29 = vld [vmem:[%s16190_s25 + $0x62c] ss:$16 sps:$4 sm:$0xff]   ;;  %v11277_v19 = vcombine.high %v18636_v34, %v18636_v34 }
 0x5a6   : > { %9697 = vmatpush1.bf16.msra.mxu0 %v13342_v16  ;;  %10230 = vmatpush1.bf16.msra.mxu1 %v13345_v3  ;;  %v13437_v16 = vld [vmem:[%s16190_s25 + $0x628] ss:$16 sps:$4 sm:$0xff]   ;;  %v13442_v3 = vld [vmem:[%s16190_s25 + $0x644] ss:$16 sps:$4 sm:$0xff]  }
 0x5a7   : > { %9698 = vmatprep.subr.bf16.mxu0 %v13350_v57  ;;  %10231 = vmatprep.subr.bf16.mxu1 %v13353_v25  ;;  %v13445_v57 = vld [vmem:[%s16190_s25 + $0x64c] ss:$16 sps:$4 sm:$0xff]   ;;  %v13440_v25 = vld [vmem:[%s16190_s25 + $0x640] ss:$16 sps:$4 sm:$0xff]  }
 0x5aa   : > { %9699 = vmatpush1.bf16.msra.mxu0 %v13348_v27  ;;  %10232 = vmatpush1.bf16.msra.mxu1 %v13351_v58  ;;  %v13443_v27 = vld [vmem:[%s16190_s25 + $0x648] ss:$16 sps:$4 sm:$0xff]   ;;  %v13448_v58 = vld [vmem:[%s16190_s25 + $0x664] ss:$16 sps:$4 sm:$0xff]  }
 0x5ab   : > { %9700 = vmatprep.subr.bf16.mxu0 %v13356_v22  ;;  %10233 = vmatprep.subr.bf16.mxu1 %v13359_v14  ;;  %v13451_v22 = vld [vmem:[%s16190_s25 + $0x66c] ss:$16 sps:$4 sm:$0xff]   ;;  %v13446_v14 = vld [vmem:[%s16190_s25 + $0x660] ss:$16 sps:$4 sm:$0xff]  }
 0x5ae   : > { %9701 = vmatpush1.bf16.msra.mxu0 %v13354_v10  ;;  %10234 = vmatpush1.bf16.msra.mxu1 %v13357_v44  ;;  %v13449_v10 = vld [vmem:[%s16190_s25 + $0x668] ss:$16 sps:$4 sm:$0xff]   ;;  %v13454_v44 = vld [vmem:[%s16190_s25 + $0x684] ss:$16 sps:$4 sm:$0xff]  }
 0x5af   : > { %9702 = vmatprep.subr.bf16.mxu0 %v13362_v47  ;;  %10235 = vmatprep.subr.bf16.mxu1 %v13365_v24  ;;  %v13457_v47 = vld [vmem:[%s16190_s25 + $0x68c] ss:$16 sps:$4 sm:$0xff]   ;;  %v13452_v24 = vld [vmem:[%s16190_s25 + $0x680] ss:$16 sps:$4 sm:$0xff]  }
 0x5b2   : > { %9703 = vmatpush1.bf16.msra.mxu0 %v13360_v52  ;;  %10236 = vmatpush1.bf16.msra.mxu1 %v13363_v7  ;;  %v13455_v52 = vld [vmem:[%s16190_s25 + $0x688] ss:$16 sps:$4 sm:$0xff]   ;;  %v13460_v7 = vld [vmem:[%s16190_s25 + $0x6a4] ss:$16 sps:$4 sm:$0xff]  }
 0x5b3   : > { %9704 = vmatprep.subr.bf16.mxu0 %v13368_v18  ;;  %10237 = vmatprep.subr.bf16.mxu1 %v13371_v5  ;;  %v13463_v18 = vld [vmem:[%s16190_s25 + $0x6ac] ss:$16 sps:$4 sm:$0xff]   ;;  %v13458_v5 = vld [vmem:[%s16190_s25 + $0x6a0] ss:$16 sps:$4 sm:$0xff]  }
 0x5b6   : > { %9705 = vmatpush1.bf16.msra.mxu0 %v13366_v32  ;;  %10238 = vmatpush1.bf16.msra.mxu1 %v13369_v8  ;;  %v13461_v32 = vld [vmem:[%s16190_s25 + $0x6a8] ss:$16 sps:$4 sm:$0xff]   ;;  %v13466_v8 = vld [vmem:[%s16190_s25 + $0x6c4] ss:$16 sps:$4 sm:$0xff]  }
 0x5b7   : > { %9706 = vmatprep.subr.bf16.mxu0 %v13374_v55  ;;  %10239 = vmatprep.subr.bf16.mxu1 %v13377_v60  ;;  %v13469_v55 = vld [vmem:[%s16190_s25 + $0x6cc] ss:$16 sps:$4 sm:$0xff]   ;;  %v13464_v60 = vld [vmem:[%s16190_s25 + $0x6c0] ss:$16 sps:$4 sm:$0xff]  }
 0x5ba   : > { %9707 = vmatpush1.bf16.msra.mxu0 %v13372_v20  ;;  %10240 = vmatpush1.bf16.msra.mxu1 %v13375_v23  ;;  %v13467_v20 = vld [vmem:[%s16190_s25 + $0x6c8] ss:$16 sps:$4 sm:$0xff]   ;;  %v13472_v23 = vld [vmem:[%s16190_s25 + $0x6e4] ss:$16 sps:$4 sm:$0xff]  }
 0x5bb   : > { %9708 = vmatprep.subr.bf16.mxu0 %v13380_v35  ;;  %10241 = vmatprep.subr.bf16.mxu1 %v13383_v2  ;;  %v13475_v35 = vld [vmem:[%s16190_s25 + $0x6ec] ss:$16 sps:$4 sm:$0xff]   ;;  %v13470_v2 = vld [vmem:[%s16190_s25 + $0x6e0] ss:$16 sps:$4 sm:$0xff]  }
 0x5be   : > { %9709 = vmatpush1.bf16.msra.mxu0 %v13378_v26  ;;  %10242 = vmatpush1.bf16.msra.mxu1 %v13381_v33  ;;  %v13473_v26 = vld [vmem:[%s16190_s25 + $0x6e8] ss:$16 sps:$4 sm:$0xff]   ;;  %v13478_v33 = vld [vmem:[%s16190_s25 + $0x704] ss:$16 sps:$4 sm:$0xff]  }
 0x5bf   : > { %9710 = vmatprep.subr.bf16.mxu0 %v13386_v41  ;;  %10243 = vmatprep.subr.bf16.mxu1 %v13389_v50  ;;  %v13481_v41 = vld [vmem:[%s16190_s25 + $0x70c] ss:$16 sps:$4 sm:$0xff]   ;;  %v13476_v50 = vld [vmem:[%s16190_s25 + $0x700] ss:$16 sps:$4 sm:$0xff]  }
 0x5c2   : > { %9711 = vmatpush1.bf16.msra.mxu0 %v13384_v21  ;;  %10244 = vmatpush1.bf16.msra.mxu1 %v13387_v54  ;;  %v13479_v21 = vld [vmem:[%s16190_s25 + $0x708] ss:$16 sps:$4 sm:$0xff]   ;;  %v13484_v54 = vld [vmem:[%s16190_s25 + $0x724] ss:$16 sps:$4 sm:$0xff]  }
 0x5c3   : > { %9712 = vmatprep.subr.bf16.mxu0 %v13392_v0  ;;  %10245 = vmatprep.subr.bf16.mxu1 %v13395_v28  ;;  %v13487_v0 = vld [vmem:[%s16190_s25 + $0x72c] ss:$16 sps:$4 sm:$0xff]   ;;  %v13482_v28 = vld [vmem:[%s16190_s25 + $0x720] ss:$16 sps:$4 sm:$0xff]  }
 0x5c6   : > { %9713 = vmatpush1.bf16.msra.mxu0 %v13390_v49  ;;  %10246 = vmatpush1.bf16.msra.mxu1 %v13393_v40  ;;  %v13485_v49 = vld [vmem:[%s16190_s25 + $0x728] ss:$16 sps:$4 sm:$0xff]   ;;  %v13490_v40 = vld [vmem:[%s16190_s25 + $0x744] ss:$16 sps:$4 sm:$0xff]  }
 0x5c7   : > { %9714 = vmatprep.subr.bf16.mxu0 %v13398_v11  ;;  %10247 = vmatprep.subr.bf16.mxu1 %v13401_v38  ;;  %v13493_v11 = vld [vmem:[%s16190_s25 + $0x74c] ss:$16 sps:$4 sm:$0xff]   ;;  %v13488_v38 = vld [vmem:[%s16190_s25 + $0x740] ss:$16 sps:$4 sm:$0xff]  }
 0x5ca   : > { %9715 = vmatpush1.bf16.msra.mxu0 %v13396_v30  ;;  %10248 = vmatpush1.bf16.msra.mxu1 %v13399_v45  ;;  %v13491_v30 = vld [vmem:[%s16190_s25 + $0x748] ss:$16 sps:$4 sm:$0xff]   ;;  %v13496_v45 = vld [vmem:[%s16190_s25 + $0x764] ss:$16 sps:$4 sm:$0xff]  }
 0x5cb   : > { %9716 = vmatprep.subr.bf16.mxu0 %v13404_v15  ;;  %10249 = vmatprep.subr.bf16.mxu1 %v13407_v62  ;;  %v13499_v15 = vld [vmem:[%s16190_s25 + $0x76c] ss:$16 sps:$4 sm:$0xff]   ;;  %v13494_v62 = vld [vmem:[%s16190_s25 + $0x760] ss:$16 sps:$4 sm:$0xff]  }
 0x5ce   : > { %9717 = vmatpush1.bf16.msra.mxu0 %v13402_v61  ;;  %10250 = vmatpush1.bf16.msra.mxu1 %v13405_v42  ;;  %v13497_v61 = vld [vmem:[%s16190_s25 + $0x768] ss:$16 sps:$4 sm:$0xff]   ;;  %v13502_v42 = vld [vmem:[%s16190_s25 + $0x784] ss:$16 sps:$4 sm:$0xff]  }
 0x5cf   : > { %9718 = vmatprep.subr.bf16.mxu0 %v13410_v12  ;;  %10251 = vmatprep.subr.bf16.mxu1 %v13413_v31  ;;  %v13505_v12 = vld [vmem:[%s16190_s25 + $0x78c] ss:$16 sps:$4 sm:$0xff]   ;;  %v13500_v31 = vld [vmem:[%s16190_s25 + $0x780] ss:$16 sps:$4 sm:$0xff]  }
 0x5d2   : > { %9719 = vmatpush1.bf16.msra.mxu0 %v13408_v56  ;;  %10252 = vmatpush1.bf16.msra.mxu1 %v13411_v13  ;;  %v13503_v56 = vld [vmem:[%s16190_s25 + $0x788] ss:$16 sps:$4 sm:$0xff]   ;;  %v13508_v13 = vld [vmem:[%s16190_s25 + $0x7a4] ss:$16 sps:$4 sm:$0xff]  }
 0x5d3   : > { %9720 = vmatprep.subr.bf16.mxu0 %v13416_v1  ;;  %10253 = vmatprep.subr.bf16.mxu1 %v13419_v36  ;;  %v13511_v1 = vld [vmem:[%s16190_s25 + $0x7ac] ss:$16 sps:$4 sm:$0xff]   ;;  %v13506_v36 = vld [vmem:[%s16190_s25 + $0x7a0] ss:$16 sps:$4 sm:$0xff]  }
 0x5d6   : > { %9721 = vmatpush1.bf16.msra.mxu0 %v13414_v4  ;;  %10254 = vmatpush1.bf16.msra.mxu1 %v13417_v63  ;;  %v13509_v4 = vld [vmem:[%s16190_s25 + $0x7a8] ss:$16 sps:$4 sm:$0xff]   ;;  %v13514_v63 = vld [vmem:[%s16190_s25 + $0x7c4] ss:$16 sps:$4 sm:$0xff]  }
 0x5d7   : > { %9722 = vmatprep.subr.bf16.mxu0 %v13422_v37  ;;  %10255 = vmatprep.subr.bf16.mxu1 %v13425_v51  ;;  %v13517_v37 = vld [vmem:[%s16190_s25 + $0x7cc] ss:$16 sps:$4 sm:$0xff]   ;;  %v13512_v51 = vld [vmem:[%s16190_s25 + $0x7c0] ss:$16 sps:$4 sm:$0xff]  }
 0x5da   : > { %9723 = vmatpush1.bf16.msra.mxu0 %v13420_v39  ;;  %10256 = vmatpush1.bf16.msra.mxu1 %v13423_v53  ;;  %v13515_v39 = vld [vmem:[%s16190_s25 + $0x7c8] ss:$16 sps:$4 sm:$0xff]   ;;  %v13520_v53 = vld [vmem:[%s16190_s25 + $0x7e4] ss:$16 sps:$4 sm:$0xff]  }
 0x5db   : > { %9733 = vmatprep.subr.bf16.mxu0 %v13430_v17  ;;  %10266 = vmatprep.subr.bf16.mxu1 %v13433_v43  ;;  %v13523_v17 = vld [vmem:[%s16190_s25 + $0x7ec] ss:$16 sps:$4 sm:$0xff]   ;;  %v13518_v43 = vld [vmem:[%s16190_s25 + $0x7e0] ss:$16 sps:$4 sm:$0xff]  }
 0x5dd   : > { %9725 = vmatmul.mubr.bf16.vlgmr.msra.gmra.mrb[0].mxu0 %v11274_v9  ;;  %10258 = vmatmul.mubr.bf16.vlgmr.msra.gmra.mrb[0].mxu1 %v11274_v9  ;;  %v13528_v9 = vld [vmem:[%s16190_s25 + $0x804] ss:$16 sps:$4 sm:$0xff]  }
 0x5de   : > { %9734 = vmatpush1.bf16.msra.mxu0 %v13428_v6  ;;  %10267 = vmatpush1.bf16.msra.mxu1 %v13431_v59  ;;  %v13521_v6 = vld [vmem:[%s16190_s25 + $0x7e8] ss:$16 sps:$4 sm:$0xff]   ;;  %v13531_v59 = vld [vmem:[%s16190_s25 + $0x80c] ss:$16 sps:$4 sm:$0xff]  }
 0x5df   : > { %9735 = vmatprep.subr.bf16.mxu0 %v13436_v46  ;;  %10268 = vmatprep.subr.bf16.mxu1 %v13439_v29  ;;  %v13526_v46 = vld [vmem:[%s16190_s25 + $0x800] ss:$16 sps:$4 sm:$0xff]   ;;  %v11276_v29 = vcombine.low %v18636_v34, %v18636_v34 }
 0x5e0   : > { %9765 = vmatprep.mubr.bf16.mxu0 %v11277_v19  ;;  %10298 = vmatprep.mubr.bf16.mxu1 %v11277_v19  ;;  %v18705_v19 = vld [vmem:[#allocation2 + $0x20] sm:$0xff] }
 0x5e1   : > { %v13532_v34 = vld [vmem:[%s16190_s25 + $0x820] ss:$16 sps:$4 sm:$0xff]  }
 0x5e2   : > { %9736 = vmatpush1.bf16.msra.mxu0 %v13434_v48  ;;  %10269 = vmatpush1.bf16.msra.mxu1 %v13437_v16  ;;  %v13529_v48 = vld [vmem:[%s16190_s25 + $0x808] ss:$16 sps:$4 sm:$0xff]   ;;  %v13534_v16 = vld [vmem:[%s16190_s25 + $0x824] ss:$16 sps:$4 sm:$0xff]  }
 0x5e3   : > { %9737 = vmatprep.subr.bf16.mxu0 %v13442_v3  ;;  %10270 = vmatprep.subr.bf16.mxu1 %v13445_v57  ;;  %v13537_v3 = vld [vmem:[%s16190_s25 + $0x82c] ss:$16 sps:$4 sm:$0xff]   ;;  %v11279_v57 = vcombine.high %v18705_v19, %v18705_v19 }
 0x5e6   : > { %9738 = vmatpush1.bf16.msra.mxu0 %v13440_v25  ;;  %10271 = vmatpush1.bf16.msra.mxu1 %v13443_v27  ;;  %v13535_v25 = vld [vmem:[%s16190_s25 + $0x828] ss:$16 sps:$4 sm:$0xff]   ;;  %v13540_v27 = vld [vmem:[%s16190_s25 + $0x844] ss:$16 sps:$4 sm:$0xff]  }
 0x5e7   : > { %9739 = vmatprep.subr.bf16.mxu0 %v13448_v58  ;;  %10272 = vmatprep.subr.bf16.mxu1 %v13451_v22  ;;  %v13543_v58 = vld [vmem:[%s16190_s25 + $0x84c] ss:$16 sps:$4 sm:$0xff]   ;;  %v13538_v22 = vld [vmem:[%s16190_s25 + $0x840] ss:$16 sps:$4 sm:$0xff]  }
 0x5ea   : > { %9740 = vmatpush1.bf16.msra.mxu0 %v13446_v14  ;;  %10273 = vmatpush1.bf16.msra.mxu1 %v13449_v10  ;;  %v13541_v14 = vld [vmem:[%s16190_s25 + $0x848] ss:$16 sps:$4 sm:$0xff]   ;;  %v13546_v10 = vld [vmem:[%s16190_s25 + $0x864] ss:$16 sps:$4 sm:$0xff]  }
 0x5eb   : > { %9741 = vmatprep.subr.bf16.mxu0 %v13454_v44  ;;  %10274 = vmatprep.subr.bf16.mxu1 %v13457_v47  ;;  %v13549_v44 = vld [vmem:[%s16190_s25 + $0x86c] ss:$16 sps:$4 sm:$0xff]   ;;  %v13544_v47 = vld [vmem:[%s16190_s25 + $0x860] ss:$16 sps:$4 sm:$0xff]  }
 0x5ee   : > { %9742 = vmatpush1.bf16.msra.mxu0 %v13452_v24  ;;  %10275 = vmatpush1.bf16.msra.mxu1 %v13455_v52  ;;  %v13547_v24 = vld [vmem:[%s16190_s25 + $0x868] ss:$16 sps:$4 sm:$0xff]   ;;  %v13552_v52 = vld [vmem:[%s16190_s25 + $0x884] ss:$16 sps:$4 sm:$0xff]  }
 0x5ef   : > { %9743 = vmatprep.subr.bf16.mxu0 %v13460_v7  ;;  %10276 = vmatprep.subr.bf16.mxu1 %v13463_v18  ;;  %v13555_v7 = vld [vmem:[%s16190_s25 + $0x88c] ss:$16 sps:$4 sm:$0xff]   ;;  %v13550_v18 = vld [vmem:[%s16190_s25 + $0x880] ss:$16 sps:$4 sm:$0xff]  }
 0x5f2   : > { %9744 = vmatpush1.bf16.msra.mxu0 %v13458_v5  ;;  %10277 = vmatpush1.bf16.msra.mxu1 %v13461_v32  ;;  %v13553_v5 = vld [vmem:[%s16190_s25 + $0x888] ss:$16 sps:$4 sm:$0xff]   ;;  %v13558_v32 = vld [vmem:[%s16190_s25 + $0x8a4] ss:$16 sps:$4 sm:$0xff]  }
 0x5f3   : > { %9745 = vmatprep.subr.bf16.mxu0 %v13466_v8  ;;  %10278 = vmatprep.subr.bf16.mxu1 %v13469_v55  ;;  %v13561_v8 = vld [vmem:[%s16190_s25 + $0x8ac] ss:$16 sps:$4 sm:$0xff]   ;;  %v13556_v55 = vld [vmem:[%s16190_s25 + $0x8a0] ss:$16 sps:$4 sm:$0xff]  }
 0x5f6   : > { %9746 = vmatpush1.bf16.msra.mxu0 %v13464_v60  ;;  %10279 = vmatpush1.bf16.msra.mxu1 %v13467_v20  ;;  %v13559_v60 = vld [vmem:[%s16190_s25 + $0x8a8] ss:$16 sps:$4 sm:$0xff]   ;;  %v13564_v20 = vld [vmem:[%s16190_s25 + $0x8c4] ss:$16 sps:$4 sm:$0xff]  }
 0x5f7   : > { %9747 = vmatprep.subr.bf16.mxu0 %v13472_v23  ;;  %10280 = vmatprep.subr.bf16.mxu1 %v13475_v35  ;;  %v13567_v23 = vld [vmem:[%s16190_s25 + $0x8cc] ss:$16 sps:$4 sm:$0xff]   ;;  %v13562_v35 = vld [vmem:[%s16190_s25 + $0x8c0] ss:$16 sps:$4 sm:$0xff]  }
 0x5fa   : > { %9748 = vmatpush1.bf16.msra.mxu0 %v13470_v2  ;;  %10281 = vmatpush1.bf16.msra.mxu1 %v13473_v26  ;;  %v13565_v2 = vld [vmem:[%s16190_s25 + $0x8c8] ss:$16 sps:$4 sm:$0xff]   ;;  %v13570_v26 = vld [vmem:[%s16190_s25 + $0x8e4] ss:$16 sps:$4 sm:$0xff]  }
 0x5fb   : > { %9749 = vmatprep.subr.bf16.mxu0 %v13478_v33  ;;  %10282 = vmatprep.subr.bf16.mxu1 %v13481_v41  ;;  %v13573_v33 = vld [vmem:[%s16190_s25 + $0x8ec] ss:$16 sps:$4 sm:$0xff]   ;;  %v13568_v41 = vld [vmem:[%s16190_s25 + $0x8e0] ss:$16 sps:$4 sm:$0xff]  }
 0x5fe   : > { %9750 = vmatpush1.bf16.msra.mxu0 %v13476_v50  ;;  %10283 = vmatpush1.bf16.msra.mxu1 %v13479_v21  ;;  %v13571_v50 = vld [vmem:[%s16190_s25 + $0x8e8] ss:$16 sps:$4 sm:$0xff]   ;;  %v13576_v21 = vld [vmem:[%s16190_s25 + $0x904] ss:$16 sps:$4 sm:$0xff]  }
 0x5ff   : > { %9751 = vmatprep.subr.bf16.mxu0 %v13484_v54  ;;  %10284 = vmatprep.subr.bf16.mxu1 %v13487_v0  ;;  %v13579_v54 = vld [vmem:[%s16190_s25 + $0x90c] ss:$16 sps:$4 sm:$0xff]   ;;  %v13574_v0 = vld [vmem:[%s16190_s25 + $0x900] ss:$16 sps:$4 sm:$0xff]  }
 0x602   : > { %9752 = vmatpush1.bf16.msra.mxu0 %v13482_v28  ;;  %10285 = vmatpush1.bf16.msra.mxu1 %v13485_v49  ;;  %v13577_v28 = vld [vmem:[%s16190_s25 + $0x908] ss:$16 sps:$4 sm:$0xff]   ;;  %v13582_v49 = vld [vmem:[%s16190_s25 + $0x924] ss:$16 sps:$4 sm:$0xff]  }
 0x603   : > { %9753 = vmatprep.subr.bf16.mxu0 %v13490_v40  ;;  %10286 = vmatprep.subr.bf16.mxu1 %v13493_v11  ;;  %v13585_v40 = vld [vmem:[%s16190_s25 + $0x92c] ss:$16 sps:$4 sm:$0xff]   ;;  %v13580_v11 = vld [vmem:[%s16190_s25 + $0x920] ss:$16 sps:$4 sm:$0xff]  }
 0x606   : > { %9754 = vmatpush1.bf16.msra.mxu0 %v13488_v38  ;;  %10287 = vmatpush1.bf16.msra.mxu1 %v13491_v30  ;;  %v13583_v38 = vld [vmem:[%s16190_s25 + $0x928] ss:$16 sps:$4 sm:$0xff]   ;;  %v13588_v30 = vld [vmem:[%s16190_s25 + $0x944] ss:$16 sps:$4 sm:$0xff]  }
 0x607   : > { %9755 = vmatprep.subr.bf16.mxu0 %v13496_v45  ;;  %10288 = vmatprep.subr.bf16.mxu1 %v13499_v15  ;;  %v13591_v45 = vld [vmem:[%s16190_s25 + $0x94c] ss:$16 sps:$4 sm:$0xff]   ;;  %v13586_v15 = vld [vmem:[%s16190_s25 + $0x940] ss:$16 sps:$4 sm:$0xff]  }
 0x60a   : > { %9756 = vmatpush1.bf16.msra.mxu0 %v13494_v62  ;;  %10289 = vmatpush1.bf16.msra.mxu1 %v13497_v61  ;;  %v13589_v62 = vld [vmem:[%s16190_s25 + $0x948] ss:$16 sps:$4 sm:$0xff]   ;;  %v13594_v61 = vld [vmem:[%s16190_s25 + $0x964] ss:$16 sps:$4 sm:$0xff]  }
 0x60b   : > { %9757 = vmatprep.subr.bf16.mxu0 %v13502_v42  ;;  %10290 = vmatprep.subr.bf16.mxu1 %v13505_v12  ;;  %v13597_v42 = vld [vmem:[%s16190_s25 + $0x96c] ss:$16 sps:$4 sm:$0xff]   ;;  %v13592_v12 = vld [vmem:[%s16190_s25 + $0x960] ss:$16 sps:$4 sm:$0xff]  }
 0x60e   : > { %9758 = vmatpush1.bf16.msra.mxu0 %v13500_v31  ;;  %10291 = vmatpush1.bf16.msra.mxu1 %v13503_v56  ;;  %v13595_v31 = vld [vmem:[%s16190_s25 + $0x968] ss:$16 sps:$4 sm:$0xff]   ;;  %v13600_v56 = vld [vmem:[%s16190_s25 + $0x984] ss:$16 sps:$4 sm:$0xff]  }
 0x60f   : > { %9759 = vmatprep.subr.bf16.mxu0 %v13508_v13  ;;  %10292 = vmatprep.subr.bf16.mxu1 %v13511_v1  ;;  %v13603_v13 = vld [vmem:[%s16190_s25 + $0x98c] ss:$16 sps:$4 sm:$0xff]   ;;  %v13598_v1 = vld [vmem:[%s16190_s25 + $0x980] ss:$16 sps:$4 sm:$0xff]  }
 0x612   : > { %9760 = vmatpush1.bf16.msra.mxu0 %v13506_v36  ;;  %10293 = vmatpush1.bf16.msra.mxu1 %v13509_v4  ;;  %v13601_v36 = vld [vmem:[%s16190_s25 + $0x988] ss:$16 sps:$4 sm:$0xff]   ;;  %v13606_v4 = vld [vmem:[%s16190_s25 + $0x9a4] ss:$16 sps:$4 sm:$0xff]  }
 0x613   : > { %9761 = vmatprep.subr.bf16.mxu0 %v13514_v63  ;;  %10294 = vmatprep.subr.bf16.mxu1 %v13517_v37  ;;  %v13609_v63 = vld [vmem:[%s16190_s25 + $0x9ac] ss:$16 sps:$4 sm:$0xff]   ;;  %v13604_v37 = vld [vmem:[%s16190_s25 + $0x9a0] ss:$16 sps:$4 sm:$0xff]  }
 0x616   : > { %9762 = vmatpush1.bf16.msra.mxu0 %v13512_v51  ;;  %10295 = vmatpush1.bf16.msra.mxu1 %v13515_v39  ;;  %v13607_v51 = vld [vmem:[%s16190_s25 + $0x9a8] ss:$16 sps:$4 sm:$0xff]   ;;  %v13612_v39 = vld [vmem:[%s16190_s25 + $0x9c4] ss:$16 sps:$4 sm:$0xff]  }
 0x617   : > { %9763 = vmatprep.subr.bf16.mxu0 %v13520_v53  ;;  %10296 = vmatprep.subr.bf16.mxu1 %v13523_v17  ;;  %v13615_v53 = vld [vmem:[%s16190_s25 + $0x9cc] ss:$16 sps:$4 sm:$0xff]   ;;  %v13610_v17 = vld [vmem:[%s16190_s25 + $0x9c0] ss:$16 sps:$4 sm:$0xff]  }
 0x61a   : > { %9764 = vmatpush1.bf16.msra.mxu0 %v13518_v43  ;;  %10297 = vmatpush1.bf16.msra.mxu1 %v13521_v6  ;;  %v13613_v43 = vld [vmem:[%s16190_s25 + $0x9c8] ss:$16 sps:$4 sm:$0xff]   ;;  %v13618_v6 = vld [vmem:[%s16190_s25 + $0x9e4] ss:$16 sps:$4 sm:$0xff]  }
 0x61b   : > { %9774 = vmatprep.subr.bf16.mxu0 %v13528_v9  ;;  %10307 = vmatprep.subr.bf16.mxu1 %v13531_v59  ;;  %v13621_v9 = vld [vmem:[%s16190_s25 + $0x9ec] ss:$16 sps:$4 sm:$0xff]   ;;  %v13616_v59 = vld [vmem:[%s16190_s25 + $0x9e0] ss:$16 sps:$4 sm:$0xff]  }
 0x61d   : > { %9766 = vmatmul.mubr.bf16.vlgmr.msra.gmra.mrb[0].mxu0 %v11276_v29  ;;  %10299 = vmatmul.mubr.bf16.vlgmr.msra.gmra.mrb[0].mxu1 %v11276_v29  ;;  %v13626_v29 = vld [vmem:[%s16190_s25 + $0xa04] ss:$16 sps:$4 sm:$0xff]  }
 0x61e   : > { %9775 = vmatpush1.bf16.msra.mxu0 %v13526_v46  ;;  %10308 = vmatpush1.bf16.msra.mxu1 %v13529_v48  ;;  %v13619_v46 = vld [vmem:[%s16190_s25 + $0x9e8] ss:$16 sps:$4 sm:$0xff]   ;;  %v13629_v48 = vld [vmem:[%s16190_s25 + $0xa0c] ss:$16 sps:$4 sm:$0xff]  }
 0x61f   : > { %9776 = vmatprep.subr.bf16.mxu0 %v13534_v16  ;;  %10309 = vmatprep.subr.bf16.mxu1 %v13537_v3  ;;  %v18772_v16 = vld [vmem:[#allocation2 + $0x28] sm:$0xff]  ;;  %v11278_v3 = vcombine.low %v18705_v19, %v18705_v19  ;;  %v13630_v19 = vld [vmem:[%s16190_s25 + $0xa20] ss:$16 sps:$4 sm:$0xff]  }
 0x620   : > { %9806 = vmatprep.mubr.bf16.mxu0 %v11279_v57  ;;  %10339 = vmatprep.mubr.bf16.mxu1 %v11279_v57  ;;  %v13624_v57 = vld [vmem:[%s16190_s25 + $0xa00] ss:$16 sps:$4 sm:$0xff]  }
 0x622   : > { %9777 = vmatpush1.bf16.msra.mxu0 %v13532_v34  ;;  %10310 = vmatpush1.bf16.msra.mxu1 %v13535_v25  ;;  %v13627_v34 = vld [vmem:[%s16190_s25 + $0xa08] ss:$16 sps:$4 sm:$0xff]   ;;  %v13632_v25 = vld [vmem:[%s16190_s25 + $0xa24] ss:$16 sps:$4 sm:$0xff]  }
 0x623   : > { %9778 = vmatprep.subr.bf16.mxu0 %v13540_v27  ;;  %10311 = vmatprep.subr.bf16.mxu1 %v13543_v58  ;;  %v13635_v27 = vld [vmem:[%s16190_s25 + $0xa2c] ss:$16 sps:$4 sm:$0xff]   ;;  %v11281_v58 = vcombine.high %v18772_v16, %v18772_v16 }
 0x626   : > { %9779 = vmatpush1.bf16.msra.mxu0 %v13538_v22  ;;  %10312 = vmatpush1.bf16.msra.mxu1 %v13541_v14  ;;  %v13633_v22 = vld [vmem:[%s16190_s25 + $0xa28] ss:$16 sps:$4 sm:$0xff]   ;;  %v13638_v14 = vld [vmem:[%s16190_s25 + $0xa44] ss:$16 sps:$4 sm:$0xff]  }
 0x627   : > { %9780 = vmatprep.subr.bf16.mxu0 %v13546_v10  ;;  %10313 = vmatprep.subr.bf16.mxu1 %v13549_v44  ;;  %v13641_v10 = vld [vmem:[%s16190_s25 + $0xa4c] ss:$16 sps:$4 sm:$0xff]   ;;  %v13636_v44 = vld [vmem:[%s16190_s25 + $0xa40] ss:$16 sps:$4 sm:$0xff]  }
 0x62a   : > { %9781 = vmatpush1.bf16.msra.mxu0 %v13544_v47  ;;  %10314 = vmatpush1.bf16.msra.mxu1 %v13547_v24  ;;  %v13639_v47 = vld [vmem:[%s16190_s25 + $0xa48] ss:$16 sps:$4 sm:$0xff]   ;;  %v13644_v24 = vld [vmem:[%s16190_s25 + $0xa64] ss:$16 sps:$4 sm:$0xff]  }
 0x62b   : > { %9782 = vmatprep.subr.bf16.mxu0 %v13552_v52  ;;  %10315 = vmatprep.subr.bf16.mxu1 %v13555_v7  ;;  %v13647_v52 = vld [vmem:[%s16190_s25 + $0xa6c] ss:$16 sps:$4 sm:$0xff]   ;;  %v13642_v7 = vld [vmem:[%s16190_s25 + $0xa60] ss:$16 sps:$4 sm:$0xff]  }
 0x62e   : > { %9783 = vmatpush1.bf16.msra.mxu0 %v13550_v18  ;;  %10316 = vmatpush1.bf16.msra.mxu1 %v13553_v5  ;;  %v13645_v18 = vld [vmem:[%s16190_s25 + $0xa68] ss:$16 sps:$4 sm:$0xff]   ;;  %v13650_v5 = vld [vmem:[%s16190_s25 + $0xa84] ss:$16 sps:$4 sm:$0xff]  }
 0x62f   : > { %9784 = vmatprep.subr.bf16.mxu0 %v13558_v32  ;;  %10317 = vmatprep.subr.bf16.mxu1 %v13561_v8  ;;  %v13653_v32 = vld [vmem:[%s16190_s25 + $0xa8c] ss:$16 sps:$4 sm:$0xff]   ;;  %v13648_v8 = vld [vmem:[%s16190_s25 + $0xa80] ss:$16 sps:$4 sm:$0xff]  }
 0x632   : > { %9785 = vmatpush1.bf16.msra.mxu0 %v13556_v55  ;;  %10318 = vmatpush1.bf16.msra.mxu1 %v13559_v60  ;;  %v13651_v55 = vld [vmem:[%s16190_s25 + $0xa88] ss:$16 sps:$4 sm:$0xff]   ;;  %v13656_v60 = vld [vmem:[%s16190_s25 + $0xaa4] ss:$16 sps:$4 sm:$0xff]  }
 0x633   : > { %9786 = vmatprep.subr.bf16.mxu0 %v13564_v20  ;;  %10319 = vmatprep.subr.bf16.mxu1 %v13567_v23  ;;  %v13659_v20 = vld [vmem:[%s16190_s25 + $0xaac] ss:$16 sps:$4 sm:$0xff]   ;;  %v13654_v23 = vld [vmem:[%s16190_s25 + $0xaa0] ss:$16 sps:$4 sm:$0xff]  }
 0x636   : > { %9787 = vmatpush1.bf16.msra.mxu0 %v13562_v35  ;;  %10320 = vmatpush1.bf16.msra.mxu1 %v13565_v2  ;;  %v13657_v35 = vld [vmem:[%s16190_s25 + $0xaa8] ss:$16 sps:$4 sm:$0xff]   ;;  %v13662_v2 = vld [vmem:[%s16190_s25 + $0xac4] ss:$16 sps:$4 sm:$0xff]  }
 0x637   : > { %9788 = vmatprep.subr.bf16.mxu0 %v13570_v26  ;;  %10321 = vmatprep.subr.bf16.mxu1 %v13573_v33  ;;  %v13665_v26 = vld [vmem:[%s16190_s25 + $0xacc] ss:$16 sps:$4 sm:$0xff]   ;;  %v13660_v33 = vld [vmem:[%s16190_s25 + $0xac0] ss:$16 sps:$4 sm:$0xff]  }
 0x63a   : > { %9789 = vmatpush1.bf16.msra.mxu0 %v13568_v41  ;;  %10322 = vmatpush1.bf16.msra.mxu1 %v13571_v50  ;;  %v13663_v41 = vld [vmem:[%s16190_s25 + $0xac8] ss:$16 sps:$4 sm:$0xff]   ;;  %v13668_v50 = vld [vmem:[%s16190_s25 + $0xae4] ss:$16 sps:$4 sm:$0xff]  }
 0x63b   : > { %9790 = vmatprep.subr.bf16.mxu0 %v13576_v21  ;;  %10323 = vmatprep.subr.bf16.mxu1 %v13579_v54  ;;  %v13671_v21 = vld [vmem:[%s16190_s25 + $0xaec] ss:$16 sps:$4 sm:$0xff]   ;;  %v13666_v54 = vld [vmem:[%s16190_s25 + $0xae0] ss:$16 sps:$4 sm:$0xff]  }
 0x63e   : > { %9791 = vmatpush1.bf16.msra.mxu0 %v13574_v0  ;;  %10324 = vmatpush1.bf16.msra.mxu1 %v13577_v28  ;;  %v13669_v0 = vld [vmem:[%s16190_s25 + $0xae8] ss:$16 sps:$4 sm:$0xff]   ;;  %v13674_v28 = vld [vmem:[%s16190_s25 + $0xb04] ss:$16 sps:$4 sm:$0xff]  }
 0x63f   : > { %9792 = vmatprep.subr.bf16.mxu0 %v13582_v49  ;;  %10325 = vmatprep.subr.bf16.mxu1 %v13585_v40  ;;  %v13677_v49 = vld [vmem:[%s16190_s25 + $0xb0c] ss:$16 sps:$4 sm:$0xff]   ;;  %v13672_v40 = vld [vmem:[%s16190_s25 + $0xb00] ss:$16 sps:$4 sm:$0xff]  }
 0x642   : > { %9793 = vmatpush1.bf16.msra.mxu0 %v13580_v11  ;;  %10326 = vmatpush1.bf16.msra.mxu1 %v13583_v38  ;;  %v13675_v11 = vld [vmem:[%s16190_s25 + $0xb08] ss:$16 sps:$4 sm:$0xff]   ;;  %v13680_v38 = vld [vmem:[%s16190_s25 + $0xb24] ss:$16 sps:$4 sm:$0xff]  }
 0x643   : > { %9794 = vmatprep.subr.bf16.mxu0 %v13588_v30  ;;  %10327 = vmatprep.subr.bf16.mxu1 %v13591_v45  ;;  %v13683_v30 = vld [vmem:[%s16190_s25 + $0xb2c] ss:$16 sps:$4 sm:$0xff]   ;;  %v13678_v45 = vld [vmem:[%s16190_s25 + $0xb20] ss:$16 sps:$4 sm:$0xff]  }
 0x646   : > { %9795 = vmatpush1.bf16.msra.mxu0 %v13586_v15  ;;  %10328 = vmatpush1.bf16.msra.mxu1 %v13589_v62  ;;  %v13681_v15 = vld [vmem:[%s16190_s25 + $0xb28] ss:$16 sps:$4 sm:$0xff]   ;;  %v13686_v62 = vld [vmem:[%s16190_s25 + $0xb44] ss:$16 sps:$4 sm:$0xff]  }
 0x647   : > { %9796 = vmatprep.subr.bf16.mxu0 %v13594_v61  ;;  %10329 = vmatprep.subr.bf16.mxu1 %v13597_v42  ;;  %v13689_v61 = vld [vmem:[%s16190_s25 + $0xb4c] ss:$16 sps:$4 sm:$0xff]   ;;  %v13684_v42 = vld [vmem:[%s16190_s25 + $0xb40] ss:$16 sps:$4 sm:$0xff]  }
 0x64a   : > { %9797 = vmatpush1.bf16.msra.mxu0 %v13592_v12  ;;  %10330 = vmatpush1.bf16.msra.mxu1 %v13595_v31  ;;  %v13687_v12 = vld [vmem:[%s16190_s25 + $0xb48] ss:$16 sps:$4 sm:$0xff]   ;;  %v13692_v31 = vld [vmem:[%s16190_s25 + $0xb64] ss:$16 sps:$4 sm:$0xff]  }
 0x64b   : > { %9798 = vmatprep.subr.bf16.mxu0 %v13600_v56  ;;  %10331 = vmatprep.subr.bf16.mxu1 %v13603_v13  ;;  %v13695_v56 = vld [vmem:[%s16190_s25 + $0xb6c] ss:$16 sps:$4 sm:$0xff]   ;;  %v13690_v13 = vld [vmem:[%s16190_s25 + $0xb60] ss:$16 sps:$4 sm:$0xff]  }
 0x64e   : > { %9799 = vmatpush1.bf16.msra.mxu0 %v13598_v1  ;;  %10332 = vmatpush1.bf16.msra.mxu1 %v13601_v36  ;;  %v13693_v1 = vld [vmem:[%s16190_s25 + $0xb68] ss:$16 sps:$4 sm:$0xff]   ;;  %v13698_v36 = vld [vmem:[%s16190_s25 + $0xb84] ss:$16 sps:$4 sm:$0xff]  }
 0x64f   : > { %9800 = vmatprep.subr.bf16.mxu0 %v13606_v4  ;;  %10333 = vmatprep.subr.bf16.mxu1 %v13609_v63  ;;  %v13701_v4 = vld [vmem:[%s16190_s25 + $0xb8c] ss:$16 sps:$4 sm:$0xff]   ;;  %v13696_v63 = vld [vmem:[%s16190_s25 + $0xb80] ss:$16 sps:$4 sm:$0xff]  }
 0x652   : > { %9801 = vmatpush1.bf16.msra.mxu0 %v13604_v37  ;;  %10334 = vmatpush1.bf16.msra.mxu1 %v13607_v51  ;;  %v13699_v37 = vld [vmem:[%s16190_s25 + $0xb88] ss:$16 sps:$4 sm:$0xff]   ;;  %v13704_v51 = vld [vmem:[%s16190_s25 + $0xba4] ss:$16 sps:$4 sm:$0xff]  }
 0x653   : > { %9802 = vmatprep.subr.bf16.mxu0 %v13612_v39  ;;  %10335 = vmatprep.subr.bf16.mxu1 %v13615_v53  ;;  %v13707_v39 = vld [vmem:[%s16190_s25 + $0xbac] ss:$16 sps:$4 sm:$0xff]   ;;  %v13702_v53 = vld [vmem:[%s16190_s25 + $0xba0] ss:$16 sps:$4 sm:$0xff]  }
 0x656   : > { %9803 = vmatpush1.bf16.msra.mxu0 %v13610_v17  ;;  %10336 = vmatpush1.bf16.msra.mxu1 %v13613_v43  ;;  %v13705_v17 = vld [vmem:[%s16190_s25 + $0xba8] ss:$16 sps:$4 sm:$0xff]   ;;  %v13710_v43 = vld [vmem:[%s16190_s25 + $0xbc4] ss:$16 sps:$4 sm:$0xff]  }
 0x657   : > { %9804 = vmatprep.subr.bf16.mxu0 %v13618_v6  ;;  %10337 = vmatprep.subr.bf16.mxu1 %v13621_v9  ;;  %v13713_v6 = vld [vmem:[%s16190_s25 + $0xbcc] ss:$16 sps:$4 sm:$0xff]   ;;  %v13708_v9 = vld [vmem:[%s16190_s25 + $0xbc0] ss:$16 sps:$4 sm:$0xff]  }
 0x65a   : > { %9805 = vmatpush1.bf16.msra.mxu0 %v13616_v59  ;;  %10338 = vmatpush1.bf16.msra.mxu1 %v13619_v46  ;;  %v13711_v59 = vld [vmem:[%s16190_s25 + $0xbc8] ss:$16 sps:$4 sm:$0xff]   ;;  %v13716_v46 = vld [vmem:[%s16190_s25 + $0xbe4] ss:$16 sps:$4 sm:$0xff]  }
 0x65b   : > { %9815 = vmatprep.subr.bf16.mxu0 %v13626_v29  ;;  %10348 = vmatprep.subr.bf16.mxu1 %v13629_v48  ;;  %v13719_v29 = vld [vmem:[%s16190_s25 + $0xbec] ss:$16 sps:$4 sm:$0xff]   ;;  %v13714_v48 = vld [vmem:[%s16190_s25 + $0xbe0] ss:$16 sps:$4 sm:$0xff]  }
 0x65d   : > { %9807 = vmatmul.mubr.bf16.vlgmr.msra.gmra.mrb[0].mxu0 %v11278_v3  ;;  %10340 = vmatmul.mubr.bf16.vlgmr.msra.gmra.mrb[0].mxu1 %v11278_v3  ;;  %v13717_v3 = vld [vmem:[%s16190_s25 + $0xbe8] ss:$16 sps:$4 sm:$0xff]  }
 0x65e   : > { %9816 = vmatpush1.bf16.msra.mxu0 %v13624_v57  ;;  %10349 = vmatpush1.bf16.msra.mxu1 %v13627_v34  ;;  %v13724_v57 = vld [vmem:[%s16190_s25 + $0xc04] ss:$16 sps:$4 sm:$0xff]   ;;  %v13727_v34 = vld [vmem:[%s16190_s25 + $0xc0c] ss:$16 sps:$4 sm:$0xff]  }
 0x65f   : > { %9817 = vmatprep.subr.bf16.mxu0 %v13632_v25  ;;  %10350 = vmatprep.subr.bf16.mxu1 %v13635_v27  ;;  %v18842_v25 = vld [vmem:[#allocation2 + $0x30] sm:$0xff]  ;;  %v11280_v27 = vcombine.low %v18772_v16, %v18772_v16 }
 0x660   : > { %9847 = vmatprep.mubr.bf16.mxu0 %v11281_v58  ;;  %10380 = vmatprep.mubr.bf16.mxu1 %v11281_v58  ;;  %v13722_v58 = vld [vmem:[%s16190_s25 + $0xc00] ss:$16 sps:$4 sm:$0xff]  }
 0x661   : > { %v13728_v16 = vld [vmem:[%s16190_s25 + $0xc20] ss:$16 sps:$4 sm:$0xff]  }
 0x662   : > { %9818 = vmatpush1.bf16.msra.mxu0 %v13630_v19  ;;  %10351 = vmatpush1.bf16.msra.mxu1 %v13633_v22  ;;  %v13725_v19 = vld [vmem:[%s16190_s25 + $0xc08] ss:$16 sps:$4 sm:$0xff]   ;;  %v13730_v22 = vld [vmem:[%s16190_s25 + $0xc24] ss:$16 sps:$4 sm:$0xff]  }
 0x663   : > { %9819 = vmatprep.subr.bf16.mxu0 %v13638_v14  ;;  %10352 = vmatprep.subr.bf16.mxu1 %v13641_v10  ;;  %v13733_v14 = vld [vmem:[%s16190_s25 + $0xc2c] ss:$16 sps:$4 sm:$0xff]   ;;  %v11283_v10 = vcombine.high %v18842_v25, %v18842_v25 }
 0x666   : > { %9820 = vmatpush1.bf16.msra.mxu0 %v13636_v44  ;;  %10353 = vmatpush1.bf16.msra.mxu1 %v13639_v47  ;;  %v13731_v44 = vld [vmem:[%s16190_s25 + $0xc28] ss:$16 sps:$4 sm:$0xff]   ;;  %v13736_v47 = vld [vmem:[%s16190_s25 + $0xc44] ss:$16 sps:$4 sm:$0xff]  }
 0x667   : > { %9821 = vmatprep.subr.bf16.mxu0 %v13644_v24  ;;  %10354 = vmatprep.subr.bf16.mxu1 %v13647_v52  ;;  %v13739_v24 = vld [vmem:[%s16190_s25 + $0xc4c] ss:$16 sps:$4 sm:$0xff]   ;;  %v13734_v52 = vld [vmem:[%s16190_s25 + $0xc40] ss:$16 sps:$4 sm:$0xff]  }
 0x66a   : > { %9822 = vmatpush1.bf16.msra.mxu0 %v13642_v7  ;;  %10355 = vmatpush1.bf16.msra.mxu1 %v13645_v18  ;;  %v13737_v7 = vld [vmem:[%s16190_s25 + $0xc48] ss:$16 sps:$4 sm:$0xff]   ;;  %v13742_v18 = vld [vmem:[%s16190_s25 + $0xc64] ss:$16 sps:$4 sm:$0xff]  }
 0x66b   : > { %9823 = vmatprep.subr.bf16.mxu0 %v13650_v5  ;;  %10356 = vmatprep.subr.bf16.mxu1 %v13653_v32  ;;  %v13745_v5 = vld [vmem:[%s16190_s25 + $0xc6c] ss:$16 sps:$4 sm:$0xff]   ;;  %v13740_v32 = vld [vmem:[%s16190_s25 + $0xc60] ss:$16 sps:$4 sm:$0xff]  }
 0x66e   : > { %9824 = vmatpush1.bf16.msra.mxu0 %v13648_v8  ;;  %10357 = vmatpush1.bf16.msra.mxu1 %v13651_v55  ;;  %v13743_v8 = vld [vmem:[%s16190_s25 + $0xc68] ss:$16 sps:$4 sm:$0xff]   ;;  %v13748_v55 = vld [vmem:[%s16190_s25 + $0xc84] ss:$16 sps:$4 sm:$0xff]  }
 0x66f   : > { %9825 = vmatprep.subr.bf16.mxu0 %v13656_v60  ;;  %10358 = vmatprep.subr.bf16.mxu1 %v13659_v20  ;;  %v13751_v60 = vld [vmem:[%s16190_s25 + $0xc8c] ss:$16 sps:$4 sm:$0xff]   ;;  %v13746_v20 = vld [vmem:[%s16190_s25 + $0xc80] ss:$16 sps:$4 sm:$0xff]  }
 0x672   : > { %9826 = vmatpush1.bf16.msra.mxu0 %v13654_v23  ;;  %10359 = vmatpush1.bf16.msra.mxu1 %v13657_v35  ;;  %v13749_v23 = vld [vmem:[%s16190_s25 + $0xc88] ss:$16 sps:$4 sm:$0xff]   ;;  %v13754_v35 = vld [vmem:[%s16190_s25 + $0xca4] ss:$16 sps:$4 sm:$0xff]  }
 0x673   : > { %9827 = vmatprep.subr.bf16.mxu0 %v13662_v2  ;;  %10360 = vmatprep.subr.bf16.mxu1 %v13665_v26  ;;  %v13757_v2 = vld [vmem:[%s16190_s25 + $0xcac] ss:$16 sps:$4 sm:$0xff]   ;;  %v13752_v26 = vld [vmem:[%s16190_s25 + $0xca0] ss:$16 sps:$4 sm:$0xff]  }
 0x676   : > { %9828 = vmatpush1.bf16.msra.mxu0 %v13660_v33  ;;  %10361 = vmatpush1.bf16.msra.mxu1 %v13663_v41  ;;  %v13755_v33 = vld [vmem:[%s16190_s25 + $0xca8] ss:$16 sps:$4 sm:$0xff]   ;;  %v13760_v41 = vld [vmem:[%s16190_s25 + $0xcc4] ss:$16 sps:$4 sm:$0xff]  }
 0x677   : > { %9829 = vmatprep.subr.bf16.mxu0 %v13668_v50  ;;  %10362 = vmatprep.subr.bf16.mxu1 %v13671_v21  ;;  %v13763_v50 = vld [vmem:[%s16190_s25 + $0xccc] ss:$16 sps:$4 sm:$0xff]   ;;  %v13758_v21 = vld [vmem:[%s16190_s25 + $0xcc0] ss:$16 sps:$4 sm:$0xff]  }
 0x67a   : > { %9830 = vmatpush1.bf16.msra.mxu0 %v13666_v54  ;;  %10363 = vmatpush1.bf16.msra.mxu1 %v13669_v0  ;;  %v13761_v54 = vld [vmem:[%s16190_s25 + $0xcc8] ss:$16 sps:$4 sm:$0xff]   ;;  %v13766_v0 = vld [vmem:[%s16190_s25 + $0xce4] ss:$16 sps:$4 sm:$0xff]  }
 0x67b   : > { %9831 = vmatprep.subr.bf16.mxu0 %v13674_v28  ;;  %10364 = vmatprep.subr.bf16.mxu1 %v13677_v49  ;;  %v13769_v28 = vld [vmem:[%s16190_s25 + $0xcec] ss:$16 sps:$4 sm:$0xff]   ;;  %v13764_v49 = vld [vmem:[%s16190_s25 + $0xce0] ss:$16 sps:$4 sm:$0xff]  }
 0x67e   : > { %9832 = vmatpush1.bf16.msra.mxu0 %v13672_v40  ;;  %10365 = vmatpush1.bf16.msra.mxu1 %v13675_v11  ;;  %v13767_v40 = vld [vmem:[%s16190_s25 + $0xce8] ss:$16 sps:$4 sm:$0xff]   ;;  %v13772_v11 = vld [vmem:[%s16190_s25 + $0xd04] ss:$16 sps:$4 sm:$0xff]  }
 0x67f   : > { %9833 = vmatprep.subr.bf16.mxu0 %v13680_v38  ;;  %10366 = vmatprep.subr.bf16.mxu1 %v13683_v30  ;;  %v13775_v38 = vld [vmem:[%s16190_s25 + $0xd0c] ss:$16 sps:$4 sm:$0xff]   ;;  %v13770_v30 = vld [vmem:[%s16190_s25 + $0xd00] ss:$16 sps:$4 sm:$0xff]  }
 0x682   : > { %9834 = vmatpush1.bf16.msra.mxu0 %v13678_v45  ;;  %10367 = vmatpush1.bf16.msra.mxu1 %v13681_v15  ;;  %v13773_v45 = vld [vmem:[%s16190_s25 + $0xd08] ss:$16 sps:$4 sm:$0xff]   ;;  %v13778_v15 = vld [vmem:[%s16190_s25 + $0xd24] ss:$16 sps:$4 sm:$0xff]  }
 0x683   : > { %9835 = vmatprep.subr.bf16.mxu0 %v13686_v62  ;;  %10368 = vmatprep.subr.bf16.mxu1 %v13689_v61  ;;  %v13781_v62 = vld [vmem:[%s16190_s25 + $0xd2c] ss:$16 sps:$4 sm:$0xff]   ;;  %v13776_v61 = vld [vmem:[%s16190_s25 + $0xd20] ss:$16 sps:$4 sm:$0xff]  }
 0x686   : > { %9836 = vmatpush1.bf16.msra.mxu0 %v13684_v42  ;;  %10369 = vmatpush1.bf16.msra.mxu1 %v13687_v12  ;;  %v13779_v42 = vld [vmem:[%s16190_s25 + $0xd28] ss:$16 sps:$4 sm:$0xff]   ;;  %v13784_v12 = vld [vmem:[%s16190_s25 + $0xd44] ss:$16 sps:$4 sm:$0xff]  }
 0x687   : > { %9837 = vmatprep.subr.bf16.mxu0 %v13692_v31  ;;  %10370 = vmatprep.subr.bf16.mxu1 %v13695_v56  ;;  %v13787_v31 = vld [vmem:[%s16190_s25 + $0xd4c] ss:$16 sps:$4 sm:$0xff]   ;;  %v13782_v56 = vld [vmem:[%s16190_s25 + $0xd40] ss:$16 sps:$4 sm:$0xff]  }
 0x68a   : > { %9838 = vmatpush1.bf16.msra.mxu0 %v13690_v13  ;;  %10371 = vmatpush1.bf16.msra.mxu1 %v13693_v1  ;;  %v13785_v13 = vld [vmem:[%s16190_s25 + $0xd48] ss:$16 sps:$4 sm:$0xff]   ;;  %v13790_v1 = vld [vmem:[%s16190_s25 + $0xd64] ss:$16 sps:$4 sm:$0xff]  }
 0x68b   : > { %9839 = vmatprep.subr.bf16.mxu0 %v13698_v36  ;;  %10372 = vmatprep.subr.bf16.mxu1 %v13701_v4  ;;  %v13793_v36 = vld [vmem:[%s16190_s25 + $0xd6c] ss:$16 sps:$4 sm:$0xff]   ;;  %v13788_v4 = vld [vmem:[%s16190_s25 + $0xd60] ss:$16 sps:$4 sm:$0xff]  }
 0x68e   : > { %9840 = vmatpush1.bf16.msra.mxu0 %v13696_v63  ;;  %10373 = vmatpush1.bf16.msra.mxu1 %v13699_v37  ;;  %v13791_v63 = vld [vmem:[%s16190_s25 + $0xd68] ss:$16 sps:$4 sm:$0xff]   ;;  %v13796_v37 = vld [vmem:[%s16190_s25 + $0xd84] ss:$16 sps:$4 sm:$0xff]  }
 0x68f   : > { %9841 = vmatprep.subr.bf16.mxu0 %v13704_v51  ;;  %10374 = vmatprep.subr.bf16.mxu1 %v13707_v39  ;;  %v13799_v51 = vld [vmem:[%s16190_s25 + $0xd8c] ss:$16 sps:$4 sm:$0xff]   ;;  %v13794_v39 = vld [vmem:[%s16190_s25 + $0xd80] ss:$16 sps:$4 sm:$0xff]  }
 0x692   : > { %9842 = vmatpush1.bf16.msra.mxu0 %v13702_v53  ;;  %10375 = vmatpush1.bf16.msra.mxu1 %v13705_v17  ;;  %v13797_v53 = vld [vmem:[%s16190_s25 + $0xd88] ss:$16 sps:$4 sm:$0xff]   ;;  %v13802_v17 = vld [vmem:[%s16190_s25 + $0xda4] ss:$16 sps:$4 sm:$0xff]  }
 0x693   : > { %9843 = vmatprep.subr.bf16.mxu0 %v13710_v43  ;;  %10376 = vmatprep.subr.bf16.mxu1 %v13713_v6  ;;  %v13805_v43 = vld [vmem:[%s16190_s25 + $0xdac] ss:$16 sps:$4 sm:$0xff]   ;;  %v13800_v6 = vld [vmem:[%s16190_s25 + $0xda0] ss:$16 sps:$4 sm:$0xff]  }
 0x696   : > { %9844 = vmatpush1.bf16.msra.mxu0 %v13708_v9  ;;  %10377 = vmatpush1.bf16.msra.mxu1 %v13711_v59  ;;  %v13803_v9 = vld [vmem:[%s16190_s25 + $0xda8] ss:$16 sps:$4 sm:$0xff]   ;;  %v13808_v59 = vld [vmem:[%s16190_s25 + $0xdc4] ss:$16 sps:$4 sm:$0xff]  }
 0x697   : > { %9845 = vmatprep.subr.bf16.mxu0 %v13716_v46  ;;  %10378 = vmatprep.subr.bf16.mxu1 %v13719_v29  ;;  %v13811_v46 = vld [vmem:[%s16190_s25 + $0xdcc] ss:$16 sps:$4 sm:$0xff]   ;;  %v13806_v29 = vld [vmem:[%s16190_s25 + $0xdc0] ss:$16 sps:$4 sm:$0xff]  }
 0x69a   : > { %9846 = vmatpush1.bf16.msra.mxu0 %v13714_v48  ;;  %10379 = vmatpush1.bf16.msra.mxu1 %v13717_v3  ;;  %v13809_v48 = vld [vmem:[%s16190_s25 + $0xdc8] ss:$16 sps:$4 sm:$0xff]   ;;  %v13814_v3 = vld [vmem:[%s16190_s25 + $0xde4] ss:$16 sps:$4 sm:$0xff]  }
 0x69b   : > { %9856 = vmatprep.subr.bf16.mxu0 %v13724_v57  ;;  %10389 = vmatprep.subr.bf16.mxu1 %v13727_v34  ;;  %v13817_v57 = vld [vmem:[%s16190_s25 + $0xdec] ss:$16 sps:$4 sm:$0xff]   ;;  %v13812_v34 = vld [vmem:[%s16190_s25 + $0xde0] ss:$16 sps:$4 sm:$0xff]  }
 0x69d   : > { %9848 = vmatmul.mubr.bf16.vlgmr.msra.gmra.mrb[0].mxu0 %v11280_v27  ;;  %10381 = vmatmul.mubr.bf16.vlgmr.msra.gmra.mrb[0].mxu1 %v11280_v27  ;;  %v13815_v27 = vld [vmem:[%s16190_s25 + $0xde8] ss:$16 sps:$4 sm:$0xff]  }
 0x69e   : > { %9857 = vmatpush1.bf16.msra.mxu0 %v13722_v58  ;;  %10390 = vmatpush1.bf16.msra.mxu1 %v13725_v19  ;;  %v13822_v58 = vld [vmem:[%s16190_s25 + $0xe04] ss:$16 sps:$4 sm:$0xff]   ;;  %v13825_v19 = vld [vmem:[%s16190_s25 + $0xe0c] ss:$16 sps:$4 sm:$0xff]  }
 0x69f   : > { %9858 = vmatprep.subr.bf16.mxu0 %v13730_v22  ;;  %10391 = vmatprep.subr.bf16.mxu1 %v13733_v14  ;;  %v18912_v22 = vld [vmem:[#allocation2 + $0x38] sm:$0xff]  ;;  %v11282_v14 = vcombine.low %v18842_v25, %v18842_v25  ;;  %v13826_v25 = vld [vmem:[%s16190_s25 + $0xe20] ss:$16 sps:$4 sm:$0xff]  }
 0x6a0   : > { %9888 = vmatprep.mubr.bf16.mxu0 %v11283_v10  ;;  %10421 = vmatprep.mubr.bf16.mxu1 %v11283_v10  ;;  %v13820_v10 = vld [vmem:[%s16190_s25 + $0xe00] ss:$16 sps:$4 sm:$0xff]  }
 0x6a2   : > { %9859 = vmatpush1.bf16.msra.mxu0 %v13728_v16  ;;  %10392 = vmatpush1.bf16.msra.mxu1 %v13731_v44  ;;  %v13823_v16 = vld [vmem:[%s16190_s25 + $0xe08] ss:$16 sps:$4 sm:$0xff]   ;;  %v13828_v44 = vld [vmem:[%s16190_s25 + $0xe24] ss:$16 sps:$4 sm:$0xff]  }
 0x6a3   : > { %9860 = vmatprep.subr.bf16.mxu0 %v13736_v47  ;;  %10393 = vmatprep.subr.bf16.mxu1 %v13739_v24  ;;  %v13831_v47 = vld [vmem:[%s16190_s25 + $0xe2c] ss:$16 sps:$4 sm:$0xff]   ;;  %v11285_v24 = vcombine.high %v18912_v22, %v18912_v22 }
 0x6a6   : > { %9861 = vmatpush1.bf16.msra.mxu0 %v13734_v52  ;;  %10394 = vmatpush1.bf16.msra.mxu1 %v13737_v7  ;;  %v13829_v52 = vld [vmem:[%s16190_s25 + $0xe28] ss:$16 sps:$4 sm:$0xff]   ;;  %v13834_v7 = vld [vmem:[%s16190_s25 + $0xe44] ss:$16 sps:$4 sm:$0xff]  }
 0x6a7   : > { %9862 = vmatprep.subr.bf16.mxu0 %v13742_v18  ;;  %10395 = vmatprep.subr.bf16.mxu1 %v13745_v5  ;;  %v13837_v18 = vld [vmem:[%s16190_s25 + $0xe4c] ss:$16 sps:$4 sm:$0xff]   ;;  %v13832_v5 = vld [vmem:[%s16190_s25 + $0xe40] ss:$16 sps:$4 sm:$0xff]  }
 0x6aa   : > { %9863 = vmatpush1.bf16.msra.mxu0 %v13740_v32  ;;  %10396 = vmatpush1.bf16.msra.mxu1 %v13743_v8  ;;  %v13835_v32 = vld [vmem:[%s16190_s25 + $0xe48] ss:$16 sps:$4 sm:$0xff]   ;;  %v13840_v8 = vld [vmem:[%s16190_s25 + $0xe64] ss:$16 sps:$4 sm:$0xff]  }
 0x6ab   : > { %9864 = vmatprep.subr.bf16.mxu0 %v13748_v55  ;;  %10397 = vmatprep.subr.bf16.mxu1 %v13751_v60  ;;  %v13843_v55 = vld [vmem:[%s16190_s25 + $0xe6c] ss:$16 sps:$4 sm:$0xff]   ;;  %v13838_v60 = vld [vmem:[%s16190_s25 + $0xe60] ss:$16 sps:$4 sm:$0xff]  }
 0x6ae   : > { %9865 = vmatpush1.bf16.msra.mxu0 %v13746_v20  ;;  %10398 = vmatpush1.bf16.msra.mxu1 %v13749_v23  ;;  %v13841_v20 = vld [vmem:[%s16190_s25 + $0xe68] ss:$16 sps:$4 sm:$0xff]   ;;  %v13846_v23 = vld [vmem:[%s16190_s25 + $0xe84] ss:$16 sps:$4 sm:$0xff]  }
 0x6af   : > { %9866 = vmatprep.subr.bf16.mxu0 %v13754_v35  ;;  %10399 = vmatprep.subr.bf16.mxu1 %v13757_v2  ;;  %v13849_v35 = vld [vmem:[%s16190_s25 + $0xe8c] ss:$16 sps:$4 sm:$0xff]   ;;  %v13844_v2 = vld [vmem:[%s16190_s25 + $0xe80] ss:$16 sps:$4 sm:$0xff]  }
 0x6b2   : > { %9867 = vmatpush1.bf16.msra.mxu0 %v13752_v26  ;;  %10400 = vmatpush1.bf16.msra.mxu1 %v13755_v33  ;;  %v13847_v26 = vld [vmem:[%s16190_s25 + $0xe88] ss:$16 sps:$4 sm:$0xff]   ;;  %v13852_v33 = vld [vmem:[%s16190_s25 + $0xea4] ss:$16 sps:$4 sm:$0xff]  }
 0x6b3   : > { %9868 = vmatprep.subr.bf16.mxu0 %v13760_v41  ;;  %10401 = vmatprep.subr.bf16.mxu1 %v13763_v50  ;;  %v13855_v41 = vld [vmem:[%s16190_s25 + $0xeac] ss:$16 sps:$4 sm:$0xff]   ;;  %v13850_v50 = vld [vmem:[%s16190_s25 + $0xea0] ss:$16 sps:$4 sm:$0xff]  }
 0x6b6   : > { %9869 = vmatpush1.bf16.msra.mxu0 %v13758_v21  ;;  %10402 = vmatpush1.bf16.msra.mxu1 %v13761_v54  ;;  %v13853_v21 = vld [vmem:[%s16190_s25 + $0xea8] ss:$16 sps:$4 sm:$0xff]   ;;  %v13858_v54 = vld [vmem:[%s16190_s25 + $0xec4] ss:$16 sps:$4 sm:$0xff]  }
 0x6b7   : > { %9870 = vmatprep.subr.bf16.mxu0 %v13766_v0  ;;  %10403 = vmatprep.subr.bf16.mxu1 %v13769_v28  ;;  %v13861_v0 = vld [vmem:[%s16190_s25 + $0xecc] ss:$16 sps:$4 sm:$0xff]   ;;  %v13856_v28 = vld [vmem:[%s16190_s25 + $0xec0] ss:$16 sps:$4 sm:$0xff]  }
 0x6ba   : > { %9871 = vmatpush1.bf16.msra.mxu0 %v13764_v49  ;;  %10404 = vmatpush1.bf16.msra.mxu1 %v13767_v40  ;;  %v13859_v49 = vld [vmem:[%s16190_s25 + $0xec8] ss:$16 sps:$4 sm:$0xff]   ;;  %v13864_v40 = vld [vmem:[%s16190_s25 + $0xee4] ss:$16 sps:$4 sm:$0xff]  }
 0x6bb   : > { %9872 = vmatprep.subr.bf16.mxu0 %v13772_v11  ;;  %10405 = vmatprep.subr.bf16.mxu1 %v13775_v38  ;;  %v13867_v11 = vld [vmem:[%s16190_s25 + $0xeec] ss:$16 sps:$4 sm:$0xff]   ;;  %v13862_v38 = vld [vmem:[%s16190_s25 + $0xee0] ss:$16 sps:$4 sm:$0xff]  }
 0x6be   : > { %9873 = vmatpush1.bf16.msra.mxu0 %v13770_v30  ;;  %10406 = vmatpush1.bf16.msra.mxu1 %v13773_v45  ;;  %v13865_v30 = vld [vmem:[%s16190_s25 + $0xee8] ss:$16 sps:$4 sm:$0xff]   ;;  %v13870_v45 = vld [vmem:[%s16190_s25 + $0xf04] ss:$16 sps:$4 sm:$0xff]  }
 0x6bf   : > { %9874 = vmatprep.subr.bf16.mxu0 %v13778_v15  ;;  %10407 = vmatprep.subr.bf16.mxu1 %v13781_v62  ;;  %v13873_v15 = vld [vmem:[%s16190_s25 + $0xf0c] ss:$16 sps:$4 sm:$0xff]   ;;  %v13868_v62 = vld [vmem:[%s16190_s25 + $0xf00] ss:$16 sps:$4 sm:$0xff]  }
 0x6c2   : > { %9875 = vmatpush1.bf16.msra.mxu0 %v13776_v61  ;;  %10408 = vmatpush1.bf16.msra.mxu1 %v13779_v42  ;;  %v13871_v61 = vld [vmem:[%s16190_s25 + $0xf08] ss:$16 sps:$4 sm:$0xff]   ;;  %v13876_v42 = vld [vmem:[%s16190_s25 + $0xf24] ss:$16 sps:$4 sm:$0xff]  }
 0x6c3   : > { %9876 = vmatprep.subr.bf16.mxu0 %v13784_v12  ;;  %10409 = vmatprep.subr.bf16.mxu1 %v13787_v31  ;;  %v13879_v12 = vld [vmem:[%s16190_s25 + $0xf2c] ss:$16 sps:$4 sm:$0xff]   ;;  %v13874_v31 = vld [vmem:[%s16190_s25 + $0xf20] ss:$16 sps:$4 sm:$0xff]  }
 0x6c6   : > { %9877 = vmatpush1.bf16.msra.mxu0 %v13782_v56  ;;  %10410 = vmatpush1.bf16.msra.mxu1 %v13785_v13  ;;  %v13877_v56 = vld [vmem:[%s16190_s25 + $0xf28] ss:$16 sps:$4 sm:$0xff]   ;;  %v13882_v13 = vld [vmem:[%s16190_s25 + $0xf44] ss:$16 sps:$4 sm:$0xff]  }
 0x6c7   : > { %9878 = vmatprep.subr.bf16.mxu0 %v13790_v1  ;;  %10411 = vmatprep.subr.bf16.mxu1 %v13793_v36  ;;  %v13885_v1 = vld [vmem:[%s16190_s25 + $0xf4c] ss:$16 sps:$4 sm:$0xff]   ;;  %v13880_v36 = vld [vmem:[%s16190_s25 + $0xf40] ss:$16 sps:$4 sm:$0xff]  }
 0x6ca   : > { %9879 = vmatpush1.bf16.msra.mxu0 %v13788_v4  ;;  %10412 = vmatpush1.bf16.msra.mxu1 %v13791_v63  ;;  %v13883_v4 = vld [vmem:[%s16190_s25 + $0xf48] ss:$16 sps:$4 sm:$0xff]   ;;  %v13888_v63 = vld [vmem:[%s16190_s25 + $0xf64] ss:$16 sps:$4 sm:$0xff]  }
 0x6cb   : > { %9880 = vmatprep.subr.bf16.mxu0 %v13796_v37  ;;  %10413 = vmatprep.subr.bf16.mxu1 %v13799_v51  ;;  %v13891_v37 = vld [vmem:[%s16190_s25 + $0xf6c] ss:$16 sps:$4 sm:$0xff]   ;;  %v13886_v51 = vld [vmem:[%s16190_s25 + $0xf60] ss:$16 sps:$4 sm:$0xff]  }
 0x6ce   : > { %9881 = vmatpush1.bf16.msra.mxu0 %v13794_v39  ;;  %10414 = vmatpush1.bf16.msra.mxu1 %v13797_v53  ;;  %v13889_v39 = vld [vmem:[%s16190_s25 + $0xf68] ss:$16 sps:$4 sm:$0xff]   ;;  %v13894_v53 = vld [vmem:[%s16190_s25 + $0xf84] ss:$16 sps:$4 sm:$0xff]  }
 0x6cf   : > { %9882 = vmatprep.subr.bf16.mxu0 %v13802_v17  ;;  %10415 = vmatprep.subr.bf16.mxu1 %v13805_v43  ;;  %v13897_v17 = vld [vmem:[%s16190_s25 + $0xf8c] ss:$16 sps:$4 sm:$0xff]   ;;  %v13892_v43 = vld [vmem:[%s16190_s25 + $0xf80] ss:$16 sps:$4 sm:$0xff]  }
 0x6d2   : > { %9883 = vmatpush1.bf16.msra.mxu0 %v13800_v6  ;;  %10416 = vmatpush1.bf16.msra.mxu1 %v13803_v9  ;;  %v13895_v6 = vld [vmem:[%s16190_s25 + $0xf88] ss:$16 sps:$4 sm:$0xff]   ;;  %v13900_v9 = vld [vmem:[%s16190_s25 + $0xfa4] ss:$16 sps:$4 sm:$0xff]  }
 0x6d3   : > { %9884 = vmatprep.subr.bf16.mxu0 %v13808_v59  ;;  %10417 = vmatprep.subr.bf16.mxu1 %v13811_v46  ;;  %v13903_v59 = vld [vmem:[%s16190_s25 + $0xfac] ss:$16 sps:$4 sm:$0xff]   ;;  %v13898_v46 = vld [vmem:[%s16190_s25 + $0xfa0] ss:$16 sps:$4 sm:$0xff]  }
 0x6d6   : > { %9885 = vmatpush1.bf16.msra.mxu0 %v13806_v29  ;;  %10418 = vmatpush1.bf16.msra.mxu1 %v13809_v48  ;;  %v13901_v29 = vld [vmem:[%s16190_s25 + $0xfa8] ss:$16 sps:$4 sm:$0xff]   ;;  %v13906_v48 = vld [vmem:[%s16190_s25 + $0xfc4] ss:$16 sps:$4 sm:$0xff]  }
 0x6d7   : > { %9886 = vmatprep.subr.bf16.mxu0 %v13814_v3  ;;  %10419 = vmatprep.subr.bf16.mxu1 %v13817_v57  ;;  %v13909_v3 = vld [vmem:[%s16190_s25 + $0xfcc] ss:$16 sps:$4 sm:$0xff]   ;;  %v13904_v57 = vld [vmem:[%s16190_s25 + $0xfc0] ss:$16 sps:$4 sm:$0xff]  }
 0x6da   : > { %9887 = vmatpush1.bf16.msra.mxu0 %v13812_v34  ;;  %10420 = vmatpush1.bf16.msra.mxu1 %v13815_v27  ;;  %v13907_v34 = vld [vmem:[%s16190_s25 + $0xfc8] ss:$16 sps:$4 sm:$0xff]   ;;  %v13912_v27 = vld [vmem:[%s16190_s25 + $0xfe4] ss:$16 sps:$4 sm:$0xff]  }
 0x6db   : > { %9897 = vmatprep.subr.bf16.mxu0 %v13822_v58  ;;  %10430 = vmatprep.subr.bf16.mxu1 %v13825_v19  ;;  %v13915_v58 = vld [vmem:[%s16190_s25 + $0xfec] ss:$16 sps:$4 sm:$0xff]   ;;  %v13910_v19 = vld [vmem:[%s16190_s25 + $0xfe0] ss:$16 sps:$4 sm:$0xff]  }
 0x6dd   : > { %9889 = vmatmul.mubr.bf16.vlgmr.msra.gmra.mrb[0].mxu0 %v11282_v14  ;;  %10422 = vmatmul.mubr.bf16.vlgmr.msra.gmra.mrb[0].mxu1 %v11282_v14  ;;  %v13913_v14 = vld [vmem:[%s16190_s25 + $0xfe8] ss:$16 sps:$4 sm:$0xff]  }
 0x6de   : > { %9898 = vmatpush1.bf16.msra.mxu0 %v13820_v10  ;;  %10431 = vmatpush1.bf16.msra.mxu1 %v13823_v16  ;;  %v13920_v10 = vld [vmem:[%s16190_s25 + $0x1004] ss:$16 sps:$4 sm:$0xff]   ;;  %v13923_v16 = vld [vmem:[%s16190_s25 + $0x100c] ss:$16 sps:$4 sm:$0xff]  }
 0x6df   : > { %9899 = vmatprep.subr.bf16.mxu0 %v13828_v44  ;;  %10432 = vmatprep.subr.bf16.mxu1 %v13831_v47  ;;  %v11284_v44 = vcombine.low %v18912_v22, %v18912_v22  ;;  %v18984_v47 = vld [vmem:[#allocation2 + $0x40] sm:$0xff] }
 0x6e0   : > { %9929 = vmatprep.mubr.bf16.mxu0 %v11285_v24  ;;  %10462 = vmatprep.mubr.bf16.mxu1 %v11285_v24  ;;  %v13918_v24 = vld [vmem:[%s16190_s25 + $0x1000] ss:$16 sps:$4 sm:$0xff]  }
 0x6e1   : > { %v13924_v22 = vld [vmem:[%s16190_s25 + $0x1020] ss:$16 sps:$4 sm:$0xff]  }
 0x6e2   : > { %9900 = vmatpush1.bf16.msra.mxu0 %v13826_v25  ;;  %10433 = vmatpush1.bf16.msra.mxu1 %v13829_v52  ;;  %v13921_v25 = vld [vmem:[%s16190_s25 + $0x1008] ss:$16 sps:$4 sm:$0xff]   ;;  %v13926_v52 = vld [vmem:[%s16190_s25 + $0x1024] ss:$16 sps:$4 sm:$0xff]  }
 0x6e3   : > { %9901 = vmatprep.subr.bf16.mxu0 %v13834_v7  ;;  %10434 = vmatprep.subr.bf16.mxu1 %v13837_v18  ;;  %v13929_v7 = vld [vmem:[%s16190_s25 + $0x102c] ss:$16 sps:$4 sm:$0xff]   ;;  %v11287_v18 = vcombine.high %v18984_v47, %v18984_v47 }
 0x6e6   : > { %9902 = vmatpush1.bf16.msra.mxu0 %v13832_v5  ;;  %10435 = vmatpush1.bf16.msra.mxu1 %v13835_v32  ;;  %v13927_v5 = vld [vmem:[%s16190_s25 + $0x1028] ss:$16 sps:$4 sm:$0xff]   ;;  %v13932_v32 = vld [vmem:[%s16190_s25 + $0x1044] ss:$16 sps:$4 sm:$0xff]  }
 0x6e7   : > { %9903 = vmatprep.subr.bf16.mxu0 %v13840_v8  ;;  %10436 = vmatprep.subr.bf16.mxu1 %v13843_v55  ;;  %v13935_v8 = vld [vmem:[%s16190_s25 + $0x104c] ss:$16 sps:$4 sm:$0xff]   ;;  %v13930_v55 = vld [vmem:[%s16190_s25 + $0x1040] ss:$16 sps:$4 sm:$0xff]  }
 0x6ea   : > { %9904 = vmatpush1.bf16.msra.mxu0 %v13838_v60  ;;  %10437 = vmatpush1.bf16.msra.mxu1 %v13841_v20  ;;  %v13933_v60 = vld [vmem:[%s16190_s25 + $0x1048] ss:$16 sps:$4 sm:$0xff]   ;;  %v13938_v20 = vld [vmem:[%s16190_s25 + $0x1064] ss:$16 sps:$4 sm:$0xff]  }
 0x6eb   : > { %9905 = vmatprep.subr.bf16.mxu0 %v13846_v23  ;;  %10438 = vmatprep.subr.bf16.mxu1 %v13849_v35  ;;  %v13941_v23 = vld [vmem:[%s16190_s25 + $0x106c] ss:$16 sps:$4 sm:$0xff]   ;;  %v13936_v35 = vld [vmem:[%s16190_s25 + $0x1060] ss:$16 sps:$4 sm:$0xff]  }
 0x6ee   : > { %9906 = vmatpush1.bf16.msra.mxu0 %v13844_v2  ;;  %10439 = vmatpush1.bf16.msra.mxu1 %v13847_v26  ;;  %v13939_v2 = vld [vmem:[%s16190_s25 + $0x1068] ss:$16 sps:$4 sm:$0xff]   ;;  %v13944_v26 = vld [vmem:[%s16190_s25 + $0x1084] ss:$16 sps:$4 sm:$0xff]  }
 0x6ef   : > { %9907 = vmatprep.subr.bf16.mxu0 %v13852_v33  ;;  %10440 = vmatprep.subr.bf16.mxu1 %v13855_v41  ;;  %v13947_v33 = vld [vmem:[%s16190_s25 + $0x108c] ss:$16 sps:$4 sm:$0xff]   ;;  %v13942_v41 = vld [vmem:[%s16190_s25 + $0x1080] ss:$16 sps:$4 sm:$0xff]  }
 0x6f2   : > { %9908 = vmatpush1.bf16.msra.mxu0 %v13850_v50  ;;  %10441 = vmatpush1.bf16.msra.mxu1 %v13853_v21  ;;  %v13945_v50 = vld [vmem:[%s16190_s25 + $0x1088] ss:$16 sps:$4 sm:$0xff]   ;;  %v13950_v21 = vld [vmem:[%s16190_s25 + $0x10a4] ss:$16 sps:$4 sm:$0xff]  }
 0x6f3   : > { %9909 = vmatprep.subr.bf16.mxu0 %v13858_v54  ;;  %10442 = vmatprep.subr.bf16.mxu1 %v13861_v0  ;;  %v13953_v54 = vld [vmem:[%s16190_s25 + $0x10ac] ss:$16 sps:$4 sm:$0xff]   ;;  %v13948_v0 = vld [vmem:[%s16190_s25 + $0x10a0] ss:$16 sps:$4 sm:$0xff]  }
 0x6f6   : > { %9910 = vmatpush1.bf16.msra.mxu0 %v13856_v28  ;;  %10443 = vmatpush1.bf16.msra.mxu1 %v13859_v49  ;;  %v13951_v28 = vld [vmem:[%s16190_s25 + $0x10a8] ss:$16 sps:$4 sm:$0xff]   ;;  %v13956_v49 = vld [vmem:[%s16190_s25 + $0x10c4] ss:$16 sps:$4 sm:$0xff]  }
 0x6f7   : > { %9911 = vmatprep.subr.bf16.mxu0 %v13864_v40  ;;  %10444 = vmatprep.subr.bf16.mxu1 %v13867_v11  ;;  %v13959_v40 = vld [vmem:[%s16190_s25 + $0x10cc] ss:$16 sps:$4 sm:$0xff]   ;;  %v13954_v11 = vld [vmem:[%s16190_s25 + $0x10c0] ss:$16 sps:$4 sm:$0xff]  }
 0x6fa   : > { %9912 = vmatpush1.bf16.msra.mxu0 %v13862_v38  ;;  %10445 = vmatpush1.bf16.msra.mxu1 %v13865_v30  ;;  %v13957_v38 = vld [vmem:[%s16190_s25 + $0x10c8] ss:$16 sps:$4 sm:$0xff]   ;;  %v13962_v30 = vld [vmem:[%s16190_s25 + $0x10e4] ss:$16 sps:$4 sm:$0xff]  }
 0x6fb   : > { %9913 = vmatprep.subr.bf16.mxu0 %v13870_v45  ;;  %10446 = vmatprep.subr.bf16.mxu1 %v13873_v15  ;;  %v13965_v45 = vld [vmem:[%s16190_s25 + $0x10ec] ss:$16 sps:$4 sm:$0xff]   ;;  %v13960_v15 = vld [vmem:[%s16190_s25 + $0x10e0] ss:$16 sps:$4 sm:$0xff]  }
 0x6fe   : > { %9914 = vmatpush1.bf16.msra.mxu0 %v13868_v62  ;;  %10447 = vmatpush1.bf16.msra.mxu1 %v13871_v61  ;;  %v13963_v62 = vld [vmem:[%s16190_s25 + $0x10e8] ss:$16 sps:$4 sm:$0xff]   ;;  %v13968_v61 = vld [vmem:[%s16190_s25 + $0x1104] ss:$16 sps:$4 sm:$0xff]  }
 0x6ff   : > { %9915 = vmatprep.subr.bf16.mxu0 %v13876_v42  ;;  %10448 = vmatprep.subr.bf16.mxu1 %v13879_v12  ;;  %v13971_v42 = vld [vmem:[%s16190_s25 + $0x110c] ss:$16 sps:$4 sm:$0xff]   ;;  %v13966_v12 = vld [vmem:[%s16190_s25 + $0x1100] ss:$16 sps:$4 sm:$0xff]  }
 0x702   : > { %9916 = vmatpush1.bf16.msra.mxu0 %v13874_v31  ;;  %10449 = vmatpush1.bf16.msra.mxu1 %v13877_v56  ;;  %v13969_v31 = vld [vmem:[%s16190_s25 + $0x1108] ss:$16 sps:$4 sm:$0xff]   ;;  %v13974_v56 = vld [vmem:[%s16190_s25 + $0x1124] ss:$16 sps:$4 sm:$0xff]  }
 0x703   : > { %9917 = vmatprep.subr.bf16.mxu0 %v13882_v13  ;;  %10450 = vmatprep.subr.bf16.mxu1 %v13885_v1  ;;  %v13977_v13 = vld [vmem:[%s16190_s25 + $0x112c] ss:$16 sps:$4 sm:$0xff]   ;;  %v13972_v1 = vld [vmem:[%s16190_s25 + $0x1120] ss:$16 sps:$4 sm:$0xff]  }
 0x706   : > { %9918 = vmatpush1.bf16.msra.mxu0 %v13880_v36  ;;  %10451 = vmatpush1.bf16.msra.mxu1 %v13883_v4  ;;  %v13975_v36 = vld [vmem:[%s16190_s25 + $0x1128] ss:$16 sps:$4 sm:$0xff]   ;;  %v13980_v4 = vld [vmem:[%s16190_s25 + $0x1144] ss:$16 sps:$4 sm:$0xff]  }
 0x707   : > { %9919 = vmatprep.subr.bf16.mxu0 %v13888_v63  ;;  %10452 = vmatprep.subr.bf16.mxu1 %v13891_v37  ;;  %v13983_v63 = vld [vmem:[%s16190_s25 + $0x114c] ss:$16 sps:$4 sm:$0xff]   ;;  %v13978_v37 = vld [vmem:[%s16190_s25 + $0x1140] ss:$16 sps:$4 sm:$0xff]  }
 0x70a   : > { %9920 = vmatpush1.bf16.msra.mxu0 %v13886_v51  ;;  %10453 = vmatpush1.bf16.msra.mxu1 %v13889_v39  ;;  %v13981_v51 = vld [vmem:[%s16190_s25 + $0x1148] ss:$16 sps:$4 sm:$0xff]   ;;  %v13986_v39 = vld [vmem:[%s16190_s25 + $0x1164] ss:$16 sps:$4 sm:$0xff]  }
 0x70b   : > { %9921 = vmatprep.subr.bf16.mxu0 %v13894_v53  ;;  %10454 = vmatprep.subr.bf16.mxu1 %v13897_v17  ;;  %v13989_v53 = vld [vmem:[%s16190_s25 + $0x116c] ss:$16 sps:$4 sm:$0xff]   ;;  %v13984_v17 = vld [vmem:[%s16190_s25 + $0x1160] ss:$16 sps:$4 sm:$0xff]  }
 0x70e   : > { %9922 = vmatpush1.bf16.msra.mxu0 %v13892_v43  ;;  %10455 = vmatpush1.bf16.msra.mxu1 %v13895_v6  ;;  %v13987_v43 = vld [vmem:[%s16190_s25 + $0x1168] ss:$16 sps:$4 sm:$0xff]   ;;  %v13992_v6 = vld [vmem:[%s16190_s25 + $0x1184] ss:$16 sps:$4 sm:$0xff]  }
 0x70f   : > { %9923 = vmatprep.subr.bf16.mxu0 %v13900_v9  ;;  %10456 = vmatprep.subr.bf16.mxu1 %v13903_v59  ;;  %v13995_v9 = vld [vmem:[%s16190_s25 + $0x118c] ss:$16 sps:$4 sm:$0xff]   ;;  %v13990_v59 = vld [vmem:[%s16190_s25 + $0x1180] ss:$16 sps:$4 sm:$0xff]  }
 0x712   : > { %9924 = vmatpush1.bf16.msra.mxu0 %v13898_v46  ;;  %10457 = vmatpush1.bf16.msra.mxu1 %v13901_v29  ;;  %v13993_v46 = vld [vmem:[%s16190_s25 + $0x1188] ss:$16 sps:$4 sm:$0xff]   ;;  %v13998_v29 = vld [vmem:[%s16190_s25 + $0x11a4] ss:$16 sps:$4 sm:$0xff]  }
 0x713   : > { %9925 = vmatprep.subr.bf16.mxu0 %v13906_v48  ;;  %10458 = vmatprep.subr.bf16.mxu1 %v13909_v3  ;;  %v14001_v48 = vld [vmem:[%s16190_s25 + $0x11ac] ss:$16 sps:$4 sm:$0xff]   ;;  %v13996_v3 = vld [vmem:[%s16190_s25 + $0x11a0] ss:$16 sps:$4 sm:$0xff]  }
 0x716   : > { %9926 = vmatpush1.bf16.msra.mxu0 %v13904_v57  ;;  %10459 = vmatpush1.bf16.msra.mxu1 %v13907_v34  ;;  %v13999_v57 = vld [vmem:[%s16190_s25 + $0x11a8] ss:$16 sps:$4 sm:$0xff]   ;;  %v14004_v34 = vld [vmem:[%s16190_s25 + $0x11c4] ss:$16 sps:$4 sm:$0xff]  }
 0x717   : > { %9927 = vmatprep.subr.bf16.mxu0 %v13912_v27  ;;  %10460 = vmatprep.subr.bf16.mxu1 %v13915_v58  ;;  %v14007_v27 = vld [vmem:[%s16190_s25 + $0x11cc] ss:$16 sps:$4 sm:$0xff]   ;;  %v14002_v58 = vld [vmem:[%s16190_s25 + $0x11c0] ss:$16 sps:$4 sm:$0xff]  }
 0x71a   : > { %9928 = vmatpush1.bf16.msra.mxu0 %v13910_v19  ;;  %10461 = vmatpush1.bf16.msra.mxu1 %v13913_v14  ;;  %v14005_v19 = vld [vmem:[%s16190_s25 + $0x11c8] ss:$16 sps:$4 sm:$0xff]   ;;  %v14010_v14 = vld [vmem:[%s16190_s25 + $0x11e4] ss:$16 sps:$4 sm:$0xff]  }
 0x71b   : > { %9938 = vmatprep.subr.bf16.mxu0 %v13920_v10  ;;  %10471 = vmatprep.subr.bf16.mxu1 %v13923_v16  ;;  %v14013_v10 = vld [vmem:[%s16190_s25 + $0x11ec] ss:$16 sps:$4 sm:$0xff]   ;;  %v14008_v16 = vld [vmem:[%s16190_s25 + $0x11e0] ss:$16 sps:$4 sm:$0xff]  }
 0x71d   : > { %9930 = vmatmul.mubr.bf16.vlgmr.msra.gmra.mrb[0].mxu0 %v11284_v44  ;;  %10463 = vmatmul.mubr.bf16.vlgmr.msra.gmra.mrb[0].mxu1 %v11284_v44  ;;  %v14011_v44 = vld [vmem:[%s16190_s25 + $0x11e8] ss:$16 sps:$4 sm:$0xff]  }
 0x71e   : > { %9939 = vmatpush1.bf16.msra.mxu0 %v13918_v24  ;;  %10472 = vmatpush1.bf16.msra.mxu1 %v13921_v25  ;;  %v14018_v24 = vld [vmem:[%s16190_s25 + $0x1204] ss:$16 sps:$4 sm:$0xff]   ;;  %v14021_v25 = vld [vmem:[%s16190_s25 + $0x120c] ss:$16 sps:$4 sm:$0xff]  }
 0x71f   : > { %9940 = vmatprep.subr.bf16.mxu0 %v13926_v52  ;;  %10473 = vmatprep.subr.bf16.mxu1 %v13929_v7  ;;  %v11286_v52 = vcombine.low %v18984_v47, %v18984_v47  ;;  %v19054_v7 = vld [vmem:[#allocation2 + $0x48] sm:$0xff]  ;;  %v14022_v47 = vld [vmem:[%s16190_s25 + $0x1220] ss:$16 sps:$4 sm:$0xff]  }
 0x720   : > { %9970 = vmatprep.mubr.bf16.mxu0 %v11287_v18  ;;  %10503 = vmatprep.mubr.bf16.mxu1 %v11287_v18  ;;  %v14016_v18 = vld [vmem:[%s16190_s25 + $0x1200] ss:$16 sps:$4 sm:$0xff]  }
 0x722   : > { %9941 = vmatpush1.bf16.msra.mxu0 %v13924_v22  ;;  %10474 = vmatpush1.bf16.msra.mxu1 %v13927_v5  ;;  %v14019_v22 = vld [vmem:[%s16190_s25 + $0x1208] ss:$16 sps:$4 sm:$0xff]   ;;  %v14024_v5 = vld [vmem:[%s16190_s25 + $0x1224] ss:$16 sps:$4 sm:$0xff]  }
 0x723   : > { %9942 = vmatprep.subr.bf16.mxu0 %v13932_v32  ;;  %10475 = vmatprep.subr.bf16.mxu1 %v13935_v8  ;;  %v14027_v32 = vld [vmem:[%s16190_s25 + $0x122c] ss:$16 sps:$4 sm:$0xff]   ;;  %v11289_v8 = vcombine.high %v19054_v7, %v19054_v7 }
 0x726   : > { %9943 = vmatpush1.bf16.msra.mxu0 %v13930_v55  ;;  %10476 = vmatpush1.bf16.msra.mxu1 %v13933_v60  ;;  %v14025_v55 = vld [vmem:[%s16190_s25 + $0x1228] ss:$16 sps:$4 sm:$0xff]   ;;  %v14030_v60 = vld [vmem:[%s16190_s25 + $0x1244] ss:$16 sps:$4 sm:$0xff]  }
 0x727   : > { %9944 = vmatprep.subr.bf16.mxu0 %v13938_v20  ;;  %10477 = vmatprep.subr.bf16.mxu1 %v13941_v23  ;;  %v14033_v20 = vld [vmem:[%s16190_s25 + $0x124c] ss:$16 sps:$4 sm:$0xff]   ;;  %v14028_v23 = vld [vmem:[%s16190_s25 + $0x1240] ss:$16 sps:$4 sm:$0xff]  }
 0x72a   : > { %9945 = vmatpush1.bf16.msra.mxu0 %v13936_v35  ;;  %10478 = vmatpush1.bf16.msra.mxu1 %v13939_v2  ;;  %v14031_v35 = vld [vmem:[%s16190_s25 + $0x1248] ss:$16 sps:$4 sm:$0xff]   ;;  %v14036_v2 = vld [vmem:[%s16190_s25 + $0x1264] ss:$16 sps:$4 sm:$0xff]  }
 0x72b   : > { %9946 = vmatprep.subr.bf16.mxu0 %v13944_v26  ;;  %10479 = vmatprep.subr.bf16.mxu1 %v13947_v33  ;;  %v14039_v26 = vld [vmem:[%s16190_s25 + $0x126c] ss:$16 sps:$4 sm:$0xff]   ;;  %v14034_v33 = vld [vmem:[%s16190_s25 + $0x1260] ss:$16 sps:$4 sm:$0xff]  }
 0x72e   : > { %9947 = vmatpush1.bf16.msra.mxu0 %v13942_v41  ;;  %10480 = vmatpush1.bf16.msra.mxu1 %v13945_v50  ;;  %v14037_v41 = vld [vmem:[%s16190_s25 + $0x1268] ss:$16 sps:$4 sm:$0xff]   ;;  %v14042_v50 = vld [vmem:[%s16190_s25 + $0x1284] ss:$16 sps:$4 sm:$0xff]  }
 0x72f   : > { %9948 = vmatprep.subr.bf16.mxu0 %v13950_v21  ;;  %10481 = vmatprep.subr.bf16.mxu1 %v13953_v54  ;;  %v14045_v21 = vld [vmem:[%s16190_s25 + $0x128c] ss:$16 sps:$4 sm:$0xff]   ;;  %v14040_v54 = vld [vmem:[%s16190_s25 + $0x1280] ss:$16 sps:$4 sm:$0xff]  }
 0x732   : > { %9949 = vmatpush1.bf16.msra.mxu0 %v13948_v0  ;;  %10482 = vmatpush1.bf16.msra.mxu1 %v13951_v28  ;;  %v14043_v0 = vld [vmem:[%s16190_s25 + $0x1288] ss:$16 sps:$4 sm:$0xff]   ;;  %v14048_v28 = vld [vmem:[%s16190_s25 + $0x12a4] ss:$16 sps:$4 sm:$0xff]  }
 0x733   : > { %9950 = vmatprep.subr.bf16.mxu0 %v13956_v49  ;;  %10483 = vmatprep.subr.bf16.mxu1 %v13959_v40  ;;  %v14051_v49 = vld [vmem:[%s16190_s25 + $0x12ac] ss:$16 sps:$4 sm:$0xff]   ;;  %v14046_v40 = vld [vmem:[%s16190_s25 + $0x12a0] ss:$16 sps:$4 sm:$0xff]  }
 0x736   : > { %9951 = vmatpush1.bf16.msra.mxu0 %v13954_v11  ;;  %10484 = vmatpush1.bf16.msra.mxu1 %v13957_v38  ;;  %v14049_v11 = vld [vmem:[%s16190_s25 + $0x12a8] ss:$16 sps:$4 sm:$0xff]   ;;  %v14054_v38 = vld [vmem:[%s16190_s25 + $0x12c4] ss:$16 sps:$4 sm:$0xff]  }
 0x737   : > { %9952 = vmatprep.subr.bf16.mxu0 %v13962_v30  ;;  %10485 = vmatprep.subr.bf16.mxu1 %v13965_v45  ;;  %v14057_v30 = vld [vmem:[%s16190_s25 + $0x12cc] ss:$16 sps:$4 sm:$0xff]   ;;  %v14052_v45 = vld [vmem:[%s16190_s25 + $0x12c0] ss:$16 sps:$4 sm:$0xff]  }
 0x73a   : > { %9953 = vmatpush1.bf16.msra.mxu0 %v13960_v15  ;;  %10486 = vmatpush1.bf16.msra.mxu1 %v13963_v62  ;;  %v14055_v15 = vld [vmem:[%s16190_s25 + $0x12c8] ss:$16 sps:$4 sm:$0xff]   ;;  %v14060_v62 = vld [vmem:[%s16190_s25 + $0x12e4] ss:$16 sps:$4 sm:$0xff]  }
 0x73b   : > { %9954 = vmatprep.subr.bf16.mxu0 %v13968_v61  ;;  %10487 = vmatprep.subr.bf16.mxu1 %v13971_v42  ;;  %v14063_v61 = vld [vmem:[%s16190_s25 + $0x12ec] ss:$16 sps:$4 sm:$0xff]   ;;  %v14058_v42 = vld [vmem:[%s16190_s25 + $0x12e0] ss:$16 sps:$4 sm:$0xff]  }
 0x73e   : > { %9955 = vmatpush1.bf16.msra.mxu0 %v13966_v12  ;;  %10488 = vmatpush1.bf16.msra.mxu1 %v13969_v31  ;;  %v14061_v12 = vld [vmem:[%s16190_s25 + $0x12e8] ss:$16 sps:$4 sm:$0xff]   ;;  %v14066_v31 = vld [vmem:[%s16190_s25 + $0x1304] ss:$16 sps:$4 sm:$0xff]  }
 0x73f   : > { %9956 = vmatprep.subr.bf16.mxu0 %v13974_v56  ;;  %10489 = vmatprep.subr.bf16.mxu1 %v13977_v13  ;;  %v14069_v56 = vld [vmem:[%s16190_s25 + $0x130c] ss:$16 sps:$4 sm:$0xff]   ;;  %v14064_v13 = vld [vmem:[%s16190_s25 + $0x1300] ss:$16 sps:$4 sm:$0xff]  }
 0x742   : > { %9957 = vmatpush1.bf16.msra.mxu0 %v13972_v1  ;;  %10490 = vmatpush1.bf16.msra.mxu1 %v13975_v36  ;;  %v14067_v1 = vld [vmem:[%s16190_s25 + $0x1308] ss:$16 sps:$4 sm:$0xff]   ;;  %v14072_v36 = vld [vmem:[%s16190_s25 + $0x1324] ss:$16 sps:$4 sm:$0xff]  }
 0x743   : > { %9958 = vmatprep.subr.bf16.mxu0 %v13980_v4  ;;  %10491 = vmatprep.subr.bf16.mxu1 %v13983_v63  ;;  %v14075_v4 = vld [vmem:[%s16190_s25 + $0x132c] ss:$16 sps:$4 sm:$0xff]   ;;  %v14070_v63 = vld [vmem:[%s16190_s25 + $0x1320] ss:$16 sps:$4 sm:$0xff]  }
 0x746   : > { %9959 = vmatpush1.bf16.msra.mxu0 %v13978_v37  ;;  %10492 = vmatpush1.bf16.msra.mxu1 %v13981_v51  ;;  %v14073_v37 = vld [vmem:[%s16190_s25 + $0x1328] ss:$16 sps:$4 sm:$0xff]   ;;  %v14078_v51 = vld [vmem:[%s16190_s25 + $0x1344] ss:$16 sps:$4 sm:$0xff]  }
 0x747   : > { %9960 = vmatprep.subr.bf16.mxu0 %v13986_v39  ;;  %10493 = vmatprep.subr.bf16.mxu1 %v13989_v53  ;;  %v14081_v39 = vld [vmem:[%s16190_s25 + $0x134c] ss:$16 sps:$4 sm:$0xff]   ;;  %v14076_v53 = vld [vmem:[%s16190_s25 + $0x1340] ss:$16 sps:$4 sm:$0xff]  }
 0x74a   : > { %9961 = vmatpush1.bf16.msra.mxu0 %v13984_v17  ;;  %10494 = vmatpush1.bf16.msra.mxu1 %v13987_v43  ;;  %v14079_v17 = vld [vmem:[%s16190_s25 + $0x1348] ss:$16 sps:$4 sm:$0xff]   ;;  %v14084_v43 = vld [vmem:[%s16190_s25 + $0x1364] ss:$16 sps:$4 sm:$0xff]  }
 0x74b   : > { %9962 = vmatprep.subr.bf16.mxu0 %v13992_v6  ;;  %10495 = vmatprep.subr.bf16.mxu1 %v13995_v9  ;;  %v14087_v6 = vld [vmem:[%s16190_s25 + $0x136c] ss:$16 sps:$4 sm:$0xff]   ;;  %v14082_v9 = vld [vmem:[%s16190_s25 + $0x1360] ss:$16 sps:$4 sm:$0xff]  }
 0x74e   : > { %9963 = vmatpush1.bf16.msra.mxu0 %v13990_v59  ;;  %10496 = vmatpush1.bf16.msra.mxu1 %v13993_v46  ;;  %v14085_v59 = vld [vmem:[%s16190_s25 + $0x1368] ss:$16 sps:$4 sm:$0xff]   ;;  %v14090_v46 = vld [vmem:[%s16190_s25 + $0x1384] ss:$16 sps:$4 sm:$0xff]  }
 0x74f   : > { %9964 = vmatprep.subr.bf16.mxu0 %v13998_v29  ;;  %10497 = vmatprep.subr.bf16.mxu1 %v14001_v48  ;;  %v14093_v29 = vld [vmem:[%s16190_s25 + $0x138c] ss:$16 sps:$4 sm:$0xff]   ;;  %v14088_v48 = vld [vmem:[%s16190_s25 + $0x1380] ss:$16 sps:$4 sm:$0xff]  }
 0x752   : > { %9965 = vmatpush1.bf16.msra.mxu0 %v13996_v3  ;;  %10498 = vmatpush1.bf16.msra.mxu1 %v13999_v57  ;;  %v14091_v3 = vld [vmem:[%s16190_s25 + $0x1388] ss:$16 sps:$4 sm:$0xff]   ;;  %v14096_v57 = vld [vmem:[%s16190_s25 + $0x13a4] ss:$16 sps:$4 sm:$0xff]  }
 0x753   : > { %9966 = vmatprep.subr.bf16.mxu0 %v14004_v34  ;;  %10499 = vmatprep.subr.bf16.mxu1 %v14007_v27  ;;  %v14099_v34 = vld [vmem:[%s16190_s25 + $0x13ac] ss:$16 sps:$4 sm:$0xff]   ;;  %v14094_v27 = vld [vmem:[%s16190_s25 + $0x13a0] ss:$16 sps:$4 sm:$0xff]  }
 0x756   : > { %9967 = vmatpush1.bf16.msra.mxu0 %v14002_v58  ;;  %10500 = vmatpush1.bf16.msra.mxu1 %v14005_v19  ;;  %v14097_v58 = vld [vmem:[%s16190_s25 + $0x13a8] ss:$16 sps:$4 sm:$0xff]   ;;  %v14102_v19 = vld [vmem:[%s16190_s25 + $0x13c4] ss:$16 sps:$4 sm:$0xff]  }
 0x757   : > { %9968 = vmatprep.subr.bf16.mxu0 %v14010_v14  ;;  %10501 = vmatprep.subr.bf16.mxu1 %v14013_v10  ;;  %v14105_v14 = vld [vmem:[%s16190_s25 + $0x13cc] ss:$16 sps:$4 sm:$0xff]   ;;  %v14100_v10 = vld [vmem:[%s16190_s25 + $0x13c0] ss:$16 sps:$4 sm:$0xff]  }
 0x75a   : > { %9969 = vmatpush1.bf16.msra.mxu0 %v14008_v16  ;;  %10502 = vmatpush1.bf16.msra.mxu1 %v14011_v44  ;;  %v14103_v16 = vld [vmem:[%s16190_s25 + $0x13c8] ss:$16 sps:$4 sm:$0xff]   ;;  %v14108_v44 = vld [vmem:[%s16190_s25 + $0x13e4] ss:$16 sps:$4 sm:$0xff]  }
 0x75b   : > { %9979 = vmatprep.subr.bf16.mxu0 %v14018_v24  ;;  %10512 = vmatprep.subr.bf16.mxu1 %v14021_v25  ;;  %v14111_v24 = vld [vmem:[%s16190_s25 + $0x13ec] ss:$16 sps:$4 sm:$0xff]   ;;  %v14106_v25 = vld [vmem:[%s16190_s25 + $0x13e0] ss:$16 sps:$4 sm:$0xff]  }
 0x75d   : > { %9971 = vmatmul.mubr.bf16.vlgmr.msra.gmra.mrb[0].mxu0 %v11286_v52  ;;  %10504 = vmatmul.mubr.bf16.vlgmr.msra.gmra.mrb[0].mxu1 %v11286_v52  ;;  %v14109_v52 = vld [vmem:[%s16190_s25 + $0x13e8] ss:$16 sps:$4 sm:$0xff]  }
 0x75e   : > { %9980 = vmatpush1.bf16.msra.mxu0 %v14016_v18  ;;  %10513 = vmatpush1.bf16.msra.mxu1 %v14019_v22  ;;  %v14116_v18 = vld [vmem:[%s16190_s25 + $0x1404] ss:$16 sps:$4 sm:$0xff]   ;;  %v14119_v22 = vld [vmem:[%s16190_s25 + $0x140c] ss:$16 sps:$4 sm:$0xff]  }
 0x75f   : > { %9981 = vmatprep.subr.bf16.mxu0 %v14024_v5  ;;  %10514 = vmatprep.subr.bf16.mxu1 %v14027_v32  ;;  %v11288_v5 = vcombine.low %v19054_v7, %v19054_v7  ;;  %v19124_v32 = vld [vmem:[#allocation2 + $0x50] sm:$0xff] }
 0x760   : > { %10011 = vmatprep.mubr.bf16.mxu0 %v11289_v8  ;;  %10544 = vmatprep.mubr.bf16.mxu1 %v11289_v8  ;;  %v14114_v8 = vld [vmem:[%s16190_s25 + $0x1400] ss:$16 sps:$4 sm:$0xff]  }
 0x761   : > { %v14120_v7 = vld [vmem:[%s16190_s25 + $0x1420] ss:$16 sps:$4 sm:$0xff]  }
 0x762   : > { %9982 = vmatpush1.bf16.msra.mxu0 %v14022_v47  ;;  %10515 = vmatpush1.bf16.msra.mxu1 %v14025_v55  ;;  %v14117_v47 = vld [vmem:[%s16190_s25 + $0x1408] ss:$16 sps:$4 sm:$0xff]   ;;  %v14122_v55 = vld [vmem:[%s16190_s25 + $0x1424] ss:$16 sps:$4 sm:$0xff]  }
 0x763   : > { %9983 = vmatprep.subr.bf16.mxu0 %v14030_v60  ;;  %10516 = vmatprep.subr.bf16.mxu1 %v14033_v20  ;;  %v14125_v60 = vld [vmem:[%s16190_s25 + $0x142c] ss:$16 sps:$4 sm:$0xff]   ;;  %v11291_v20 = vcombine.high %v19124_v32, %v19124_v32 }
 0x766   : > { %9984 = vmatpush1.bf16.msra.mxu0 %v14028_v23  ;;  %10517 = vmatpush1.bf16.msra.mxu1 %v14031_v35  ;;  %v14123_v23 = vld [vmem:[%s16190_s25 + $0x1428] ss:$16 sps:$4 sm:$0xff]   ;;  %v14128_v35 = vld [vmem:[%s16190_s25 + $0x1444] ss:$16 sps:$4 sm:$0xff]  }
 0x767   : > { %9985 = vmatprep.subr.bf16.mxu0 %v14036_v2  ;;  %10518 = vmatprep.subr.bf16.mxu1 %v14039_v26  ;;  %v14131_v2 = vld [vmem:[%s16190_s25 + $0x144c] ss:$16 sps:$4 sm:$0xff]   ;;  %v14126_v26 = vld [vmem:[%s16190_s25 + $0x1440] ss:$16 sps:$4 sm:$0xff]  }
 0x76a   : > { %9986 = vmatpush1.bf16.msra.mxu0 %v14034_v33  ;;  %10519 = vmatpush1.bf16.msra.mxu1 %v14037_v41  ;;  %v14129_v33 = vld [vmem:[%s16190_s25 + $0x1448] ss:$16 sps:$4 sm:$0xff]   ;;  %v14134_v41 = vld [vmem:[%s16190_s25 + $0x1464] ss:$16 sps:$4 sm:$0xff]  }
 0x76b   : > { %9987 = vmatprep.subr.bf16.mxu0 %v14042_v50  ;;  %10520 = vmatprep.subr.bf16.mxu1 %v14045_v21  ;;  %v14137_v50 = vld [vmem:[%s16190_s25 + $0x146c] ss:$16 sps:$4 sm:$0xff]   ;;  %v14132_v21 = vld [vmem:[%s16190_s25 + $0x1460] ss:$16 sps:$4 sm:$0xff]  }
 0x76e   : > { %9988 = vmatpush1.bf16.msra.mxu0 %v14040_v54  ;;  %10521 = vmatpush1.bf16.msra.mxu1 %v14043_v0  ;;  %v14135_v54 = vld [vmem:[%s16190_s25 + $0x1468] ss:$16 sps:$4 sm:$0xff]   ;;  %v14140_v0 = vld [vmem:[%s16190_s25 + $0x1484] ss:$16 sps:$4 sm:$0xff]  }
 0x76f   : > { %9989 = vmatprep.subr.bf16.mxu0 %v14048_v28  ;;  %10522 = vmatprep.subr.bf16.mxu1 %v14051_v49  ;;  %v14143_v28 = vld [vmem:[%s16190_s25 + $0x148c] ss:$16 sps:$4 sm:$0xff]   ;;  %v14138_v49 = vld [vmem:[%s16190_s25 + $0x1480] ss:$16 sps:$4 sm:$0xff]  }
 0x772   : > { %9990 = vmatpush1.bf16.msra.mxu0 %v14046_v40  ;;  %10523 = vmatpush1.bf16.msra.mxu1 %v14049_v11  ;;  %v14141_v40 = vld [vmem:[%s16190_s25 + $0x1488] ss:$16 sps:$4 sm:$0xff]   ;;  %v14146_v11 = vld [vmem:[%s16190_s25 + $0x14a4] ss:$16 sps:$4 sm:$0xff]  }
 0x773   : > { %9991 = vmatprep.subr.bf16.mxu0 %v14054_v38  ;;  %10524 = vmatprep.subr.bf16.mxu1 %v14057_v30  ;;  %v14149_v38 = vld [vmem:[%s16190_s25 + $0x14ac] ss:$16 sps:$4 sm:$0xff]   ;;  %v14144_v30 = vld [vmem:[%s16190_s25 + $0x14a0] ss:$16 sps:$4 sm:$0xff]  }
 0x776   : > { %9992 = vmatpush1.bf16.msra.mxu0 %v14052_v45  ;;  %10525 = vmatpush1.bf16.msra.mxu1 %v14055_v15  ;;  %v14147_v45 = vld [vmem:[%s16190_s25 + $0x14a8] ss:$16 sps:$4 sm:$0xff]   ;;  %v14152_v15 = vld [vmem:[%s16190_s25 + $0x14c4] ss:$16 sps:$4 sm:$0xff]  }
 0x777   : > { %9993 = vmatprep.subr.bf16.mxu0 %v14060_v62  ;;  %10526 = vmatprep.subr.bf16.mxu1 %v14063_v61  ;;  %v14155_v62 = vld [vmem:[%s16190_s25 + $0x14cc] ss:$16 sps:$4 sm:$0xff]   ;;  %v14150_v61 = vld [vmem:[%s16190_s25 + $0x14c0] ss:$16 sps:$4 sm:$0xff]  }
 0x77a   : > { %9994 = vmatpush1.bf16.msra.mxu0 %v14058_v42  ;;  %10527 = vmatpush1.bf16.msra.mxu1 %v14061_v12  ;;  %v14153_v42 = vld [vmem:[%s16190_s25 + $0x14c8] ss:$16 sps:$4 sm:$0xff]   ;;  %v14158_v12 = vld [vmem:[%s16190_s25 + $0x14e4] ss:$16 sps:$4 sm:$0xff]  }
 0x77b   : > { %9995 = vmatprep.subr.bf16.mxu0 %v14066_v31  ;;  %10528 = vmatprep.subr.bf16.mxu1 %v14069_v56  ;;  %v14161_v31 = vld [vmem:[%s16190_s25 + $0x14ec] ss:$16 sps:$4 sm:$0xff]   ;;  %v14156_v56 = vld [vmem:[%s16190_s25 + $0x14e0] ss:$16 sps:$4 sm:$0xff]  }
 0x77e   : > { %9996 = vmatpush1.bf16.msra.mxu0 %v14064_v13  ;;  %10529 = vmatpush1.bf16.msra.mxu1 %v14067_v1  ;;  %v14159_v13 = vld [vmem:[%s16190_s25 + $0x14e8] ss:$16 sps:$4 sm:$0xff]   ;;  %v14164_v1 = vld [vmem:[%s16190_s25 + $0x1504] ss:$16 sps:$4 sm:$0xff]  }
 0x77f   : > { %9997 = vmatprep.subr.bf16.mxu0 %v14072_v36  ;;  %10530 = vmatprep.subr.bf16.mxu1 %v14075_v4  ;;  %v14167_v36 = vld [vmem:[%s16190_s25 + $0x150c] ss:$16 sps:$4 sm:$0xff]   ;;  %v14162_v4 = vld [vmem:[%s16190_s25 + $0x1500] ss:$16 sps:$4 sm:$0xff]  }
 0x782   : > { %9998 = vmatpush1.bf16.msra.mxu0 %v14070_v63  ;;  %10531 = vmatpush1.bf16.msra.mxu1 %v14073_v37  ;;  %v14165_v63 = vld [vmem:[%s16190_s25 + $0x1508] ss:$16 sps:$4 sm:$0xff]   ;;  %v14170_v37 = vld [vmem:[%s16190_s25 + $0x1524] ss:$16 sps:$4 sm:$0xff]  }
 0x783   : > { %9999 = vmatprep.subr.bf16.mxu0 %v14078_v51  ;;  %10532 = vmatprep.subr.bf16.mxu1 %v14081_v39  ;;  %v14173_v51 = vld [vmem:[%s16190_s25 + $0x152c] ss:$16 sps:$4 sm:$0xff]   ;;  %v14168_v39 = vld [vmem:[%s16190_s25 + $0x1520] ss:$16 sps:$4 sm:$0xff]  }
 0x786   : > { %10000 = vmatpush1.bf16.msra.mxu0 %v14076_v53  ;;  %10533 = vmatpush1.bf16.msra.mxu1 %v14079_v17  ;;  %v14171_v53 = vld [vmem:[%s16190_s25 + $0x1528] ss:$16 sps:$4 sm:$0xff]   ;;  %v14176_v17 = vld [vmem:[%s16190_s25 + $0x1544] ss:$16 sps:$4 sm:$0xff]  }
 0x787   : > { %10001 = vmatprep.subr.bf16.mxu0 %v14084_v43  ;;  %10534 = vmatprep.subr.bf16.mxu1 %v14087_v6  ;;  %v14179_v43 = vld [vmem:[%s16190_s25 + $0x154c] ss:$16 sps:$4 sm:$0xff]   ;;  %v14174_v6 = vld [vmem:[%s16190_s25 + $0x1540] ss:$16 sps:$4 sm:$0xff]  }
 0x78a   : > { %10002 = vmatpush1.bf16.msra.mxu0 %v14082_v9  ;;  %10535 = vmatpush1.bf16.msra.mxu1 %v14085_v59  ;;  %v14177_v9 = vld [vmem:[%s16190_s25 + $0x1548] ss:$16 sps:$4 sm:$0xff]   ;;  %v14182_v59 = vld [vmem:[%s16190_s25 + $0x1564] ss:$16 sps:$4 sm:$0xff]  }
 0x78b   : > { %10003 = vmatprep.subr.bf16.mxu0 %v14090_v46  ;;  %10536 = vmatprep.subr.bf16.mxu1 %v14093_v29  ;;  %v14185_v46 = vld [vmem:[%s16190_s25 + $0x156c] ss:$16 sps:$4 sm:$0xff]   ;;  %v14180_v29 = vld [vmem:[%s16190_s25 + $0x1560] ss:$16 sps:$4 sm:$0xff]  }
 0x78e   : > { %10004 = vmatpush1.bf16.msra.mxu0 %v14088_v48  ;;  %10537 = vmatpush1.bf16.msra.mxu1 %v14091_v3  ;;  %v14183_v48 = vld [vmem:[%s16190_s25 + $0x1568] ss:$16 sps:$4 sm:$0xff]   ;;  %v14188_v3 = vld [vmem:[%s16190_s25 + $0x1584] ss:$16 sps:$4 sm:$0xff]  }
 0x78f   : > { %10005 = vmatprep.subr.bf16.mxu0 %v14096_v57  ;;  %10538 = vmatprep.subr.bf16.mxu1 %v14099_v34  ;;  %v14191_v57 = vld [vmem:[%s16190_s25 + $0x158c] ss:$16 sps:$4 sm:$0xff]   ;;  %v14186_v34 = vld [vmem:[%s16190_s25 + $0x1580] ss:$16 sps:$4 sm:$0xff]  }
 0x792   : > { %10006 = vmatpush1.bf16.msra.mxu0 %v14094_v27  ;;  %10539 = vmatpush1.bf16.msra.mxu1 %v14097_v58  ;;  %v14189_v27 = vld [vmem:[%s16190_s25 + $0x1588] ss:$16 sps:$4 sm:$0xff]   ;;  %v14194_v58 = vld [vmem:[%s16190_s25 + $0x15a4] ss:$16 sps:$4 sm:$0xff]  }
 0x793   : > { %10007 = vmatprep.subr.bf16.mxu0 %v14102_v19  ;;  %10540 = vmatprep.subr.bf16.mxu1 %v14105_v14  ;;  %v14197_v19 = vld [vmem:[%s16190_s25 + $0x15ac] ss:$16 sps:$4 sm:$0xff]   ;;  %v14192_v14 = vld [vmem:[%s16190_s25 + $0x15a0] ss:$16 sps:$4 sm:$0xff]  }
 0x796   : > { %10008 = vmatpush1.bf16.msra.mxu0 %v14100_v10  ;;  %10541 = vmatpush1.bf16.msra.mxu1 %v14103_v16  ;;  %v14195_v10 = vld [vmem:[%s16190_s25 + $0x15a8] ss:$16 sps:$4 sm:$0xff]   ;;  %v14200_v16 = vld [vmem:[%s16190_s25 + $0x15c4] ss:$16 sps:$4 sm:$0xff]  }
 0x797   : > { %10009 = vmatprep.subr.bf16.mxu0 %v14108_v44  ;;  %10542 = vmatprep.subr.bf16.mxu1 %v14111_v24  ;;  %v14203_v44 = vld [vmem:[%s16190_s25 + $0x15cc] ss:$16 sps:$4 sm:$0xff]   ;;  %v14198_v24 = vld [vmem:[%s16190_s25 + $0x15c0] ss:$16 sps:$4 sm:$0xff]  }
 0x79a   : > { %10010 = vmatpush1.bf16.msra.mxu0 %v14106_v25  ;;  %10543 = vmatpush1.bf16.msra.mxu1 %v14109_v52  ;;  %v14201_v25 = vld [vmem:[%s16190_s25 + $0x15c8] ss:$16 sps:$4 sm:$0xff]   ;;  %v14206_v52 = vld [vmem:[%s16190_s25 + $0x15e4] ss:$16 sps:$4 sm:$0xff]  }
 0x79b   : > { %10020 = vmatprep.subr.bf16.mxu0 %v14116_v18  ;;  %10553 = vmatprep.subr.bf16.mxu1 %v14119_v22  ;;  %v14209_v18 = vld [vmem:[%s16190_s25 + $0x15ec] ss:$16 sps:$4 sm:$0xff]   ;;  %v14204_v22 = vld [vmem:[%s16190_s25 + $0x15e0] ss:$16 sps:$4 sm:$0xff]  }
 0x79d   : > { %10012 = vmatmul.mubr.bf16.vlgmr.msra.gmra.mrb[0].mxu0 %v11288_v5  ;;  %10545 = vmatmul.mubr.bf16.vlgmr.msra.gmra.mrb[0].mxu1 %v11288_v5  ;;  %v14207_v5 = vld [vmem:[%s16190_s25 + $0x15e8] ss:$16 sps:$4 sm:$0xff]  }
 0x79e   : > { %10021 = vmatpush1.bf16.msra.mxu0 %v14114_v8  ;;  %10554 = vmatpush1.bf16.msra.mxu1 %v14117_v47  ;;  %v14214_v8 = vld [vmem:[%s16190_s25 + $0x1604] ss:$16 sps:$4 sm:$0xff]   ;;  %v14217_v47 = vld [vmem:[%s16190_s25 + $0x160c] ss:$16 sps:$4 sm:$0xff]  }
 0x79f   : > { %10022 = vmatprep.subr.bf16.mxu0 %v14122_v55  ;;  %10555 = vmatprep.subr.bf16.mxu1 %v14125_v60  ;;  %v11290_v55 = vcombine.low %v19124_v32, %v19124_v32  ;;  %v19194_v60 = vld [vmem:[#allocation2 + $0x58] sm:$0xff]  ;;  %v14218_v32 = vld [vmem:[%s16190_s25 + $0x1620] ss:$16 sps:$4 sm:$0xff]  }
 0x7a0   : > { %10052 = vmatprep.mubr.bf16.mxu0 %v11291_v20  ;;  %10585 = vmatprep.mubr.bf16.mxu1 %v11291_v20  ;;  %v14212_v20 = vld [vmem:[%s16190_s25 + $0x1600] ss:$16 sps:$4 sm:$0xff]  }
 0x7a2   : > { %10023 = vmatpush1.bf16.msra.mxu0 %v14120_v7  ;;  %10556 = vmatpush1.bf16.msra.mxu1 %v14123_v23  ;;  %v14215_v7 = vld [vmem:[%s16190_s25 + $0x1608] ss:$16 sps:$4 sm:$0xff]   ;;  %v14220_v23 = vld [vmem:[%s16190_s25 + $0x1624] ss:$16 sps:$4 sm:$0xff]  }
 0x7a3   : > { %10024 = vmatprep.subr.bf16.mxu0 %v14128_v35  ;;  %10557 = vmatprep.subr.bf16.mxu1 %v14131_v2  ;;  %v14223_v35 = vld [vmem:[%s16190_s25 + $0x162c] ss:$16 sps:$4 sm:$0xff]   ;;  %v11293_v2 = vcombine.high %v19194_v60, %v19194_v60 }
 0x7a6   : > { %10025 = vmatpush1.bf16.msra.mxu0 %v14126_v26  ;;  %10558 = vmatpush1.bf16.msra.mxu1 %v14129_v33  ;;  %v14221_v26 = vld [vmem:[%s16190_s25 + $0x1628] ss:$16 sps:$4 sm:$0xff]   ;;  %v14226_v33 = vld [vmem:[%s16190_s25 + $0x1644] ss:$16 sps:$4 sm:$0xff]  }
 0x7a7   : > { %10026 = vmatprep.subr.bf16.mxu0 %v14134_v41  ;;  %10559 = vmatprep.subr.bf16.mxu1 %v14137_v50  ;;  %v14229_v41 = vld [vmem:[%s16190_s25 + $0x164c] ss:$16 sps:$4 sm:$0xff]   ;;  %v14224_v50 = vld [vmem:[%s16190_s25 + $0x1640] ss:$16 sps:$4 sm:$0xff]  }
 0x7aa   : > { %10027 = vmatpush1.bf16.msra.mxu0 %v14132_v21  ;;  %10560 = vmatpush1.bf16.msra.mxu1 %v14135_v54  ;;  %v14227_v21 = vld [vmem:[%s16190_s25 + $0x1648] ss:$16 sps:$4 sm:$0xff]   ;;  %v14232_v54 = vld [vmem:[%s16190_s25 + $0x1664] ss:$16 sps:$4 sm:$0xff]  }
 0x7ab   : > { %10028 = vmatprep.subr.bf16.mxu0 %v14140_v0  ;;  %10561 = vmatprep.subr.bf16.mxu1 %v14143_v28  ;;  %v14235_v0 = vld [vmem:[%s16190_s25 + $0x166c] ss:$16 sps:$4 sm:$0xff]   ;;  %v14230_v28 = vld [vmem:[%s16190_s25 + $0x1660] ss:$16 sps:$4 sm:$0xff]  }
 0x7ae   : > { %10029 = vmatpush1.bf16.msra.mxu0 %v14138_v49  ;;  %10562 = vmatpush1.bf16.msra.mxu1 %v14141_v40  ;;  %v14233_v49 = vld [vmem:[%s16190_s25 + $0x1668] ss:$16 sps:$4 sm:$0xff]   ;;  %v14238_v40 = vld [vmem:[%s16190_s25 + $0x1684] ss:$16 sps:$4 sm:$0xff]  }
 0x7af   : > { %10030 = vmatprep.subr.bf16.mxu0 %v14146_v11  ;;  %10563 = vmatprep.subr.bf16.mxu1 %v14149_v38  ;;  %v14241_v11 = vld [vmem:[%s16190_s25 + $0x168c] ss:$16 sps:$4 sm:$0xff]   ;;  %v14236_v38 = vld [vmem:[%s16190_s25 + $0x1680] ss:$16 sps:$4 sm:$0xff]  }
 0x7b2   : > { %10031 = vmatpush1.bf16.msra.mxu0 %v14144_v30  ;;  %10564 = vmatpush1.bf16.msra.mxu1 %v14147_v45  ;;  %v14239_v30 = vld [vmem:[%s16190_s25 + $0x1688] ss:$16 sps:$4 sm:$0xff]   ;;  %v14244_v45 = vld [vmem:[%s16190_s25 + $0x16a4] ss:$16 sps:$4 sm:$0xff]  }
 0x7b3   : > { %10032 = vmatprep.subr.bf16.mxu0 %v14152_v15  ;;  %10565 = vmatprep.subr.bf16.mxu1 %v14155_v62  ;;  %v14247_v15 = vld [vmem:[%s16190_s25 + $0x16ac] ss:$16 sps:$4 sm:$0xff]   ;;  %v14242_v62 = vld [vmem:[%s16190_s25 + $0x16a0] ss:$16 sps:$4 sm:$0xff]  }
 0x7b6   : > { %10033 = vmatpush1.bf16.msra.mxu0 %v14150_v61  ;;  %10566 = vmatpush1.bf16.msra.mxu1 %v14153_v42  ;;  %v14245_v61 = vld [vmem:[%s16190_s25 + $0x16a8] ss:$16 sps:$4 sm:$0xff]   ;;  %v14250_v42 = vld [vmem:[%s16190_s25 + $0x16c4] ss:$16 sps:$4 sm:$0xff]  }
 0x7b7   : > { %10034 = vmatprep.subr.bf16.mxu0 %v14158_v12  ;;  %10567 = vmatprep.subr.bf16.mxu1 %v14161_v31  ;;  %v14253_v12 = vld [vmem:[%s16190_s25 + $0x16cc] ss:$16 sps:$4 sm:$0xff]   ;;  %v14248_v31 = vld [vmem:[%s16190_s25 + $0x16c0] ss:$16 sps:$4 sm:$0xff]  }
 0x7ba   : > { %10035 = vmatpush1.bf16.msra.mxu0 %v14156_v56  ;;  %10568 = vmatpush1.bf16.msra.mxu1 %v14159_v13  ;;  %v14251_v56 = vld [vmem:[%s16190_s25 + $0x16c8] ss:$16 sps:$4 sm:$0xff]   ;;  %v14256_v13 = vld [vmem:[%s16190_s25 + $0x16e4] ss:$16 sps:$4 sm:$0xff]  }
 0x7bb   : > { %10036 = vmatprep.subr.bf16.mxu0 %v14164_v1  ;;  %10569 = vmatprep.subr.bf16.mxu1 %v14167_v36  ;;  %v14259_v1 = vld [vmem:[%s16190_s25 + $0x16ec] ss:$16 sps:$4 sm:$0xff]   ;;  %v14254_v36 = vld [vmem:[%s16190_s25 + $0x16e0] ss:$16 sps:$4 sm:$0xff]  }
 0x7be   : > { %10037 = vmatpush1.bf16.msra.mxu0 %v14162_v4  ;;  %10570 = vmatpush1.bf16.msra.mxu1 %v14165_v63  ;;  %v14257_v4 = vld [vmem:[%s16190_s25 + $0x16e8] ss:$16 sps:$4 sm:$0xff]   ;;  %v14262_v63 = vld [vmem:[%s16190_s25 + $0x1704] ss:$16 sps:$4 sm:$0xff]  }
 0x7bf   : > { %10038 = vmatprep.subr.bf16.mxu0 %v14170_v37  ;;  %10571 = vmatprep.subr.bf16.mxu1 %v14173_v51  ;;  %v14265_v37 = vld [vmem:[%s16190_s25 + $0x170c] ss:$16 sps:$4 sm:$0xff]   ;;  %v14260_v51 = vld [vmem:[%s16190_s25 + $0x1700] ss:$16 sps:$4 sm:$0xff]  }
 0x7c2   : > { %10039 = vmatpush1.bf16.msra.mxu0 %v14168_v39  ;;  %10572 = vmatpush1.bf16.msra.mxu1 %v14171_v53  ;;  %v14263_v39 = vld [vmem:[%s16190_s25 + $0x1708] ss:$16 sps:$4 sm:$0xff]   ;;  %v14268_v53 = vld [vmem:[%s16190_s25 + $0x1724] ss:$16 sps:$4 sm:$0xff]  }
 0x7c3   : > { %10040 = vmatprep.subr.bf16.mxu0 %v14176_v17  ;;  %10573 = vmatprep.subr.bf16.mxu1 %v14179_v43  ;;  %v14271_v17 = vld [vmem:[%s16190_s25 + $0x172c] ss:$16 sps:$4 sm:$0xff]   ;;  %v14266_v43 = vld [vmem:[%s16190_s25 + $0x1720] ss:$16 sps:$4 sm:$0xff]  }
 0x7c6   : > { %10041 = vmatpush1.bf16.msra.mxu0 %v14174_v6  ;;  %10574 = vmatpush1.bf16.msra.mxu1 %v14177_v9  ;;  %v14269_v6 = vld [vmem:[%s16190_s25 + $0x1728] ss:$16 sps:$4 sm:$0xff]   ;;  %v14274_v9 = vld [vmem:[%s16190_s25 + $0x1744] ss:$16 sps:$4 sm:$0xff]  }
 0x7c7   : > { %10042 = vmatprep.subr.bf16.mxu0 %v14182_v59  ;;  %10575 = vmatprep.subr.bf16.mxu1 %v14185_v46  ;;  %v14277_v59 = vld [vmem:[%s16190_s25 + $0x174c] ss:$16 sps:$4 sm:$0xff]   ;;  %v14272_v46 = vld [vmem:[%s16190_s25 + $0x1740] ss:$16 sps:$4 sm:$0xff]  }
 0x7ca   : > { %10043 = vmatpush1.bf16.msra.mxu0 %v14180_v29  ;;  %10576 = vmatpush1.bf16.msra.mxu1 %v14183_v48  ;;  %v14275_v29 = vld [vmem:[%s16190_s25 + $0x1748] ss:$16 sps:$4 sm:$0xff]   ;;  %v14280_v48 = vld [vmem:[%s16190_s25 + $0x1764] ss:$16 sps:$4 sm:$0xff]  }
 0x7cb   : > { %10044 = vmatprep.subr.bf16.mxu0 %v14188_v3  ;;  %10577 = vmatprep.subr.bf16.mxu1 %v14191_v57  ;;  %v14283_v3 = vld [vmem:[%s16190_s25 + $0x176c] ss:$16 sps:$4 sm:$0xff]   ;;  %v14278_v57 = vld [vmem:[%s16190_s25 + $0x1760] ss:$16 sps:$4 sm:$0xff]  }
 0x7ce   : > { %10045 = vmatpush1.bf16.msra.mxu0 %v14186_v34  ;;  %10578 = vmatpush1.bf16.msra.mxu1 %v14189_v27  ;;  %v14281_v34 = vld [vmem:[%s16190_s25 + $0x1768] ss:$16 sps:$4 sm:$0xff]   ;;  %v14286_v27 = vld [vmem:[%s16190_s25 + $0x1784] ss:$16 sps:$4 sm:$0xff]  }
 0x7cf   : > { %10046 = vmatprep.subr.bf16.mxu0 %v14194_v58  ;;  %10579 = vmatprep.subr.bf16.mxu1 %v14197_v19  ;;  %v14289_v58 = vld [vmem:[%s16190_s25 + $0x178c] ss:$16 sps:$4 sm:$0xff]   ;;  %v14284_v19 = vld [vmem:[%s16190_s25 + $0x1780] ss:$16 sps:$4 sm:$0xff]  }
 0x7d2   : > { %10047 = vmatpush1.bf16.msra.mxu0 %v14192_v14  ;;  %10580 = vmatpush1.bf16.msra.mxu1 %v14195_v10  ;;  %v14287_v14 = vld [vmem:[%s16190_s25 + $0x1788] ss:$16 sps:$4 sm:$0xff]   ;;  %v14292_v10 = vld [vmem:[%s16190_s25 + $0x17a4] ss:$16 sps:$4 sm:$0xff]  }
 0x7d3   : > { %10048 = vmatprep.subr.bf16.mxu0 %v14200_v16  ;;  %10581 = vmatprep.subr.bf16.mxu1 %v14203_v44  ;;  %v14295_v16 = vld [vmem:[%s16190_s25 + $0x17ac] ss:$16 sps:$4 sm:$0xff]   ;;  %v14290_v44 = vld [vmem:[%s16190_s25 + $0x17a0] ss:$16 sps:$4 sm:$0xff]  }
 0x7d6   : > { %10049 = vmatpush1.bf16.msra.mxu0 %v14198_v24  ;;  %10582 = vmatpush1.bf16.msra.mxu1 %v14201_v25  ;;  %v14293_v24 = vld [vmem:[%s16190_s25 + $0x17a8] ss:$16 sps:$4 sm:$0xff]   ;;  %v14298_v25 = vld [vmem:[%s16190_s25 + $0x17c4] ss:$16 sps:$4 sm:$0xff]  }
 0x7d7   : > { %10050 = vmatprep.subr.bf16.mxu0 %v14206_v52  ;;  %10583 = vmatprep.subr.bf16.mxu1 %v14209_v18  ;;  %v14301_v52 = vld [vmem:[%s16190_s25 + $0x17cc] ss:$16 sps:$4 sm:$0xff]   ;;  %v14296_v18 = vld [vmem:[%s16190_s25 + $0x17c0] ss:$16 sps:$4 sm:$0xff]  }
 0x7da   : > { %10051 = vmatpush1.bf16.msra.mxu0 %v14204_v22  ;;  %10584 = vmatpush1.bf16.msra.mxu1 %v14207_v5  ;;  %v14299_v22 = vld [vmem:[%s16190_s25 + $0x17c8] ss:$16 sps:$4 sm:$0xff]   ;;  %v14304_v5 = vld [vmem:[%s16190_s25 + $0x17e4] ss:$16 sps:$4 sm:$0xff]  }
 0x7db   : > { %10061 = vmatprep.subr.bf16.mxu0 %v14214_v8  ;;  %10594 = vmatprep.subr.bf16.mxu1 %v14217_v47  ;;  %v14307_v8 = vld [vmem:[%s16190_s25 + $0x17ec] ss:$16 sps:$4 sm:$0xff]   ;;  %v14302_v47 = vld [vmem:[%s16190_s25 + $0x17e0] ss:$16 sps:$4 sm:$0xff]  }
 0x7dd   : > { %10053 = vmatmul.mubr.bf16.vlgmr.msra.gmra.mrb[0].mxu0 %v11290_v55  ;;  %10586 = vmatmul.mubr.bf16.vlgmr.msra.gmra.mrb[0].mxu1 %v11290_v55  ;;  %v14305_v55 = vld [vmem:[%s16190_s25 + $0x17e8] ss:$16 sps:$4 sm:$0xff]  }
 0x7de   : > { %10062 = vmatpush1.bf16.msra.mxu0 %v14212_v20  ;;  %10595 = vmatpush1.bf16.msra.mxu1 %v14215_v7  ;;  %v14312_v20 = vld [vmem:[%s16190_s25 + $0x1804] ss:$16 sps:$4 sm:$0xff]   ;;  %v14315_v7 = vld [vmem:[%s16190_s25 + $0x180c] ss:$16 sps:$4 sm:$0xff]  }
 0x7df   : > { %10063 = vmatprep.subr.bf16.mxu0 %v14220_v23  ;;  %10596 = vmatprep.subr.bf16.mxu1 %v14223_v35  ;;  %v11292_v23 = vcombine.low %v19194_v60, %v19194_v60  ;;  %v14310_v35 = vld [vmem:[%s16190_s25 + $0x1800] ss:$16 sps:$4 sm:$0xff]   ;;  %v14319_v60 = vld [vmem:[%s16190_s25 + $0x1828] ss:$16 sps:$4 sm:$0xff]  }
 0x7e0   : > { %10093 = vmatprep.mubr.bf16.mxu0 %v11293_v2  ;;  %10626 = vmatprep.mubr.bf16.mxu1 %v11293_v2  ;;  %v14313_v2 = vld [vmem:[%s16190_s25 + $0x1808] ss:$16 sps:$4 sm:$0xff]  }
 0x7e2   : > { %10064 = vmatpush1.bf16.msra.mxu0 %v14218_v32  ;;  %10597 = vmatpush1.bf16.msra.mxu1 %v14221_v26  ;;  %v14318_v32 = vld [vmem:[%s16190_s25 + $0x1824] ss:$16 sps:$4 sm:$0xff]   ;;  %v14321_v26 = vld [vmem:[%s16190_s25 + $0x182c] ss:$16 sps:$4 sm:$0xff]  }
 0x7e3   : > { %10065 = vmatprep.subr.bf16.mxu0 %v14226_v33  ;;  %10598 = vmatprep.subr.bf16.mxu1 %v14229_v41  ;;  %v14316_v33 = vld [vmem:[%s16190_s25 + $0x1820] ss:$16 sps:$4 sm:$0xff]   ;;  %v14324_v41 = vld [vmem:[%s16190_s25 + $0x1844] ss:$16 sps:$4 sm:$0xff]  }
 0x7e6   : > { %10066 = vmatpush1.bf16.msra.mxu0 %v14224_v50  ;;  %10599 = vmatpush1.bf16.msra.mxu1 %v14227_v21  ;;  %v14327_v50 = vld [vmem:[%s16190_s25 + $0x184c] ss:$16 sps:$4 sm:$0xff]   ;;  %v14475_v21 = vmov 0  }
 0x7e7   : > { %10067 = vmatprep.subr.bf16.mxu0 %v14232_v54  ;;  %10600 = vmatprep.subr.bf16.mxu1 %v14235_v0  ;;  %v14322_v54 = vld [vmem:[%s16190_s25 + $0x1840] ss:$16 sps:$4 sm:$0xff]   ;;  %v14325_v0 = vld [vmem:[%s16190_s25 + $0x1848] ss:$16 sps:$4 sm:$0xff]  }
 0x7ea   : > { %10068 = vmatpush1.bf16.msra.mxu0 %v14230_v28  ;;  %10601 = vmatpush1.bf16.msra.mxu1 %v14233_v49  ;;  %v14330_v28 = vld [vmem:[%s16190_s25 + $0x1864] ss:$16 sps:$4 sm:$0xff]   ;;  %v14333_v49 = vld [vmem:[%s16190_s25 + $0x186c] ss:$16 sps:$4 sm:$0xff]  }
 0x7eb   : > { %10069 = vmatprep.subr.bf16.mxu0 %v14238_v40  ;;  %10602 = vmatprep.subr.bf16.mxu1 %v14241_v11  ;;  %v14328_v40 = vld [vmem:[%s16190_s25 + $0x1860] ss:$16 sps:$4 sm:$0xff]   ;;  %v14331_v11 = vld [vmem:[%s16190_s25 + $0x1868] ss:$16 sps:$4 sm:$0xff]  }
 0x7ee   : > { %10070 = vmatpush1.bf16.msra.mxu0 %v14236_v38  ;;  %10603 = vmatpush1.bf16.msra.mxu1 %v14239_v30  ;;  %v14336_v38 = vld [vmem:[%s16190_s25 + $0x1884] ss:$16 sps:$4 sm:$0xff]   ;;  %v14339_v30 = vld [vmem:[%s16190_s25 + $0x188c] ss:$16 sps:$4 sm:$0xff]  }
 0x7ef   : > { %10071 = vmatprep.subr.bf16.mxu0 %v14244_v45  ;;  %10604 = vmatprep.subr.bf16.mxu1 %v14247_v15  ;;  %v14334_v45 = vld [vmem:[%s16190_s25 + $0x1880] ss:$16 sps:$4 sm:$0xff]   ;;  %v14337_v15 = vld [vmem:[%s16190_s25 + $0x1888] ss:$16 sps:$4 sm:$0xff]  }
 0x7f2   : > { %10072 = vmatpush1.bf16.msra.mxu0 %v14242_v62  ;;  %10605 = vmatpush1.bf16.msra.mxu1 %v14245_v61  ;;  %v14342_v62 = vld [vmem:[%s16190_s25 + $0x18a4] ss:$16 sps:$4 sm:$0xff]   ;;  %v14345_v61 = vld [vmem:[%s16190_s25 + $0x18ac] ss:$16 sps:$4 sm:$0xff]  }
 0x7f3   : > { %10073 = vmatprep.subr.bf16.mxu0 %v14250_v42  ;;  %10606 = vmatprep.subr.bf16.mxu1 %v14253_v12  ;;  %v14340_v42 = vld [vmem:[%s16190_s25 + $0x18a0] ss:$16 sps:$4 sm:$0xff]   ;;  %v14343_v12 = vld [vmem:[%s16190_s25 + $0x18a8] ss:$16 sps:$4 sm:$0xff]  }
 0x7f6   : > { %10074 = vmatpush1.bf16.msra.mxu0 %v14248_v31  ;;  %10607 = vmatpush1.bf16.msra.mxu1 %v14251_v56  ;;  %v14348_v31 = vld [vmem:[%s16190_s25 + $0x18c4] ss:$16 sps:$4 sm:$0xff]   ;;  %v14351_v56 = vld [vmem:[%s16190_s25 + $0x18cc] ss:$16 sps:$4 sm:$0xff]  }
 0x7f7   : > { %10075 = vmatprep.subr.bf16.mxu0 %v14256_v13  ;;  %10608 = vmatprep.subr.bf16.mxu1 %v14259_v1  ;;  %v14346_v13 = vld [vmem:[%s16190_s25 + $0x18c0] ss:$16 sps:$4 sm:$0xff]   ;;  %v14349_v1 = vld [vmem:[%s16190_s25 + $0x18c8] ss:$16 sps:$4 sm:$0xff]  }
 0x7fa   : > { %10076 = vmatpush1.bf16.msra.mxu0 %v14254_v36  ;;  %10609 = vmatpush1.bf16.msra.mxu1 %v14257_v4  ;;  %v14354_v36 = vld [vmem:[%s16190_s25 + $0x18e4] ss:$16 sps:$4 sm:$0xff]   ;;  %v14357_v4 = vld [vmem:[%s16190_s25 + $0x18ec] ss:$16 sps:$4 sm:$0xff]  }
 0x7fb   : > { %10077 = vmatprep.subr.bf16.mxu0 %v14262_v63  ;;  %10610 = vmatprep.subr.bf16.mxu1 %v14265_v37  ;;  %v14352_v63 = vld [vmem:[%s16190_s25 + $0x18e0] ss:$16 sps:$4 sm:$0xff]   ;;  %v14355_v37 = vld [vmem:[%s16190_s25 + $0x18e8] ss:$16 sps:$4 sm:$0xff]   ;;  %s12172_s25 = sshll.u32 %s14556_s20, 5 }
 0x7fc   : > { %s10690_s14 = scalar_lea.vmem [#allocation3], %s12172_s25 }
 0x7fe   : > { %10078 = vmatpush1.bf16.msra.mxu0 %v14260_v51  ;;  %10611 = vmatpush1.bf16.msra.mxu1 %v14263_v39  ;;  %v14358_v51 = vld [vmem:[#allocation2 + $0x60] ss:$0 sps:$4 sm:$0xff]   ;;  %v5502_v39 = vlaneseq }
 0x7ff   : > { %10079 = vmatprep.subr.bf16.mxu0 %v14268_v53  ;;  %10612 = vmatprep.subr.bf16.mxu1 %v14271_v17 }
 0x800   : > { %v5503_v53 = vshrl.u32 %v5502_v39, 7  ;;  %v10741_v39 = vld [vmem:[%s19768_s7 + $0x128] sm:$0xff] (!%p12097_p10) }
 0x802   : > { %10080 = vmatpush1.bf16.msra.mxu0 %v14266_v43  ;;  %10613 = vmatpush1.bf16.msra.mxu1 %v14269_v6  ;;  %v5504_v17 = vsub.s32 0, %v5503_v53  ;;  %v5512_v43 = vsub.s32 2, %v5503_v53  ;;  %v5500_v6 = vld [vmem:[%s2005_s23] sm:$0xf] }
 0x803   : > { %10081 = vmatprep.subr.bf16.mxu0 %v14274_v9  ;;  %10614 = vmatprep.subr.bf16.mxu1 %v14277_v59  ;;  %v5508_v9 = vsub.s32 1, %v5503_v53  ;;  %v5516_v59 = vsub.s32 3, %v5503_v53 }
 0x806   : > { %10082 = vmatpush1.bf16.msra.mxu0 %v14272_v46  ;;  %10615 = vmatpush1.bf16.msra.mxu1 %v14275_v29  ;;  %v5505_v46 = vrot.slane %v5500_v6, %v5504_v17  ;;  %v5513_v29 = vrot.slane %v5500_v6, %v5512_v43  ;;  %v10726_v17 = vld [vmem:[%s19768_s7 + $0xb0] sm:$0xff] (!%p12097_p10)  ;;  %v10727_v43 = vld [vmem:[%s19768_s7 + $0xb8] sm:$0xff] (!%p12097_p10) }
 0x807   : > { %10083 = vmatprep.subr.bf16.mxu0 %v14280_v48  ;;  %10616 = vmatprep.subr.bf16.mxu1 %v14283_v3  ;;  %v5509_v48 = vrot.slane %v5500_v6, %v5508_v9  ;;  %v5517_v3 = vrot.slane %v5500_v6, %v5516_v59  ;;  %v10758_v6 = vld [vmem:[%s19768_s7 + $0x1b0] sm:$0xff] (!%p12097_p10)  ;;  %v12716_v59 = vpack.c.bf16 (!%p12097_p10), %v10727_v43, %v10726_v17  ;;  %v12148_v17 = vld [vmem:[%s19768_s7 + $0x388] sm:$0xff] (!%p12097_p10) }
 0x80a   : > { %10084 = vmatpush1.bf16.msra.mxu0 %v14278_v57  ;;  %10617 = vmatpush1.bf16.msra.mxu1 %v14281_v34 }
 0x80b   : > { %10085 = vmatprep.subr.bf16.mxu0 %v14286_v27  ;;  %10618 = vmatprep.subr.bf16.mxu1 %v14289_v58 }
 0x80e   : > { %10086 = vmatpush1.bf16.msra.mxu0 %v14284_v19  ;;  %10619 = vmatpush1.bf16.msra.mxu1 %v14287_v14 }
 0x80f   : > { %10087 = vmatprep.subr.bf16.mxu0 %v14292_v10  ;;  %10620 = vmatprep.subr.bf16.mxu1 %v14295_v16 }
 0x812   : > { %10088 = vmatpush1.bf16.msra.mxu0 %v14290_v44  ;;  %10621 = vmatpush1.bf16.msra.mxu1 %v14293_v24 }
 0x813   : > { %10089 = vmatprep.subr.bf16.mxu0 %v14298_v25  ;;  %10622 = vmatprep.subr.bf16.mxu1 %v14301_v52 }
 0x816   : > { %10090 = vmatpush1.bf16.msra.mxu0 %v14296_v18  ;;  %10623 = vmatpush1.bf16.msra.mxu1 %v14299_v22 }
 0x817   : > { %10091 = vmatprep.subr.bf16.mxu0 %v14304_v5  ;;  %10624 = vmatprep.subr.bf16.mxu1 %v14307_v8 }
 0x81a   : > { %10092 = vmatpush1.bf16.msra.mxu0 %v14302_v47  ;;  %10625 = vmatpush1.bf16.msra.mxu1 %v14305_v55 }
 0x81b   : > { %10102 = vmatprep.subr.bf16.mxu0 %v14312_v20  ;;  %10635 = vmatprep.subr.bf16.mxu1 %v14315_v7 }
 0x81d   : > { %10094 = vmatmul.mubr.bf16.vlgmr.msra.gmra.mrb[0].mxu0 %v11292_v23  ;;  %10627 = vmatmul.mubr.bf16.vlgmr.msra.gmra.mrb[0].mxu1 %v11292_v23  ;;  %v10720_v23 = vld [vmem:[%s19768_s7 + $0x80] sm:$0xff] (!%p12097_p10) }
 0x81e   : > { %10103 = vmatpush1.bf16.msra.mxu0 %v14310_v35  ;;  %10636 = vmatpush1.bf16.msra.mxu1 %v14313_v2  ;;  %v10721_v35 = vld [vmem:[%s19768_s7 + $0x88] sm:$0xff] (!%p12097_p10)  ;;  %v10752_v2 = vld [vmem:[%s19768_s7 + $0x180] sm:$0xff] (!%p12097_p10) }
 0x81f   : > { %10104 = vmatprep.subr.bf16.mxu0 %v14318_v32  ;;  %10637 = vmatprep.subr.bf16.mxu1 %v14321_v26  ;;  %v12704_v32 = vpack.c.bf16 (!%p12097_p10), %v10721_v35, %v10720_v23  ;;  %v10753_v26 = vld [vmem:[%s19768_s7 + $0x188] sm:$0xff] (!%p12097_p10)  ;;  %v10714_v35 = vld [vmem:[%s19768_s7 + $0x50] sm:$0xff] (!%p12097_p10) }
 0x820   : > { %10134 = vmatprep.mubr.bf16.mxu0 %v14475_v21  ;;  %10667 = vmatprep.mubr.bf16.mxu1 %v14475_v21  ;;  %v10736_v21 = vld [vmem:[%s19768_s7 + $0x100] sm:$0xff] (!%p12097_p10) }
 0x822   : > { %10105 = vmatpush1.bf16.msra.mxu0 %v14316_v33  ;;  %10638 = vmatpush1.bf16.msra.mxu1 %v14319_v60  ;;  %v10704_v33 = vld [vmem:[%s19768_s7] sm:$0xff] (!%p12097_p10)  ;;  %v10705_v60 = vld [vmem:[%s19768_s7 + $0x8] sm:$0xff] (!%p12097_p10) }
 0x823   : > { %10106 = vmatprep.subr.bf16.mxu0 %v14324_v41  ;;  %10639 = vmatprep.subr.bf16.mxu1 %v14327_v50  ;;  %v12736_v41 = vpack.c.bf16 (!%p12097_p10), %v10753_v26, %v10752_v2  ;;  %v12706_v50 = vpack.c.bf16 (!%p12097_p10), %v10705_v60, %v10704_v33  ;;  %v10715_v2 = vld [vmem:[%s19768_s7 + $0x58] sm:$0xff] (!%p12097_p10)  ;;  %v10732_v60 = vld [vmem:[%s19768_s7 + $0xe0] sm:$0xff] (!%p12097_p10) }
 0x824   : > { %v10747_v33 = vld [vmem:[%s19768_s7 + $0x158] sm:$0xff] (!%p12097_p10) }
 0x826   : > { %10107 = vmatpush1.bf16.msra.mxu0 %v14322_v54  ;;  %10640 = vmatpush1.bf16.msra.mxu1 %v14325_v0  ;;  %v10737_v54 = vld [vmem:[%s19768_s7 + $0x108] sm:$0xff] (!%p12097_p10)  ;;  %v10722_v0 = vld [vmem:[%s19768_s7 + $0x90] sm:$0xff] (!%p12097_p10) }
 0x827   : > { %10108 = vmatprep.subr.bf16.mxu0 %v14330_v28  ;;  %10641 = vmatprep.subr.bf16.mxu1 %v14333_v49  ;;  %v12738_v28 = vpack.c.bf16 (!%p12097_p10), %v10737_v54, %v10736_v21  ;;  %v10723_v49 = vld [vmem:[%s19768_s7 + $0x98] sm:$0xff] (!%p12097_p10)  ;;  %v10765_v21 = vld [vmem:[%s19768_s7 + $0x1e8] sm:$0xff] (!%p12097_p10)  ;;  %v12726_v54 = vpack.c.bf16 (!%p12097_p10), %v10715_v2, %v10714_v35  ;;  %v12103_v35 = vld [vmem:[%s19768_s7 + $0x220] sm:$0xff] (!%p12097_p10) }
 0x828   : > { %v12104_v2 = vld [vmem:[%s19768_s7 + $0x228] sm:$0xff] (!%p12097_p10) }
 0x82a   : > { %10109 = vmatpush1.bf16.msra.mxu0 %v14328_v40  ;;  %10642 = vmatpush1.bf16.msra.mxu1 %v14331_v11  ;;  %v10754_v40 = vld [vmem:[%s19768_s7 + $0x190] sm:$0xff] (!%p12097_p10)  ;;  %v10755_v11 = vld [vmem:[%s19768_s7 + $0x198] sm:$0xff] (!%p12097_p10) }
 0x82b   : > { %10110 = vmatprep.subr.bf16.mxu0 %v14336_v38  ;;  %10643 = vmatprep.subr.bf16.mxu1 %v14339_v30  ;;  %v12708_v38 = vpack.c.bf16 (!%p12097_p10), %v10723_v49, %v10722_v0  ;;  %v12740_v30 = vpack.c.bf16 (!%p12097_p10), %v10755_v11, %v10754_v40  ;;  %v10716_v0 = vld [vmem:[%s19768_s7 + $0x60] sm:$0xff] (!%p12097_p10) }
 0x82c   : > { %v10748_v11 = vld [vmem:[%s19768_s7 + $0x160] sm:$0xff] (!%p12097_p10) }
 0x82e   : > { %10111 = vmatpush1.bf16.msra.mxu0 %v14334_v45  ;;  %10644 = vmatpush1.bf16.msra.mxu1 %v14337_v15  ;;  %v10706_v45 = vld [vmem:[%s19768_s7 + $0x10] sm:$0xff] (!%p12097_p10)  ;;  %v10707_v15 = vld [vmem:[%s19768_s7 + $0x18] sm:$0xff] (!%p12097_p10) }
 0x82f   : > { %10112 = vmatprep.subr.bf16.mxu0 %v14342_v62  ;;  %10645 = vmatprep.subr.bf16.mxu1 %v14345_v61  ;;  %v10738_v62 = vld [vmem:[%s19768_s7 + $0x110] sm:$0xff] (!%p12097_p10)  ;;  %v12710_v61 = vpack.c.bf16 (!%p12097_p10), %v10707_v15, %v10706_v45  ;;  %v10749_v15 = vld [vmem:[%s19768_s7 + $0x168] sm:$0xff] (!%p12097_p10) }
 0x832   : > { %10113 = vmatpush1.bf16.msra.mxu0 %v14340_v42  ;;  %10646 = vmatpush1.bf16.msra.mxu1 %v14343_v12  ;;  %v10739_v42 = vld [vmem:[%s19768_s7 + $0x118] sm:$0xff] (!%p12097_p10)  ;;  %v10724_v12 = vld [vmem:[%s19768_s7 + $0xa0] sm:$0xff] (!%p12097_p10) }
 0x833   : > { %10114 = vmatprep.subr.bf16.mxu0 %v14348_v31  ;;  %10647 = vmatprep.subr.bf16.mxu1 %v14351_v56  ;;  %v10725_v31 = vld [vmem:[%s19768_s7 + $0xa8] sm:$0xff] (!%p12097_p10)  ;;  %v12742_v56 = vpack.c.bf16 (!%p12097_p10), %v10739_v42, %v10738_v62  ;;  %v10734_v62 = vld [vmem:[%s19768_s7 + $0xf0] sm:$0xff] (!%p12097_p10) }
 0x834   : > { %v10766_v42 = vld [vmem:[%s19768_s7 + $0x1f0] sm:$0xff] (!%p12097_p10) }
 0x836   : > { %10115 = vmatpush1.bf16.msra.mxu0 %v14346_v13  ;;  %10648 = vmatpush1.bf16.msra.mxu1 %v14349_v1  ;;  %v12712_v13 = vpack.c.bf16 (!%p12097_p10), %v10725_v31, %v10724_v12  ;;  %v10756_v1 = vld [vmem:[%s19768_s7 + $0x1a0] sm:$0xff] (!%p12097_p10)  ;;  %v10767_v12 = vld [vmem:[%s19768_s7 + $0x1f8] sm:$0xff] (!%p12097_p10) }
 0x837   : > { %10116 = vmatprep.subr.bf16.mxu0 %v14354_v36  ;;  %10649 = vmatprep.subr.bf16.mxu1 %v14357_v4  ;;  %v10757_v36 = vld [vmem:[%s19768_s7 + $0x1a8] sm:$0xff] (!%p12097_p10)  ;;  %v10708_v4 = vld [vmem:[%s19768_s7 + $0x20] sm:$0xff] (!%p12097_p10) }
 0x83a   : > { %10117 = vmatpush1.bf16.msra.mxu0 %v14352_v63  ;;  %10650 = vmatpush1.bf16.msra.mxu1 %v14355_v37  ;;  %v12744_v63 = vpack.c.bf16 (!%p12097_p10), %v10757_v36, %v10756_v1  ;;  %v10709_v37 = vld [vmem:[%s19768_s7 + $0x28] sm:$0xff] (!%p12097_p10)  ;;  %v10718_v1 = vld [vmem:[%s19768_s7 + $0x70] sm:$0xff] (!%p12097_p10)  ;;  %v10719_v36 = vld [vmem:[%s19768_s7 + $0x78] sm:$0xff] (!%p12097_p10) }
 0x83b   : > { %12705 = vmatprep.subr.bf16.mxu0 (!%p12097_p10), %v12704_v32  ;;  %12737 = vmatprep.subr.bf16.mxu1 (!%p12097_p10), %v12736_v41  ;;  %v12714_v53 = vpack.c.bf16 (!%p12097_p10), %v10709_v37, %v10708_v4  ;;  %v10746_v32 = vld [vmem:[%s19768_s7 + $0x150] sm:$0xff] (!%p12097_p10)  ;;  %v10733_v41 = vld [vmem:[%s19768_s7 + $0xe8] sm:$0xff] (!%p12097_p10)  ;;  %v10751_v37 = vld [vmem:[%s19768_s7 + $0x178] sm:$0xff] (!%p12097_p10)  ;;  %v12734_v43 = vpack.c.bf16 (!%p12097_p10), %v10719_v36, %v10718_v1 }
 0x83c   : > { %v12758_v49 = vpack.c.bf16 (!%p12097_p10), %v10747_v33, %v10746_v32  ;;  %v12728_v40 = vpack.c.bf16 (!%p12097_p10), %v10733_v41, %v10732_v60  ;;  %v10750_v4 = vld [vmem:[%s19768_s7 + $0x170] sm:$0xff] (!%p12097_p10)  ;;  %v12135_v32 = vld [vmem:[%s19768_s7 + $0x320] sm:$0xff] (!%p12097_p10)  ;;  %v12136_v33 = vld [vmem:[%s19768_s7 + $0x328] sm:$0xff] (!%p12097_p10) }
 0x83d   : > { %10135 = vmatmul.mubr.bf16.vlgmr.msra.gmra.mrb[0].mxu0 %v14358_v51  ;;  %10668 = vmatmul.mubr.bf16.vlgmr.msra.gmra.mrb[0].mxu1 %v14358_v51  ;;  %v10740_v51 = vld [vmem:[%s19768_s7 + $0x120] sm:$0xff] (!%p12097_p10)  ;;  %v12121_v60 = vld [vmem:[%s19768_s7 + $0x2b0] sm:$0xff] (!%p12097_p10)  ;;  %v12122_v41 = vld [vmem:[%s19768_s7 + $0x2b8] sm:$0xff] (!%p12097_p10) }
 0x83e   : > { %12707 = vmatpush3.bf16.msra.mxu0 (!%p12097_p10), %v12706_v50  ;;  %12739 = vmatpush3.bf16.msra.mxu1 (!%p12097_p10), %v12738_v28  ;;  %v12746_v9 = vpack.c.bf16 (!%p12097_p10), %v10741_v39, %v10740_v51  ;;  %v10764_v50 = vld [vmem:[%s19768_s7 + $0x1e0] sm:$0xff] (!%p12097_p10)  ;;  %v10717_v28 = vld [vmem:[%s19768_s7 + $0x68] sm:$0xff] (!%p12097_p10) }
 0x83f   : > { %12709 = vmatprep.subr.bf16.mxu0 (!%p12097_p10), %v12708_v38  ;;  %12741 = vmatprep.subr.bf16.mxu1 (!%p12097_p10), %v12740_v30  ;;  %v12760_v45 = vpack.c.bf16 (!%p12097_p10), %v10765_v21, %v10764_v50  ;;  %v12730_v31 = vpack.c.bf16 (!%p12097_p10), %v10717_v28, %v10716_v0  ;;  %v12115_v51 = vld [vmem:[%s19768_s7 + $0x280] sm:$0xff] (!%p12097_p10)  ;;  %v12116_v39 = vld [vmem:[%s19768_s7 + $0x288] sm:$0xff] (!%p12097_p10)  ;;  %v12153_v50 = vld [vmem:[%s19768_s7 + $0x3b0] sm:$0xff] (!%p12097_p10)  ;;  %v12810_v0 = vpack.c.bf16 (!%p12097_p10), %v12136_v33, %v12135_v32 }
 0x840   : > { %v12154_v21 = vld [vmem:[%s19768_s7 + $0x3b8] sm:$0xff] (!%p12097_p10)  ;;  %v12780_v28 = vpack.c.bf16 (!%p12097_p10), %v12122_v41, %v12121_v60  ;;  %v12107_v1 = vld [vmem:[%s19768_s7 + $0x240] sm:$0xff] (!%p12097_p10)  ;;  %v12108_v36 = vld [vmem:[%s19768_s7 + $0x248] sm:$0xff] (!%p12097_p10) }
 0x841   : > { %v12146_v32 = vld [vmem:[%s19768_s7 + $0x378] sm:$0xff] (!%p12097_p10) }
 0x842   : > { %12711 = vmatpush3.bf16.msra.mxu0 (!%p12097_p10), %v12710_v61  ;;  %12743 = vmatpush3.bf16.msra.mxu1 (!%p12097_p10), %v12742_v56  ;;  %v10735_v61 = vld [vmem:[%s19768_s7 + $0xf8] sm:$0xff] (!%p12097_p10)  ;;  %v12762_v56 = vpack.c.bf16 (!%p12097_p10), %v10749_v15, %v10748_v11  ;;  %v12137_v11 = vld [vmem:[%s19768_s7 + $0x330] sm:$0xff] (!%p12097_p10)  ;;  %v12124_v15 = vld [vmem:[%s19768_s7 + $0x2c8] sm:$0xff] (!%p12097_p10) }
 0x843   : > { %12713 = vmatprep.subr.bf16.mxu0 (!%p12097_p10), %v12712_v13  ;;  %12745 = vmatprep.subr.bf16.mxu1 (!%p12097_p10), %v12744_v63  ;;  %v12732_v13 = vpack.c.bf16 (!%p12097_p10), %v10735_v61, %v10734_v62  ;;  %v12764_v63 = vpack.c.bf16 (!%p12097_p10), %v10767_v12, %v10766_v42  ;;  %v12155_v62 = vld [vmem:[%s19768_s7 + $0x3c0] sm:$0xff] (!%p12097_p10)  ;;  %v12156_v61 = vld [vmem:[%s19768_s7 + $0x3c8] sm:$0xff] (!%p12097_p10) }
 0x846   : > { %12715 = vmatpush3.bf16.msra.mxu0 (!%p12097_p10), %v12714_v53  ;;  %12747 = vmatpush3.bf16.msra.mxu1 (!%p12097_p10), %v12746_v9  ;;  %v12147_v53 = vld [vmem:[%s19768_s7 + $0x380] sm:$0xff] (!%p12097_p10)  ;;  %v12768_v9 = vpack.c.bf16 (!%p12097_p10), %v12116_v39, %v12115_v51  ;;  %v12125_v51 = vld [vmem:[%s19768_s7 + $0x2d0] sm:$0xff] (!%p12097_p10)  ;;  %v12126_v39 = vld [vmem:[%s19768_s7 + $0x2d8] sm:$0xff] (!%p12097_p10) }
 0x847   : > { %12717 = vmatprep.subr.bf16.mxu0 (!%p12097_p10), %v12716_v59  ;;  %v12099_v59 = vld [vmem:[%s19768_s7 + $0x200] sm:$0xff] (!%p12097_p10) }
 0x910   : > { %v10136_v57 = vpop.f32.mrb[0].mxu0  ;;  %v10669_v34 = vpop.f32.mrb[0].mxu1 }
 0x911   : > { %v12982_v27 = vadd.f32 %v10136_v57, %v5505_v46  ;;  %v12984_v58 = vadd.f32 %v10669_v34, %v5513_v29  ;;  %v10138_v19 = vpop.f32.mrb[1].mxu0  ;;  %v10671_v14 = vpop.f32.mrb[1].mxu1  ;;  %10698 = sbr.rel (%p12097_p10) target bundleno = 3144 (0xc48), region = 87  ;;  %v10759_v46 = vld [vmem:[%s19768_s7 + $0x1b8] sm:$0xff] (!%p12097_p10)  ;;  %v10710_v29 = vld [vmem:[%s19768_s7 + $0x30] sm:$0xff] (!%p12097_p10) }
 0x912   : > { %v12983_v10 = vadd.f32 %v10138_v19, %v5509_v48  ;;  %v12985_v16 = vadd.f32 %v10671_v14, %v5517_v3  ;;  %v10140_v44 = vpop.f32.mrb[2].mxu0  ;;  %v10673_v24 = vpop.f32.mrb[2].mxu1  ;;  %v10711_v48 = vld [vmem:[%s19768_s7 + $0x38] sm:$0xff] (!%p12097_p10)  ;;  %v12748_v3 = vpack.c.bf16 (!%p12097_p10), %v10759_v46, %v10758_v6  ;;  %v10742_v57 = vld [vmem:[%s19768_s7 + $0x130] sm:$0xff] (!%p12097_p10)  ;;  %v10760_v19 = vld [vmem:[%s19768_s7 + $0x1c0] sm:$0xff] (!%p12097_p10)  ;;  %v12766_v6 = vpack.c.bf16 (!%p12097_p10), %v10751_v37, %v10750_v4 }
 0x913   : > { %vm10676_vm1 = vcmp.ge.f32.partialorder %v12982_v27, 0.0  ;;  %v10680_v25 = vmul.f32 0.2, %v12982_v27  ;;  %vm10678_vm2 = vcmp.ge.f32.partialorder %v12984_v58, 0.0  ;;  %v10682_v52 = vmul.f32 0.2, %v12984_v58 }
 0x914   : > { %vm10677_vm3 = vcmp.ge.f32.partialorder %v12983_v10, 0.0  ;;  %v10681_v18 = vmul.f32 0.2, %v12983_v10  ;;  %vm10679_vm4 = vcmp.ge.f32.partialorder %v12985_v16, 0.0  ;;  %v10683_v22 = vmul.f32 0.2, %v12985_v16  ;;  %12749 = vmatprep.subr.bf16.mxu1 (!%p12097_p10), %v12748_v3 }
 0x915   : > { %v10684_v5 = vsel %vm10676_vm1, %v12982_v27, %v10680_v25  ;;  %v10686_v8 = vsel %vm10678_vm2, %v12984_v58, %v10682_v52  ;;  %v10141_v47 = vpop.f32.mrb[3].mxu0  ;;  %v10674_v55 = vpop.f32.mrb[3].mxu1  ;;  %v10743_v34 = vld [vmem:[%s19768_s7 + $0x138] sm:$0xff] (!%p12097_p10)  ;;  %v10728_v27 = vld [vmem:[%s19768_s7 + $0xc0] sm:$0xff] (!%p12097_p10)  ;;  %v10729_v58 = vld [vmem:[%s19768_s7 + $0xc8] sm:$0xff] (!%p12097_p10) }
 0x916   : > { %10691 = vst [vmem:[%s10690_s14] sm:$0xff] %v10684_v5  ;;  %10693 = vst [vmem:[%s10690_s14 + $0x10] sm:$0xff] %v10686_v8  ;;  %v10685_v20 = vsel %vm10677_vm3, %v12983_v10, %v10681_v18  ;;  %v10687_v7 = vsel %vm10679_vm4, %v12985_v16, %v10683_v22  ;;  %v10761_v14 = vld [vmem:[%s19768_s7 + $0x1c8] sm:$0xff] (!%p12097_p10)  ;;  %v12718_v10 = vpack.c.bf16 (!%p12097_p10), %v10711_v48, %v10710_v29  ;;  %v10712_v24 = vld [vmem:[%s19768_s7 + $0x40] sm:$0xff] (!%p12097_p10) }
 0x917   : > { %10692 = vst [vmem:[%s10690_s14 + $0x8] sm:$0xff] %v10685_v20  ;;  %10694 = vst [vmem:[%s10690_s14 + $0x18] sm:$0xff] %v10687_v7  ;;  %v12750_v16 = vpack.c.bf16 (!%p12097_p10), %v10743_v34, %v10742_v57  ;;  %v12720_v44 = vpack.c.bf16 (!%p12097_p10), %v10729_v58, %v10728_v27  ;;  %v10713_v25 = vld [vmem:[%s19768_s7 + $0x48] sm:$0xff] (!%p12097_p10)  ;;  %v10744_v52 = vld [vmem:[%s19768_s7 + $0x140] sm:$0xff] (!%p12097_p10)  ;;  %v12752_v18 = vpack.c.bf16 (!%p12097_p10), %v10761_v14, %v10760_v19 }
 0x918   : > { %v10745_v22 = vld [vmem:[%s19768_s7 + $0x148] sm:$0xff]  ;;  %v10730_v5 = vld [vmem:[%s19768_s7 + $0xd0] sm:$0xff]  ;;  %v10731_v8 = vld [vmem:[%s19768_s7 + $0xd8] sm:$0xff]  ;;  %12719 = vmatpush3.bf16.msra.mxu0 %v12718_v10  ;;  %v12722_v20 = vpack.c.bf16 %v10713_v25, %v10712_v24  ;;  %v12800_v48 = vpack.c.bf16 %v12148_v17, %v12147_v53 }
 0x919   : > { %v10762_v47 = vld [vmem:[%s19768_s7 + $0x1d0] sm:$0xff]  ;;  %v10763_v55 = vld [vmem:[%s19768_s7 + $0x1d8] sm:$0xff]  ;;  %12751 = vmatpush3.bf16.msra.mxu1 %v12750_v16  ;;  %12721 = vmatprep.subr.bf16.mxu0 %v12720_v44  ;;  %v12754_v7 = vpack.c.bf16 %v10745_v22, %v10744_v52  ;;  %v12724_v23 = vpack.c.bf16 %v10731_v8, %v10730_v5  ;;  %v12100_v46 = vld [vmem:[%s19768_s7 + $0x208] sm:$0xff] }
 0x91a   : > { %12753 = vmatprep.subr.bf16.mxu1 %v12752_v18  ;;  %v12756_v26 = vpack.c.bf16 %v10763_v55, %v10762_v47  ;;  %v12131_v29 = vld [vmem:[%s19768_s7 + $0x300] sm:$0xff]  ;;  %v12132_v3 = vld [vmem:[%s19768_s7 + $0x308] sm:$0xff]  ;;  %v12117_v57 = vld [vmem:[%s19768_s7 + $0x290] sm:$0xff]  ;;  %v12770_v10 = vpack.c.bf16 %v12100_v46, %v12099_v59 }
 0x91b   : > { %v12118_v34 = vld [vmem:[%s19768_s7 + $0x298] sm:$0xff]  ;;  %v12149_v27 = vld [vmem:[%s19768_s7 + $0x390] sm:$0xff]  ;;  %v12802_v16 = vpack.c.bf16 %v12132_v3, %v12131_v29  ;;  %v12119_v5 = vld [vmem:[%s19768_s7 + $0x2a0] sm:$0xff] }
 0x91c   : > { %12723 = vmatpush3.bf16.msra.mxu0 %v12722_v20  ;;  %v12150_v58 = vld [vmem:[%s19768_s7 + $0x398] sm:$0xff]  ;;  %v12772_v44 = vpack.c.bf16 %v12118_v34, %v12117_v57  ;;  %v12101_v24 = vld [vmem:[%s19768_s7 + $0x210] sm:$0xff]  ;;  %v12120_v8 = vld [vmem:[%s19768_s7 + $0x2a8] sm:$0xff] }
 0x91d   : > { %12755 = vmatpush3.bf16.msra.mxu1 %v12754_v7  ;;  %12725 = vmatprep.subr.bf16.mxu0 %v12724_v23  ;;  %v12102_v25 = vld [vmem:[%s19768_s7 + $0x218] sm:$0xff]  ;;  %v12133_v52 = vld [vmem:[%s19768_s7 + $0x310] sm:$0xff]  ;;  %v12804_v18 = vpack.c.bf16 %v12150_v58, %v12149_v27  ;;  %v12151_v47 = vld [vmem:[%s19768_s7 + $0x3a0] sm:$0xff]  ;;  %v12776_v23 = vpack.c.bf16 %v12120_v8, %v12119_v5 }
 0x91e   : > { %v10701_v38 = vld [vmem:[#allocation3 + $0x8] sm:$0xff]  ;;  %v10703_v30 = vld [vmem:[#allocation3 + $0x18] sm:$0xff]  ;;  %12757 = vmatprep.subr.bf16.mxu1 %v12756_v26  ;;  %v10700_v19 = vld [vmem:[#allocation3] sm:$0xff]  ;;  %v12774_v20 = vpack.c.bf16 %v12102_v25, %v12101_v24 }
 0x91f   : > { %10832 = vmatprep.mubr.f32.mxu0 %v10701_v38  ;;  %10902 = vmatprep.mubr.f32.mxu1 %v10703_v30  ;;  %v10702_v14 = vld [vmem:[#allocation3 + $0x10] sm:$0xff]  ;;  %v12152_v55 = vld [vmem:[%s19768_s7 + $0x3a8] sm:$0xff]  ;;  %v12812_v38 = vpack.c.bf16 %v12154_v21, %v12153_v50  ;;  %v12139_v4 = vld [vmem:[%s19768_s7 + $0x340] sm:$0xff] }
 0x920   : > { %12727 = vmatpush3.bf16.msra.mxu0 %v12726_v54  ;;  %v12134_v22 = vld [vmem:[%s19768_s7 + $0x318] sm:$0xff]  ;;  %v12808_v26 = vpack.c.bf16 %v12152_v55, %v12151_v47  ;;  %v12778_v54 = vpack.c.bf16 %v12104_v2, %v12103_v35  ;;  %v10917_v12 = vld [vmem:[#allocation3 + $0x28] sm:$0xff]  ;;  %v12127_v57 = vld [vmem:[%s19768_s7 + $0x2e0] sm:$0xff] }
 0x921   : > { %12759 = vmatpush3.bf16.msra.mxu1 %v12758_v49  ;;  %12729 = vmatprep.subr.bf16.mxu0 %v12728_v40  ;;  %v12806_v7 = vpack.c.bf16 %v12134_v22, %v12133_v52  ;;  %v12105_v49 = vld [vmem:[%s19768_s7 + $0x230] sm:$0xff]  ;;  %v12106_v40 = vld [vmem:[%s19768_s7 + $0x238] sm:$0xff]  ;;  %v12140_v37 = vld [vmem:[%s19768_s7 + $0x348] sm:$0xff] }
 0x922   : > { %12761 = vmatprep.subr.bf16.mxu1 %v12760_v45  ;;  %v12138_v30 = vld [vmem:[%s19768_s7 + $0x338] sm:$0xff]  ;;  %v12123_v45 = vld [vmem:[%s19768_s7 + $0x2c0] sm:$0xff]  ;;  %v12782_v42 = vpack.c.bf16 %v12106_v40, %v12105_v49  ;;  %v12157_v53 = vld [vmem:[%s19768_s7 + $0x3d0] sm:$0xff] }
 0x923   : > { %v12158_v17 = vld [vmem:[%s19768_s7 + $0x3d8] sm:$0xff]  ;;  %v12109_v59 = vld [vmem:[%s19768_s7 + $0x250] sm:$0xff]  ;;  %v12128_v34 = vld [vmem:[%s19768_s7 + $0x2e8] sm:$0xff] }
 0x924   : > { %12731 = vmatpush3.bf16.msra.mxu0 %v12730_v31  ;;  %v10919_v31 = vld [vmem:[#allocation3 + $0x38] sm:$0xff]  ;;  %v12141_v29 = vld [vmem:[%s19768_s7 + $0x350] sm:$0xff]  ;;  %v12160_v58 = vld [vmem:[%s19768_s7 + $0x3e8] sm:$0xff] }
 0x925   : > { %12763 = vmatpush3.bf16.msra.mxu1 %v12762_v56  ;;  %12733 = vmatprep.subr.bf16.mxu0 %v12732_v13  ;;  %v12814_v56 = vpack.c.bf16 %v12138_v30, %v12137_v11  ;;  %v12784_v13 = vpack.c.bf16 %v12124_v15, %v12123_v45  ;;  %v12110_v46 = vld [vmem:[%s19768_s7 + $0x258] sm:$0xff]  ;;  %v12159_v27 = vld [vmem:[%s19768_s7 + $0x3e0] sm:$0xff]  ;;  %v12144_v52 = vld [vmem:[%s19768_s7 + $0x368] sm:$0xff] }
 0x926   : > { %12765 = vmatprep.subr.bf16.mxu1 %v12764_v63  ;;  %v12816_v63 = vpack.c.bf16 %v12156_v61, %v12155_v62  ;;  %v12142_v3 = vld [vmem:[%s19768_s7 + $0x358] sm:$0xff]  ;;  %v12143_v24 = vld [vmem:[%s19768_s7 + $0x360] sm:$0xff]  ;;  %v12824_v25 = vpack.c.bf16 %v12160_v58, %v12159_v27  ;;  %v12161_v5 = vld [vmem:[%s19768_s7 + $0x3f0] sm:$0xff] }
 0x927   : > { %v12130_v22 = vld [vmem:[%s19768_s7 + $0x2f8] sm:$0xff]  ;;  %v12826_v55 = vpack.c.bf16 %v12144_v52, %v12143_v24  ;;  %v12145_v2 = vld [vmem:[%s19768_s7 + $0x370] sm:$0xff]  ;;  %v10916_v60 = vld [vmem:[#allocation3 + $0x20] sm:$0xff] }
 0x928   : > { %12735 = vmatpush3.bf16.msra.mxu0 %v12734_v43  ;;  %v12786_v43 = vpack.c.bf16 %v12108_v36, %v12107_v1  ;;  %v12162_v8 = vld [vmem:[%s19768_s7 + $0x3f8] sm:$0xff]  ;;  %v12830_v33 = vpack.c.bf16 %v12146_v32, %v12145_v2  ;;  %v12098_v45 = vld [vmem:[%s19769_s8] ss:$0 sm:$0xff] }
 0x929   : > { %12767 = vmatpush3.bf16.msra.mxu1 %v12766_v6  ;;  %12769 = vmatprep.subr.bf16.mxu0 %v12768_v9  ;;  %v12818_v6 = vpack.c.bf16 %v12140_v37, %v12139_v4  ;;  %v12788_v9 = vpack.c.bf16 %v12126_v39, %v12125_v51  ;;  %v12828_v35 = vpack.c.bf16 %v12162_v8, %v12161_v5  ;;  %v10918_v41 = vld [vmem:[#allocation3 + $0x30] sm:$0xff] }
 0x92a   : > { %12801 = vmatprep.subr.bf16.mxu1 %v12800_v48  ;;  %v12820_v48 = vpack.c.bf16 %v12158_v17, %v12157_v53 }
 0x92b   : > { %10833 = vmatmul.mubr.f32.vlgmr.msra.gmra.mrb[0].mxu0 %v10700_v19  ;;  %v12790_v19 = vpack.c.bf16 %v12110_v46, %v12109_v59 }
 0x92c   : > { %10903 = vmatmul.mubr.f32.vlgmr.msra.gmra.mrb[0].mxu1 %v10702_v14  ;;  %12771 = vmatpush3.bf16.msra.mxu0 %v12770_v10  ;;  %v12822_v14 = vpack.c.bf16 %v12142_v3, %v12141_v29  ;;  %v12792_v10 = vpack.c.bf16 %v12128_v34, %v12127_v57 }
 0x92d   : > { %12803 = vmatpush3.bf16.msra.mxu1 %v12802_v16  ;;  %12773 = vmatprep.subr.bf16.mxu0 %v12772_v44  ;;  %v12111_v16 = vld [vmem:[%s19768_s7 + $0x260] sm:$0xff]  ;;  %v12112_v44 = vld [vmem:[%s19768_s7 + $0x268] sm:$0xff] }
 0x92e   : > { %12805 = vmatprep.subr.bf16.mxu1 %v12804_v18  ;;  %11049 = vmatprep.mubr.f32.mxu0 %v10917_v12  ;;  %v12129_v18 = vld [vmem:[%s19768_s7 + $0x2f0] sm:$0xff]  ;;  %v12794_v47 = vpack.c.bf16 %v12112_v44, %v12111_v16 }
 0x92f   : > { %11119 = vmatprep.mubr.f32.mxu1 %v10919_v31 }
 0x930   : > { %12775 = vmatpush3.bf16.msra.mxu0 %v12774_v20  ;;  %v12796_v20 = vpack.c.bf16 %v12130_v22, %v12129_v18 }
 0x931   : > { %12807 = vmatpush3.bf16.msra.mxu1 %v12806_v7  ;;  %12777 = vmatprep.subr.bf16.mxu0 %v12776_v23  ;;  %v12113_v7 = vld [vmem:[%s19768_s7 + $0x270] sm:$0xff]  ;;  %v12114_v23 = vld [vmem:[%s19768_s7 + $0x278] sm:$0xff] }
 0x932   : > { %12809 = vmatprep.subr.bf16.mxu1 %v12808_v26  ;;  %v12798_v26 = vpack.c.bf16 %v12114_v23, %v12113_v7 }
 0x934   : > { %12779 = vmatpush3.bf16.msra.mxu0 %v12778_v54 }
 0x935   : > { %12811 = vmatpush3.bf16.msra.mxu1 %v12810_v0  ;;  %12781 = vmatprep.subr.bf16.mxu0 %v12780_v28 }
 0x936   : > { %12813 = vmatprep.subr.bf16.mxu1 %v12812_v38 }
 0x938   : > { %12783 = vmatpush3.bf16.msra.mxu0 %v12782_v42 }
 0x939   : > { %12815 = vmatpush3.bf16.msra.mxu1 %v12814_v56  ;;  %12785 = vmatprep.subr.bf16.mxu0 %v12784_v13 }
 0x93a   : > { %12817 = vmatprep.subr.bf16.mxu1 %v12816_v63 }
 0x93c   : > { %12787 = vmatpush3.bf16.msra.mxu0 %v12786_v43 }
 0x93d   : > { %12819 = vmatpush3.bf16.msra.mxu1 %v12818_v6  ;;  %12789 = vmatprep.subr.bf16.mxu0 %v12788_v9 }
 0x93e   : > { %12821 = vmatprep.subr.bf16.mxu1 %v12820_v48 }
 0x940   : > { %12791 = vmatpush3.bf16.msra.mxu0 %v12790_v19 }
 0x941   : > { %12823 = vmatpush3.bf16.msra.mxu1 %v12822_v14  ;;  %12793 = vmatprep.subr.bf16.mxu0 %v12792_v10 }
 0x942   : > { %12825 = vmatprep.subr.bf16.mxu1 %v12824_v25 }
 0x944   : > { %12795 = vmatpush3.bf16.msra.mxu0 %v12794_v47 }
 0x945   : > { %12827 = vmatpush3.bf16.msra.mxu1 %v12826_v55  ;;  %12797 = vmatprep.subr.bf16.mxu0 %v12796_v20 }
 0x946   : > { %12829 = vmatprep.subr.bf16.mxu1 %v12828_v35 }
 0x948   : > { %12799 = vmatpush3.bf16.msra.mxu0 %v12798_v26 }
 0x949   : > { %12831 = vmatpush3.bf16.msra.mxu1 %v12830_v33 }
 0x94b   : > { %11050 = vmatmul.mubr.f32.vlgmr.msra.gmra.mrb[2].mxu0 %v10916_v60 }
 0x94c   : > { %11120 = vmatmul.mubr.f32.vlgmr.msra.gmra.mrb[2].mxu1 %v10918_v41 }
 0x9fe   : > { %v12276_v50 = vpop.f32.mrb[0].mxu0 }
 0x9ff   : > { %v12311_v21 = vpop.f32.mrb[0].mxu1  ;;  %v12277_v54 = vpop.f32.mrb[1].mxu0 }
 0xa00   : > { %v12278_v0 = vadd.f32 %v12277_v54, %v12276_v50  ;;  %v12312_v28 = vpop.f32.mrb[1].mxu1 }
 0xa01   : > { %v12313_v49 = vadd.f32 %v12312_v28, %v12311_v21 }
 0xa03   : > { %v10905_v40 = vadd.f32 %v12313_v49, %v12278_v0 }
 0xa05   : > { %v10914_v42 = vadd.f32 %v12098_v45, %v10905_v40 }
 0xa1e   : > { %v12346_v11 = vpop.f32.mrb[2].mxu0 }
 0xa1f   : > { %v12381_v38 = vpop.f32.mrb[2].mxu1  ;;  %v12347_v30 = vpop.f32.mrb[3].mxu0 }
 0xa20   : > { %v12348_v15 = vadd.f32 %v12347_v30, %v12346_v11  ;;  %v12382_v62 = vpop.f32.mrb[3].mxu1 }
 0xa21   : > { %v12383_v61 = vadd.f32 %v12382_v62, %v12381_v38 }
 0xa23   : > { %v11122_v12 = vadd.f32 %v12383_v61, %v12348_v15 }
 0xa25   : > { %v11125_v31 = vadd.f32 %v11122_v12, %v10914_v42 }
 0xa27   : > { %11127 = vst.msk [vmem:[#allocation5] sm:$0xf] %vm11126_vm5, %v11125_v31  ;;  %v11135_v56 = vsel %vm11134_vm6, %v11125_v31, -inf }
 0xa28   : > { %11136 = vmax.xlane.f32.xlu0 %v11135_v56 }
 0xab5   : > { %v11137_v13 = vpop.xlane.xlu0 %11136 }
 0xab6   : > { %v11138_v1 = vsub.f32 %v11125_v31, %v11137_v13 }
 0xab8   : > { %v11139_v36 = vmul.f32 1.442695, %v11138_v1 }
 0xaba   : > { %14359 = vpow2.f32 %v11139_v36 }
 0xac4   : > { %v14360_v4 = vpop.eup %14359 }
 0xac5   : > { %11142 = vrot.lane.b32.xlu0 %v14360_v4, %s14476_s13 }
 0xb37   : > { %v11143_v63 = vpop.permute.xlu0 %11142 }
 0xb38   : > { %v11145_v37 = vsel %vm11132_vm7, %v11143_v63, 0.0 }
 0xb39   : > { %11146 = vadd.xlane.f32.xlu1 %v11145_v37 }
 0xb4a   : > { %11129 = vrot.lane.b32.xlu1 %v11125_v31, %s14476_s13 }
 0xbc6   : > { %v11147_v51 = vpop.xlane.xlu1 %11146 }
 0xbc7   : > { %14361 = vrcp.f32 %v11147_v51 }
 0xbca   : > { %v11130_v39 = vpop.permute.xlu1 %11129 }
 0xbcb   : > { %11133 = vst.msk [vmem:[#allocation9] sm:$0xf] %vm11132_vm7, %v11130_v39 }
 0xbd1   : > { %v14362_v53 = vpop.eup %14361 }
 0xbd2   : > { %v11149_v17 = vmul.f32 %v14362_v53, %v14360_v4 }
 0xbd4   : > { %11151 = vrot.lane.b32.xlu1 %v11149_v17, %s14476_s13 }
 0xc46   : > { %v11152_v43 = vpop.permute.xlu1 %11151 }
 0xc47   : > { %11154 = vst.msk [vmem:[#allocation7] sm:$0xf] %vm11132_vm7, %v11152_v43 }
 0xc48 PF: > { %p13096_p11 = scmp.eq.s32.totalorder %s14556_s20, 1  ;;  %s14477_s15 = smov [#allocation7]  }
 0xc49   : > { %s11173_s16 = sshll.u32 %s14477_s15, 4  ;;  %s14478_s22 = smov [#allocation5]   ;;  %s11174_s16 = int_to_ptr.vmem [resolvable:$true] %s11173_s16 }
 0xc4a   : > { %s11162_s19 = sshll.u32 %s14478_s22, 4  ;;  %s14363_s26 = scalar_lea.vmem %s11174_s16, 64  ;;  %s11163_s19 = int_to_ptr.vmem [resolvable:$true] %s11162_s19 }
 0xc4b   : > { %p14364_p12 = scmp.ne.s32.totalorder %s11174_s16, %s14363_s26  ;;  %p14370_p1 = scmp.lt.s32.totalorder %s11174_s16, %s11174_s16 }
 0xc4c   : > { %p14371_p2 = scmp.lt.s32.totalorder %s14363_s26, %s14363_s26 }
 0xc4d   : > { %p14365_p13 = pnand %p14364_p12, %p13096_p11 }
 0xc4e   : > { %p14372_p3 = por %p14371_p2, %p14370_p1 }
 0xc4f   : > { %p14366_p0 = pneg %p14365_p13 }
 0xc51   : > { %p14373_p4 = pnand %p14372_p3, %p14366_p0 }
 0xc53   : > { %14376 = shalt.err (!%p14373_p4)
}
 0xc54   : > { %s14377_s28 = scalar_lea.hbm %s19771_s10, 64 }
 0xc55   : > { %p14378_p5 = scmp.ne.s32.totalorder %s19771_s10, %s14377_s28  ;;  %p14383_p8 = scmp.lt.u32.totalorder %s14377_s28, %s19771_s10 }
 0xc57   : > { %p14379_p6 = pnand %p14378_p5, %p13096_p11 }
 0xc59   : > { %p14380_p7 = pneg %p14379_p6 }
 0xc5b   : > { %p14385_p9 = pnand %p14383_p8, %p14380_p7 }
 0xc5d   : > { %14388 = shalt.err (!%p14385_p9)
}
 0xc5e   : > { %13087 = dma.vmem_to_hbm [thread:$0]  (%p13096_p11), %s11174_s16, 64, %s19771_s10, [#allocation8]  }
 0xc5f   : > { %s14389_s13 = scalar_lea.vmem %s11163_s19, 64  ;;  %p14396_p0 = scmp.lt.s32.totalorder %s11163_s19, %s11163_s19 }
 0xc60   : > { %p14390_p10 = scmp.ne.s32.totalorder %s11163_s19, %s14389_s13  ;;  %p14397_p1 = scmp.lt.s32.totalorder %s14389_s13, %s14389_s13 }
 0xc62   : > { %p14391_p12 = pnand %p14390_p10, %p13096_p11  ;;  %p14398_p2 = por %p14397_p1, %p14396_p0 }
 0xc64   : > { %p14392_p13 = pneg %p14391_p12 }
 0xc66   : > { %p14399_p3 = pnand %p14398_p2, %p14392_p13 }
 0xc68   : > { %14402 = shalt.err (!%p14399_p3)
}
 0xc69   : > { %s14403_s26 = scalar_lea.hbm %s19770_s9, 64 }
 0xc6a   : > { %p14404_p4 = scmp.ne.s32.totalorder %s19770_s9, %s14403_s26  ;;  %p14409_p7 = scmp.lt.u32.totalorder %s14403_s26, %s19770_s9 }
 0xc6c   : > { %p14405_p5 = pnand %p14404_p4, %p13096_p11 }
 0xc6e   : > { %p14406_p6 = pneg %p14405_p5 }
 0xc70   : > { %p14411_p8 = pnand %p14409_p7, %p14406_p6 }
 0xc72   : > { %14414 = shalt.err (!%p14411_p8)
}
 0xc73   : > { %13085 = dma.vmem_to_hbm [thread:$0]  (%p13096_p11), %s11163_s19, 64, %s19770_s9, [#allocation6]  }
 0xc74   : > { %s14479_s14 = smov [#allocation9]  }
 0xc75   : > { %s11184_s23 = sshll.u32 %s14479_s14, 4  ;;  %s11185_s23 = int_to_ptr.vmem [resolvable:$true] %s11184_s23 }
 0xc76   : > { %s14415_s30 = scalar_lea.vmem %s11185_s23, 64  ;;  %p14422_p13 = scmp.lt.s32.totalorder %s11185_s23, %s11185_s23 }
 0xc77   : > { %p14416_p9 = scmp.ne.s32.totalorder %s11185_s23, %s14415_s30  ;;  %p14423_p0 = scmp.lt.s32.totalorder %s14415_s30, %s14415_s30 }
 0xc79   : > { %p14417_p10 = pnand %p14416_p9, %p13096_p11  ;;  %p14424_p1 = por %p14423_p0, %p14422_p13 }
 0xc7b   : > { %p14418_p12 = pneg %p14417_p10 }
 0xc7d   : > { %p14425_p2 = pnand %p14424_p1, %p14418_p12 }
 0xc7f   : > { %14428 = shalt.err (!%p14425_p2)
}
 0xc80   : > { %s14429_s15 = scalar_lea.hbm %s19772_s11, 64 }
 0xc81   : > { %p14430_p3 = scmp.ne.s32.totalorder %s19772_s11, %s14429_s15  ;;  %p14435_p6 = scmp.lt.u32.totalorder %s14429_s15, %s19772_s11 }
 0xc83   : > { %p14431_p4 = pnand %p14430_p3, %p13096_p11 }
 0xc85   : > { %p14432_p5 = pneg %p14431_p4 }
 0xc87   : > { %p14437_p7 = pnand %p14435_p6, %p14432_p5 }
 0xc89   : > { %14440 = shalt.err (!%p14437_p7)
}
 0xc8a   : > { %13089 = dma.vmem_to_hbm [thread:$0]  (%p13096_p11), %s11185_s23, 64, %s19772_s11, [#allocation8]  }
 0xc8b   : > { %14454 = dma.done.wait (%p13096_p11), [#allocation6], 64  }
 0xc8c   : > { %14456 = vsyncadd (%p13096_p11), [#allocation6], 4294967232 }
 0xc8d   : > { %14458 = dma.done.wait (%p13096_p11), [#allocation8], 128  }
 0xc8e   : > { %14460 = vsyncadd (%p13096_p11), [#allocation8], 4294967168 }
 0xc8f PF: > { %p21_p8 = scmp.ge.s32.totalorder %s14559_s21, 4   ;;  %s19872_s17 = smov %s14467_s18 }
 0xc90   : > { %s19873_s18 = smov %s14568_s24  ;;  %s19874_s19 = smov %s14559_s21 }
 0xc91   :  { %23 = sbr.rel (!%p21_p8) target bundleno = 3 (0x3), region = 141 }
 0xc98   :  { %11205 = vsyncpa [#allocation6], 1 }
 0xc99   :  { %11207 = vsyncpa [#allocation6 + $0x1], 1 }
 0xc9a   :  { %11208 = vsyncpa [#allocation8], 1 }

</bundles_post_ra>
